<compile_context>
chip_gen: v7x
topology: tpu7x:2x2x1
jax: 0.10.0
libtpu: 0.0.40
codegen_flags: <defaults>
</compile_context>

<pallas_src>
import functools
import math

import jax
import jax.numpy as jnp
from jax.experimental import pallas as pl
from jax.experimental.pallas import tpu as pltpu


def _resnet_block_kernel(x_ref, temb_ref, mint_ref, mval_ref,
                         g1_ref, be1_ref, m1cg_ref, m1gc_ref,
                         w1_ref, b1_ref, wt_ref, bt_ref,
                         g2_ref, be2_ref, m2cg_ref, m2gc_ref,
                         w2_ref, b2_ref, wr_ref, br_ref,
                         out_ref, pad1_ref, pad2_ref,
                         *, H, W, groups, eps):
    Wp = W + 2                 # padded row width
    Q = H * Wp                 # rows in the "output row" layout (cols j>=W are junk)
    P = (H + 2) * Wp           # rows in the flattened zero-padded layout
    Ppad = pad1_ref.shape[0]   # P + 2: tail keeps every tap slice [off, off+Q) in-bounds
    Cin = x_ref.shape[2]
    Cout = out_ref.shape[2]

    x = x_ref[0]               # (P, Cin) -- zero at the halo positions
    mint = mint_ref[...]       # (P, 1)   interior mask of the padded layout
    mval = mval_ref[...]       # (Q, 1)   valid-column mask of the output-row layout

    # ---------------- GroupNorm(Cin) + Swish on x ----------------
    # Halo entries of x are zero, so plain sums are correct; divide by the true count.
    cnt1 = float(H * W * (Cin // groups))
    s1 = jnp.sum(x, axis=0, keepdims=True)                       # (1, Cin)
    q1 = jnp.sum(x * x, axis=0, keepdims=True)                   # (1, Cin)
    gs1 = jnp.dot(s1, m1cg_ref[...], preferred_element_type=jnp.float32) / cnt1
    gq1 = jnp.dot(q1, m1cg_ref[...], preferred_element_type=jnp.float32) / cnt1
    gv1 = gq1 - gs1 * gs1
    mean1 = jnp.dot(gs1, m1gc_ref[...], preferred_element_type=jnp.float32)   # (1, Cin)
    rstd1 = jax.lax.rsqrt(
        jnp.dot(gv1, m1gc_ref[...], preferred_element_type=jnp.float32) + eps)
    a1 = (x - mean1) * (rstd1 * g1_ref[...]) + be1_ref[...]
    a1 = a1 * jax.nn.sigmoid(a1)
    a1 = a1 * mint                                               # re-zero the halo

    # Fill the conv1 source scratch: rows [0, P) carry a1, the 2 tail rows stay zero.
    pad1_ref[0:P, :] = a1
    pad1_ref[P:Ppad, :] = jnp.zeros((Ppad - P, Cin), jnp.float32)

    # ---------------- time-embedding MLP: Swish -> Linear ----------------
    t = temb_ref[0]                                              # (1, T)
    t = t * jax.nn.sigmoid(t)
    tproj = jnp.dot(t, wt_ref[...], preferred_element_type=jnp.float32) + bt_ref[...]

    # ---------------- 3x3 conv = 9 shifted-slice matmuls on the MXU ----------------
    def conv3x3(src_ref, w_ref):
        acc = None
        for kh in range(3):
            for kw in range(3):
                off = kh * Wp + kw                               # static offsets
                tap = src_ref[off:off + Q, :]                    # (Q, C)
                c = jnp.dot(tap, w_ref[kh * 3 + kw],
                            preferred_element_type=jnp.float32)
                acc = c if acc is None else acc + c
        return acc

    h = conv3x3(pad1_ref, w1_ref) + b1_ref[...] + tproj          # (Q, Cout)

    # ---------------- GroupNorm(Cout) + Swish on h ----------------
    cnt2 = float(H * W * (Cout // groups))
    hm = h * mval                                                # zero out junk columns
    s2 = jnp.sum(hm, axis=0, keepdims=True)
    q2 = jnp.sum(hm * hm, axis=0, keepdims=True)
    gs2 = jnp.dot(s2, m2cg_ref[...], preferred_element_type=jnp.float32) / cnt2
    gq2 = jnp.dot(q2, m2cg_ref[...], preferred_element_type=jnp.float32) / cnt2
    gv2 = gq2 - gs2 * gs2
    mean2 = jnp.dot(gs2, m2gc_ref[...], preferred_element_type=jnp.float32)
    rstd2 = jax.lax.rsqrt(
        jnp.dot(gv2, m2gc_ref[...], preferred_element_type=jnp.float32) + eps)
    a2 = (hm - mean2) * (rstd2 * g2_ref[...]) + be2_ref[...]
    a2 = a2 * jax.nn.sigmoid(a2)
    a2 = a2 * mval                                               # junk/halo contributions -> 0

    # Re-pad a2 into the flattened (H+2, W+2) layout: logical (i,j) at row i*Wp+j
    # lands at (i+1)*Wp+(j+1) = row + (Wp+1); junk rows carry zeros so every halo
    # position of pad2 ends up exactly zero.  Only the head / tail need explicit zeros.
    off0 = Wp + 1
    pad2_ref[0:off0, :] = jnp.zeros((off0, Cout), jnp.float32)
    pad2_ref[off0:off0 + Q, :] = a2
    pad2_ref[off0 + Q:Ppad, :] = jnp.zeros((Ppad - off0 - Q, Cout), jnp.float32)

    acc2 = conv3x3(pad2_ref, w2_ref)                             # (Q, Cout)

    # ---------------- residual 1x1 conv (identity passed as eye/zeros) ----------------
    xr = x_ref[0, off0:off0 + Q, :]                              # x in output-row layout
    res = jnp.dot(xr, wr_ref[...], preferred_element_type=jnp.float32) + br_ref[...]

    out_ref[0] = (acc2 + b2_ref[...] + res).astype(out_ref.dtype)


def resnet_block_reg_forward(x, time_emb, params, *, groups=4, eps=1e-5):
    """ResnetBlock_reg forward.  x: (N, Cin, H, W) NCHW, time_emb: (N, T).
    params (PyTorch layouts): gn1_w/gn1_b (Cin,), conv1_w (Cout,Cin,3,3), conv1_b (Cout,),
    mlp_w (Cout,T), mlp_b (Cout,), gn2_w/gn2_b (Cout,), conv2_w (Cout,Cout,3,3),
    conv2_b (Cout,), optional res_w (Cout,Cin,1,1) / res_b (Cout,).
    Returns (N, Cout, H, W)."""
    N, Cin, H, W = x.shape
    Cout = params["conv1_w"].shape[0]
    T = time_emb.shape[1]
    Wp = W + 2
    P = (H + 2) * Wp
    Q = H * Wp
    Ppad = P + 2               # scratch tail so every tap slice [off, off+Q) is in-bounds

    # ---- layout glue (pure indexing; stays outside the kernel) ----
    x_nhwc = jnp.transpose(x, (0, 2, 3, 1)).astype(jnp.float32)
    x_pf = jnp.pad(x_nhwc, ((0, 0), (1, 1), (1, 1), (0, 0))).reshape(N, P, Cin)
    temb = time_emb.astype(jnp.float32).reshape(N, 1, T)

    mask_int = jnp.zeros((H + 2, Wp), jnp.float32).at[1:H + 1, 1:W + 1].set(1.0)
    mask_int = mask_int.reshape(P, 1)
    mask_val = jnp.zeros((H, Wp), jnp.float32).at[:, :W].set(1.0).reshape(Q, 1)

    def conv_taps(w_oihw):     # (O, I, 3, 3) -> (9, I, O), tap index = kh*3 + kw
        o, i = w_oihw.shape[0], w_oihw.shape[1]
        return jnp.transpose(w_oihw, (2, 3, 1, 0)).reshape(9, i, o).astype(jnp.float32)

    def group_mats(C):
        gidx = jnp.arange(C) // (C // groups)
        m_cg = (gidx[:, None] == jnp.arange(groups)[None, :]).astype(jnp.float32)
        return m_cg, m_cg.T    # (C, G), (G, C)

    m1_cg, m1_gc = group_mats(Cin)
    m2_cg, m2_gc = group_mats(Cout)

    w1 = conv_taps(params["conv1_w"]);  b1 = params["conv1_b"].reshape(1, Cout)
    w2 = conv_taps(params["conv2_w"]);  b2 = params["conv2_b"].reshape(1, Cout)
    g1 = params["gn1_w"].reshape(1, Cin);  be1 = params["gn1_b"].reshape(1, Cin)
    g2 = params["gn2_w"].reshape(1, Cout); be2 = params["gn2_b"].reshape(1, Cout)
    wt = jnp.transpose(params["mlp_w"]).astype(jnp.float32)        # (T, Cout)
    bt = params["mlp_b"].reshape(1, Cout)
    if "res_w" in params:
        wr = jnp.transpose(params["res_w"].reshape(Cout, Cin)).astype(jnp.float32)
        br = params["res_b"].reshape(1, Cout)
    else:                       # dim == dim_out -> identity residual
        wr = jnp.eye(Cin, dtype=jnp.float32)
        br = jnp.zeros((1, Cout), jnp.float32)

    kernel = functools.partial(_resnet_block_kernel, H=H, W=W, groups=groups, eps=eps)
    const2 = lambda i: (0, 0)
    const3 = lambda i: (0, 0, 0)

    out_flat = pl.pallas_call(
        kernel,
        out_shape=jax.ShapeDtypeStruct((N, Q, Cout), jnp.float32),
        grid_spec=pltpu.PrefetchScalarGridSpec(
            num_scalar_prefetch=0,
            grid=(N,),
            in_specs=[
                pl.BlockSpec((1, P, Cin), lambda i: (i, 0, 0)),      # x (padded, flat)
                pl.BlockSpec((1, 1, T), lambda i: (i, 0, 0)),        # time_emb
                pl.BlockSpec((P, 1), const2),                        # interior mask
                pl.BlockSpec((Q, 1), const2),                        # valid-col mask
                pl.BlockSpec((1, Cin), const2),                      # gn1 gamma
                pl.BlockSpec((1, Cin), const2),                      # gn1 beta
                pl.BlockSpec((Cin, groups), const2),                 # group one-hot (C->G)
                pl.BlockSpec((groups, Cin), const2),                 # group one-hot (G->C)
                pl.BlockSpec((9, Cin, Cout), const3),                # conv1 taps
                pl.BlockSpec((1, Cout), const2),                     # conv1 bias
                pl.BlockSpec((T, Cout), const2),                     # mlp weight
                pl.BlockSpec((1, Cout), const2),                     # mlp bias
                pl.BlockSpec((1, Cout), const2),                     # gn2 gamma
                pl.BlockSpec((1, Cout), const2),                     # gn2 beta
                pl.BlockSpec((Cout, groups), const2),
                pl.BlockSpec((groups, Cout), const2),
                pl.BlockSpec((9, Cout, Cout), const3),               # conv2 taps
                pl.BlockSpec((1, Cout), const2),                     # conv2 bias
                pl.BlockSpec((Cin, Cout), const2),                   # res 1x1 weight
                pl.BlockSpec((1, Cout), const2),                     # res bias
            ],
            out_specs=pl.BlockSpec((1, Q, Cout), lambda i: (i, 0, 0)),
            scratch_shapes=[
                pltpu.VMEM((Ppad, Cin), jnp.float32),
                pltpu.VMEM((Ppad, Cout), jnp.float32),
            ],
        ),
        compiler_params=pltpu.CompilerParams(
            dimension_semantics=("parallel",)),
    )(x_pf, temb, mask_int, mask_val,
      g1, be1, m1_cg, m1_gc, w1, b1, wt, bt,
      g2, be2, m2_cg, m2_gc, w2, b2, wr, br)

    out = out_flat.reshape(N, H, Wp, Cout)[:, :, :W, :]          # drop junk columns
    return jnp.transpose(out, (0, 3, 1, 2)).astype(x.dtype)      # back to NCHW


# ----------------------------- pure-JAX reference -----------------------------
def _reference(x, temb, p, groups):
    def gn(v, gamma, beta, eps=1e-5):
        n, c, h, w = v.shape
        vg = v.reshape(n, groups, c // groups, h, w)
        mean = jnp.mean(vg, axis=(2, 3, 4), keepdims=True)
        var = jnp.mean((vg - mean) ** 2, axis=(2, 3, 4), keepdims=True)
        vn = ((vg - mean) * jax.lax.rsqrt(var + eps)).reshape(n, c, h, w)
        return vn * gamma.reshape(1, c, 1, 1) + beta.reshape(1, c, 1, 1)

    def swish(v):
        return v * jax.nn.sigmoid(v)

    def conv(v, w, b, pad):
        y = jax.lax.conv_general_dilated(
            v, w, (1, 1), ((pad, pad), (pad, pad)),
            dimension_numbers=("NCHW", "OIHW", "NCHW"))
        return y + b.reshape(1, -1, 1, 1)

    h = conv(swish(gn(x, p["gn1_w"], p["gn1_b"])), p["conv1_w"], p["conv1_b"], 1)
    h = h + (swish(temb) @ p["mlp_w"].T + p["mlp_b"])[:, :, None, None]
    h = conv(swish(gn(h, p["gn2_w"], p["gn2_b"])), p["conv2_w"], p["conv2_b"], 1)
    return h + conv(x, p["res_w"], p["res_b"], 0)


if __name__ == "__main__":
    N, dim, dim_out, H, W = 2, 4, 8, 16, 16
    time_emb_dim, groups = 32, 4

    key = jax.random.PRNGKey(0)
    ks = jax.random.split(key, 14)

    x = jax.random.normal(ks[0], (N, dim, H, W), jnp.float32)
    temb = jax.random.normal(ks[1], (N, time_emb_dim), jnp.float32)

    def conv_init(kw_, kb_, cout, cin, k):
        bound = 1.0 / math.sqrt(cin * k * k)
        w = jax.random.uniform(kw_, (cout, cin, k, k), jnp.float32, -bound, bound)
        b = jax.random.uniform(kb_, (cout,), jnp.float32, -bound, bound)
        return w, b

    conv1_w, conv1_b = conv_init(ks[2], ks[3], dim_out, dim, 3)
    conv2_w, conv2_b = conv_init(ks[4], ks[5], dim_out, dim_out, 3)
    res_w, res_b = conv_init(ks[6], ks[7], dim_out, dim, 1)
    lb = 1.0 / math.sqrt(time_emb_dim)
    mlp_w = jax.random.uniform(ks[8], (dim_out, time_emb_dim), jnp.float32, -lb, lb)
    mlp_b = jax.random.uniform(ks[9], (dim_out,), jnp.float32, -lb, lb)
    gn1_w = 1.0 + 0.1 * jax.random.normal(ks[10], (dim,), jnp.float32)
    gn1_b = 0.1 * jax.random.normal(ks[11], (dim,), jnp.float32)
    gn2_w = 1.0 + 0.1 * jax.random.normal(ks[12], (dim_out,), jnp.float32)
    gn2_b = 0.1 * jax.random.normal(ks[13], (dim_out,), jnp.float32)

    params = dict(gn1_w=gn1_w, gn1_b=gn1_b, conv1_w=conv1_w, conv1_b=conv1_b,
                  mlp_w=mlp_w, mlp_b=mlp_b,
                  gn2_w=gn2_w, gn2_b=gn2_b, conv2_w=conv2_w, conv2_b=conv2_b,
                  res_w=res_w, res_b=res_b)

    out = resnet_block_reg_forward(x, temb, params, groups=groups)
    out = jax.block_until_ready(out)

    ref = _reference(x, temb, params, groups)
    assert out.shape == (N, dim_out, H, W), out.shape
    assert not bool(jnp.any(jnp.isnan(out))), "NaN in kernel output"
    max_err = float(jnp.max(jnp.abs(out - ref)))
    assert jnp.allclose(out, ref, atol=5e-3, rtol=5e-3), max_err

    print("KERNEL_OK")
</pallas_src>

<mosaic_0001>
module attributes {stable_mosaic.version = 11 : i64} {
  func.func @_resnet_block_kernel(%arg0: i32, %arg1: memref<1x324x4xf32, #tpu.memory_space<vmem>>, %arg2: memref<1x1x32xf32, #tpu.memory_space<vmem>>, %arg3: memref<324x1xf32, #tpu.memory_space<vmem>>, %arg4: memref<288x1xf32, #tpu.memory_space<vmem>>, %arg5: memref<1x4xf32, #tpu.memory_space<vmem>>, %arg6: memref<1x4xf32, #tpu.memory_space<vmem>>, %arg7: memref<4x4xf32, #tpu.memory_space<vmem>>, %arg8: memref<4x4xf32, #tpu.memory_space<vmem>>, %arg9: memref<9x4x8xf32, #tpu.memory_space<vmem>>, %arg10: memref<1x8xf32, #tpu.memory_space<vmem>>, %arg11: memref<32x8xf32, #tpu.memory_space<vmem>>, %arg12: memref<1x8xf32, #tpu.memory_space<vmem>>, %arg13: memref<1x8xf32, #tpu.memory_space<vmem>>, %arg14: memref<1x8xf32, #tpu.memory_space<vmem>>, %arg15: memref<8x4xf32, #tpu.memory_space<vmem>>, %arg16: memref<4x8xf32, #tpu.memory_space<vmem>>, %arg17: memref<9x8x8xf32, #tpu.memory_space<vmem>>, %arg18: memref<1x8xf32, #tpu.memory_space<vmem>>, %arg19: memref<4x8xf32, #tpu.memory_space<vmem>>, %arg20: memref<1x8xf32, #tpu.memory_space<vmem>>, %arg21: memref<1x288x8xf32, #tpu.memory_space<vmem>>, %arg22: memref<326x4xf32, #tpu.memory_space<vmem>>, %arg23: memref<326x8xf32, #tpu.memory_space<vmem>>) attributes {dimension_semantics = [#tpu.dimension_semantics<parallel>], iteration_bounds = array<i64: 2>, scalar_prefetch = 0 : i64, scratch_operands = 2 : i64, tpu.core_type = #tpu.core_type<tc>, window_params = [{transform_indices = @transform_0, window_bounds = array<i64: 1, 324, 4>}, {transform_indices = @transform_1, window_bounds = array<i64: 1, 1, 32>}, {pipeline_mode = #tpu.pipeline_mode<synchronous>, transform_indices = @transform_2, window_bounds = array<i64: 324, 1>}, {pipeline_mode = #tpu.pipeline_mode<synchronous>, transform_indices = @transform_3, window_bounds = array<i64: 288, 1>}, {pipeline_mode = #tpu.pipeline_mode<synchronous>, transform_indices = @transform_4, window_bounds = array<i64: 1, 4>}, {pipeline_mode = #tpu.pipeline_mode<synchronous>, transform_indices = @transform_5, window_bounds = array<i64: 1, 4>}, {pipeline_mode = #tpu.pipeline_mode<synchronous>, transform_indices = @transform_6, window_bounds = array<i64: 4, 4>}, {pipeline_mode = #tpu.pipeline_mode<synchronous>, transform_indices = @transform_7, window_bounds = array<i64: 4, 4>}, {pipeline_mode = #tpu.pipeline_mode<synchronous>, transform_indices = @transform_8, window_bounds = array<i64: 9, 4, 8>}, {pipeline_mode = #tpu.pipeline_mode<synchronous>, transform_indices = @transform_9, window_bounds = array<i64: 1, 8>}, {pipeline_mode = #tpu.pipeline_mode<synchronous>, transform_indices = @transform_10, window_bounds = array<i64: 32, 8>}, {pipeline_mode = #tpu.pipeline_mode<synchronous>, transform_indices = @transform_11, window_bounds = array<i64: 1, 8>}, {pipeline_mode = #tpu.pipeline_mode<synchronous>, transform_indices = @transform_12, window_bounds = array<i64: 1, 8>}, {pipeline_mode = #tpu.pipeline_mode<synchronous>, transform_indices = @transform_13, window_bounds = array<i64: 1, 8>}, {pipeline_mode = #tpu.pipeline_mode<synchronous>, transform_indices = @transform_14, window_bounds = array<i64: 8, 4>}, {pipeline_mode = #tpu.pipeline_mode<synchronous>, transform_indices = @transform_15, window_bounds = array<i64: 4, 8>}, {pipeline_mode = #tpu.pipeline_mode<synchronous>, transform_indices = @transform_16, window_bounds = array<i64: 9, 8, 8>}, {pipeline_mode = #tpu.pipeline_mode<synchronous>, transform_indices = @transform_17, window_bounds = array<i64: 1, 8>}, {pipeline_mode = #tpu.pipeline_mode<synchronous>, transform_indices = @transform_18, window_bounds = array<i64: 4, 8>}, {pipeline_mode = #tpu.pipeline_mode<synchronous>, transform_indices = @transform_19, window_bounds = array<i64: 1, 8>}, {transform_indices = @transform_20, window_bounds = array<i64: 1, 288, 8>}]} {
    %c0 = arith.constant 0 : index
    %c0_0 = arith.constant 0 : index
    %c0_1 = arith.constant 0 : index
    %0 = vector.load %arg1[%c0, %c0_0, %c0_1] : memref<1x324x4xf32, #tpu.memory_space<vmem>>, vector<1x324x4xf32>
    %1 = vector.shape_cast %0 : vector<1x324x4xf32> to vector<324x4xf32>
    %c0_2 = arith.constant 0 : index
    %c0_3 = arith.constant 0 : index
    %2 = vector.load %arg3[%c0_2, %c0_3] : memref<324x1xf32, #tpu.memory_space<vmem>>, vector<324x1xf32>
    %c0_4 = arith.constant 0 : index
    %c0_5 = arith.constant 0 : index
    %3 = vector.load %arg4[%c0_4, %c0_5] : memref<288x1xf32, #tpu.memory_space<vmem>>, vector<288x1xf32>
    %cst = arith.constant dense<0.000000e+00> : vector<4xf32>
    %4 = vector.multi_reduction <add>, %1, %cst [0] : vector<324x4xf32> to vector<4xf32>
    %5 = vector.shape_cast %4 : vector<4xf32> to vector<1x4xf32>
    %6 = arith.mulf %1, %1 : vector<324x4xf32>
    %cst_6 = arith.constant dense<0.000000e+00> : vector<4xf32>
    %7 = vector.multi_reduction <add>, %6, %cst_6 [0] : vector<324x4xf32> to vector<4xf32>
    %8 = vector.shape_cast %7 : vector<4xf32> to vector<1x4xf32>
    %c0_7 = arith.constant 0 : index
    %c0_8 = arith.constant 0 : index
    %9 = vector.load %arg7[%c0_7, %c0_8] : memref<4x4xf32, #tpu.memory_space<vmem>>, vector<4x4xf32>
    %cst_9 = arith.constant dense<0.000000e+00> : vector<1x4xf32>
    %10 = tpu.matmul %5, %9, %cst_9 {dimension_numbers = #tpu.dot_dimension_numbers<[1], [0], [0], [1], [0, 0, 1, 1], [], []>} : vector<1x4xf32>, vector<4x4xf32>, vector<1x4xf32> -> vector<1x4xf32>
    %cst_10 = arith.constant 2.560000e+02 : f32
    %11 = vector.broadcast %cst_10 : f32 to vector<1x4xf32>
    %12 = arith.divf %10, %11 : vector<1x4xf32>
    %c0_11 = arith.constant 0 : index
    %c0_12 = arith.constant 0 : index
    %13 = vector.load %arg7[%c0_11, %c0_12] : memref<4x4xf32, #tpu.memory_space<vmem>>, vector<4x4xf32>
    %cst_13 = arith.constant dense<0.000000e+00> : vector<1x4xf32>
    %14 = tpu.matmul %8, %13, %cst_13 {dimension_numbers = #tpu.dot_dimension_numbers<[1], [0], [0], [1], [0, 0, 1, 1], [], []>} : vector<1x4xf32>, vector<4x4xf32>, vector<1x4xf32> -> vector<1x4xf32>
    %cst_14 = arith.constant 2.560000e+02 : f32
    %15 = vector.broadcast %cst_14 : f32 to vector<1x4xf32>
    %16 = arith.divf %14, %15 : vector<1x4xf32>
    %17 = arith.mulf %12, %12 : vector<1x4xf32>
    %18 = arith.subf %16, %17 : vector<1x4xf32>
    %c0_15 = arith.constant 0 : index
    %c0_16 = arith.constant 0 : index
    %19 = vector.load %arg8[%c0_15, %c0_16] : memref<4x4xf32, #tpu.memory_space<vmem>>, vector<4x4xf32>
    %cst_17 = arith.constant dense<0.000000e+00> : vector<1x4xf32>
    %20 = tpu.matmul %12, %19, %cst_17 {dimension_numbers = #tpu.dot_dimension_numbers<[1], [0], [0], [1], [0, 0, 1, 1], [], []>} : vector<1x4xf32>, vector<4x4xf32>, vector<1x4xf32> -> vector<1x4xf32>
    %c0_18 = arith.constant 0 : index
    %c0_19 = arith.constant 0 : index
    %21 = vector.load %arg8[%c0_18, %c0_19] : memref<4x4xf32, #tpu.memory_space<vmem>>, vector<4x4xf32>
    %cst_20 = arith.constant dense<0.000000e+00> : vector<1x4xf32>
    %22 = tpu.matmul %18, %21, %cst_20 {dimension_numbers = #tpu.dot_dimension_numbers<[1], [0], [0], [1], [0, 0, 1, 1], [], []>} : vector<1x4xf32>, vector<4x4xf32>, vector<1x4xf32> -> vector<1x4xf32>
    %cst_21 = arith.constant 9.99999974E-6 : f32
    %23 = vector.broadcast %cst_21 : f32 to vector<1x4xf32>
    %24 = arith.addf %22, %23 : vector<1x4xf32>
    %25 = math.rsqrt %24 : vector<1x4xf32>
    %26 = vector.broadcast %20 : vector<1x4xf32> to vector<324x4xf32>
    %27 = arith.subf %1, %26 : vector<324x4xf32>
    %c0_22 = arith.constant 0 : index
    %c0_23 = arith.constant 0 : index
    %28 = vector.load %arg5[%c0_22, %c0_23] : memref<1x4xf32, #tpu.memory_space<vmem>>, vector<1x4xf32>
    %29 = arith.mulf %25, %28 : vector<1x4xf32>
    %30 = vector.broadcast %29 : vector<1x4xf32> to vector<324x4xf32>
    %31 = arith.mulf %27, %30 : vector<324x4xf32>
    %c0_24 = arith.constant 0 : index
    %c0_25 = arith.constant 0 : index
    %32 = vector.load %arg6[%c0_24, %c0_25] : memref<1x4xf32, #tpu.memory_space<vmem>>, vector<1x4xf32>
    %33 = vector.broadcast %32 : vector<1x4xf32> to vector<324x4xf32>
    %34 = arith.addf %31, %33 : vector<324x4xf32>
    %35 = arith.negf %34 : vector<324x4xf32>
    %36 = math.exp %35 : vector<324x4xf32>
    %cst_26 = arith.constant 1.000000e+00 : f32
    %37 = vector.broadcast %cst_26 : f32 to vector<324x4xf32>
    %38 = arith.addf %37, %36 : vector<324x4xf32>
    %39 = arith.divf %37, %38 : vector<324x4xf32>
    %40 = arith.mulf %34, %39 : vector<324x4xf32>
    %41 = vector.broadcast %2 : vector<324x1xf32> to vector<324x4xf32>
    %42 = arith.mulf %40, %41 : vector<324x4xf32>
    %c0_27 = arith.constant 0 : index
    %c0_28 = arith.constant 0 : index
    %43 = vector.load %arg22[%c0_27, %c0_28] : memref<326x4xf32, #tpu.memory_space<vmem>>, vector<324x4xf32>
    tpu.vector_store %arg22[%c0_27, %c0_28], %42 {strides = array<i32>} : memref<326x4xf32, #tpu.memory_space<vmem>>, vector<324x4xf32>,
    %cst_29 = arith.constant 0.000000e+00 : f32
    %44 = vector.broadcast %cst_29 : f32 to vector<2x4xf32>
    %c324 = arith.constant 324 : index
    %c0_30 = arith.constant 0 : index
    %45 = vector.load %arg22[%c324, %c0_30] : memref<326x4xf32, #tpu.memory_space<vmem>>, vector<2x4xf32>
    tpu.vector_store %arg22[%c324, %c0_30], %44 {strides = array<i32>} : memref<326x4xf32, #tpu.memory_space<vmem>>, vector<2x4xf32>,
    %c0_31 = arith.constant 0 : index
    %c0_32 = arith.constant 0 : index
    %c0_33 = arith.constant 0 : index
    %46 = vector.load %arg2[%c0_31, %c0_32, %c0_33] : memref<1x1x32xf32, #tpu.memory_space<vmem>>, vector<1x1x32xf32>
    %47 = vector.shape_cast %46 : vector<1x1x32xf32> to vector<1x32xf32>
    %48 = arith.negf %47 : vector<1x32xf32>
    %49 = math.exp %48 : vector<1x32xf32>
    %cst_34 = arith.constant 1.000000e+00 : f32
    %50 = vector.broadcast %cst_34 : f32 to vector<1x32xf32>
    %51 = arith.addf %50, %49 : vector<1x32xf32>
    %52 = arith.divf %50, %51 : vector<1x32xf32>
    %53 = arith.mulf %47, %52 : vector<1x32xf32>
    %c0_35 = arith.constant 0 : index
    %c0_36 = arith.constant 0 : index
    %54 = vector.load %arg11[%c0_35, %c0_36] : memref<32x8xf32, #tpu.memory_space<vmem>>, vector<32x8xf32>
    %cst_37 = arith.constant dense<0.000000e+00> : vector<1x8xf32>
    %55 = tpu.matmul %53, %54, %cst_37 {dimension_numbers = #tpu.dot_dimension_numbers<[1], [0], [0], [1], [0, 0, 1, 1], [], []>} : vector<1x32xf32>, vector<32x8xf32>, vector<1x8xf32> -> vector<1x8xf32>
    %c0_38 = arith.constant 0 : index
    %c0_39 = arith.constant 0 : index
    %56 = vector.load %arg12[%c0_38, %c0_39] : memref<1x8xf32, #tpu.memory_space<vmem>>, vector<1x8xf32>
    %57 = arith.addf %55, %56 : vector<1x8xf32>
    %c0_40 = arith.constant 0 : index
    %c0_41 = arith.constant 0 : index
    %58 = vector.load %arg22[%c0_40, %c0_41] : memref<326x4xf32, #tpu.memory_space<vmem>>, vector<288x4xf32>
    %c0_42 = arith.constant 0 : index
    %c0_43 = arith.constant 0 : index
    %c0_44 = arith.constant 0 : index
    %59 = vector.load %arg9[%c0_42, %c0_43, %c0_44] : memref<9x4x8xf32, #tpu.memory_space<vmem>>, vector<1x4x8xf32>
    %60 = vector.shape_cast %59 : vector<1x4x8xf32> to vector<4x8xf32>
    %cst_45 = arith.constant dense<0.000000e+00> : vector<288x8xf32>
    %61 = tpu.matmul %58, %60, %cst_45 {dimension_numbers = #tpu.dot_dimension_numbers<[1], [0], [0], [1], [0, 0, 1, 1], [], []>} : vector<288x4xf32>, vector<4x8xf32>, vector<288x8xf32> -> vector<288x8xf32>
    %c1 = arith.constant 1 : index
    %c0_46 = arith.constant 0 : index
    %62 = vector.load %arg22[%c1, %c0_46] : memref<326x4xf32, #tpu.memory_space<vmem>>, vector<288x4xf32>
    %c1_47 = arith.constant 1 : index
    %c0_48 = arith.constant 0 : index
    %c0_49 = arith.constant 0 : index
    %63 = vector.load %arg9[%c1_47, %c0_48, %c0_49] : memref<9x4x8xf32, #tpu.memory_space<vmem>>, vector<1x4x8xf32>
    %64 = vector.shape_cast %63 : vector<1x4x8xf32> to vector<4x8xf32>
    %cst_50 = arith.constant dense<0.000000e+00> : vector<288x8xf32>
    %65 = tpu.matmul %62, %64, %cst_50 {dimension_numbers = #tpu.dot_dimension_numbers<[1], [0], [0], [1], [0, 0, 1, 1], [], []>} : vector<288x4xf32>, vector<4x8xf32>, vector<288x8xf32> -> vector<288x8xf32>
    %66 = arith.addf %61, %65 : vector<288x8xf32>
    %c2 = arith.constant 2 : index
    %c0_51 = arith.constant 0 : index
    %67 = vector.load %arg22[%c2, %c0_51] : memref<326x4xf32, #tpu.memory_space<vmem>>, vector<288x4xf32>
    %c2_52 = arith.constant 2 : index
    %c0_53 = arith.constant 0 : index
    %c0_54 = arith.constant 0 : index
    %68 = vector.load %arg9[%c2_52, %c0_53, %c0_54] : memref<9x4x8xf32, #tpu.memory_space<vmem>>, vector<1x4x8xf32>
    %69 = vector.shape_cast %68 : vector<1x4x8xf32> to vector<4x8xf32>
    %cst_55 = arith.constant dense<0.000000e+00> : vector<288x8xf32>
    %70 = tpu.matmul %67, %69, %cst_55 {dimension_numbers = #tpu.dot_dimension_numbers<[1], [0], [0], [1], [0, 0, 1, 1], [], []>} : vector<288x4xf32>, vector<4x8xf32>, vector<288x8xf32> -> vector<288x8xf32>
    %71 = arith.addf %66, %70 : vector<288x8xf32>
    %c18 = arith.constant 18 : index
    %c0_56 = arith.constant 0 : index
    %72 = vector.load %arg22[%c18, %c0_56] : memref<326x4xf32, #tpu.memory_space<vmem>>, vector<288x4xf32>
    %c3 = arith.constant 3 : index
    %c0_57 = arith.constant 0 : index
    %c0_58 = arith.constant 0 : index
    %73 = vector.load %arg9[%c3, %c0_57, %c0_58] : memref<9x4x8xf32, #tpu.memory_space<vmem>>, vector<1x4x8xf32>
    %74 = vector.shape_cast %73 : vector<1x4x8xf32> to vector<4x8xf32>
    %cst_59 = arith.constant dense<0.000000e+00> : vector<288x8xf32>
    %75 = tpu.matmul %72, %74, %cst_59 {dimension_numbers = #tpu.dot_dimension_numbers<[1], [0], [0], [1], [0, 0, 1, 1], [], []>} : vector<288x4xf32>, vector<4x8xf32>, vector<288x8xf32> -> vector<288x8xf32>
    %76 = arith.addf %71, %75 : vector<288x8xf32>
    %c19 = arith.constant 19 : index
    %c0_60 = arith.constant 0 : index
    %77 = vector.load %arg22[%c19, %c0_60] : memref<326x4xf32, #tpu.memory_space<vmem>>, vector<288x4xf32>
    %c4 = arith.constant 4 : index
    %c0_61 = arith.constant 0 : index
    %c0_62 = arith.constant 0 : index
    %78 = vector.load %arg9[%c4, %c0_61, %c0_62] : memref<9x4x8xf32, #tpu.memory_space<vmem>>, vector<1x4x8xf32>
    %79 = vector.shape_cast %78 : vector<1x4x8xf32> to vector<4x8xf32>
    %cst_63 = arith.constant dense<0.000000e+00> : vector<288x8xf32>
    %80 = tpu.matmul %77, %79, %cst_63 {dimension_numbers = #tpu.dot_dimension_numbers<[1], [0], [0], [1], [0, 0, 1, 1], [], []>} : vector<288x4xf32>, vector<4x8xf32>, vector<288x8xf32> -> vector<288x8xf32>
    %81 = arith.addf %76, %80 : vector<288x8xf32>
    %c20 = arith.constant 20 : index
    %c0_64 = arith.constant 0 : index
    %82 = vector.load %arg22[%c20, %c0_64] : memref<326x4xf32, #tpu.memory_space<vmem>>, vector<288x4xf32>
    %c5 = arith.constant 5 : index
    %c0_65 = arith.constant 0 : index
    %c0_66 = arith.constant 0 : index
    %83 = vector.load %arg9[%c5, %c0_65, %c0_66] : memref<9x4x8xf32, #tpu.memory_space<vmem>>, vector<1x4x8xf32>
    %84 = vector.shape_cast %83 : vector<1x4x8xf32> to vector<4x8xf32>
    %cst_67 = arith.constant dense<0.000000e+00> : vector<288x8xf32>
    %85 = tpu.matmul %82, %84, %cst_67 {dimension_numbers = #tpu.dot_dimension_numbers<[1], [0], [0], [1], [0, 0, 1, 1], [], []>} : vector<288x4xf32>, vector<4x8xf32>, vector<288x8xf32> -> vector<288x8xf32>
    %86 = arith.addf %81, %85 : vector<288x8xf32>
    %c36 = arith.constant 36 : index
    %c0_68 = arith.constant 0 : index
    %87 = vector.load %arg22[%c36, %c0_68] : memref<326x4xf32, #tpu.memory_space<vmem>>, vector<288x4xf32>
    %c6 = arith.constant 6 : index
    %c0_69 = arith.constant 0 : index
    %c0_70 = arith.constant 0 : index
    %88 = vector.load %arg9[%c6, %c0_69, %c0_70] : memref<9x4x8xf32, #tpu.memory_space<vmem>>, vector<1x4x8xf32>
    %89 = vector.shape_cast %88 : vector<1x4x8xf32> to vector<4x8xf32>
    %cst_71 = arith.constant dense<0.000000e+00> : vector<288x8xf32>
    %90 = tpu.matmul %87, %89, %cst_71 {dimension_numbers = #tpu.dot_dimension_numbers<[1], [0], [0], [1], [0, 0, 1, 1], [], []>} : vector<288x4xf32>, vector<4x8xf32>, vector<288x8xf32> -> vector<288x8xf32>
    %91 = arith.addf %86, %90 : vector<288x8xf32>
    %c37 = arith.constant 37 : index
    %c0_72 = arith.constant 0 : index
    %92 = vector.load %arg22[%c37, %c0_72] : memref<326x4xf32, #tpu.memory_space<vmem>>, vector<288x4xf32>
    %c7 = arith.constant 7 : index
    %c0_73 = arith.constant 0 : index
    %c0_74 = arith.constant 0 : index
    %93 = vector.load %arg9[%c7, %c0_73, %c0_74] : memref<9x4x8xf32, #tpu.memory_space<vmem>>, vector<1x4x8xf32>
    %94 = vector.shape_cast %93 : vector<1x4x8xf32> to vector<4x8xf32>
    %cst_75 = arith.constant dense<0.000000e+00> : vector<288x8xf32>
    %95 = tpu.matmul %92, %94, %cst_75 {dimension_numbers = #tpu.dot_dimension_numbers<[1], [0], [0], [1], [0, 0, 1, 1], [], []>} : vector<288x4xf32>, vector<4x8xf32>, vector<288x8xf32> -> vector<288x8xf32>
    %96 = arith.addf %91, %95 : vector<288x8xf32>
    %c38 = arith.constant 38 : index
    %c0_76 = arith.constant 0 : index
    %97 = vector.load %arg22[%c38, %c0_76] : memref<326x4xf32, #tpu.memory_space<vmem>>, vector<288x4xf32>
    %c8 = arith.constant 8 : index
    %c0_77 = arith.constant 0 : index
    %c0_78 = arith.constant 0 : index
    %98 = vector.load %arg9[%c8, %c0_77, %c0_78] : memref<9x4x8xf32, #tpu.memory_space<vmem>>, vector<1x4x8xf32>
    %99 = vector.shape_cast %98 : vector<1x4x8xf32> to vector<4x8xf32>
    %cst_79 = arith.constant dense<0.000000e+00> : vector<288x8xf32>
    %100 = tpu.matmul %97, %99, %cst_79 {dimension_numbers = #tpu.dot_dimension_numbers<[1], [0], [0], [1], [0, 0, 1, 1], [], []>} : vector<288x4xf32>, vector<4x8xf32>, vector<288x8xf32> -> vector<288x8xf32>
    %101 = arith.addf %96, %100 : vector<288x8xf32>
    %c0_80 = arith.constant 0 : index
    %c0_81 = arith.constant 0 : index
    %102 = vector.load %arg10[%c0_80, %c0_81] : memref<1x8xf32, #tpu.memory_space<vmem>>, vector<1x8xf32>
    %103 = vector.broadcast %102 : vector<1x8xf32> to vector<288x8xf32>
    %104 = arith.addf %101, %103 : vector<288x8xf32>
    %105 = vector.broadcast %57 : vector<1x8xf32> to vector<288x8xf32>
    %106 = arith.addf %104, %105 : vector<288x8xf32>
    %107 = vector.broadcast %3 : vector<288x1xf32> to vector<288x8xf32>
    %108 = arith.mulf %106, %107 : vector<288x8xf32>
    %cst_82 = arith.constant dense<0.000000e+00> : vector<8xf32>
    %109 = vector.multi_reduction <add>, %108, %cst_82 [0] : vector<288x8xf32> to vector<8xf32>
    %110 = vector.shape_cast %109 : vector<8xf32> to vector<1x8xf32>
    %111 = arith.mulf %108, %108 : vector<288x8xf32>
    %cst_83 = arith.constant dense<0.000000e+00> : vector<8xf32>
    %112 = vector.multi_reduction <add>, %111, %cst_83 [0] : vector<288x8xf32> to vector<8xf32>
    %113 = vector.shape_cast %112 : vector<8xf32> to vector<1x8xf32>
    %c0_84 = arith.constant 0 : index
    %c0_85 = arith.constant 0 : index
    %114 = vector.load %arg15[%c0_84, %c0_85] : memref<8x4xf32, #tpu.memory_space<vmem>>, vector<8x4xf32>
    %cst_86 = arith.constant dense<0.000000e+00> : vector<1x4xf32>
    %115 = tpu.matmul %110, %114, %cst_86 {dimension_numbers = #tpu.dot_dimension_numbers<[1], [0], [0], [1], [0, 0, 1, 1], [], []>} : vector<1x8xf32>, vector<8x4xf32>, vector<1x4xf32> -> vector<1x4xf32>
    %cst_87 = arith.constant 5.120000e+02 : f32
    %116 = vector.broadcast %cst_87 : f32 to vector<1x4xf32>
    %117 = arith.divf %115, %116 : vector<1x4xf32>
    %c0_88 = arith.constant 0 : index
    %c0_89 = arith.constant 0 : index
    %118 = vector.load %arg15[%c0_88, %c0_89] : memref<8x4xf32, #tpu.memory_space<vmem>>, vector<8x4xf32>
    %cst_90 = arith.constant dense<0.000000e+00> : vector<1x4xf32>
    %119 = tpu.matmul %113, %118, %cst_90 {dimension_numbers = #tpu.dot_dimension_numbers<[1], [0], [0], [1], [0, 0, 1, 1], [], []>} : vector<1x8xf32>, vector<8x4xf32>, vector<1x4xf32> -> vector<1x4xf32>
    %cst_91 = arith.constant 5.120000e+02 : f32
    %120 = vector.broadcast %cst_91 : f32 to vector<1x4xf32>
    %121 = arith.divf %119, %120 : vector<1x4xf32>
    %122 = arith.mulf %117, %117 : vector<1x4xf32>
    %123 = arith.subf %121, %122 : vector<1x4xf32>
    %c0_92 = arith.constant 0 : index
    %c0_93 = arith.constant 0 : index
    %124 = vector.load %arg16[%c0_92, %c0_93] : memref<4x8xf32, #tpu.memory_space<vmem>>, vector<4x8xf32>
    %cst_94 = arith.constant dense<0.000000e+00> : vector<1x8xf32>
    %125 = tpu.matmul %117, %124, %cst_94 {dimension_numbers = #tpu.dot_dimension_numbers<[1], [0], [0], [1], [0, 0, 1, 1], [], []>} : vector<1x4xf32>, vector<4x8xf32>, vector<1x8xf32> -> vector<1x8xf32>
    %c0_95 = arith.constant 0 : index
    %c0_96 = arith.constant 0 : index
    %126 = vector.load %arg16[%c0_95, %c0_96] : memref<4x8xf32, #tpu.memory_space<vmem>>, vector<4x8xf32>
    %cst_97 = arith.constant dense<0.000000e+00> : vector<1x8xf32>
    %127 = tpu.matmul %123, %126, %cst_97 {dimension_numbers = #tpu.dot_dimension_numbers<[1], [0], [0], [1], [0, 0, 1, 1], [], []>} : vector<1x4xf32>, vector<4x8xf32>, vector<1x8xf32> -> vector<1x8xf32>
    %cst_98 = arith.constant 9.99999974E-6 : f32
    %128 = vector.broadcast %cst_98 : f32 to vector<1x8xf32>
    %129 = arith.addf %127, %128 : vector<1x8xf32>
    %130 = math.rsqrt %129 : vector<1x8xf32>
    %131 = vector.broadcast %125 : vector<1x8xf32> to vector<288x8xf32>
    %132 = arith.subf %108, %131 : vector<288x8xf32>
    %c0_99 = arith.constant 0 : index
    %c0_100 = arith.constant 0 : index
    %133 = vector.load %arg13[%c0_99, %c0_100] : memref<1x8xf32, #tpu.memory_space<vmem>>, vector<1x8xf32>
    %134 = arith.mulf %130, %133 : vector<1x8xf32>
    %135 = vector.broadcast %134 : vector<1x8xf32> to vector<288x8xf32>
    %136 = arith.mulf %132, %135 : vector<288x8xf32>
    %c0_101 = arith.constant 0 : index
    %c0_102 = arith.constant 0 : index
    %137 = vector.load %arg14[%c0_101, %c0_102] : memref<1x8xf32, #tpu.memory_space<vmem>>, vector<1x8xf32>
    %138 = vector.broadcast %137 : vector<1x8xf32> to vector<288x8xf32>
    %139 = arith.addf %136, %138 : vector<288x8xf32>
    %140 = arith.negf %139 : vector<288x8xf32>
    %141 = math.exp %140 : vector<288x8xf32>
    %cst_103 = arith.constant 1.000000e+00 : f32
    %142 = vector.broadcast %cst_103 : f32 to vector<288x8xf32>
    %143 = arith.addf %142, %141 : vector<288x8xf32>
    %144 = arith.divf %142, %143 : vector<288x8xf32>
    %145 = arith.mulf %139, %144 : vector<288x8xf32>
    %146 = vector.broadcast %3 : vector<288x1xf32> to vector<288x8xf32>
    %147 = arith.mulf %145, %146 : vector<288x8xf32>
    %cst_104 = arith.constant 0.000000e+00 : f32
    %148 = vector.broadcast %cst_104 : f32 to vector<19x8xf32>
    %c0_105 = arith.constant 0 : index
    %c0_106 = arith.constant 0 : index
    %149 = vector.load %arg23[%c0_105, %c0_106] : memref<326x8xf32, #tpu.memory_space<vmem>>, vector<19x8xf32>
    tpu.vector_store %arg23[%c0_105, %c0_106], %148 {strides = array<i32>} : memref<326x8xf32, #tpu.memory_space<vmem>>, vector<19x8xf32>,
    %c19_107 = arith.constant 19 : index
    %c0_108 = arith.constant 0 : index
    %150 = vector.load %arg23[%c19_107, %c0_108] : memref<326x8xf32, #tpu.memory_space<vmem>>, vector<288x8xf32>
    tpu.vector_store %arg23[%c19_107, %c0_108], %147 {strides = array<i32>} : memref<326x8xf32, #tpu.memory_space<vmem>>, vector<288x8xf32>,
    %cst_109 = arith.constant 0.000000e+00 : f32
    %151 = vector.broadcast %cst_109 : f32 to vector<19x8xf32>
    %c307 = arith.constant 307 : index
    %c0_110 = arith.constant 0 : index
    %152 = vector.load %arg23[%c307, %c0_110] : memref<326x8xf32, #tpu.memory_space<vmem>>, vector<19x8xf32>
    tpu.vector_store %arg23[%c307, %c0_110], %151 {strides = array<i32>} : memref<326x8xf32, #tpu.memory_space<vmem>>, vector<19x8xf32>,
    %c0_111 = arith.constant 0 : index
    %c0_112 = arith.constant 0 : index
    %153 = vector.load %arg23[%c0_111, %c0_112] : memref<326x8xf32, #tpu.memory_space<vmem>>, vector<288x8xf32>
    %c0_113 = arith.constant 0 : index
    %c0_114 = arith.constant 0 : index
    %c0_115 = arith.constant 0 : index
    %154 = vector.load %arg17[%c0_113, %c0_114, %c0_115] : memref<9x8x8xf32, #tpu.memory_space<vmem>>, vector<1x8x8xf32>
    %155 = vector.shape_cast %154 : vector<1x8x8xf32> to vector<8x8xf32>
    %cst_116 = arith.constant dense<0.000000e+00> : vector<288x8xf32>
    %156 = tpu.matmul %153, %155, %cst_116 {dimension_numbers = #tpu.dot_dimension_numbers<[1], [0], [0], [1], [0, 0, 1, 1], [], []>} : vector<288x8xf32>, vector<8x8xf32>, vector<288x8xf32> -> vector<288x8xf32>
    %c1_117 = arith.constant 1 : index
    %c0_118 = arith.constant 0 : index
    %157 = vector.load %arg23[%c1_117, %c0_118] : memref<326x8xf32, #tpu.memory_space<vmem>>, vector<288x8xf32>
    %c1_119 = arith.constant 1 : index
    %c0_120 = arith.constant 0 : index
    %c0_121 = arith.constant 0 : index
    %158 = vector.load %arg17[%c1_119, %c0_120, %c0_121] : memref<9x8x8xf32, #tpu.memory_space<vmem>>, vector<1x8x8xf32>
    %159 = vector.shape_cast %158 : vector<1x8x8xf32> to vector<8x8xf32>
    %cst_122 = arith.constant dense<0.000000e+00> : vector<288x8xf32>
    %160 = tpu.matmul %157, %159, %cst_122 {dimension_numbers = #tpu.dot_dimension_numbers<[1], [0], [0], [1], [0, 0, 1, 1], [], []>} : vector<288x8xf32>, vector<8x8xf32>, vector<288x8xf32> -> vector<288x8xf32>
    %161 = arith.addf %156, %160 : vector<288x8xf32>
    %c2_123 = arith.constant 2 : index
    %c0_124 = arith.constant 0 : index
    %162 = vector.load %arg23[%c2_123, %c0_124] : memref<326x8xf32, #tpu.memory_space<vmem>>, vector<288x8xf32>
    %c2_125 = arith.constant 2 : index
    %c0_126 = arith.constant 0 : index
    %c0_127 = arith.constant 0 : index
    %163 = vector.load %arg17[%c2_125, %c0_126, %c0_127] : memref<9x8x8xf32, #tpu.memory_space<vmem>>, vector<1x8x8xf32>
    %164 = vector.shape_cast %163 : vector<1x8x8xf32> to vector<8x8xf32>
    %cst_128 = arith.constant dense<0.000000e+00> : vector<288x8xf32>
    %165 = tpu.matmul %162, %164, %cst_128 {dimension_numbers = #tpu.dot_dimension_numbers<[1], [0], [0], [1], [0, 0, 1, 1], [], []>} : vector<288x8xf32>, vector<8x8xf32>, vector<288x8xf32> -> vector<288x8xf32>
    %166 = arith.addf %161, %165 : vector<288x8xf32>
    %c18_129 = arith.constant 18 : index
    %c0_130 = arith.constant 0 : index
    %167 = vector.load %arg23[%c18_129, %c0_130] : memref<326x8xf32, #tpu.memory_space<vmem>>, vector<288x8xf32>
    %c3_131 = arith.constant 3 : index
    %c0_132 = arith.constant 0 : index
    %c0_133 = arith.constant 0 : index
    %168 = vector.load %arg17[%c3_131, %c0_132, %c0_133] : memref<9x8x8xf32, #tpu.memory_space<vmem>>, vector<1x8x8xf32>
    %169 = vector.shape_cast %168 : vector<1x8x8xf32> to vector<8x8xf32>
    %cst_134 = arith.constant dense<0.000000e+00> : vector<288x8xf32>
    %170 = tpu.matmul %167, %169, %cst_134 {dimension_numbers = #tpu.dot_dimension_numbers<[1], [0], [0], [1], [0, 0, 1, 1], [], []>} : vector<288x8xf32>, vector<8x8xf32>, vector<288x8xf32> -> vector<288x8xf32>
    %171 = arith.addf %166, %170 : vector<288x8xf32>
    %c19_135 = arith.constant 19 : index
    %c0_136 = arith.constant 0 : index
    %172 = vector.load %arg23[%c19_135, %c0_136] : memref<326x8xf32, #tpu.memory_space<vmem>>, vector<288x8xf32>
    %c4_137 = arith.constant 4 : index
    %c0_138 = arith.constant 0 : index
    %c0_139 = arith.constant 0 : index
    %173 = vector.load %arg17[%c4_137, %c0_138, %c0_139] : memref<9x8x8xf32, #tpu.memory_space<vmem>>, vector<1x8x8xf32>
    %174 = vector.shape_cast %173 : vector<1x8x8xf32> to vector<8x8xf32>
    %cst_140 = arith.constant dense<0.000000e+00> : vector<288x8xf32>
    %175 = tpu.matmul %172, %174, %cst_140 {dimension_numbers = #tpu.dot_dimension_numbers<[1], [0], [0], [1], [0, 0, 1, 1], [], []>} : vector<288x8xf32>, vector<8x8xf32>, vector<288x8xf32> -> vector<288x8xf32>
    %176 = arith.addf %171, %175 : vector<288x8xf32>
    %c20_141 = arith.constant 20 : index
    %c0_142 = arith.constant 0 : index
    %177 = vector.load %arg23[%c20_141, %c0_142] : memref<326x8xf32, #tpu.memory_space<vmem>>, vector<288x8xf32>
    %c5_143 = arith.constant 5 : index
    %c0_144 = arith.constant 0 : index
    %c0_145 = arith.constant 0 : index
    %178 = vector.load %arg17[%c5_143, %c0_144, %c0_145] : memref<9x8x8xf32, #tpu.memory_space<vmem>>, vector<1x8x8xf32>
    %179 = vector.shape_cast %178 : vector<1x8x8xf32> to vector<8x8xf32>
    %cst_146 = arith.constant dense<0.000000e+00> : vector<288x8xf32>
    %180 = tpu.matmul %177, %179, %cst_146 {dimension_numbers = #tpu.dot_dimension_numbers<[1], [0], [0], [1], [0, 0, 1, 1], [], []>} : vector<288x8xf32>, vector<8x8xf32>, vector<288x8xf32> -> vector<288x8xf32>
    %181 = arith.addf %176, %180 : vector<288x8xf32>
    %c36_147 = arith.constant 36 : index
    %c0_148 = arith.constant 0 : index
    %182 = vector.load %arg23[%c36_147, %c0_148] : memref<326x8xf32, #tpu.memory_space<vmem>>, vector<288x8xf32>
    %c6_149 = arith.constant 6 : index
    %c0_150 = arith.constant 0 : index
    %c0_151 = arith.constant 0 : index
    %183 = vector.load %arg17[%c6_149, %c0_150, %c0_151] : memref<9x8x8xf32, #tpu.memory_space<vmem>>, vector<1x8x8xf32>
    %184 = vector.shape_cast %183 : vector<1x8x8xf32> to vector<8x8xf32>
    %cst_152 = arith.constant dense<0.000000e+00> : vector<288x8xf32>
    %185 = tpu.matmul %182, %184, %cst_152 {dimension_numbers = #tpu.dot_dimension_numbers<[1], [0], [0], [1], [0, 0, 1, 1], [], []>} : vector<288x8xf32>, vector<8x8xf32>, vector<288x8xf32> -> vector<288x8xf32>
    %186 = arith.addf %181, %185 : vector<288x8xf32>
    %c37_153 = arith.constant 37 : index
    %c0_154 = arith.constant 0 : index
    %187 = vector.load %arg23[%c37_153, %c0_154] : memref<326x8xf32, #tpu.memory_space<vmem>>, vector<288x8xf32>
    %c7_155 = arith.constant 7 : index
    %c0_156 = arith.constant 0 : index
    %c0_157 = arith.constant 0 : index
    %188 = vector.load %arg17[%c7_155, %c0_156, %c0_157] : memref<9x8x8xf32, #tpu.memory_space<vmem>>, vector<1x8x8xf32>
    %189 = vector.shape_cast %188 : vector<1x8x8xf32> to vector<8x8xf32>
    %cst_158 = arith.constant dense<0.000000e+00> : vector<288x8xf32>
    %190 = tpu.matmul %187, %189, %cst_158 {dimension_numbers = #tpu.dot_dimension_numbers<[1], [0], [0], [1], [0, 0, 1, 1], [], []>} : vector<288x8xf32>, vector<8x8xf32>, vector<288x8xf32> -> vector<288x8xf32>
    %191 = arith.addf %186, %190 : vector<288x8xf32>
    %c38_159 = arith.constant 38 : index
    %c0_160 = arith.constant 0 : index
    %192 = vector.load %arg23[%c38_159, %c0_160] : memref<326x8xf32, #tpu.memory_space<vmem>>, vector<288x8xf32>
    %c8_161 = arith.constant 8 : index
    %c0_162 = arith.constant 0 : index
    %c0_163 = arith.constant 0 : index
    %193 = vector.load %arg17[%c8_161, %c0_162, %c0_163] : memref<9x8x8xf32, #tpu.memory_space<vmem>>, vector<1x8x8xf32>
    %194 = vector.shape_cast %193 : vector<1x8x8xf32> to vector<8x8xf32>
    %cst_164 = arith.constant dense<0.000000e+00> : vector<288x8xf32>
    %195 = tpu.matmul %192, %194, %cst_164 {dimension_numbers = #tpu.dot_dimension_numbers<[1], [0], [0], [1], [0, 0, 1, 1], [], []>} : vector<288x8xf32>, vector<8x8xf32>, vector<288x8xf32> -> vector<288x8xf32>
    %196 = arith.addf %191, %195 : vector<288x8xf32>
    %c0_165 = arith.constant 0 : index
    %c19_166 = arith.constant 19 : index
    %c0_167 = arith.constant 0 : index
    %197 = vector.load %arg1[%c0_165, %c19_166, %c0_167] : memref<1x324x4xf32, #tpu.memory_space<vmem>>, vector<1x288x4xf32>
    %198 = vector.shape_cast %197 : vector<1x288x4xf32> to vector<288x4xf32>
    %c0_168 = arith.constant 0 : index
    %c0_169 = arith.constant 0 : index
    %199 = vector.load %arg19[%c0_168, %c0_169] : memref<4x8xf32, #tpu.memory_space<vmem>>, vector<4x8xf32>
    %cst_170 = arith.constant dense<0.000000e+00> : vector<288x8xf32>
    %200 = tpu.matmul %198, %199, %cst_170 {dimension_numbers = #tpu.dot_dimension_numbers<[1], [0], [0], [1], [0, 0, 1, 1], [], []>} : vector<288x4xf32>, vector<4x8xf32>, vector<288x8xf32> -> vector<288x8xf32>
    %c0_171 = arith.constant 0 : index
    %c0_172 = arith.constant 0 : index
    %201 = vector.load %arg20[%c0_171, %c0_172] : memref<1x8xf32, #tpu.memory_space<vmem>>, vector<1x8xf32>
    %202 = vector.broadcast %201 : vector<1x8xf32> to vector<288x8xf32>
    %203 = arith.addf %200, %202 : vector<288x8xf32>
    %c0_173 = arith.constant 0 : index
    %c0_174 = arith.constant 0 : index
    %204 = vector.load %arg18[%c0_173, %c0_174] : memref<1x8xf32, #tpu.memory_space<vmem>>, vector<1x8xf32>
    %205 = vector.broadcast %204 : vector<1x8xf32> to vector<288x8xf32>
    %206 = arith.addf %196, %205 : vector<288x8xf32>
    %207 = arith.addf %206, %203 : vector<288x8xf32>
    %c0_175 = arith.constant 0 : index
    %c0_176 = arith.constant 0 : index
    %c0_177 = arith.constant 0 : index
    %208 = vector.load %arg21[%c0_175, %c0_176, %c0_177] : memref<1x288x8xf32, #tpu.memory_space<vmem>>, vector<1x288x8xf32>
    %209 = vector.shape_cast %208 : vector<1x288x8xf32> to vector<288x8xf32>
    %210 = vector.shape_cast %207 : vector<288x8xf32> to vector<1x288x8xf32>
    tpu.vector_store %arg21[%c0_175, %c0_176, %c0_177], %210 {strides = array<i32>} : memref<1x288x8xf32, #tpu.memory_space<vmem>>, vector<1x288x8xf32>,
    return
  }
  func.func @transform_0(%arg0: i32) -> (i32, i32, i32) {
    %c0_i32 = arith.constant 0 : i32
    %c0_i32_0 = arith.constant 0 : i32
    %c0_i32_1 = arith.constant 0 : i32
    return %arg0, %c0_i32, %c0_i32_0 : i32, i32, i32
  }
  func.func @transform_1(%arg0: i32) -> (i32, i32, i32) {
    %c0_i32 = arith.constant 0 : i32
    %c0_i32_0 = arith.constant 0 : i32
    %c0_i32_1 = arith.constant 0 : i32
    return %arg0, %c0_i32, %c0_i32_0 : i32, i32, i32
  }
  func.func @transform_2(%arg0: i32) -> (i32, i32) {
    %c0_i32 = arith.constant 0 : i32
    %c0_i32_0 = arith.constant 0 : i32
    %c0_i32_1 = arith.constant 0 : i32
    return %c0_i32, %c0_i32_0 : i32, i32
  }
  func.func @transform_3(%arg0: i32) -> (i32, i32) {
    %c0_i32 = arith.constant 0 : i32
    %c0_i32_0 = arith.constant 0 : i32
    %c0_i32_1 = arith.constant 0 : i32
    return %c0_i32, %c0_i32_0 : i32, i32
  }
  func.func @transform_4(%arg0: i32) -> (i32, i32) {
    %c0_i32 = arith.constant 0 : i32
    %c0_i32_0 = arith.constant 0 : i32
    %c0_i32_1 = arith.constant 0 : i32
    return %c0_i32, %c0_i32_0 : i32, i32
  }
  func.func @transform_5(%arg0: i32) -> (i32, i32) {
    %c0_i32 = arith.constant 0 : i32
    %c0_i32_0 = arith.constant 0 : i32
    %c0_i32_1 = arith.constant 0 : i32
    return %c0_i32, %c0_i32_0 : i32, i32
  }
  func.func @transform_6(%arg0: i32) -> (i32, i32) {
    %c0_i32 = arith.constant 0 : i32
    %c0_i32_0 = arith.constant 0 : i32
    %c0_i32_1 = arith.constant 0 : i32
    return %c0_i32, %c0_i32_0 : i32, i32
  }
  func.func @transform_7(%arg0: i32) -> (i32, i32) {
    %c0_i32 = arith.constant 0 : i32
    %c0_i32_0 = arith.constant 0 : i32
    %c0_i32_1 = arith.constant 0 : i32
    return %c0_i32, %c0_i32_0 : i32, i32
  }
  func.func @transform_8(%arg0: i32) -> (i32, i32, i32) {
    %c0_i32 = arith.constant 0 : i32
    %c0_i32_0 = arith.constant 0 : i32
    %c0_i32_1 = arith.constant 0 : i32
    %c0_i32_2 = arith.constant 0 : i32
    return %c0_i32, %c0_i32_0, %c0_i32_1 : i32, i32, i32
  }
  func.func @transform_9(%arg0: i32) -> (i32, i32) {
    %c0_i32 = arith.constant 0 : i32
    %c0_i32_0 = arith.constant 0 : i32
    %c0_i32_1 = arith.constant 0 : i32
    return %c0_i32, %c0_i32_0 : i32, i32
  }
  func.func @transform_10(%arg0: i32) -> (i32, i32) {
    %c0_i32 = arith.constant 0 : i32
    %c0_i32_0 = arith.constant 0 : i32
    %c0_i32_1 = arith.constant 0 : i32
    return %c0_i32, %c0_i32_0 : i32, i32
  }
  func.func @transform_11(%arg0: i32) -> (i32, i32) {
    %c0_i32 = arith.constant 0 : i32
    %c0_i32_0 = arith.constant 0 : i32
    %c0_i32_1 = arith.constant 0 : i32
    return %c0_i32, %c0_i32_0 : i32, i32
  }
  func.func @transform_12(%arg0: i32) -> (i32, i32) {
    %c0_i32 = arith.constant 0 : i32
    %c0_i32_0 = arith.constant 0 : i32
    %c0_i32_1 = arith.constant 0 : i32
    return %c0_i32, %c0_i32_0 : i32, i32
  }
  func.func @transform_13(%arg0: i32) -> (i32, i32) {
    %c0_i32 = arith.constant 0 : i32
    %c0_i32_0 = arith.constant 0 : i32
    %c0_i32_1 = arith.constant 0 : i32
    return %c0_i32, %c0_i32_0 : i32, i32
  }
  func.func @transform_14(%arg0: i32) -> (i32, i32) {
    %c0_i32 = arith.constant 0 : i32
    %c0_i32_0 = arith.constant 0 : i32
    %c0_i32_1 = arith.constant 0 : i32
    return %c0_i32, %c0_i32_0 : i32, i32
  }
  func.func @transform_15(%arg0: i32) -> (i32, i32) {
    %c0_i32 = arith.constant 0 : i32
    %c0_i32_0 = arith.constant 0 : i32
    %c0_i32_1 = arith.constant 0 : i32
    return %c0_i32, %c0_i32_0 : i32, i32
  }
  func.func @transform_16(%arg0: i32) -> (i32, i32, i32) {
    %c0_i32 = arith.constant 0 : i32
    %c0_i32_0 = arith.constant 0 : i32
    %c0_i32_1 = arith.constant 0 : i32
    %c0_i32_2 = arith.constant 0 : i32
    return %c0_i32, %c0_i32_0, %c0_i32_1 : i32, i32, i32
  }
  func.func @transform_17(%arg0: i32) -> (i32, i32) {
    %c0_i32 = arith.constant 0 : i32
    %c0_i32_0 = arith.constant 0 : i32
    %c0_i32_1 = arith.constant 0 : i32
    return %c0_i32, %c0_i32_0 : i32, i32
  }
  func.func @transform_18(%arg0: i32) -> (i32, i32) {
    %c0_i32 = arith.constant 0 : i32
    %c0_i32_0 = arith.constant 0 : i32
    %c0_i32_1 = arith.constant 0 : i32
    return %c0_i32, %c0_i32_0 : i32, i32
  }
  func.func @transform_19(%arg0: i32) -> (i32, i32) {
    %c0_i32 = arith.constant 0 : i32
    %c0_i32_0 = arith.constant 0 : i32
    %c0_i32_1 = arith.constant 0 : i32
    return %c0_i32, %c0_i32_0 : i32, i32
  }
  func.func @transform_20(%arg0: i32) -> (i32, i32, i32) {
    %c0_i32 = arith.constant 0 : i32
    %c0_i32_0 = arith.constant 0 : i32
    %c0_i32_1 = arith.constant 0 : i32
    return %arg0, %c0_i32, %c0_i32_0 : i32, i32, i32
  }
}

</mosaic_0001>

<bundles_post_ra>
// kernel: tpu_custom_call.1
= control target key start
LH: loop header
LB: loop body
LE: loop exit
PB: predicated region body
PF: predicated region fallthrough
CT: control target
= control target key end

     0   :  { %s18855_s0 = inlined_call_operand.vmem [shape: f32[2,324,4], index: 0, kind: input, shape index: {}]   ;;  %s18856_s1 = inlined_call_operand.vmem [shape: f32[2,1,32], index: 1, kind: input, shape index: {}]   ;;  %s18857_s2 = inlined_call_operand.vmem [shape: f32[324,1], index: 2, kind: input, shape index: {}]   ;;  %s18858_s3 = inlined_call_operand.vmem [shape: f32[288,1], index: 3, kind: input, shape index: {}]   ;;  %s18859_s4 = inlined_call_operand.vmem [shape: f32[1,4], index: 4, kind: input, shape index: {}]   ;;  %s18860_s5 = inlined_call_operand.vmem [shape: f32[1,4], index: 5, kind: input, shape index: {}]   ;;  %s18861_s6 = inlined_call_operand.vmem [shape: f32[4,4], index: 6, kind: input, shape index: {}]   ;;  %s18862_s7 = inlined_call_operand.vmem [shape: f32[4,4], index: 7, kind: input, shape index: {}]   ;;  %s18863_s8 = inlined_call_operand.vmem [shape: f32[9,4,8], index: 8, kind: input, shape index: {}]   ;;  %s18864_s9 = inlined_call_operand.vmem [shape: f32[1,8], index: 9, kind: input, shape index: {}]   ;;  %s18865_s10 = inlined_call_operand.vmem [shape: f32[32,8], index: 10, kind: input, shape index: {}]   ;;  %s18866_s11 = inlined_call_operand.vmem [shape: f32[1,8], index: 11, kind: input, shape index: {}]   ;;  %s18867_s12 = inlined_call_operand.vmem [shape: f32[1,8], index: 12, kind: input, shape index: {}]   ;;  %s18868_s13 = inlined_call_operand.vmem [shape: f32[1,8], index: 13, kind: input, shape index: {}]   ;;  %s18869_s14 = inlined_call_operand.vmem [shape: f32[8,4], index: 14, kind: input, shape index: {}]   ;;  %s18870_s15 = inlined_call_operand.vmem [shape: f32[4,8], index: 15, kind: input, shape index: {}]   ;;  %s18871_s16 = inlined_call_operand.vmem [shape: f32[9,8,8], index: 16, kind: input, shape index: {}]   ;;  %s18872_s17 = inlined_call_operand.vmem [shape: f32[1,8], index: 17, kind: input, shape index: {}]   ;;  %s18873_s18 = inlined_call_operand.vmem [shape: f32[4,8], index: 18, kind: input, shape index: {}]   ;;  %s18874_s19 = inlined_call_operand.vmem [shape: f32[1,8], index: 19, kind: input, shape index: {}]   ;;  %s18875_s20 = inlined_call_operand.vmem [shape: f32[2,288,8], index: 20, kind: output, shape index: {}]  }
   0x1   :  { %18957 = sst [smem:[#allocation52_spill]] %s18855_s0 }
   0x2   :  { %18958 = sst [smem:[#allocation53_spill]] %s18856_s1  ;;  %s15281_s1 = smov 0  }
   0x3   :  { %18959 = sst [smem:[#allocation54_spill]] %s18857_s2 }
   0x4   :  { %18960 = sst [smem:[#allocation55_spill]] %s18858_s3 }
   0x5   :  { %18961 = sst [smem:[#allocation56_spill]] %s18859_s4 }
   0x6 LB: > { %s11484_s22 = sadd.s32 4294967295, %s15170_s1   ;;  %p11488_p0 = scmp.ge.s32.totalorder %s15170_s1, 1  ;;  %s15170_s1 = sphi %s15281_s1, %s30_s1  }
   0x7   : > { %p570_p1 = scmp.lt.s32.totalorder %s15170_s1, 3 }
   0x9   : > { %p571_p2 = pnand %p11488_p0, %p570_p1 }
   0xb   : > { %574 = sbr.rel (%p571_p2) target bundleno = 2946 (0xb82), region = 100 }
  0x12   : > { %v979_v0 = vld [vmem:[%s18861_s6] sm:$0xf]  ;;  %vm983_vm0 = vcmask 1043456   ;;  %p631_p3 = scmp.lt.s32.totalorder %s11484_s22, 1  ;;  %v18878_v1 = vmov 0.0   ;;  %vm15173_vm1 = vmmov 0  }
  0x13   : > { %13025 = vmatprep.subr.mxu0 %v18878_v1  ;;  %13027 = vmatprep.mubr.msk.f32.mxu0 %vm15173_vm1, %v18878_v1  ;;  %s18962_s3 = sld [smem:[#allocation54_spill]]  ;;  %v15174_v4 = vmov 0   ;;  %vm762_vm2 = vcmask 31744   ;;  %s18963_s30 = sld [smem:[#allocation52_spill]]  ;;  %vm842_vm3 = vcmask 27648   ;;  %vm2000_vm4 = vcmask 25600  }
  0x14   : > { %13026 = vmatpush3.msk.msra.mxu0 %vm983_vm0, %v979_v0  ;;  %s19158_s22 = smov (!%p631_p3, %s11484_s22), 1  ;;  %13030 = vmatprep.subr.mxu1 %v18878_v1  ;;  %s18964_s26 = sld [smem:[#allocation55_spill]]  ;;  %vm2015_vm5 = vcmask 261120   ;;  %vm6185_vm6 = vcmask 64512   ;;  %vm7094_vm7 = vcmask 59392  }
  0x15   : > { %13031 = vmatpush3.msk.msra.mxu1 %vm983_vm0, %v979_v0  ;;  %13032 = vmatprep.mubr.msk.f32.mxu1 %vm15173_vm1, %v18878_v1  ;;  %s14832_s28 = smul.u32 328, %s19158_s22  ;;  %s18967_s23 = sld [smem:[#allocation56_spill]] }
  0x16   : > { %14846 = vset.pattern.permute.xlu0 %v15174_v4  ;;  %14847 = vset.pattern.permute.xlu1 %v15174_v4  ;;  %s19062_s29 = sld [smem:[#allocation53_spill]]  ;;  %s14833_s24 = smul.u32 288, %s19158_s22 }
  0x17   : > { %13035 = vmatprep.subr.mxu0 %v18878_v1  ;;  %13040 = vmatprep.subr.mxu1 %v18878_v1 }
  0x19   : > { %v685_v2 = vld [vmem:[%s18962_s3] sm:$0xff]  ;;  %v687_v3 = vld [vmem:[%s18962_s3 + $0x10] sm:$0xff]  ;;  %s15312_s0 = scalar_lea.vmem %s18963_s30, %s14832_s28  ;;  %v686_v5 = vld [vmem:[%s18962_s3 + $0x8] sm:$0xff] }
  0x1a   : > { %1715 = vperm.xlu0 %14846, %v685_v2   ;;  %1725 = vperm.xlu1 %14847, %v687_v3   ;;  %v688_v6 = vld [vmem:[%s18962_s3 + $0x18] sm:$0xff]  ;;  %v15323_v7 = vld [vmem:[%s15312_s0] sm:$0xff]  ;;  %v15326_v8 = vld [vmem:[%s15312_s0 + $0x8] sm:$0xff] }
  0x1b   : > { %v15329_v9 = vld [vmem:[%s15312_s0 + $0x10] sm:$0xff]  ;;  %v15332_v10 = vld [vmem:[%s15312_s0 + $0x18] sm:$0xff]  ;;  %v763_v11 = vsel %vm762_vm2, %v15323_v7, 0.0  ;;  %v764_v12 = vsel %vm762_vm2, %v15326_v8, 0.0  ;;  %v15341_v14 = vld [vmem:[%s15312_s0 + $0x20] sm:$0xff]  ;;  %v851_v47 = vmul.f32 %v15323_v7, %v15323_v7  ;;  %v852_v48 = vmul.f32 %v15326_v8, %v15326_v8 }
  0x1c   : > { %v766_v13 = vsel %vm762_vm2, %v15329_v9, 0.0  ;;  %v765_v15 = vadd.f32 %v764_v12, %v763_v11  ;;  %v768_v16 = vsel %vm762_vm2, %v15332_v10, 0.0  ;;  %v689_v17 = vld [vmem:[%s18962_s3 + $0x20] sm:$0xff]  ;;  %v690_v18 = vld [vmem:[%s18962_s3 + $0x28] sm:$0xff]  ;;  %v770_v21 = vsel %vm762_vm2, %v15341_v14, 0.0  ;;  %v15357_v22 = vld [vmem:[%s15312_s0 + $0x30] sm:$0xff]  ;;  %s638_s30 = scalar_lea.vmem %s19062_s29, %s19158_s22 }
  0x1d   : > { %v15352_v19 = vld [vmem:[%s15312_s0 + $0x28] sm:$0xff]  ;;  %v691_v25 = vld [vmem:[%s18962_s3 + $0x30] sm:$0xff]  ;;  %v15365_v26 = vld [vmem:[%s15312_s0 + $0x38] sm:$0xff]  ;;  %v774_v28 = vsel %vm762_vm2, %v15357_v22, 0.0  ;;  %v853_v50 = vmul.f32 %v15329_v9, %v15329_v9  ;;  %v854_v53 = vmul.f32 %v15332_v10, %v15332_v10  ;;  %v855_v57 = vmul.f32 %v15341_v14, %v15341_v14 }
  0x1e   : > { %1720 = vperm.xlu0 %14846, %v686_v5   ;;  %1730 = vperm.xlu1 %14847, %v688_v6   ;;  %v767_v20 = vadd.f32 %v766_v13, %v765_v15  ;;  %v772_v24 = vsel %vm762_vm2, %v15352_v19, 0.0  ;;  %v15370_v29 = vld [vmem:[%s15312_s0 + $0x40] sm:$0xff]  ;;  %v776_v31 = vsel %vm762_vm2, %v15365_v26, 0.0  ;;  %v15378_v33 = vld [vmem:[%s15312_s0 + $0x48] sm:$0xff]  ;;  %v15383_v36 = vld [vmem:[%s15312_s0 + $0x50] sm:$0xff]  ;;  %v892_v58 = vsel %vm762_vm2, %v851_v47, 0.0 }
  0x1f   : > { %v693_v32 = vld [vmem:[%s18962_s3 + $0x40] sm:$0xff]  ;;  %v778_v35 = vsel %vm762_vm2, %v15370_v29, 0.0  ;;  %v780_v38 = vsel %vm762_vm2, %v15378_v33, 0.0  ;;  %v15388_v39 = vld [vmem:[%s15312_s0 + $0x58] sm:$0xff]  ;;  %v782_v41 = vsel %vm762_vm2, %v15383_v36, 0.0  ;;  %v15398_v45 = vld [vmem:[%s15312_s0 + $0x68] sm:$0xff]  ;;  %v856_v2 = vmul.f32 %v15352_v19, %v15352_v19 }
  0x20   : > { %v769_v23 = vadd.f32 %v768_v16, %v767_v20  ;;  %v15393_v42 = vld [vmem:[%s15312_s0 + $0x60] sm:$0xff]  ;;  %v784_v44 = vsel %vm762_vm2, %v15388_v39, 0.0  ;;  %v15409_v51 = vld [vmem:[%s15312_s0 + $0x70] sm:$0xff]  ;;  %v788_v54 = vsel %vm762_vm2, %v15398_v45, 0.0  ;;  %v15416_v55 = vld [vmem:[%s15312_s0 + $0x78] sm:$0xff]  ;;  %v893_v59 = vsel %vm762_vm2, %v852_v48, 0.0 }
  0x21   : > { %v786_v49 = vsel %vm762_vm2, %v15393_v42, 0.0  ;;  %v790_v60 = vsel %vm762_vm2, %v15409_v51, 0.0  ;;  %v894_v61 = vadd.f32 %v893_v59, %v892_v58  ;;  %v895_v62 = vsel %vm762_vm2, %v853_v50, 0.0  ;;  %v15426_v63 = vld [vmem:[%s15312_s0 + $0x80] sm:$0xff]  ;;  %v15434_v6 = vld [vmem:[%s15312_s0 + $0x88] sm:$0xff]  ;;  %v15474_v50 = vld [vmem:[%s15312_s0 + $0xb0] sm:$0xff] }
  0x22   : > { %1735 = vperm.xlu0 %14846, %v689_v17   ;;  %1740 = vperm.xlu1 %14847, %v690_v18   ;;  %v771_v27 = vadd.f32 %v770_v21, %v769_v23  ;;  %v897_v3 = vsel %vm762_vm2, %v854_v53, 0.0  ;;  %v792_v4 = vsel %vm762_vm2, %v15416_v55, 0.0  ;;  %v857_v12 = vmul.f32 %v15357_v22, %v15357_v22  ;;  %v15442_v17 = vld [vmem:[%s15312_s0 + $0x90] sm:$0xff]  ;;  %v15482_v58 = vld [vmem:[%s15312_s0 + $0xb8] sm:$0xff] }
  0x23   : > { %v896_v5 = vadd.f32 %v895_v62, %v894_v61  ;;  %v899_v13 = vsel %vm762_vm2, %v855_v57, 0.0  ;;  %v794_v15 = vsel %vm762_vm2, %v15426_v63, 0.0  ;;  %v858_v20 = vmul.f32 %v15365_v26, %v15365_v26 }
  0x24   : > { %v773_v30 = vadd.f32 %v772_v24, %v771_v27  ;;  %v901_v21 = vsel %vm762_vm2, %v856_v2, 0.0  ;;  %v796_v23 = vsel %vm762_vm2, %v15434_v6, 0.0  ;;  %v862_v53 = vmul.f32 %v15388_v39, %v15388_v39  ;;  %v15490_v2 = vld [vmem:[%s15312_s0 + $0xc0] sm:$0xff] }
  0x25   : > { %v898_v16 = vadd.f32 %v897_v3, %v896_v5  ;;  %v806_v62 = vsel %vm762_vm2, %v15474_v50, 0.0 }
  0x26   : > { %1745 = vperm.xlu0 %14846, %v691_v25   ;;  %v775_v34 = vadd.f32 %v774_v28, %v773_v30  ;;  %v15450_v25 = vld [vmem:[%s15312_s0 + $0x98] sm:$0xff]  ;;  %v859_v28 = vmul.f32 %v15370_v29, %v15370_v29  ;;  %v903_v30 = vsel %vm762_vm2, %v857_v12, 0.0  ;;  %v913_v5 = vsel %vm762_vm2, %v862_v53, 0.0  ;;  %v15530_v53 = vld [vmem:[%s15312_s0 + $0xe8] sm:$0xff] }
  0x27   : > { %v900_v24 = vadd.f32 %v899_v13, %v898_v16  ;;  %v15498_v13 = vld [vmem:[%s15312_s0 + $0xc8] sm:$0xff]  ;;  %v865_v16 = vmul.f32 %v15409_v51, %v15409_v51 }
  0x28   : > { %v777_v37 = vadd.f32 %v776_v31, %v775_v34  ;;  %v798_v31 = vsel %vm762_vm2, %v15442_v17, 0.0  ;;  %v15458_v34 = vld [vmem:[%s15312_s0 + $0xa0] sm:$0xff]  ;;  %v907_v47 = vsel %vm762_vm2, %v859_v28, 0.0 }
  0x29   : > { %v802_v48 = vsel %vm762_vm2, %v15458_v34, 0.0 }
  0x2a   : > { %1755 = vperm.xlu0 %14846, %v693_v32   ;;  %v779_v40 = vadd.f32 %v778_v35, %v777_v37  ;;  %v902_v32 = vadd.f32 %v901_v21, %v900_v24  ;;  %v860_v37 = vmul.f32 %v15378_v33, %v15378_v33 }
  0x2c   : > { %v781_v43 = vadd.f32 %v780_v38, %v779_v40  ;;  %v905_v38 = vsel %vm762_vm2, %v858_v20, 0.0  ;;  %v800_v40 = vsel %vm762_vm2, %v15450_v25, 0.0  ;;  %v810_v20 = vsel %vm762_vm2, %v15490_v2, 0.0 }
  0x2e   : > { %v783_v46 = vadd.f32 %v782_v41, %v781_v43  ;;  %v904_v41 = vadd.f32 %v903_v30, %v902_v32  ;;  %v15466_v43 = vld [vmem:[%s15312_s0 + $0xa8] sm:$0xff]  ;;  %v812_v30 = vsel %vm762_vm2, %v15498_v13, 0.0  ;;  %v15514_v32 = vld [vmem:[%s15312_s0 + $0xd8] sm:$0xff] }
  0x30   : > { %v785_v52 = vadd.f32 %v784_v44, %v783_v46  ;;  %v861_v46 = vmul.f32 %v15383_v36, %v15383_v36 }
  0x32   : > { %v787_v56 = vadd.f32 %v786_v49, %v785_v52  ;;  %v906_v49 = vadd.f32 %v905_v38, %v904_v41  ;;  %v911_v61 = vsel %vm762_vm2, %v861_v46, 0.0  ;;  %v919_v38 = vsel %vm762_vm2, %v865_v16, 0.0 }
  0x34   : > { %v789_v0 = vadd.f32 %v788_v54, %v787_v56  ;;  %v909_v54 = vsel %vm762_vm2, %v860_v37, 0.0  ;;  %v804_v56 = vsel %vm762_vm2, %v15466_v43, 0.0  ;;  %v908_v57 = vadd.f32 %v907_v47, %v906_v49 }
  0x35   : > { %v867_v37 = vmul.f32 %v15426_v63, %v15426_v63  ;;  %v868_v47 = vmul.f32 %v15434_v6, %v15434_v6  ;;  %v816_v49 = vsel %vm762_vm2, %v15514_v32, 0.0 }
  0x36   : > { %v791_v11 = vadd.f32 %v790_v60, %v789_v0  ;;  %v863_v60 = vmul.f32 %v15393_v42, %v15393_v42  ;;  %v910_v0 = vadd.f32 %v909_v54, %v908_v57 }
  0x37   : > { %v923_v57 = vsel %vm762_vm2, %v867_v37, 0.0 }
  0x38   : > { %v793_v18 = vadd.f32 %v792_v4, %v791_v11  ;;  %v864_v4 = vmul.f32 %v15398_v45, %v15398_v45  ;;  %v808_v11 = vsel %vm762_vm2, %v15482_v58, 0.0  ;;  %v912_v12 = vadd.f32 %v911_v61, %v910_v0  ;;  %v15538_v61 = vld [vmem:[%s15312_s0 + $0xf0] sm:$0xff] }
  0x39   : > { %v870_v0 = vmul.f32 %v15450_v25, %v15450_v25 }
  0x3a   : > { %v795_v27 = vadd.f32 %v794_v15, %v793_v18  ;;  %v915_v18 = vsel %vm762_vm2, %v863_v60, 0.0  ;;  %v914_v21 = vadd.f32 %v913_v5, %v912_v12  ;;  %v917_v28 = vsel %vm762_vm2, %v864_v4, 0.0 }
  0x3b   : > { %v820_v4 = vsel %vm762_vm2, %v15530_v53, 0.0 }
  0x3c   : > { %v797_v35 = vadd.f32 %v796_v23, %v795_v27  ;;  %v15506_v23 = vld [vmem:[%s15312_s0 + $0xd0] sm:$0xff]  ;;  %v866_v27 = vmul.f32 %v15416_v55, %v15416_v55 }
  0x3e   : > { %v799_v44 = vadd.f32 %v798_v31, %v797_v35  ;;  %v916_v31 = vadd.f32 %v915_v18, %v914_v21  ;;  %v822_v18 = vsel %vm762_vm2, %v15538_v61, 0.0  ;;  %v15554_v21 = vld [vmem:[%s15312_s0 + $0x100] sm:$0xff] }
  0x40   : > { %v801_v52 = vadd.f32 %v800_v40, %v799_v44  ;;  %v814_v40 = vsel %vm762_vm2, %v15506_v23, 0.0  ;;  %v918_v41 = vadd.f32 %v917_v28, %v916_v31  ;;  %v15522_v44 = vld [vmem:[%s15312_s0 + $0xe0] sm:$0xff]  ;;  %v929_v28 = vsel %vm762_vm2, %v870_v0, 0.0 }
  0x42   : > { %v803_v59 = vadd.f32 %v802_v48, %v801_v52  ;;  %v921_v48 = vsel %vm762_vm2, %v866_v27, 0.0  ;;  %v920_v52 = vadd.f32 %v919_v38, %v918_v41  ;;  %v872_v27 = vmul.f32 %v15466_v43, %v15466_v43 }
  0x43   : > { %v873_v38 = vmul.f32 %v15474_v50, %v15474_v50  ;;  %v826_v41 = vsel %vm762_vm2, %v15554_v21, 0.0 }
  0x44   : > { %v805_v3 = vadd.f32 %v804_v56, %v803_v59  ;;  %v869_v56 = vmul.f32 %v15442_v17, %v15442_v17  ;;  %v818_v59 = vsel %vm762_vm2, %v15522_v44, 0.0  ;;  %v922_v60 = vadd.f32 %v921_v48, %v920_v52 }
  0x45   : > { %v933_v52 = vsel %vm762_vm2, %v872_v27, 0.0  ;;  %v877_v27 = vmul.f32 %v15506_v23, %v15506_v23 }
  0x46   : > { %v807_v15 = vadd.f32 %v806_v62, %v805_v3  ;;  %v925_v3 = vsel %vm762_vm2, %v868_v47, 0.0  ;;  %v924_v5 = vadd.f32 %v923_v57, %v922_v60  ;;  %v927_v16 = vsel %vm762_vm2, %v869_v56, 0.0  ;;  %v15570_v47 = vld [vmem:[%s15312_s0 + $0x110] sm:$0xff]  ;;  %v15578_v57 = vld [vmem:[%s15312_s0 + $0x118] sm:$0xff] }
  0x47   : > { %v875_v60 = vmul.f32 %v15490_v2, %v15490_v2  ;;  %v830_v0 = vsel %vm762_vm2, %v15570_v47, 0.0 }
  0x48   : > { %v809_v24 = vadd.f32 %v808_v11, %v807_v15  ;;  %v15546_v11 = vld [vmem:[%s15312_s0 + $0xf8] sm:$0xff]  ;;  %v871_v15 = vmul.f32 %v15458_v34, %v15458_v34 }
  0x4a   : > { %v811_v35 = vadd.f32 %v810_v20, %v809_v24  ;;  %v926_v20 = vadd.f32 %v925_v3, %v924_v5 }
  0x4c   : > { %v813_v46 = vadd.f32 %v812_v30, %v811_v35  ;;  %v824_v30 = vsel %vm762_vm2, %v15546_v11, 0.0  ;;  %v928_v31 = vadd.f32 %v927_v16, %v926_v20  ;;  %v15562_v35 = vld [vmem:[%s15312_s0 + $0x108] sm:$0xff]  ;;  %v832_v16 = vsel %vm762_vm2, %v15578_v57, 0.0 }
  0x4d   : > { %v15594_v20 = vld [vmem:[%s15312_s0 + $0x128] sm:$0xff] }
  0x4e   : > { %v815_v54 = vadd.f32 %v814_v40, %v813_v46  ;;  %v931_v40 = vsel %vm762_vm2, %v871_v15, 0.0  ;;  %v930_v46 = vadd.f32 %v929_v28, %v928_v31  ;;  %v939_v28 = vsel %vm762_vm2, %v875_v60, 0.0 }
  0x50   : > { %v817_v62 = vadd.f32 %v816_v49, %v815_v54  ;;  %v874_v49 = vmul.f32 %v15482_v58, %v15482_v58  ;;  %v828_v54 = vsel %vm762_vm2, %v15562_v35, 0.0  ;;  %v932_v56 = vadd.f32 %v931_v40, %v930_v46 }
  0x51   : > { %v878_v40 = vmul.f32 %v15514_v32, %v15514_v32  ;;  %v836_v46 = vsel %vm762_vm2, %v15594_v20, 0.0 }
  0x52   : > { %v819_v12 = vadd.f32 %v818_v59, %v817_v62  ;;  %v935_v62 = vsel %vm762_vm2, %v873_v38, 0.0  ;;  %v934_v3 = vadd.f32 %v933_v52, %v932_v56  ;;  %v937_v15 = vsel %vm762_vm2, %v874_v49, 0.0  ;;  %v15610_v49 = vld [vmem:[%s15312_s0 + $0x138] sm:$0xff] }
  0x53   : > { %v943_v56 = vsel %vm762_vm2, %v877_v27, 0.0 }
  0x54   : > { %v821_v24 = vadd.f32 %v820_v4, %v819_v12  ;;  %v15586_v4 = vld [vmem:[%s15312_s0 + $0x120] sm:$0xff]  ;;  %v876_v12 = vmul.f32 %v15498_v13, %v15498_v13 }
  0x56   : > { %v823_v37 = vadd.f32 %v822_v18, %v821_v24  ;;  %v936_v18 = vadd.f32 %v935_v62, %v934_v3  ;;  %v15618_v62 = vld [vmem:[%s15312_s0 + $0x140] sm:$0xf]  ;;  %v880_v3 = vmul.f32 %v15530_v53, %v15530_v53 }
  0x57   : > { %v843_v27 = vsel %vm842_vm3, %v15618_v62, 0.0 }
  0x58   : > { %v825_v48 = vadd.f32 %v824_v30, %v823_v37  ;;  %v834_v30 = vsel %vm762_vm2, %v15586_v4, 0.0  ;;  %v938_v31 = vadd.f32 %v937_v15, %v936_v18  ;;  %v15602_v37 = vld [vmem:[%s15312_s0 + $0x130] sm:$0xff]  ;;  %v881_v18 = vmul.f32 %v15538_v61, %v15538_v61 }
  0x5a   : > { %v827_v59 = vadd.f32 %v826_v41, %v825_v48  ;;  %v941_v41 = vsel %vm762_vm2, %v876_v12, 0.0  ;;  %v940_v48 = vadd.f32 %v939_v28, %v938_v31  ;;  %v840_v12 = vsel %vm762_vm2, %v15610_v49, 0.0 }
  0x5b   : > { %v882_v31 = vmul.f32 %v15546_v11, %v15546_v11 }
  0x5c   : > { %v829_v5 = vadd.f32 %v828_v54, %v827_v59  ;;  %v879_v54 = vmul.f32 %v15522_v44, %v15522_v44  ;;  %v838_v59 = vsel %vm762_vm2, %v15602_v37, 0.0  ;;  %v942_v60 = vadd.f32 %v941_v41, %v940_v48 }
  0x5d   : > { %v951_v48 = vsel %vm762_vm2, %v881_v18, 0.0 }
  0x5e   : > { %v831_v24 = vadd.f32 %v830_v0, %v829_v5  ;;  %v945_v5 = vsel %vm762_vm2, %v878_v40, 0.0  ;;  %v944_v15 = vadd.f32 %v943_v56, %v942_v60 }
  0x60   : > { %v833_v38 = vadd.f32 %v832_v16, %v831_v24  ;;  %v947_v24 = vsel %vm762_vm2, %v879_v54, 0.0  ;;  %v946_v28 = vadd.f32 %v945_v5, %v944_v15  ;;  %v884_v54 = vmul.f32 %v15562_v35, %v15562_v35 }
  0x61   : > { %v885_v5 = vmul.f32 %v15570_v47, %v15570_v47 }
  0x62   : > { %v835_v52 = vadd.f32 %v834_v30, %v833_v38  ;;  %v949_v38 = vsel %vm762_vm2, %v880_v3, 0.0  ;;  %v948_v40 = vadd.f32 %v947_v24, %v946_v28  ;;  %v957_v18 = vsel %vm762_vm2, %v884_v54, 0.0 }
  0x63   : > { %v887_v28 = vmul.f32 %v15586_v4, %v15586_v4 }
  0x64   : > { %v837_v0 = vadd.f32 %v836_v46, %v835_v52  ;;  %v883_v46 = vmul.f32 %v15554_v21, %v15554_v21  ;;  %v950_v52 = vadd.f32 %v949_v38, %v948_v40  ;;  %v888_v40 = vmul.f32 %v15594_v20, %v15594_v20 }
  0x66   : > { %v839_v16 = vadd.f32 %v838_v59, %v837_v0  ;;  %v953_v59 = vsel %vm762_vm2, %v882_v31, 0.0  ;;  %v952_v60 = vadd.f32 %v951_v48, %v950_v52  ;;  %v955_v3 = vsel %vm762_vm2, %v883_v46, 0.0 }
  0x67   : > { %v889_v52 = vmul.f32 %v15602_v37, %v15602_v37 }
  0x68   : > { %v841_v30 = vadd.f32 %v840_v12, %v839_v16  ;;  %v954_v12 = vadd.f32 %v953_v59, %v952_v60  ;;  %v886_v16 = vmul.f32 %v15578_v57, %v15578_v57  ;;  %v890_v59 = vmul.f32 %v15610_v49, %v15610_v49 }
  0x69   : > { %v965_v60 = vsel %vm762_vm2, %v888_v40, 0.0 }
  0x6a   : > { %v844_v41 = vadd.f32 %v843_v27, %v841_v30  ;;  %v956_v24 = vadd.f32 %v955_v3, %v954_v12  ;;  %v959_v30 = vsel %vm762_vm2, %v885_v5, 0.0  ;;  %v891_v5 = vmul.f32 %v15618_v62, %v15618_v62 }
  0x6b   : > { %v967_v3 = vsel %vm762_vm2, %v889_v52, 0.0  ;;  %v695_v52 = vld [vmem:[%s18962_s3 + $0x50] sm:$0xff] }
  0x6c   : > { %v845_v56 = vrot.slane %v844_v41, 4  ;;  %v958_v31 = vadd.f32 %v957_v18, %v956_v24  ;;  %v971_v18 = vsel %vm842_vm3, %v891_v5, 0.0  ;;  %1765 = vperm.xlu0 %14846, %v695_v52   ;;  %v701_v5 = vld [vmem:[%s18962_s3 + $0x80] sm:$0xff] }
  0x6d   : > { %v717_v52 = vld [vmem:[%s18962_s3 + $0x100] sm:$0xff] }
  0x6e   : > { %v846_v0 = vadd.f32 %v845_v56, %v844_v41  ;;  %v961_v41 = vsel %vm762_vm2, %v886_v16, 0.0  ;;  %v960_v46 = vadd.f32 %v959_v30, %v958_v31  ;;  %v963_v56 = vsel %vm762_vm2, %v887_v28, 0.0 }
  0x70   : > { %v847_v15 = vrot.slane %v846_v0, 2  ;;  %v962_v54 = vadd.f32 %v961_v41, %v960_v46  ;;  %v1135_v46 = vld [vmem:[%s18862_s7] sm:$0xf] }
  0x72   : > { %v848_v27 = vadd.f32 %v847_v15, %v846_v0  ;;  %v964_v0 = vadd.f32 %v963_v56, %v962_v54  ;;  %v969_v15 = vsel %vm762_vm2, %v890_v59, 0.0  ;;  %v694_v56 = vld [vmem:[%s18962_s3 + $0x48] sm:$0xff]  ;;  %v697_v54 = vld [vmem:[%s18962_s3 + $0x60] sm:$0xff]  ;;  %v696_v59 = vld [vmem:[%s18962_s3 + $0x58] sm:$0xff] }
  0x73   : > { %1775 = vperm.xlu0 %14846, %v697_v54   ;;  %v719_v54 = vld [vmem:[%s18962_s3 + $0x110] sm:$0xff] }
  0x74   : > { %v849_v38 = vrot.slane %v848_v27, 1  ;;  %v966_v12 = vadd.f32 %v965_v60, %v964_v0  ;;  %v699_v60 = vld [vmem:[%s18962_s3 + $0x70] sm:$0xff]  ;;  %v698_v0 = vld [vmem:[%s18962_s3 + $0x68] sm:$0xff] }
  0x76   : > { %v850_v48 = vadd.f32 %v849_v38, %v848_v27  ;;  %v968_v16 = vadd.f32 %v967_v3, %v966_v12  ;;  %v700_v3 = vld [vmem:[%s18962_s3 + $0x78] sm:$0xff]  ;;  %v703_v12 = vld [vmem:[%s18962_s3 + $0x90] sm:$0xff] }
  0x77   : > { %1785 = vperm.xlu0 %14846, %v699_v60   ;;  %v721_v60 = vld [vmem:[%s18962_s3 + $0x120] sm:$0xff] }
  0x78   : > { %13028 = vmatmul.mubr.msk.f32.vlgmr.msra.gmra.mrb[0].mxu0 %vm762_vm2, %v850_v48  ;;  %v970_v24 = vadd.f32 %v969_v15, %v968_v16  ;;  %v692_v48 = vld [vmem:[%s18962_s3 + $0x38] sm:$0xff]  ;;  %v702_v15 = vld [vmem:[%s18962_s3 + $0x88] sm:$0xff]  ;;  %v705_v16 = vld [vmem:[%s18962_s3 + $0xa0] sm:$0xff] }
  0x79   : > { %13037 = vmatprep.mubr.msk.f32.mxu0 %vm15173_vm1, %v18878_v1  ;;  %13036 = vmatpush3.msk.msra.mxu0 %vm983_vm0, %v1135_v46 }
  0x7a   : > { %v972_v27 = vadd.f32 %v971_v18, %v970_v24  ;;  %1750 = vperm.xlu1 %14847, %v692_v48   ;;  %v704_v18 = vld [vmem:[%s18962_s3 + $0x98] sm:$0xff]  ;;  %v707_v24 = vld [vmem:[%s18962_s3 + $0xb0] sm:$0xff]  ;;  %v714_v48 = vld [vmem:[%s18962_s3 + $0xe8] sm:$0xff] }
  0x7b   : > { %1795 = vperm.xlu0 %14846, %v701_v5   ;;  %v723_v5 = vld [vmem:[%s18962_s3 + $0x130] sm:$0xff] }
  0x7c   : > { %v973_v28 = vrot.slane %v972_v27, 4 }
  0x7e   : > { %v974_v30 = vadd.f32 %v973_v28, %v972_v27  ;;  %1760 = vperm.xlu1 %14847, %v694_v56   ;;  %v706_v27 = vld [vmem:[%s18962_s3 + $0xa8] sm:$0xff]  ;;  %v709_v28 = vld [vmem:[%s18962_s3 + $0xc0] sm:$0xff]  ;;  %v716_v56 = vld [vmem:[%s18962_s3 + $0xf8] sm:$0xff] }
  0x7f   : > { %1805 = vperm.xlu0 %14846, %v703_v12   ;;  %v725_v12 = vld [vmem:[%s18962_s3 + $0x140] sm:$0xf] }
  0x80   : > { %v975_v31 = vrot.slane %v974_v30, 2 }
  0x82   : > { %v976_v38 = vadd.f32 %v975_v31, %v974_v30  ;;  %1770 = vperm.xlu1 %14847, %v696_v59   ;;  %v708_v30 = vld [vmem:[%s18962_s3 + $0xb8] sm:$0xff]  ;;  %v711_v31 = vld [vmem:[%s18962_s3 + $0xd0] sm:$0xff]  ;;  %v718_v59 = vld [vmem:[%s18962_s3 + $0x108] sm:$0xff] }
  0x83   : > { %1815 = vperm.xlu0 %14846, %v705_v16   ;;  %v727_v16 = vld [vmem:[%s18964_s26 + $0x8] sm:$0xff] }
  0x84   : > { %v977_v40 = vrot.slane %v976_v38, 1 }
  0x86   : > { %v978_v41 = vadd.f32 %v977_v40, %v976_v38  ;;  %1780 = vperm.xlu1 %14847, %v698_v0   ;;  %v710_v38 = vld [vmem:[%s18962_s3 + $0xc8] sm:$0xff]  ;;  %v713_v40 = vld [vmem:[%s18962_s3 + $0xe0] sm:$0xff]  ;;  %v720_v0 = vld [vmem:[%s18962_s3 + $0x118] sm:$0xff] }
  0x87   : > { %1825 = vperm.xlu0 %14846, %v707_v24   ;;  %v729_v24 = vld [vmem:[%s18964_s26 + $0x18] sm:$0xff] }
  0x88   : > { %13033 = vmatmul.mubr.msk.f32.vlgmr.msra.gmra.mrb[0].mxu1 %vm762_vm2, %v978_v41  ;;  %v712_v41 = vld [vmem:[%s18962_s3 + $0xd8] sm:$0xff] }
  0x89   : > { %13042 = vmatprep.mubr.msk.f32.mxu1 %vm15173_vm1, %v18878_v1  ;;  %13041 = vmatpush3.msk.msra.mxu1 %vm983_vm0, %v1135_v46  ;;  %v715_v46 = vld [vmem:[%s18962_s3 + $0xf0] sm:$0xff] }
  0x8a   : > { %1790 = vperm.xlu1 %14847, %v700_v3   ;;  %v722_v3 = vld [vmem:[%s18962_s3 + $0x128] sm:$0xff] }
  0x8b   : > { %1835 = vperm.xlu0 %14846, %v709_v28   ;;  %v731_v28 = vld [vmem:[%s18964_s26 + $0x28] sm:$0xff] }
  0x8e   : > { %1800 = vperm.xlu1 %14847, %v702_v15   ;;  %v724_v15 = vld [vmem:[%s18962_s3 + $0x138] sm:$0xff] }
  0x8f   : > { %1845 = vperm.xlu0 %14846, %v711_v31   ;;  %v733_v31 = vld [vmem:[%s18964_s26 + $0x38] sm:$0xff] }
  0x92   : > { %1810 = vperm.xlu1 %14847, %v704_v18   ;;  %v726_v18 = vld [vmem:[%s18964_s26] sm:$0xff] }
  0x93   : > { %1855 = vperm.xlu0 %14846, %v713_v40   ;;  %v735_v40 = vld [vmem:[%s18964_s26 + $0x48] sm:$0xff] }
  0x96   : > { %1820 = vperm.xlu1 %14847, %v706_v27   ;;  %v728_v27 = vld [vmem:[%s18964_s26 + $0x10] sm:$0xff] }
  0x97   : > { %1865 = vperm.xlu0 %14846, %v715_v46   ;;  %v737_v46 = vld [vmem:[%s18964_s26 + $0x58] sm:$0xff] }
  0x9a   : > { %1830 = vperm.xlu1 %14847, %v708_v30   ;;  %v730_v30 = vld [vmem:[%s18964_s26 + $0x20] sm:$0xff] }
  0x9b   : > { %1875 = vperm.xlu0 %14846, %v717_v52   ;;  %v739_v52 = vld [vmem:[%s18964_s26 + $0x68] sm:$0xff] }
  0x9e   : > { %1840 = vperm.xlu1 %14847, %v710_v38   ;;  %v732_v38 = vld [vmem:[%s18964_s26 + $0x30] sm:$0xff] }
  0x9f   : > { %1885 = vperm.xlu0 %14846, %v719_v54   ;;  %v741_v54 = vld [vmem:[%s18964_s26 + $0x78] sm:$0xff] }
  0xa2   : > { %1850 = vperm.xlu1 %14847, %v712_v41   ;;  %v734_v41 = vld [vmem:[%s18964_s26 + $0x40] sm:$0xff] }
  0xa3   : > { %1895 = vperm.xlu0 %14846, %v721_v60   ;;  %v743_v60 = vld [vmem:[%s18964_s26 + $0x88] sm:$0xff] }
  0xa6   : > { %1860 = vperm.xlu1 %14847, %v714_v48   ;;  %v736_v48 = vld [vmem:[%s18964_s26 + $0x50] sm:$0xff] }
  0xa7   : > { %1905 = vperm.xlu0 %14846, %v723_v5   ;;  %v745_v5 = vld [vmem:[%s18964_s26 + $0x98] sm:$0xff] }
  0xaa   : > { %1870 = vperm.xlu1 %14847, %v716_v56   ;;  %v738_v56 = vld [vmem:[%s18964_s26 + $0x60] sm:$0xff] }
  0xab   : > { %1915 = vperm.xlu0 %14846, %v725_v12   ;;  %v747_v12 = vld [vmem:[%s18964_s26 + $0xa8] sm:$0xff] }
  0xae   : > { %1880 = vperm.xlu1 %14847, %v718_v59   ;;  %v740_v59 = vld [vmem:[%s18964_s26 + $0x70] sm:$0xff] }
  0xaf   : > { %5976 = vperm.xlu0 %14846, %v727_v16  }
  0xb2   : > { %1890 = vperm.xlu1 %14847, %v720_v0   ;;  %v742_v0 = vld [vmem:[%s18964_s26 + $0x80] sm:$0xff] }
  0xb3   : > { %5986 = vperm.xlu0 %14846, %v729_v24   ;;  %v746_v24 = vld [vmem:[%s18964_s26 + $0xa0] sm:$0xff] }
  0xb6   : > { %1900 = vperm.xlu1 %14847, %v722_v3   ;;  %v744_v3 = vld [vmem:[%s18964_s26 + $0x90] sm:$0xff] }
  0xb7   : > { %5996 = vperm.xlu0 %14846, %v731_v28   ;;  %v748_v28 = vld [vmem:[%s18964_s26 + $0xb0] sm:$0xff] }
  0xba   : > { %1910 = vperm.xlu1 %14847, %v724_v15  }
  0xbb   : > { %6006 = vperm.xlu0 %14846, %v733_v31   ;;  %v750_v31 = vld [vmem:[%s18964_s26 + $0xc0] sm:$0xff] }
  0xbe   : > { %5971 = vperm.xlu1 %14847, %v726_v18  }
  0xbf   : > { %6016 = vperm.xlu0 %14846, %v735_v40   ;;  %v752_v40 = vld [vmem:[%s18964_s26 + $0xd0] sm:$0xff] }
  0xc2   : > { %5981 = vperm.xlu1 %14847, %v728_v27   ;;  %v749_v27 = vld [vmem:[%s18964_s26 + $0xb8] sm:$0xff] }
  0xc3   : > { %6026 = vperm.xlu0 %14846, %v737_v46   ;;  %v754_v46 = vld [vmem:[%s18964_s26 + $0xe0] sm:$0xff] }
  0xc6   : > { %5991 = vperm.xlu1 %14847, %v730_v30   ;;  %v751_v30 = vld [vmem:[%s18964_s26 + $0xc8] sm:$0xff] }
  0xc7   : > { %6036 = vperm.xlu0 %14846, %v739_v52  }
  0xca   : > { %6001 = vperm.xlu1 %14847, %v732_v38   ;;  %v753_v38 = vld [vmem:[%s18964_s26 + $0xd8] sm:$0xff] }
  0xcb   : > { %6046 = vperm.xlu0 %14846, %v741_v54   ;;  %v759_v54 = vld [vmem:[%s18964_s26 + $0x108] sm:$0xff] }
  0xce   : > { %6011 = vperm.xlu1 %14847, %v734_v41   ;;  %v755_v41 = vld [vmem:[%s18964_s26 + $0xe8] sm:$0xff] }
  0xcf   : > { %6056 = vperm.xlu0 %14846, %v743_v60  }
  0xd2   : > { %6021 = vperm.xlu1 %14847, %v736_v48   ;;  %v757_v48 = vld [vmem:[%s18964_s26 + $0xf8] sm:$0xff] }
  0xd3   : > { %6066 = vperm.xlu0 %14846, %v745_v5  }
  0xd6   : > { %6031 = vperm.xlu1 %14847, %v738_v56   ;;  %v756_v56 = vld [vmem:[%s18964_s26 + $0xf0] sm:$0xff] }
  0xd7   : > { %6076 = vperm.xlu0 %14846, %v747_v12   ;;  %v761_v12 = vld [vmem:[%s18964_s26 + $0x118] sm:$0xff] }
  0xda   : > { %6041 = vperm.xlu1 %14847, %v740_v59  }
  0xdb   : > { %6086 = vperm.xlu0 %14846, %v749_v27  }
  0xde   : > { %6051 = vperm.xlu1 %14847, %v742_v0  }
  0xdf   : > { %6096 = vperm.xlu0 %14846, %v751_v30  }
  0xe2   : > { %6061 = vperm.xlu1 %14847, %v744_v3   ;;  %v758_v3 = vld [vmem:[%s18964_s26 + $0x100] sm:$0xff] }
  0xe3   : > { %6106 = vperm.xlu0 %14846, %v753_v38  }
  0xe6   : > { %6071 = vperm.xlu1 %14847, %v746_v24   ;;  %v1286_v24 = vlaneseq }
  0xe7   : > { %6116 = vperm.xlu0 %14846, %v755_v41  }
  0xe8   : > { %v1287_v27 = vshrl.u32 %v1286_v24, 7 }
  0xea   : > { %6081 = vperm.xlu1 %14847, %v748_v28   ;;  %v15884_v28 = vsub.s32 0, %v1287_v27 }
  0xeb   : > { %6126 = vperm.xlu0 %14846, %v757_v48  }
  0xec   : > { %18965 = vst [vmem:[#allocation4_spill] sm:$0xff] %v15884_v28 }
  0xee   : > { %6091 = vperm.xlu1 %14847, %v750_v31  }
  0xef   : > { %6136 = vperm.xlu0 %14846, %v759_v54  }
  0xf2   : > { %6101 = vperm.xlu1 %14847, %v752_v40  }
  0xf3   : > { %6146 = vperm.xlu0 %14846, %v761_v12  }
  0xf6   : > { %6111 = vperm.xlu1 %14847, %v754_v46  }
  0xfa   : > { %6121 = vperm.xlu1 %14847, %v756_v56  }
  0xfe   : > { %6131 = vperm.xlu1 %14847, %v758_v3  }
 0x14b   : > { %v1053_v15 = vpop.f32.mrb[0].mxu0 }
 0x14c   : > { %v1058_v16 = vmul.f32 0.00390625, %v1053_v15  ;;  %v13029_v18 = vpop.f32.mrb[1].mxu0  ;;  %v760_v15 = vld [vmem:[%s18964_s26 + $0x110] sm:$0xff] }
 0x14d   : > { %6141 = vperm.xlu1 %14847, %v760_v15  }
 0x14e   : > { %13038 = vmatmul.mubr.msk.f32.vlgmr.msra.gmra.mrb[2].mxu0 %vm762_vm2, %v1058_v16  ;;  %v1133_v52 = vmul.f32 %v1058_v16, %v1058_v16 }
 0x14f   : > { %13053 = vmatprep.mubr.msk.f32.mxu0 %vm15173_vm1, %v18878_v1 }
 0x15b   : > { %v1128_v59 = vpop.f32.mrb[0].mxu1 }
 0x15c   : > { %v1132_v60 = vmul.f32 0.00390625, %v1128_v59  ;;  %v13034_v0 = vpop.f32.mrb[1].mxu1 }
 0x15d   : > { %v15950_v0 = vpop.permute.xlu0 %1715 }
 0x15e   : > { %v1134_v5 = vsub.f32 %v1132_v60, %v1133_v52 }
 0x160   : > { %13043 = vmatmul.mubr.msk.f32.vlgmr.msra.gmra.mrb[2].mxu1 %vm762_vm2, %v1134_v5 }
 0x161   : > { %v15991_v27 = vpop.permute.xlu0 %1720 }
 0x221   : > { %v1208_v16 = vpop.f32.mrb[2].mxu0 }
 0x222   : > { %v13039_v18 = vpop.f32.mrb[3].mxu0  ;;  %v15887_v40 = vrot.slane %v1208_v16, %v15884_v28  ;;  %v15989_v16 = vpop.permute.xlu1 %1725 }
 0x224   : > { %v1290_v41 = vsub.f32 %v15323_v7, %v15887_v40  ;;  %v1291_v46 = vsub.f32 %v15326_v8, %v15887_v40  ;;  %v1292_v48 = vsub.f32 %v15329_v9, %v15887_v40  ;;  %v1293_v52 = vsub.f32 %v15332_v10, %v15887_v40  ;;  %v11543_v7 = vld [vmem:[%s18863_s8 + $0x4] sm:$0xf]  ;;  %v15909_v8 = vld [vmem:[%s18863_s8] sm:$0xf] }
 0x225   : > { %v1294_v56 = vsub.f32 %v15341_v14, %v15887_v40  ;;  %v1295_v54 = vsub.f32 %v15352_v19, %v15887_v40  ;;  %v1296_v59 = vsub.f32 %v15357_v22, %v15887_v40  ;;  %18966 = vst [vmem:[#allocation5_spill] sm:$0xff] %v15909_v8  ;;  %v1297_v9 = vsub.f32 %v15365_v26, %v15887_v40 }
 0x226   : > { %v1298_v10 = vsub.f32 %v15370_v29, %v15887_v40  ;;  %v1299_v14 = vsub.f32 %v15378_v33, %v15887_v40  ;;  %v1300_v19 = vsub.f32 %v15383_v36, %v15887_v40  ;;  %13056 = vmatprep.subr.msk.mxu1 %vm983_vm0, %v11543_v7  ;;  %v1301_v22 = vsub.f32 %v15388_v39, %v15887_v40 }
 0x227   : > { %v1302_v60 = vsub.f32 %v15393_v42, %v15887_v40  ;;  %v1303_v26 = vsub.f32 %v15398_v45, %v15887_v40  ;;  %v1304_v29 = vsub.f32 %v15409_v51, %v15887_v40  ;;  %13057 = vmatpush3.msk.msra.mxu1 %vm983_vm0, %v11543_v7  ;;  %v1305_v33 = vsub.f32 %v15416_v55, %v15887_v40  ;;  %v1331_v45 = vld [vmem:[%s18967_s23] sm:$0x1] }
 0x228   : > { %v1306_v36 = vsub.f32 %v15426_v63, %v15887_v40  ;;  %v1307_v39 = vsub.f32 %v15434_v6, %v15887_v40  ;;  %v1308_v42 = vsub.f32 %v15442_v17, %v15887_v40  ;;  %13112 = vmatprep.subr.msk.mxu1 %vm983_vm0, %v15909_v8  ;;  %v1309_v51 = vsub.f32 %v15450_v25, %v15887_v40 }
 0x229   : > { %v1310_v55 = vsub.f32 %v15458_v34, %v15887_v40  ;;  %v1311_v63 = vsub.f32 %v15466_v43, %v15887_v40  ;;  %v1312_v6 = vsub.f32 %v15474_v50, %v15887_v40  ;;  %v1313_v5 = vsub.f32 %v15482_v58, %v15887_v40 }
 0x22a   : > { %v1314_v3 = vsub.f32 %v15490_v2, %v15887_v40  ;;  %v1315_v25 = vsub.f32 %v15498_v13, %v15887_v40  ;;  %v1316_v34 = vsub.f32 %v15506_v23, %v15887_v40  ;;  %v1317_v43 = vsub.f32 %v15514_v32, %v15887_v40 }
 0x22b   : > { %v1318_v50 = vsub.f32 %v15522_v44, %v15887_v40  ;;  %v1319_v12 = vsub.f32 %v15530_v53, %v15887_v40  ;;  %v1320_v58 = vsub.f32 %v15538_v61, %v15887_v40  ;;  %v1321_v2 = vsub.f32 %v15546_v11, %v15887_v40 }
 0x22c   : > { %v1322_v13 = vsub.f32 %v15554_v21, %v15887_v40  ;;  %v1323_v23 = vsub.f32 %v15562_v35, %v15887_v40  ;;  %v1324_v32 = vsub.f32 %v15570_v47, %v15887_v40  ;;  %v1325_v44 = vsub.f32 %v15578_v57, %v15887_v40 }
 0x22d   : > { %v1326_v53 = vsub.f32 %v15586_v4, %v15887_v40  ;;  %v1327_v11 = vsub.f32 %v15594_v20, %v15887_v40  ;;  %v1328_v21 = vsub.f32 %v15602_v37, %v15887_v40  ;;  %v1329_v35 = vsub.f32 %v15610_v49, %v15887_v40 }
 0x22e   : > { %v1330_v47 = vsub.f32 %v15618_v62, %v15887_v40 }
 0x233   : > { %v1281_v30 = vpop.f32.mrb[2].mxu1 }
 0x234   : > { %v1282_v31 = vadd.f32 1e-05, %v1281_v30  ;;  %v13044_v38 = vpop.f32.mrb[3].mxu1 }
 0x236   : > { %14848 = vrsqrt.f32 %v1282_v31 }
 0x240   : > { %v14849_v17 = vpop.eup %14848 }
 0x241   : > { %v1332_v15 = vmul.f32 %v14849_v17, %v1331_v45 }
 0x243   : > { %v1336_v61 = vrot.slane %v1332_v15, %v15884_v28 }
 0x245   : > { %v1337_v57 = vmul.f32 %v1336_v61, %v1290_v41  ;;  %v1338_v18 = vmul.f32 %v1336_v61, %v1291_v46  ;;  %v1339_v24 = vmul.f32 %v1336_v61, %v1292_v48  ;;  %v1340_v4 = vmul.f32 %v1336_v61, %v1293_v52 }
 0x246   : > { %v1341_v30 = vmul.f32 %v1336_v61, %v1294_v56  ;;  %v1342_v31 = vmul.f32 %v1336_v61, %v1295_v54  ;;  %v1343_v20 = vmul.f32 %v1336_v61, %v1296_v59  ;;  %v1344_v38 = vmul.f32 %v1336_v61, %v1297_v9 }
 0x247   : > { %v1345_v7 = vmul.f32 %v1336_v61, %v1298_v10  ;;  %v1346_v37 = vmul.f32 %v1336_v61, %v1299_v14  ;;  %v1347_v45 = vmul.f32 %v1336_v61, %v1300_v19  ;;  %v1348_v17 = vmul.f32 %v1336_v61, %v1301_v22  ;;  %v16015_v10 = vpop.permute.xlu1 %1730 }
 0x248   : > { %v1349_v49 = vmul.f32 %v1336_v61, %v1302_v60  ;;  %v15993_v15 = vmul.f32 %v1336_v61, %v1303_v26  ;;  %v15995_v62 = vmul.f32 %v1336_v61, %v1304_v29  ;;  %v15997_v40 = vmul.f32 %v1336_v61, %v1305_v33  ;;  %v16025_v26 = vpop.permute.xlu0 %1735 }
 0x249   : > { %v15999_v41 = vmul.f32 %v1336_v61, %v1306_v36  ;;  %v16001_v46 = vmul.f32 %v1336_v61, %v1307_v39  ;;  %v16003_v48 = vmul.f32 %v1336_v61, %v1308_v42  ;;  %v16005_v52 = vmul.f32 %v1336_v61, %v1309_v51 }
 0x24a   : > { %v16007_v56 = vmul.f32 %v1336_v61, %v1310_v55  ;;  %v16009_v54 = vmul.f32 %v1336_v61, %v1311_v63  ;;  %v16011_v59 = vmul.f32 %v1336_v61, %v1312_v6  ;;  %v16013_v9 = vmul.f32 %v1336_v61, %v1313_v5 }
 0x24b   : > { %v16017_v14 = vmul.f32 %v1336_v61, %v1314_v3  ;;  %v16019_v19 = vmul.f32 %v1336_v61, %v1315_v25  ;;  %v16021_v22 = vmul.f32 %v1336_v61, %v1316_v34  ;;  %v16023_v60 = vmul.f32 %v1336_v61, %v1317_v43  ;;  %v16053_v43 = vpop.permute.xlu1 %1740 }
 0x24c   : > { %v16027_v29 = vmul.f32 %v1336_v61, %v1318_v50  ;;  %v16029_v33 = vmul.f32 %v1336_v61, %v1319_v12  ;;  %v16031_v36 = vmul.f32 %v1336_v61, %v1320_v58  ;;  %v16033_v39 = vmul.f32 %v1336_v61, %v1321_v2  ;;  %v16058_v50 = vld [vmem:[%s18860_s5] ss:$0 sm:$0xff]  ;;  %v16060_v12 = vpop.permute.xlu0 %1745 }
 0x24d   : > { %v16035_v42 = vmul.f32 %v1336_v61, %v1322_v13  ;;  %v16037_v51 = vmul.f32 %v1336_v61, %v1323_v23  ;;  %v16039_v55 = vmul.f32 %v1336_v61, %v1324_v32  ;;  %v16041_v63 = vmul.f32 %v1336_v61, %v1325_v44 }
 0x24e   : > { %v16043_v6 = vmul.f32 %v1336_v61, %v1326_v53  ;;  %v16045_v5 = vmul.f32 %v1336_v61, %v1327_v11  ;;  %v16047_v3 = vmul.f32 %v1336_v61, %v1328_v21  ;;  %v16049_v25 = vmul.f32 %v1336_v61, %v1329_v35 }
 0x24f   : > { %v16051_v34 = vmul.f32 %v1336_v61, %v1330_v47  ;;  %v16063_v58 = vadd.f32 %v16058_v50, %v1337_v57  ;;  %v16066_v2 = vadd.f32 %v16058_v50, %v1338_v18  ;;  %v16069_v13 = vadd.f32 %v16058_v50, %v1339_v24  ;;  %v16074_v32 = vpop.permute.xlu1 %1750 }
 0x250   : > { %v16072_v23 = vadd.f32 %v16058_v50, %v1340_v4  ;;  %v16077_v44 = vadd.f32 %v16058_v50, %v1341_v30  ;;  %v16079_v53 = vpop.permute.xlu0 %1755  ;;  %v16082_v61 = vadd.f32 %v16058_v50, %v1342_v31  ;;  %v16085_v11 = vadd.f32 %v16058_v50, %v1343_v20 }
 0x251   : > { %v11500_v21 = vmul.f32 -1.442695, %v16063_v58  ;;  %v11501_v35 = vmul.f32 -1.442695, %v16066_v2  ;;  %v16090_v47 = vadd.f32 %v16058_v50, %v1344_v38  ;;  %v11502_v57 = vmul.f32 -1.442695, %v16069_v13 }
 0x252   : > { %v11503_v18 = vmul.f32 -1.442695, %v16072_v23  ;;  %v16095_v24 = vadd.f32 %v16058_v50, %v1345_v7  ;;  %v11504_v4 = vmul.f32 -1.442695, %v16077_v44  ;;  %v16099_v30 = vadd.f32 %v16058_v50, %v1346_v37 }
 0x253   : > { %14850 = vpow2.f32 %v11500_v21  ;;  %v11505_v31 = vmul.f32 -1.442695, %v16082_v61  ;;  %v16102_v20 = vpop.permute.xlu1 %1760  ;;  %v16105_v38 = vadd.f32 %v16058_v50, %v1347_v45  ;;  %v11506_v1 = vmul.f32 -1.442695, %v16085_v11 }
 0x254   : > { %14852 = vpow2.f32 %v11501_v35  ;;  %v16108_v28 = vpop.permute.xlu0 %1765  ;;  %v16111_v7 = vadd.f32 %v16058_v50, %v1348_v17  ;;  %v11507_v21 = vmul.f32 -1.442695, %v16090_v47  ;;  %v16115_v37 = vadd.f32 %v16058_v50, %v1349_v49 }
 0x255   : > { %14854 = vpow2.f32 %v11502_v57  ;;  %18968 = vst [vmem:[#allocation6_spill] sm:$0xff] %v16108_v28  ;;  %v11508_v35 = vmul.f32 -1.442695, %v16095_v24  ;;  %v16120_v45 = vadd.f32 %v16058_v50, %v15993_v15  ;;  %v11509_v57 = vmul.f32 -1.442695, %v16099_v30 }
 0x256   : > { %14856 = vpow2.f32 %v11503_v18  ;;  %v16125_v17 = vadd.f32 %v16058_v50, %v15995_v62  ;;  %v11510_v8 = vmul.f32 -1.442695, %v16105_v38  ;;  %v16130_v49 = vadd.f32 %v16058_v50, %v15997_v40 }
 0x257   : > { %14858 = vpow2.f32 %v11504_v4  ;;  %18969 = vst [vmem:[#allocation7_spill] sm:$0xff] %v16120_v45  ;;  %v11511_v18 = vmul.f32 -1.442695, %v16111_v7  ;;  %v16133_v4 = vpop.permute.xlu1 %1770  ;;  %v16137_v15 = vadd.f32 %v16058_v50, %v15999_v41  ;;  %v11513_v40 = vmul.f32 -1.442695, %v16120_v45 }
 0x258   : > { %14860 = vpow2.f32 %v11505_v31  ;;  %18970 = vst [vmem:[#allocation8_spill] sm:$0xff] %v16125_v17  ;;  %18971 = vst [vmem:[#allocation9_spill] sm:$0xff] %v16130_v49  ;;  %v11512_v31 = vmul.f32 -1.442695, %v16115_v37  ;;  %v16140_v62 = vpop.permute.xlu0 %1775  ;;  %v11514_v41 = vmul.f32 -1.442695, %v16125_v17  ;;  %v16172_v17 = vadd.f32 %v16058_v50, %v16009_v54 }
 0x259   : > { %14862 = vpow2.f32 %v11506_v1  ;;  %18972 = vst [vmem:[#allocation10_spill] sm:$0xff] %v16133_v4  ;;  %18973 = vst [vmem:[#allocation11_spill] sm:$0xff] %v16137_v15  ;;  %v16144_v1 = vadd.f32 %v16058_v50, %v16001_v46  ;;  %v11515_v46 = vmul.f32 -1.442695, %v16130_v49 }
 0x25a   : > { %14864 = vpow2.f32 %v11507_v21  ;;  %18974 = vst [vmem:[#allocation12_spill] sm:$0xff] %v16140_v62  ;;  %v16151_v21 = vadd.f32 %v16058_v50, %v16003_v48  ;;  %v11516_v48 = vmul.f32 -1.442695, %v16137_v15  ;;  %18979 = vst [vmem:[#allocation17_spill] sm:$0xff] %v16172_v17 }
 0x25b   : > { %14866 = vpow2.f32 %v11508_v35  ;;  %18975 = vst [vmem:[#allocation13_spill] sm:$0xff] %v16144_v1  ;;  %v16158_v35 = vadd.f32 %v16058_v50, %v16005_v52  ;;  %v11517_v52 = vmul.f32 -1.442695, %v16144_v1  ;;  %v16178_v45 = vpop.permute.xlu1 %1780 }
 0x25c   : > { %14868 = vpow2.f32 %v11509_v57  ;;  %18976 = vst [vmem:[#allocation14_spill] sm:$0xff] %v16151_v21  ;;  %v16165_v57 = vadd.f32 %v16058_v50, %v16007_v56  ;;  %18981 = vst [vmem:[#allocation18_spill] sm:$0xff] %v16178_v45  ;;  %v16182_v56 = vadd.f32 %v16058_v50, %v16011_v59  ;;  %v16187_v54 = vpop.permute.xlu0 %1785  ;;  %v16198_v59 = vadd.f32 %v16058_v50, %v16017_v14 }
 0x25d   : > { %v16147_v28 = vpop.eup %14850  ;;  %14870 = vpow2.f32 %v11510_v8  ;;  %18977 = vst [vmem:[#allocation15_spill] sm:$0xff] %v16158_v35  ;;  %18983 = vst [vmem:[#allocation20_spill] sm:$0xff] %v16187_v54  ;;  %v16205_v54 = vadd.f32 %v16058_v50, %v16019_v19 }
 0x25e   : > { %v16154_v4 = vpop.eup %14852  ;;  %14872 = vpow2.f32 %v11511_v18  ;;  %18978 = vst [vmem:[#allocation16_spill] sm:$0xff] %v16165_v57  ;;  %v18980_v18 = vmov 0.0   ;;  %18982 = vst [vmem:[#allocation19_spill] sm:$0xff] %v16182_v56  ;;  %v11522_v14 = vmul.f32 -1.442695, %v16182_v56 }
 0x25f   : > { %v16161_v62 = vpop.eup %14854  ;;  %14874 = vpow2.f32 %v11512_v31  ;;  %2001 = vst.msk [vmem:[#allocation2 + $0x144] sm:$0x3] %vm2000_vm4, %v18980_v18  ;;  %v11518_v31 = vmul.f32 -1.442695, %v16151_v21  ;;  %v11519_v18 = vmul.f32 -1.442695, %v16158_v35 }
 0x260   : > { %v16168_v8 = vpop.eup %14856  ;;  %14876 = vpow2.f32 %v11513_v40  ;;  %v16191_v40 = vadd.f32 %v16058_v50, %v16013_v9  ;;  %18985 = vst [vmem:[#allocation22_spill] sm:$0xff] %v16198_v59  ;;  %v11520_v21 = vmul.f32 -1.442695, %v16165_v57  ;;  %18986 = vst [vmem:[#allocation23_spill] sm:$0xff] %v16205_v54  ;;  %v11521_v9 = vmul.f32 -1.442695, %v16172_v17  ;;  %v16233_v45 = vpop.permute.xlu0 %1795 }
 0x261   : > { %v16176_v49 = vpop.eup %14858  ;;  %14878 = vpow2.f32 %v11514_v41  ;;  %v11524_v56 = vmul.f32 -1.442695, %v16198_v59  ;;  %18991 = vst [vmem:[#allocation28_spill] sm:$0xff] %v16233_v45  ;;  %v16251_v45 = vadd.f32 %v16058_v50, %v16033_v39 }
 0x262   : > { %v16185_v15 = vpop.eup %14860  ;;  %18984 = vst [vmem:[#allocation21_spill] sm:$0xff] %v16191_v40  ;;  %14880 = vpow2.f32 %v11515_v46  ;;  %v16212_v46 = vadd.f32 %v16058_v50, %v16021_v22  ;;  %v11523_v19 = vmul.f32 -1.442695, %v16191_v40  ;;  %v16228_v22 = vadd.f32 %v16058_v50, %v16027_v29 }
 0x263   : > { %v16194_v1 = vpop.eup %14862  ;;  %14882 = vpow2.f32 %v11516_v48  ;;  %v16219_v48 = vadd.f32 %v16058_v50, %v16023_v60  ;;  %v16237_v60 = vadd.f32 %v16058_v50, %v16029_v33  ;;  %v16244_v29 = vadd.f32 %v16058_v50, %v16031_v36  ;;  %18994 = vst [vmem:[#allocation31_spill] sm:$0xff] %v16251_v45 }
 0x264   : > { %v16201_v41 = vpop.eup %14864  ;;  %14884 = vpow2.f32 %v11517_v52  ;;  %18987 = vst [vmem:[#allocation24_spill] sm:$0xff] %v16212_v46  ;;  %v16224_v52 = vpop.permute.xlu1 %1790  ;;  %18990 = vst [vmem:[#allocation27_spill] sm:$0xff] %v16228_v22  ;;  %v11526_v59 = vmul.f32 -1.442695, %v16212_v46  ;;  %v11528_v36 = vmul.f32 -1.442695, %v16228_v22 }
 0x265   : > { %v16208_v35 = vpop.eup %14866  ;;  %14886 = vpow2.f32 %v11518_v31  ;;  %18988 = vst [vmem:[#allocation25_spill] sm:$0xff] %v16219_v48  ;;  %18989 = vst [vmem:[#allocation26_spill] sm:$0xff] %v16224_v52  ;;  %v11527_v33 = vmul.f32 -1.442695, %v16219_v48  ;;  %v11529_v39 = vmul.f32 -1.442695, %v16237_v60  ;;  %v16279_v52 = vpop.permute.xlu0 %1805 }
 0x266   : > { %v16215_v57 = vpop.eup %14868  ;;  %14888 = vpow2.f32 %v11519_v18  ;;  %18992 = vst [vmem:[#allocation29_spill] sm:$0xff] %v16237_v60  ;;  %v11525_v18 = vmul.f32 -1.442695, %v16205_v54  ;;  %18993 = vst [vmem:[#allocation30_spill] sm:$0xff] %v16244_v29  ;;  %v11530_v22 = vmul.f32 -1.442695, %v16244_v29 }
 0x267   : > { %v16222_v17 = vpop.eup %14870  ;;  %14890 = vpow2.f32 %v11520_v21  ;;  %18999 = vst [vmem:[#allocation36_spill] sm:$0xff] %v16279_v52  ;;  %v16297_v52 = vadd.f32 %v16058_v50, %v16045_v5 }
 0x268   : > { %v16231_v31 = vpop.eup %14872  ;;  %14892 = vpow2.f32 %v11521_v9  ;;  %v16258_v9 = vadd.f32 %v16058_v50, %v16035_v42  ;;  %v16274_v42 = vadd.f32 %v16058_v50, %v16039_v55  ;;  %v16290_v55 = vadd.f32 %v16058_v50, %v16043_v6 }
 0x269   : > { %v16240_v40 = vpop.eup %14874  ;;  %14894 = vpow2.f32 %v11522_v14  ;;  %v16265_v14 = vadd.f32 %v16058_v50, %v16037_v51  ;;  %v16283_v51 = vadd.f32 %v16058_v50, %v16041_v63  ;;  %19002 = vst [vmem:[#allocation39_spill] sm:$0xff] %v16297_v52 }
 0x26a   : > { %v16247_v21 = vpop.eup %14876  ;;  %14896 = vpow2.f32 %v11523_v19  ;;  %18995 = vst [vmem:[#allocation32_spill] sm:$0xff] %v16258_v9  ;;  %v16270_v19 = vpop.permute.xlu1 %1800  ;;  %18998 = vst [vmem:[#allocation35_spill] sm:$0xff] %v16274_v42  ;;  %v11532_v29 = vmul.f32 -1.442695, %v16258_v9  ;;  %v11534_v6 = vmul.f32 -1.442695, %v16274_v42 }
 0x26b   : > { %v16254_v54 = vpop.eup %14878  ;;  %14898 = vpow2.f32 %v11524_v56  ;;  %18996 = vst [vmem:[#allocation33_spill] sm:$0xff] %v16265_v14  ;;  %18997 = vst [vmem:[#allocation34_spill] sm:$0xff] %v16270_v19  ;;  %v11533_v63 = vmul.f32 -1.442695, %v16265_v14  ;;  %v11535_v5 = vmul.f32 -1.442695, %v16283_v51  ;;  %v16325_v19 = vpop.permute.xlu0 %1815 }
 0x26c   : > { %v16261_v46 = vpop.eup %14880  ;;  %14900 = vpow2.f32 %v11525_v18  ;;  %19000 = vst [vmem:[#allocation37_spill] sm:$0xff] %v16283_v51  ;;  %v11531_v18 = vmul.f32 -1.442695, %v16251_v45  ;;  %19001 = vst [vmem:[#allocation38_spill] sm:$0xff] %v16290_v55  ;;  %v11536_v42 = vmul.f32 -1.442695, %v16290_v55 }
 0x26d   : > { %v16268_v48 = vpop.eup %14882  ;;  %14902 = vpow2.f32 %v11526_v59  ;;  %19007 = vst [vmem:[#allocation44_spill] sm:$0xff] %v16325_v19 }
 0x26e   : > { %v16277_v56 = vpop.eup %14884  ;;  %14904 = vpow2.f32 %v11527_v33  ;;  %v16304_v33 = vadd.f32 %v16058_v50, %v16047_v3  ;;  %v16320_v3 = vadd.f32 %v16058_v50, %v16051_v34 }
 0x26f   : > { %v16286_v60 = vpop.eup %14886  ;;  %14906 = vpow2.f32 %v11528_v36  ;;  %v16311_v36 = vadd.f32 %v16058_v50, %v16049_v25  ;;  %v11537_v25 = vmul.f32 -1.442695, %v16297_v52 }
 0x270   : > { %v16293_v59 = vpop.eup %14888  ;;  %14908 = vpow2.f32 %v11529_v39  ;;  %19003 = vst [vmem:[#allocation40_spill] sm:$0xff] %v16304_v33  ;;  %v16316_v39 = vpop.permute.xlu1 %1810  ;;  %19006 = vst [vmem:[#allocation43_spill] sm:$0xff] %v16320_v3 }
 0x271   : > { %v16300_v45 = vpop.eup %14890  ;;  %14910 = vpow2.f32 %v11530_v22  ;;  %19004 = vst [vmem:[#allocation41_spill] sm:$0xff] %v16311_v36  ;;  %19005 = vst [vmem:[#allocation42_spill] sm:$0xff] %v16316_v39  ;;  %v11539_v34 = vmul.f32 -1.442695, %v16311_v36  ;;  %v1553_v36 = vadd.f32 1.0, %v16176_v49 }
 0x272   : > { %v16307_v9 = vpop.eup %14892  ;;  %14912 = vpow2.f32 %v11531_v18  ;;  %v11538_v18 = vmul.f32 -1.442695, %v16304_v33 }
 0x273   : > { %v16314_v14 = vpop.eup %14894  ;;  %14914 = vpow2.f32 %v11532_v29  ;;  %v11540_v29 = vmul.f32 -1.442695, %v16320_v3  ;;  %v1551_v3 = vadd.f32 1.0, %v16161_v62 }
 0x274   : > { %v16323_v22 = vpop.eup %14896  ;;  %14916 = vpow2.f32 %v11533_v63  ;;  %v1549_v63 = vadd.f32 1.0, %v16147_v28  ;;  %v16342_v19 = vpop.permute.xlu1 %1820 }
 0x275   : > { %v16328_v51 = vpop.eup %14898  ;;  %14918 = vpow2.f32 %v11534_v6  ;;  %19008 = vst [vmem:[#allocation45_spill] sm:$0xff] %v16342_v19  ;;  %v1550_v6 = vadd.f32 1.0, %v16154_v4  ;;  %v1554_v4 = vadd.f32 1.0, %v16185_v15 }
 0x276   : > { %v16331_v39 = vpop.eup %14900  ;;  %14920 = vpow2.f32 %v11535_v5  ;;  %v16347_v5 = vpop.permute.xlu0 %1825 }
 0x277   : > { %v16334_v50 = vpop.eup %14902  ;;  %14922 = vpow2.f32 %v11536_v42  ;;  %19009 = vst [vmem:[#allocation46_spill] sm:$0xff] %v16347_v5 }
 0x278   : > { %v16337_v55 = vpop.eup %14904  ;;  %14924 = vpow2.f32 %v11537_v25  ;;  %v1552_v25 = vadd.f32 1.0, %v16168_v8  ;;  %v1556_v8 = vadd.f32 1.0, %v16201_v41  ;;  %v1560_v41 = vadd.f32 1.0, %v16231_v31 }
 0x279   : > { %v16340_v52 = vpop.eup %14906  ;;  %14926 = vpow2.f32 %v11538_v18 }
 0x27a   : > { %v16345_v33 = vpop.eup %14908  ;;  %14928 = vpow2.f32 %v11539_v34  ;;  %v1555_v34 = vadd.f32 1.0, %v16194_v1  ;;  %v16369_v49 = vpop.permute.xlu0 %1835 }
 0x27b   : > { %v16350_v42 = vpop.eup %14910  ;;  %14930 = vpow2.f32 %v11540_v29  ;;  %v16364_v29 = vpop.permute.xlu1 %1830  ;;  %19011 = vst [vmem:[#allocation48_spill] sm:$0xff] %v16369_v49 }
 0x27c   : > { %v16353_v28 = vpop.eup %14912  ;;  %14932 = vrcp.f32 %v1549_v63  ;;  %19010 = vst [vmem:[#allocation47_spill] sm:$0xff] %v16364_v29  ;;  %v1557_v63 = vadd.f32 1.0, %v16208_v35  ;;  %v1561_v35 = vadd.f32 1.0, %v16240_v40 }
 0x27d   : > { %v16356_v18 = vpop.eup %14914  ;;  %14934 = vrcp.f32 %v1550_v6  ;;  %v1558_v6 = vadd.f32 1.0, %v16215_v57  ;;  %v1562_v57 = vadd.f32 1.0, %v16247_v21 }
 0x27e   : > { %v16359_v19 = vpop.eup %14916  ;;  %14936 = vrcp.f32 %v1551_v3  ;;  %v1559_v3 = vadd.f32 1.0, %v16222_v17  ;;  %v16389_v17 = vpop.permute.xlu0 %1845 }
 0x27f   : > { %v16362_v62 = vpop.eup %14918  ;;  %14938 = vrcp.f32 %v1552_v25  ;;  %v16386_v49 = vpop.permute.xlu1 %1840  ;;  %19014 = vst [vmem:[#allocation51_spill] sm:$0xff] %v16389_v17 }
 0x280   : > { %v16367_v5 = vpop.eup %14920  ;;  %14940 = vrcp.f32 %v1553_v36  ;;  %19013 = vst [vmem:[#allocation50_spill] sm:$0xff] %v16386_v49 }
 0x281   : > { %v16372_v15 = vpop.eup %14922  ;;  %14942 = vrcp.f32 %v1554_v4 }
 0x282   : > { %v16375_v1 = vpop.eup %14924  ;;  %14944 = vrcp.f32 %v1555_v34  ;;  %v1563_v34 = vadd.f32 1.0, %v16254_v54 }
 0x283   : > { %v16378_v29 = vpop.eup %14926  ;;  %14946 = vrcp.f32 %v1556_v8  ;;  %v1564_v8 = vadd.f32 1.0, %v16261_v46  ;;  %v1567_v46 = vadd.f32 1.0, %v16286_v60  ;;  %v1569_v60 = vadd.f32 1.0, %v16300_v45 }
 0x284   : > { %v16381_v25 = vpop.eup %14928  ;;  %14948 = vrcp.f32 %v1557_v63  ;;  %v1571_v45 = vadd.f32 1.0, %v16314_v14  ;;  %v1573_v14 = vadd.f32 1.0, %v16328_v51 }
 0x285   : > { %v16384_v36 = vpop.eup %14930  ;;  %14950 = vrcp.f32 %v1558_v6  ;;  %v1566_v6 = vadd.f32 1.0, %v16277_v56 }
 0x286   : > { %19012 = vst [vmem:[#allocation49_spill] sm:$0xff] %v16384_v36  ;;  %v14933_v4 = vpop.eup %14932  ;;  %14952 = vrcp.f32 %v1559_v3  ;;  %v1565_v36 = vadd.f32 1.0, %v16268_v48 }
 0x287   : > { %v14935_v31 = vpop.eup %14934  ;;  %14954 = vrcp.f32 %v1560_v41  ;;  %v1672_v40 = vmul.f32 %v14933_v4, %v16063_v58 }
 0x288   : > { %v14937_v63 = vpop.eup %14936  ;;  %14956 = vrcp.f32 %v1561_v35  ;;  %v1673_v49 = vmul.f32 %v14935_v31, %v16066_v2  ;;  %v16402_v35 = vpop.permute.xlu1 %1850  ;;  %v1568_v2 = vadd.f32 1.0, %v16293_v59 }
 0x289   : > { %v14939_v21 = vpop.eup %14938  ;;  %14958 = vrcp.f32 %v1562_v57  ;;  %v1674_v17 = vmul.f32 %v14937_v63, %v16069_v13  ;;  %v1918_v54 = vmul.f32 %v15950_v0, %v1672_v40  ;;  %v16408_v57 = vpop.permute.xlu0 %1855  ;;  %v1576_v63 = vadd.f32 1.0, %v16337_v55 }
 0x28a   : > { %v14941_v3 = vpop.eup %14940  ;;  %14960 = vrcp.f32 %v1563_v34  ;;  %v1675_v58 = vmul.f32 %v14939_v21, %v16072_v23  ;;  %v1919_v41 = vmul.f32 %v15991_v27, %v1673_v49  ;;  %v1570_v49 = vadd.f32 1.0, %v16307_v9 }
 0x28b   : > { %v14943_v48 = vpop.eup %14942  ;;  %14962 = vrcp.f32 %v1564_v8  ;;  %v1676_v56 = vmul.f32 %v14941_v3, %v16077_v44  ;;  %v1920_v13 = vmul.f32 %v15989_v16, %v1674_v17  ;;  %1959 = vst.msk [vmem:[#allocation2] sm:$0xff] %vm762_vm2, %v1918_v54  ;;  %v1572_v9 = vadd.f32 1.0, %v16323_v22 }
 0x28c   : > { %v14945_v0 = vpop.eup %14944  ;;  %14964 = vrcp.f32 %v1565_v36  ;;  %v1677_v27 = vmul.f32 %v14943_v48, %v16082_v61  ;;  %v1921_v23 = vmul.f32 %v16015_v10, %v1675_v58  ;;  %1960 = vst.msk [vmem:[#allocation2 + $0x8] sm:$0xff] %vm762_vm2, %v1919_v41  ;;  %v16430_v31 = vpop.permute.xlu1 %1860  ;;  %v1574_v22 = vadd.f32 1.0, %v16331_v39 }
 0x28d   : > { %v14947_v59 = vpop.eup %14946  ;;  %14966 = vrcp.f32 %v1566_v6  ;;  %v1678_v16 = vmul.f32 %v14945_v0, %v16085_v11  ;;  %v1922_v44 = vmul.f32 %v16025_v26, %v1676_v56  ;;  %1961 = vst.msk [vmem:[#allocation2 + $0x10] sm:$0xff] %vm762_vm2, %v1920_v13  ;;  %v16436_v8 = vpop.permute.xlu0 %1865  ;;  %v1578_v41 = vadd.f32 1.0, %v16345_v33  ;;  %v19022_v33 = vld [vmem:[#allocation5_spill] sm:$0xff] }
 0x28e   : > { %v14949_v4 = vpop.eup %14948  ;;  %14968 = vrcp.f32 %v1567_v46  ;;  %v1679_v61 = vmul.f32 %v14947_v59, %v16090_v47  ;;  %v1923_v10 = vmul.f32 %v16053_v43, %v1677_v27  ;;  %1962 = vst.msk [vmem:[#allocation2 + $0x18] sm:$0xff] %vm762_vm2, %v1921_v23  ;;  %v19020_v27 = vld [vmem:[#allocation9_spill] sm:$0xff]  ;;  %v19021_v59 = vld [vmem:[#allocation18_spill] sm:$0xff] }
 0x28f   : > { %v14951_v36 = vpop.eup %14950  ;;  %14970 = vrcp.f32 %v1568_v2  ;;  %v1680_v11 = vmul.f32 %v14949_v4, %v16095_v24  ;;  %v1924_v26 = vmul.f32 %v16060_v12, %v1678_v16  ;;  %1963 = vst.msk [vmem:[#allocation2 + $0x20] sm:$0xff] %vm762_vm2, %v1922_v44  ;;  %v19019_v2 = vld [vmem:[#allocation12_spill] sm:$0xff]  ;;  %v1580_v4 = vadd.f32 1.0, %v16353_v28 }
 0x290   : > { %v14953_v17 = vpop.eup %14952  ;;  %14972 = vrcp.f32 %v1569_v60  ;;  %v1681_v47 = vmul.f32 %v14951_v36, %v16099_v30  ;;  %v1925_v43 = vmul.f32 %v16074_v32, %v1679_v61  ;;  %1964 = vst.msk [vmem:[#allocation2 + $0x28] sm:$0xff] %vm762_vm2, %v1923_v10  ;;  %v1575_v30 = vadd.f32 1.0, %v16334_v50  ;;  %v16468_v44 = vpop.permute.xlu1 %1870  ;;  %v19024_v61 = vld [vmem:[#allocation20_spill] sm:$0xff] }
 0x291   : > { %v14955_v34 = vpop.eup %14954  ;;  %14974 = vrcp.f32 %v1570_v49  ;;  %v1682_v12 = vmul.f32 %v14953_v17, %v16105_v38  ;;  %v1926_v24 = vmul.f32 %v16079_v53, %v1680_v11  ;;  %1965 = vst.msk [vmem:[#allocation2 + $0x30] sm:$0xff] %vm762_vm2, %v1924_v26  ;;  %v19015_v38 = vld [vmem:[#allocation6_spill] sm:$0xff]  ;;  %v1577_v50 = vadd.f32 1.0, %v16340_v52  ;;  %v19018_v52 = vld [vmem:[#allocation8_spill] sm:$0xff]  ;;  %v19025_v26 = vld [vmem:[#allocation13_spill] sm:$0xff] }
 0x292   : > { %v14957_v51 = vpop.eup %14956  ;;  %14976 = vrcp.f32 %v1571_v45  ;;  %v1683_v32 = vmul.f32 %v14955_v34, %v16111_v7  ;;  %v1927_v40 = vmul.f32 %v16102_v20, %v1681_v47  ;;  %1966 = vst.msk [vmem:[#allocation2 + $0x38] sm:$0xff] %vm762_vm2, %v1925_v43  ;;  %v19016_v7 = vld [vmem:[#allocation7_spill] sm:$0xff]  ;;  %v19017_v20 = vld [vmem:[#allocation10_spill] sm:$0xff]  ;;  %v1579_v60 = vadd.f32 1.0, %v16350_v42 }
 0x293   : > { %v14959_v39 = vpop.eup %14958  ;;  %14978 = vrcp.f32 %v1572_v9  ;;  %v1684_v53 = vmul.f32 %v14957_v51, %v16115_v37  ;;  %v1928_v21 = vmul.f32 %v19015_v38, %v1682_v12  ;;  %1967 = vst.msk [vmem:[#allocation2 + $0x40] sm:$0xff] %vm762_vm2, %v1926_v24  ;;  %v2126_v6 = vld [vmem:[#allocation2 + $0x1] sm:$0xff]  ;;  %v16476_v9 = vpop.permute.xlu0 %1875  ;;  %v1581_v11 = vadd.f32 1.0, %v16356_v18  ;;  %v19028_v24 = vld [vmem:[#allocation28_spill] sm:$0xff] }
 0x294   : > { %v14961_v54 = vpop.eup %14960  ;;  %14980 = vrcp.f32 %v1573_v14  ;;  %v1685_v3 = vmul.f32 %v14959_v39, %v19016_v7  ;;  %v1929_v46 = vmul.f32 %v19017_v20, %v1683_v32  ;;  %1968 = vst.msk [vmem:[#allocation2 + $0x48] sm:$0xff] %vm762_vm2, %v1927_v40  ;;  %13058 = vmatprep.mubr.msk.f32.mxu1 %vm762_vm2, %v2126_v6  ;;  %v2127_v55 = vld [vmem:[#allocation2 + $0x9] sm:$0xff]  ;;  %v19026_v14 = vld [vmem:[#allocation26_spill] sm:$0xff]  ;;  %v1582_v34 = vadd.f32 1.0, %v16359_v19 }
 0x295   : > { %v16454_v37 = vld [vmem:[%s18863_s8 + $0x8] sm:$0xf]  ;;  %v14963_v58 = vpop.eup %14962  ;;  %14982 = vrcp.f32 %v1574_v22  ;;  %v1686_v48 = vmul.f32 %v14961_v54, %v19018_v52  ;;  %v1930_v56 = vmul.f32 %v19019_v2, %v1684_v53  ;;  %1969 = vst.msk [vmem:[#allocation2 + $0x50] sm:$0xff] %vm762_vm2, %v1928_v21  ;;  %13059 = vmatmul.mubr.msk.f32.vlgmr.msra.gmra.mrb[4].mxu1 %vm762_vm2, %v2127_v55  ;;  %v2128_v13 = vld [vmem:[#allocation2 + $0x11] sm:$0xff]  ;;  %v19027_v22 = vld [vmem:[#allocation14_spill] sm:$0xff]  ;;  %v1583_v32 = vadd.f32 1.0, %v16362_v62 }
 0x296   : > { %v14965_v0 = vpop.eup %14964  ;;  %14984 = vrcp.f32 %v1575_v30  ;;  %v1687_v23 = vmul.f32 %v14963_v58, %v19020_v27  ;;  %v1931_v49 = vmul.f32 %v19021_v59, %v1685_v3  ;;  %1970 = vst.msk [vmem:[#allocation2 + $0x58] sm:$0xff] %vm762_vm2, %v1929_v46  ;;  %13113 = vmatpush3.msk.msra.mxu1 %vm983_vm0, %v19022_v33  ;;  %13061 = vmatprep.mubr.msk.f32.mxu1 %vm762_vm2, %v2128_v13  ;;  %v19023_v45 = vld [vmem:[#allocation11_spill] sm:$0xff]  ;;  %v2129_v47 = vld [vmem:[#allocation2 + $0x19] sm:$0xff]  ;;  %v1584_v38 = vadd.f32 1.0, %v16367_v5  ;;  %v19031_v21 = vld [vmem:[#allocation16_spill] sm:$0xff]  ;;  %v16500_v5 = vpop.permute.xlu1 %1880 }
 0x297   : > { %v14967_v16 = vpop.eup %14966  ;;  %14986 = vrcp.f32 %v1576_v63  ;;  %v1688_v42 = vmul.f32 %v14965_v0, %v19023_v45  ;;  %v1932_v10 = vmul.f32 %v19024_v61, %v1686_v48  ;;  %1971 = vst.msk [vmem:[#allocation2 + $0x60] sm:$0xff] %vm762_vm2, %v1930_v56  ;;  %13168 = vmatprep.subr.msk.mxu1 %vm983_vm0, %v16454_v37  ;;  %v2130_v18 = vld [vmem:[#allocation2 + $0x21] sm:$0xff]  ;;  %v19032_v54 = vld [vmem:[#allocation36_spill] sm:$0xff]  ;;  %v1585_v7 = vadd.f32 1.0, %v16372_v15  ;;  %v19033_v3 = vld [vmem:[#allocation17_spill] sm:$0xff] }
 0x298   : > { %v14969_v36 = vpop.eup %14968  ;;  %14988 = vrcp.f32 %v1577_v50  ;;  %v1689_v17 = vmul.f32 %v14967_v16, %v19025_v26  ;;  %v1933_v28 = vmul.f32 %v19026_v14, %v1687_v23  ;;  %1972 = vst.msk [vmem:[#allocation2 + $0x68] sm:$0xff] %vm762_vm2, %v1931_v49  ;;  %v19029_v40 = vld [vmem:[#allocation15_spill] sm:$0xff]  ;;  %v19030_v63 = vld [vmem:[#allocation34_spill] sm:$0xff]  ;;  %v1586_v52 = vadd.f32 1.0, %v16375_v1  ;;  %v19036_v56 = vld [vmem:[#allocation44_spill] sm:$0xff] }
 0x299   : > { %v14971_v43 = vpop.eup %14970  ;;  %14990 = vrcp.f32 %v1578_v41  ;;  %v1690_v12 = vmul.f32 %v14969_v36, %v19027_v22  ;;  %v1934_v51 = vmul.f32 %v19028_v24, %v1688_v42  ;;  %1973 = vst.msk [vmem:[#allocation2 + $0x70] sm:$0xff] %vm762_vm2, %v1932_v10  ;;  %13062 = vmatmul.mubr.msk.f32.gmra.mrb[6].mxu1 %vm762_vm2, %v2129_v47  ;;  %v19034_v46 = vld [vmem:[#allocation42_spill] sm:$0xff]  ;;  %v2131_v58 = vld [vmem:[#allocation2 + $0x29] sm:$0xff]  ;;  %v2132_v15 = vld [vmem:[#allocation2 + $0x31] sm:$0xff]  ;;  %v1587_v27 = vadd.f32 1.0, %v16378_v29 }
 0x29a   : > { %v14973_v30 = vpop.eup %14972  ;;  %14992 = vrcp.f32 %v1579_v60  ;;  %v1691_v39 = vmul.f32 %v14971_v43, %v19029_v40  ;;  %v1935_v53 = vmul.f32 %v19030_v63, %v1689_v17  ;;  %1974 = vst.msk [vmem:[#allocation2 + $0x78] sm:$0xff] %vm762_vm2, %v1933_v28  ;;  %13064 = vmatprep.mubr.msk.f32.mxu1 %vm762_vm2, %v2130_v18  ;;  %v19035_v48 = vld [vmem:[#allocation19_spill] sm:$0xff]  ;;  %v16507_v60 = vpop.permute.xlu0 %1885  ;;  %v19037_v23 = vld [vmem:[#allocation21_spill] sm:$0xff]  ;;  %v1588_v16 = vadd.f32 1.0, %v16381_v25  ;;  %v19040_v42 = vld [vmem:[#allocation46_spill] sm:$0xff] }
 0x29b   : > { %v14975_v19 = vpop.eup %14974  ;;  %14994 = vrcp.f32 %v1580_v4  ;;  %v1692_v6 = vmul.f32 %v14973_v30, %v19031_v21  ;;  %v1936_v50 = vmul.f32 %v19032_v54, %v1690_v12  ;;  %1975 = vst.msk [vmem:[#allocation2 + $0x80] sm:$0xff] %vm762_vm2, %v1934_v51  ;;  %v19038_v49 = vld [vmem:[#allocation45_spill] sm:$0xff]  ;;  %v19039_v4 = vld [vmem:[#allocation22_spill] sm:$0xff]  ;;  %v19043_v17 = vld [vmem:[#allocation47_spill] sm:$0xff] }
 0x29c   : > { %v14977_v62 = vpop.eup %14976  ;;  %14996 = vrcp.f32 %v1581_v11  ;;  %v1693_v20 = vmul.f32 %v14975_v19, %v19033_v3  ;;  %v1937_v55 = vmul.f32 %v19034_v46, %v1691_v39  ;;  %1976 = vst.msk [vmem:[#allocation2 + $0x88] sm:$0xff] %vm762_vm2, %v1935_v53  ;;  %v19041_v10 = vld [vmem:[#allocation49_spill] sm:$0xff]  ;;  %v19042_v11 = vld [vmem:[#allocation23_spill] sm:$0xff]  ;;  %v19044_v25 = vld [vmem:[#allocation24_spill] sm:$0xff]  ;;  %v1891_v39 = vpop.permute.xlu1 %1890 }
 0x29d   : > { %v14979_v41 = vpop.eup %14978  ;;  %14998 = vrcp.f32 %v1582_v34  ;;  %v1694_v2 = vmul.f32 %v14977_v62, %v19035_v48  ;;  %v1938_v13 = vmul.f32 %v19036_v56, %v1692_v6  ;;  %1977 = vst.msk [vmem:[#allocation2 + $0x90] sm:$0xff] %vm762_vm2, %v1936_v50  ;;  %13065 = vmatmul.mubr.msk.f32.gmra.mrb[8].mxu1 %vm762_vm2, %v2131_v58  ;;  %v1589_v36 = vadd.f32 1.0, %v19041_v10  ;;  %v2133_v28 = vld [vmem:[#allocation2 + $0x39] sm:$0xff]  ;;  %v19045_v34 = vld [vmem:[#allocation48_spill] sm:$0xff]  ;;  %v2134_v12 = vld [vmem:[#allocation2 + $0x41] sm:$0xff] }
 0x29e   : > { %v14981_v0 = vpop.eup %14980  ;;  %15000 = vrcp.f32 %v1583_v32  ;;  %v1695_v59 = vmul.f32 %v14979_v41, %v19037_v23  ;;  %v1939_v1 = vmul.f32 %v19038_v49, %v1693_v20  ;;  %1978 = vst.msk [vmem:[#allocation2 + $0x98] sm:$0xff] %vm762_vm2, %v1937_v55  ;;  %13067 = vmatprep.mubr.msk.f32.mxu1 %vm762_vm2, %v2132_v15  ;;  %v19046_v51 = vld [vmem:[#allocation25_spill] sm:$0xff]  ;;  %v19047_v30 = vld [vmem:[#allocation50_spill] sm:$0xff]  ;;  %v19048_v63 = vld [vmem:[#allocation27_spill] sm:$0xff]  ;;  %v1896_v6 = vpop.permute.xlu0 %1895 }
 0x29f   : > { %v14983_v33 = vpop.eup %14982  ;;  %15002 = vrcp.f32 %v1584_v38  ;;  %v1696_v45 = vmul.f32 %v14981_v0, %v19039_v4  ;;  %v1940_v61 = vmul.f32 %v19040_v42, %v1694_v2  ;;  %1979 = vst.msk [vmem:[#allocation2 + $0xa0] sm:$0xff] %vm762_vm2, %v1938_v13  ;;  %v19049_v19 = vld [vmem:[#allocation51_spill] sm:$0xff]  ;;  %v19050_v54 = vld [vmem:[#allocation29_spill] sm:$0xff]  ;;  %v19051_v20 = vld [vmem:[#allocation30_spill] sm:$0xff] }
 0x2a0   : > { %v14985_v29 = vpop.eup %14984  ;;  %15004 = vrcp.f32 %v1585_v7  ;;  %v1697_v26 = vmul.f32 %v14983_v33, %v19042_v11  ;;  %v1941_v14 = vmul.f32 %v19043_v17, %v1695_v59  ;;  %1980 = vst.msk [vmem:[#allocation2 + $0xa8] sm:$0xff] %vm762_vm2, %v1939_v1  ;;  %v2135_v7 = vld [vmem:[#allocation2 + $0x49] sm:$0xff]  ;;  %v2136_v58 = vld [vmem:[#allocation2 + $0x51] sm:$0xff]  ;;  %v2137_v59 = vld [vmem:[#allocation2 + $0x59] sm:$0xff]  ;;  %v1901_v49 = vpop.permute.xlu1 %1900 }
 0x2a1   : > { %v14987_v47 = vpop.eup %14986  ;;  %15006 = vrcp.f32 %v1586_v52  ;;  %v1698_v43 = vmul.f32 %v14985_v29, %v19044_v25  ;;  %v1942_v22 = vmul.f32 %v19045_v34, %v1696_v45  ;;  %1981 = vst.msk [vmem:[#allocation2 + $0xb0] sm:$0xff] %vm762_vm2, %v1940_v61  ;;  %13068 = vmatmul.mubr.msk.f32.gmra.mrb[10].mxu1 %vm762_vm2, %v2133_v28  ;;  %v19052_v52 = vld [vmem:[#allocation31_spill] sm:$0xff]  ;;  %v19053_v56 = vld [vmem:[#allocation32_spill] sm:$0xff]  ;;  %v19054_v0 = vld [vmem:[#allocation33_spill] sm:$0xff] }
 0x2a2   : > { %v14989_v24 = vpop.eup %14988  ;;  %15008 = vrcp.f32 %v1587_v27  ;;  %v1699_v18 = vmul.f32 %v14987_v47, %v19046_v51  ;;  %v1943_v32 = vmul.f32 %v19047_v30, %v1697_v26  ;;  %1982 = vst.msk [vmem:[#allocation2 + $0xb8] sm:$0xff] %vm762_vm2, %v1941_v14  ;;  %13070 = vmatprep.mubr.msk.f32.mxu1 %vm762_vm2, %v2134_v12  ;;  %v19055_v1 = vld [vmem:[#allocation35_spill] sm:$0xff]  ;;  %v1906_v45 = vpop.permute.xlu0 %1905  ;;  %v19056_v42 = vld [vmem:[#allocation37_spill] sm:$0xff]  ;;  %v19057_v10 = vld [vmem:[#allocation38_spill] sm:$0xff] }
 0x2a3   : > { %v14991_v40 = vpop.eup %14990  ;;  %15010 = vrcp.f32 %v1588_v16  ;;  %v1700_v53 = vmul.f32 %v14989_v24, %v19048_v63  ;;  %v1944_v38 = vmul.f32 %v19049_v19, %v1698_v43  ;;  %1983 = vst.msk [vmem:[#allocation2 + $0xc0] sm:$0xff] %vm762_vm2, %v1942_v22  ;;  %v19058_v26 = vld [vmem:[#allocation39_spill] sm:$0xff]  ;;  %v2140_v34 = vld [vmem:[#allocation2 + $0x71] sm:$0xff]  ;;  %v2141_v63 = vld [vmem:[#allocation2 + $0x79] sm:$0xff] }
 0x2a4   : > { %v14993_v21 = vpop.eup %14992  ;;  %15012 = vrcp.f32 %v1589_v36  ;;  %v1701_v50 = vmul.f32 %v14991_v40, %v19050_v54  ;;  %v1945_v62 = vmul.f32 %v16402_v35, %v1699_v18  ;;  %1984 = vst.msk [vmem:[#allocation2 + $0xc8] sm:$0xff] %vm762_vm2, %v1943_v32  ;;  %v2139_v28 = vld [vmem:[#allocation2 + $0x69] sm:$0xff]  ;;  %v1911_v51 = vpop.permute.xlu1 %1910  ;;  %v2142_v19 = vld [vmem:[#allocation2 + $0x81] sm:$0xff] }
 0x2a5   : > { %v14995_v3 = vpop.eup %14994  ;;  %v1702_v46 = vmul.f32 %v14993_v21, %v19051_v20  ;;  %v1946_v55 = vmul.f32 %v16408_v57, %v1700_v53  ;;  %1985 = vst.msk [vmem:[#allocation2 + $0xd0] sm:$0xff] %vm762_vm2, %v1944_v38  ;;  %13071 = vmatmul.mubr.msk.f32.gmra.mrb[12].mxu1 %vm762_vm2, %v2135_v7  ;;  %v19061_v18 = vld [vmem:[#allocation43_spill] sm:$0xff]  ;;  %v2144_v21 = vld [vmem:[#allocation2 + $0x91] sm:$0xff] }
 0x2a6   : > { %v14997_v41 = vpop.eup %14996  ;;  %v1703_v48 = vmul.f32 %v14995_v3, %v19052_v52  ;;  %v1947_v2 = vmul.f32 %v16430_v31, %v1701_v50  ;;  %1986 = vst.msk [vmem:[#allocation2 + $0xd8] sm:$0xff] %vm762_vm2, %v1945_v62  ;;  %13073 = vmatprep.mubr.msk.f32.mxu1 %vm762_vm2, %v2136_v58  ;;  %v1916_v40 = vpop.permute.xlu0 %1915  ;;  %v2143_v38 = vld [vmem:[#allocation2 + $0x89] sm:$0xff] }
 0x2a7   : > { %v14999_v35 = vpop.eup %14998  ;;  %v1704_v13 = vmul.f32 %v14997_v41, %v19053_v56  ;;  %v1948_v15 = vmul.f32 %v16436_v8, %v1702_v46  ;;  %1987 = vst.msk [vmem:[#allocation2 + $0xe0] sm:$0xff] %vm762_vm2, %v1946_v55  ;;  %v2138_v8 = vld [vmem:[#allocation2 + $0x61] sm:$0xff] }
 0x2a8   : > { %v15001_v57 = vpop.eup %15000  ;;  %v1705_v27 = vmul.f32 %v14999_v35, %v19054_v0  ;;  %v1949_v23 = vmul.f32 %v16468_v44, %v1703_v48  ;;  %1988 = vst.msk [vmem:[#allocation2 + $0xe8] sm:$0xff] %vm762_vm2, %v1947_v2  ;;  %v2146_v54 = vld [vmem:[#allocation2 + $0xa1] sm:$0xff]  ;;  %v2147_v50 = vld [vmem:[#allocation2 + $0xa9] sm:$0xff] }
 0x2a9   : > { %v15003_v31 = vpop.eup %15002  ;;  %v1706_v33 = vmul.f32 %v15001_v57, %v19055_v1  ;;  %v1950_v16 = vmul.f32 %v16476_v9, %v1704_v13  ;;  %1989 = vst.msk [vmem:[#allocation2 + $0xf0] sm:$0xff] %vm762_vm2, %v1948_v15  ;;  %13074 = vmatmul.mubr.msk.f32.gmra.mrb[14].mxu1 %vm762_vm2, %v2137_v59  ;;  %v2148_v62 = vld [vmem:[#allocation2 + $0xb1] sm:$0xff]  ;;  %v2089_v15 = vld [vmem:[#allocation2] sm:$0xff]  ;;  %v2090_v57 = vld [vmem:[#allocation2 + $0x8] sm:$0xff] }
 0x2aa   : > { %v15005_v4 = vpop.eup %15004  ;;  %v1707_v61 = vmul.f32 %v15003_v31, %v19056_v42  ;;  %v1951_v44 = vmul.f32 %v16500_v5, %v1705_v27  ;;  %1990 = vst.msk [vmem:[#allocation2 + $0xf8] sm:$0xff] %vm762_vm2, %v1949_v23  ;;  %13076 = vmatprep.mubr.msk.f32.mxu1 %vm762_vm2, %v2138_v8  ;;  %v19059_v5 = vld [vmem:[#allocation40_spill] sm:$0xff]  ;;  %v2149_v7 = vld [vmem:[#allocation2 + $0xb9] sm:$0xff]  ;;  %v16600_v0 = vld [vmem:[%s18863_s8 + $0xc] sm:$0xf] }
 0x2ab   : > { %v15007_v29 = vpop.eup %15006  ;;  %v1708_v36 = vmul.f32 %v15005_v4, %v19057_v10  ;;  %v1952_v9 = vmul.f32 %v16507_v60, %v1706_v33  ;;  %1991 = vst.msk [vmem:[#allocation2 + $0x100] sm:$0xff] %vm762_vm2, %v1950_v16  ;;  %v19060_v60 = vld [vmem:[#allocation41_spill] sm:$0xff]  ;;  %v2150_v3 = vld [vmem:[#allocation2 + $0xc1] sm:$0xff]  ;;  %v2091_v27 = vld [vmem:[#allocation2 + $0x10] sm:$0xff] }
 0x2ac   : > { %v15009_v11 = vpop.eup %15008  ;;  %v1709_v17 = vmul.f32 %v15007_v29, %v19058_v26  ;;  %v1953_v14 = vmul.f32 %v1891_v39, %v1707_v61  ;;  %1992 = vst.msk [vmem:[#allocation2 + $0x108] sm:$0xff] %vm762_vm2, %v1951_v44  ;;  %v2151_v20 = vld [vmem:[#allocation2 + $0xc9] sm:$0xff]  ;;  %v2092_v23 = vld [vmem:[#allocation2 + $0x18] sm:$0xff]  ;;  %v2093_v59 = vld [vmem:[#allocation2 + $0x20] sm:$0xff] }
 0x2ad   : > { %v15011_v47 = vpop.eup %15010  ;;  %v1710_v25 = vmul.f32 %v15009_v11, %v19059_v5  ;;  %v1954_v43 = vmul.f32 %v1896_v6, %v1708_v36  ;;  %1993 = vst.msk [vmem:[#allocation2 + $0x110] sm:$0xff] %vm762_vm2, %v1952_v9  ;;  %13077 = vmatmul.mubr.msk.f32.gmra.mrb[16].mxu1 %vm762_vm2, %v2139_v28  ;;  %v2145_v6 = vld [vmem:[#allocation2 + $0x99] sm:$0xff]  ;;  %v2152_v46 = vld [vmem:[#allocation2 + $0xd1] sm:$0xff]  ;;  %v2094_v31 = vld [vmem:[#allocation2 + $0x28] sm:$0xff] }
 0x2ae   : > { %v15013_v22 = vpop.eup %15012  ;;  %v1711_v12 = vmul.f32 %v15011_v47, %v19060_v60  ;;  %v1955_v24 = vmul.f32 %v1901_v49, %v1709_v17  ;;  %1994 = vst.msk [vmem:[#allocation2 + $0x118] sm:$0xff] %vm762_vm2, %v1953_v14  ;;  %13079 = vmatprep.mubr.msk.f32.mxu1 %vm762_vm2, %v2140_v34  ;;  %v2153_v55 = vld [vmem:[#allocation2 + $0xd9] sm:$0xff]  ;;  %v2095_v49 = vld [vmem:[#allocation2 + $0x30] sm:$0xff]  ;;  %v2098_v33 = vld [vmem:[#allocation2 + $0x48] sm:$0xff] }
 0x2af   : > { %v1712_v30 = vmul.f32 %v15013_v22, %v19061_v18  ;;  %v1956_v32 = vmul.f32 %v1906_v45, %v1710_v25  ;;  %1995 = vst.msk [vmem:[#allocation2 + $0x120] sm:$0xff] %vm762_vm2, %v1954_v43  ;;  %v2154_v58 = vld [vmem:[#allocation2 + $0xe1] sm:$0xff]  ;;  %v2096_v1 = vld [vmem:[#allocation2 + $0x38] sm:$0xff]  ;;  %v2099_v16 = vld [vmem:[#allocation2 + $0x50] sm:$0xff] }
 0x2b0   : > { %v1957_v39 = vmul.f32 %v1911_v51, %v1711_v12  ;;  %1996 = vst.msk [vmem:[#allocation2 + $0x128] sm:$0xff] %vm762_vm2, %v1955_v24  ;;  %v2155_v41 = vld [vmem:[#allocation2 + $0xe9] sm:$0xff]  ;;  %v2100_v8 = vld [vmem:[#allocation2 + $0x58] sm:$0xff]  ;;  %v2101_v4 = vld [vmem:[#allocation2 + $0x60] sm:$0xff] }
 0x2b1   : > { %v1958_v53 = vmul.f32 %v1916_v40, %v1712_v30  ;;  %1997 = vst.msk [vmem:[#allocation2 + $0x130] sm:$0xff] %vm762_vm2, %v1956_v32  ;;  %13080 = vmatmul.mubr.msk.f32.gmra.mrb[18].mxu1 %vm762_vm2, %v2141_v63  ;;  %v2156_v52 = vld [vmem:[#allocation2 + $0xf1] sm:$0xff]  ;;  %v2102_v45 = vld [vmem:[#allocation2 + $0x68] sm:$0xff]  ;;  %v2105_v44 = vld [vmem:[#allocation2 + $0x80] sm:$0xff] }
 0x2b2   : > { %1998 = vst.msk [vmem:[#allocation2 + $0x138] sm:$0xff] %vm762_vm2, %v1957_v39  ;;  %13082 = vmatprep.mubr.msk.f32.mxu1 %vm762_vm2, %v2142_v19  ;;  %v2157_v48 = vld [vmem:[#allocation2 + $0xf9] sm:$0xff]  ;;  %v2103_v42 = vld [vmem:[#allocation2 + $0x70] sm:$0xff]  ;;  %v2106_v29 = vld [vmem:[#allocation2 + $0x88] sm:$0xff] }
 0x2b3   : > { %1999 = vst.msk [vmem:[#allocation2 + $0x140] sm:$0xf] %vm842_vm3, %v1958_v53  ;;  %v2158_v2 = vld [vmem:[#allocation2 + $0x101] sm:$0xff]  ;;  %v2104_v61 = vld [vmem:[#allocation2 + $0x78] sm:$0xff]  ;;  %v2107_v10 = vld [vmem:[#allocation2 + $0x90] sm:$0xff] }
 0x2b4   : > { %v2159_v35 = vld [vmem:[#allocation2 + $0x109] sm:$0xff]  ;;  %v2108_v36 = vld [vmem:[#allocation2 + $0x98] sm:$0xff]  ;;  %v2109_v9 = vld [vmem:[#allocation2 + $0xa0] sm:$0xff] }
 0x2b5   : > { %13083 = vmatmul.mubr.msk.f32.gmra.mrb[20].mxu1 %vm762_vm2, %v2143_v38  ;;  %v2160_v56 = vld [vmem:[#allocation2 + $0x111] sm:$0xff]  ;;  %v2110_v11 = vld [vmem:[#allocation2 + $0xa8] sm:$0xff]  ;;  %v2113_v14 = vld [vmem:[#allocation2 + $0xc0] sm:$0xff] }
 0x2b6   : > { %13085 = vmatprep.mubr.msk.f32.mxu1 %vm762_vm2, %v2144_v21  ;;  %v2161_v13 = vld [vmem:[#allocation2 + $0x119] sm:$0xff]  ;;  %v2111_v26 = vld [vmem:[#allocation2 + $0xb0] sm:$0xff]  ;;  %v2114_v28 = vld [vmem:[#allocation2 + $0xc8] sm:$0xff] }
 0x2b7   : > { %v2112_v17 = vld [vmem:[#allocation2 + $0xb8] sm:$0xff]  ;;  %v2115_v47 = vld [vmem:[#allocation2 + $0xd0] sm:$0xff]  ;;  %v2117_v25 = vld [vmem:[#allocation2 + $0xe0] sm:$0xff] }
 0x2b8   : > { %v2116_v5 = vld [vmem:[#allocation2 + $0xd8] sm:$0xff]  ;;  %v2118_v43 = vld [vmem:[#allocation2 + $0xe8] sm:$0xff]  ;;  %v2119_v34 = vld [vmem:[#allocation2 + $0xf0] sm:$0xff] }
 0x2b9   : > { %13086 = vmatmul.mubr.msk.f32.gmra.mrb[22].mxu1 %vm762_vm2, %v2145_v6  ;;  %v2120_v22 = vld [vmem:[#allocation2 + $0xf8] sm:$0xff]  ;;  %v2121_v60 = vld [vmem:[#allocation2 + $0x100] sm:$0xff]  ;;  %v2122_v12 = vld [vmem:[#allocation2 + $0x108] sm:$0xff] }
 0x2ba   : > { %13088 = vmatprep.mubr.msk.f32.mxu1 %vm762_vm2, %v2146_v54  ;;  %v2123_v24 = vld [vmem:[#allocation2 + $0x110] sm:$0xff]  ;;  %v2124_v51 = vld [vmem:[#allocation2 + $0x118] sm:$0xff]  ;;  %v2876_v18 = vld [vmem:[#allocation2 + $0x2] sm:$0xff] }
 0x2bb   : > { %v2877_v30 = vld [vmem:[#allocation2 + $0xa] sm:$0xff]  ;;  %v16648_v40 = vld [vmem:[#allocation2 + $0x12] sm:$0xff]  ;;  %v16656_v39 = vld [vmem:[#allocation2 + $0x1a] sm:$0xff] }
 0x2bc   : > { %v16645_v32 = vld [vmem:[%s18863_s8 + $0x10] sm:$0xf]  ;;  %v16660_v63 = vld [vmem:[#allocation2 + $0x22] sm:$0xff]  ;;  %v16672_v38 = vld [vmem:[#allocation2 + $0x3a] sm:$0xff] }
 0x2bd   : > { %13089 = vmatmul.mubr.msk.f32.gmra.mrb[24].mxu1 %vm762_vm2, %v2147_v50  ;;  %v16664_v53 = vld [vmem:[#allocation2 + $0x2a] sm:$0xff]  ;;  %v16668_v19 = vld [vmem:[#allocation2 + $0x32] sm:$0xff]  ;;  %v16676_v21 = vld [vmem:[#allocation2 + $0x42] sm:$0xff] }
 0x2be   : > { %13091 = vmatprep.mubr.msk.f32.mxu1 %vm762_vm2, %v2148_v62  ;;  %v16680_v6 = vld [vmem:[#allocation2 + $0x4a] sm:$0xff]  ;;  %v16684_v54 = vld [vmem:[#allocation2 + $0x52] sm:$0xff]  ;;  %v2887_v50 = vld [vmem:[#allocation2 + $0x5a] sm:$0xff] }
 0x2bf   : > { %v2888_v62 = vld [vmem:[#allocation2 + $0x62] sm:$0xff] }
 0x2c1   : > { %13092 = vmatmul.mubr.msk.f32.gmra.mrb[26].mxu1 %vm762_vm2, %v2149_v7  ;;  %v2889_v7 = vld [vmem:[#allocation2 + $0x6a] sm:$0xff] }
 0x2c2   : > { %13094 = vmatprep.mubr.msk.f32.mxu1 %vm762_vm2, %v2150_v3  ;;  %v2890_v3 = vld [vmem:[#allocation2 + $0x72] sm:$0xff] }
 0x2c5   : > { %13095 = vmatmul.mubr.msk.f32.gmra.mrb[28].mxu1 %vm762_vm2, %v2151_v20  ;;  %v2891_v20 = vld [vmem:[#allocation2 + $0x7a] sm:$0xff] }
 0x2c6   : > { %13097 = vmatprep.mubr.msk.f32.mxu1 %vm762_vm2, %v2152_v46  ;;  %v2892_v46 = vld [vmem:[#allocation2 + $0x82] sm:$0xff] }
 0x2c9   : > { %13098 = vmatmul.mubr.msk.f32.gmra.mrb[30].mxu1 %vm762_vm2, %v2153_v55  ;;  %v2893_v55 = vld [vmem:[#allocation2 + $0x8a] sm:$0xff] }
 0x2ca   : > { %13100 = vmatprep.mubr.msk.f32.mxu1 %vm762_vm2, %v2154_v58  ;;  %v2894_v58 = vld [vmem:[#allocation2 + $0x92] sm:$0xff] }
 0x2cd   : > { %13101 = vmatmul.mubr.msk.f32.gmra.mrb[32].mxu1 %vm762_vm2, %v2155_v41  ;;  %v2895_v41 = vld [vmem:[#allocation2 + $0x9a] sm:$0xff] }
 0x2ce   : > { %13103 = vmatprep.mubr.msk.f32.mxu1 %vm762_vm2, %v2156_v52  ;;  %v2896_v52 = vld [vmem:[#allocation2 + $0xa2] sm:$0xff] }
 0x2d1   : > { %13104 = vmatmul.mubr.msk.f32.gmra.mrb[34].mxu1 %vm762_vm2, %v2157_v48  ;;  %v2897_v48 = vld [vmem:[#allocation2 + $0xaa] sm:$0xff] }
 0x2d2   : > { %13106 = vmatprep.mubr.msk.f32.mxu1 %vm762_vm2, %v2158_v2  ;;  %v2898_v2 = vld [vmem:[#allocation2 + $0xb2] sm:$0xff] }
 0x2d5   : > { %13107 = vmatmul.mubr.msk.f32.gmra.mrb[36].mxu1 %vm762_vm2, %v2159_v35  ;;  %v2899_v35 = vld [vmem:[#allocation2 + $0xba] sm:$0xff] }
 0x2d6   : > { %13109 = vmatprep.mubr.msk.f32.mxu1 %vm762_vm2, %v2160_v56  ;;  %v2900_v56 = vld [vmem:[#allocation2 + $0xc2] sm:$0xff] }
 0x2d9   : > { %13110 = vmatmul.mubr.msk.f32.gmra.mrb[38].mxu1 %vm762_vm2, %v2161_v13  ;;  %v2901_v13 = vld [vmem:[#allocation2 + $0xca] sm:$0xff] }
 0x2da   : > { %13114 = vmatprep.mubr.msk.f32.mxu1 %vm762_vm2, %v2089_v15  ;;  %v2902_v15 = vld [vmem:[#allocation2 + $0xd2] sm:$0xff] }
 0x2dd   : > { %13115 = vmatmul.mubr.msk.f32.vlgmr.msra.gmra.mrb[4].mxu1 %vm762_vm2, %v2090_v57  ;;  %v2903_v57 = vld [vmem:[#allocation2 + $0xda] sm:$0xff] }
 0x2de   : > { %13169 = vmatpush3.msk.msra.mxu1 %vm983_vm0, %v16454_v37  ;;  %13117 = vmatprep.mubr.msk.f32.mxu1 %vm762_vm2, %v2091_v27  ;;  %v2097_v37 = vld [vmem:[#allocation2 + $0x40] sm:$0xff]  ;;  %v2905_v27 = vld [vmem:[#allocation2 + $0xea] sm:$0xff] }
 0x2df   : > { %13224 = vmatprep.subr.msk.mxu1 %vm983_vm0, %v16600_v0 }
 0x2e1   : > { %13118 = vmatmul.mubr.msk.f32.gmra.mrb[6].mxu1 %vm762_vm2, %v2092_v23  ;;  %v2906_v23 = vld [vmem:[#allocation2 + $0xf2] sm:$0xff] }
 0x2e2   : > { %13120 = vmatprep.mubr.msk.f32.mxu1 %vm762_vm2, %v2093_v59  ;;  %v2907_v59 = vld [vmem:[#allocation2 + $0xfa] sm:$0xff] }
 0x2e5   : > { %13121 = vmatmul.mubr.msk.f32.gmra.mrb[8].mxu1 %vm762_vm2, %v2094_v31  ;;  %v2908_v31 = vld [vmem:[#allocation2 + $0x102] sm:$0xff] }
 0x2e6   : > { %13123 = vmatprep.mubr.msk.f32.mxu1 %vm762_vm2, %v2095_v49  ;;  %v2909_v49 = vld [vmem:[#allocation2 + $0x10a] sm:$0xff] }
 0x2e9   : > { %13124 = vmatmul.mubr.msk.f32.gmra.mrb[10].mxu1 %vm762_vm2, %v2096_v1  ;;  %v2910_v1 = vld [vmem:[#allocation2 + $0x112] sm:$0xff] }
 0x2ea   : > { %13126 = vmatprep.mubr.msk.f32.mxu1 %vm762_vm2, %v2097_v37  ;;  %v2911_v37 = vld [vmem:[#allocation2 + $0x11a] sm:$0xff] }
 0x2ed   : > { %13127 = vmatmul.mubr.msk.f32.gmra.mrb[12].mxu1 %vm762_vm2, %v2098_v33  ;;  %v11732_v33 = vld [vmem:[%s18863_s8 + $0x14] sm:$0xf] }
 0x2ee   : > { %13129 = vmatprep.mubr.msk.f32.mxu1 %vm762_vm2, %v2099_v16  ;;  %v3340_v16 = vld [vmem:[#allocation2 + $0x122] sm:$0xff] }
 0x2f1   : > { %13130 = vmatmul.mubr.msk.f32.gmra.mrb[14].mxu1 %vm762_vm2, %v2100_v8  ;;  %v3341_v8 = vld [vmem:[#allocation2 + $0x12a] sm:$0xff] }
 0x2f2   : > { %13132 = vmatprep.mubr.msk.f32.mxu1 %vm762_vm2, %v2101_v4  ;;  %v3736_v4 = vld [vmem:[#allocation2 + $0x13] sm:$0xff] }
 0x2f5   : > { %13133 = vmatmul.mubr.msk.f32.gmra.mrb[16].mxu1 %vm762_vm2, %v2102_v45  ;;  %v3737_v45 = vld [vmem:[#allocation2 + $0x1b] sm:$0xff] }
 0x2f6   : > { %13135 = vmatprep.mubr.msk.f32.mxu1 %vm762_vm2, %v2103_v42  ;;  %v16768_v42 = vld [vmem:[%s18863_s8 + $0x18] sm:$0xf] }
 0x2f9   : > { %13136 = vmatmul.mubr.msk.f32.gmra.mrb[18].mxu1 %vm762_vm2, %v2104_v61  ;;  %v3738_v61 = vld [vmem:[#allocation2 + $0x23] sm:$0xff] }
 0x2fa   : > { %13138 = vmatprep.mubr.msk.f32.mxu1 %vm762_vm2, %v2105_v44  ;;  %v3739_v44 = vld [vmem:[#allocation2 + $0x2b] sm:$0xff] }
 0x2fd   : > { %13139 = vmatmul.mubr.msk.f32.gmra.mrb[20].mxu1 %vm762_vm2, %v2106_v29  ;;  %v3740_v29 = vld [vmem:[#allocation2 + $0x33] sm:$0xff] }
 0x2fe   : > { %13141 = vmatprep.mubr.msk.f32.mxu1 %vm762_vm2, %v2107_v10  ;;  %v3741_v10 = vld [vmem:[#allocation2 + $0x3b] sm:$0xff] }
 0x301   : > { %13142 = vmatmul.mubr.msk.f32.gmra.mrb[22].mxu1 %vm762_vm2, %v2108_v36  ;;  %v3742_v36 = vld [vmem:[#allocation2 + $0x43] sm:$0xff] }
 0x302   : > { %13144 = vmatprep.mubr.msk.f32.mxu1 %vm762_vm2, %v2109_v9  ;;  %v3743_v9 = vld [vmem:[#allocation2 + $0x4b] sm:$0xff] }
 0x305   : > { %13145 = vmatmul.mubr.msk.f32.gmra.mrb[24].mxu1 %vm762_vm2, %v2110_v11  ;;  %v3744_v11 = vld [vmem:[#allocation2 + $0x53] sm:$0xff] }
 0x306   : > { %13147 = vmatprep.mubr.msk.f32.mxu1 %vm762_vm2, %v2111_v26  ;;  %v3745_v26 = vld [vmem:[#allocation2 + $0x5b] sm:$0xff] }
 0x309   : > { %13148 = vmatmul.mubr.msk.f32.gmra.mrb[26].mxu1 %vm762_vm2, %v2112_v17  ;;  %v3746_v17 = vld [vmem:[#allocation2 + $0x63] sm:$0xff] }
 0x30a   : > { %13150 = vmatprep.mubr.msk.f32.mxu1 %vm762_vm2, %v2113_v14  ;;  %v3747_v14 = vld [vmem:[#allocation2 + $0x6b] sm:$0xff] }
 0x30d   : > { %13151 = vmatmul.mubr.msk.f32.gmra.mrb[28].mxu1 %vm762_vm2, %v2114_v28  ;;  %v3748_v28 = vld [vmem:[#allocation2 + $0x73] sm:$0xff] }
 0x30e   : > { %13153 = vmatprep.mubr.msk.f32.mxu1 %vm762_vm2, %v2115_v47  ;;  %v3749_v47 = vld [vmem:[#allocation2 + $0x7b] sm:$0xff] }
 0x311   : > { %13154 = vmatmul.mubr.msk.f32.gmra.mrb[30].mxu1 %vm762_vm2, %v2116_v5  ;;  %v3750_v5 = vld [vmem:[#allocation2 + $0x83] sm:$0xff] }
 0x312   : > { %13156 = vmatprep.mubr.msk.f32.mxu1 %vm762_vm2, %v2117_v25  ;;  %v3751_v25 = vld [vmem:[#allocation2 + $0x8b] sm:$0xff] }
 0x315   : > { %13157 = vmatmul.mubr.msk.f32.gmra.mrb[32].mxu1 %vm762_vm2, %v2118_v43  ;;  %v3752_v43 = vld [vmem:[#allocation2 + $0x93] sm:$0xff] }
 0x316   : > { %13159 = vmatprep.mubr.msk.f32.mxu1 %vm762_vm2, %v2119_v34  ;;  %v3753_v34 = vld [vmem:[#allocation2 + $0x9b] sm:$0xff] }
 0x319   : > { %13160 = vmatmul.mubr.msk.f32.gmra.mrb[34].mxu1 %vm762_vm2, %v2120_v22  ;;  %v3754_v22 = vld [vmem:[#allocation2 + $0xa3] sm:$0xff] }
 0x31a   : > { %13162 = vmatprep.mubr.msk.f32.mxu1 %vm762_vm2, %v2121_v60  ;;  %v3755_v60 = vld [vmem:[#allocation2 + $0xab] sm:$0xff] }
 0x31d   : > { %13163 = vmatmul.mubr.msk.f32.gmra.mrb[36].mxu1 %vm762_vm2, %v2122_v12  ;;  %v3756_v12 = vld [vmem:[#allocation2 + $0xb3] sm:$0xff] }
 0x31e   : > { %13165 = vmatprep.mubr.msk.f32.mxu1 %vm762_vm2, %v2123_v24  ;;  %v3757_v24 = vld [vmem:[#allocation2 + $0xbb] sm:$0xff] }
 0x321   : > { %13166 = vmatmul.mubr.msk.f32.gmra.mrb[38].mxu1 %vm762_vm2, %v2124_v51  ;;  %v3758_v51 = vld [vmem:[#allocation2 + $0xc3] sm:$0xff] }
 0x322   : > { %13170 = vmatprep.mubr.msk.f32.mxu1 %vm762_vm2, %v2876_v18  ;;  %v3759_v18 = vld [vmem:[#allocation2 + $0xcb] sm:$0xff] }
 0x325   : > { %13171 = vmatmul.mubr.msk.f32.vlgmr.msra.gmra.mrb[4].mxu1 %vm762_vm2, %v2877_v30  ;;  %v3760_v30 = vld [vmem:[#allocation2 + $0xd3] sm:$0xff] }
 0x326   : > { %13225 = vmatpush3.msk.msra.mxu1 %vm983_vm0, %v16600_v0  ;;  %13173 = vmatprep.mubr.msk.f32.mxu1 %vm762_vm2, %v16648_v40  ;;  %v2904_v0 = vld [vmem:[#allocation2 + $0xe2] sm:$0xff] }
 0x327   : > { %13280 = vmatprep.subr.msk.mxu1 %vm983_vm0, %v16645_v32 }
 0x329   : > { %13174 = vmatmul.mubr.msk.f32.gmra.mrb[6].mxu1 %vm762_vm2, %v16656_v39 }
 0x32a   : > { %13176 = vmatprep.mubr.msk.f32.mxu1 %vm762_vm2, %v16660_v63 }
 0x32d   : > { %13177 = vmatmul.mubr.msk.f32.gmra.mrb[8].mxu1 %vm762_vm2, %v16664_v53 }
 0x32e   : > { %13179 = vmatprep.mubr.msk.f32.mxu1 %vm762_vm2, %v16668_v19 }
 0x331   : > { %13180 = vmatmul.mubr.msk.f32.gmra.mrb[10].mxu1 %vm762_vm2, %v16672_v38 }
 0x332   : > { %13182 = vmatprep.mubr.msk.f32.mxu1 %vm762_vm2, %v16676_v21 }
 0x335   : > { %13183 = vmatmul.mubr.msk.f32.gmra.mrb[12].mxu1 %vm762_vm2, %v16680_v6 }
 0x336   : > { %13185 = vmatprep.mubr.msk.f32.mxu1 %vm762_vm2, %v16684_v54 }
 0x339   : > { %13186 = vmatmul.mubr.msk.f32.gmra.mrb[14].mxu1 %vm762_vm2, %v2887_v50 }
 0x33a   : > { %13188 = vmatprep.mubr.msk.f32.mxu1 %vm762_vm2, %v2888_v62 }
 0x33d   : > { %13189 = vmatmul.mubr.msk.f32.gmra.mrb[16].mxu1 %vm762_vm2, %v2889_v7 }
 0x33e   : > { %13191 = vmatprep.mubr.msk.f32.mxu1 %vm762_vm2, %v2890_v3 }
 0x341   : > { %13192 = vmatmul.mubr.msk.f32.gmra.mrb[18].mxu1 %vm762_vm2, %v2891_v20 }
 0x342   : > { %13194 = vmatprep.mubr.msk.f32.mxu1 %vm762_vm2, %v2892_v46 }
 0x345   : > { %13195 = vmatmul.mubr.msk.f32.gmra.mrb[20].mxu1 %vm762_vm2, %v2893_v55 }
 0x346   : > { %13197 = vmatprep.mubr.msk.f32.mxu1 %vm762_vm2, %v2894_v58 }
 0x349   : > { %13198 = vmatmul.mubr.msk.f32.gmra.mrb[22].mxu1 %vm762_vm2, %v2895_v41 }
 0x34a   : > { %13200 = vmatprep.mubr.msk.f32.mxu1 %vm762_vm2, %v2896_v52 }
 0x34d   : > { %13201 = vmatmul.mubr.msk.f32.gmra.mrb[24].mxu1 %vm762_vm2, %v2897_v48 }
 0x34e   : > { %13203 = vmatprep.mubr.msk.f32.mxu1 %vm762_vm2, %v2898_v2 }
 0x351   : > { %13204 = vmatmul.mubr.msk.f32.gmra.mrb[26].mxu1 %vm762_vm2, %v2899_v35 }
 0x352   : > { %13206 = vmatprep.mubr.msk.f32.mxu1 %vm762_vm2, %v2900_v56 }
 0x355   : > { %13207 = vmatmul.mubr.msk.f32.gmra.mrb[28].mxu1 %vm762_vm2, %v2901_v13 }
 0x356   : > { %13209 = vmatprep.mubr.msk.f32.mxu1 %vm762_vm2, %v2902_v15 }
 0x359   : > { %13210 = vmatmul.mubr.msk.f32.gmra.mrb[30].mxu1 %vm762_vm2, %v2903_v57 }
 0x35a   : > { %13212 = vmatprep.mubr.msk.f32.mxu1 %vm762_vm2, %v2904_v0 }
 0x35d   : > { %13213 = vmatmul.mubr.msk.f32.gmra.mrb[32].mxu1 %vm762_vm2, %v2905_v27 }
 0x35e   : > { %13215 = vmatprep.mubr.msk.f32.mxu1 %vm762_vm2, %v2906_v23 }
 0x361   : > { %13216 = vmatmul.mubr.msk.f32.gmra.mrb[34].mxu1 %vm762_vm2, %v2907_v59 }
 0x362   : > { %13218 = vmatprep.mubr.msk.f32.mxu1 %vm762_vm2, %v2908_v31 }
 0x365   : > { %13219 = vmatmul.mubr.msk.f32.gmra.mrb[36].mxu1 %vm762_vm2, %v2909_v49 }
 0x366   : > { %13221 = vmatprep.mubr.msk.f32.mxu1 %vm762_vm2, %v2910_v1 }
 0x369   : > { %13222 = vmatmul.mubr.msk.f32.gmra.mrb[38].mxu1 %vm762_vm2, %v2911_v37 }
 0x36a   : > { %13226 = vmatprep.mubr.msk.f32.mxu1 %vm762_vm2, %v16648_v40  ;;  %v3762_v40 = vld [vmem:[#allocation2 + $0xe3] sm:$0xff] }
 0x36d   : > { %13227 = vmatmul.mubr.msk.f32.vlgmr.msra.gmra.mrb[4].mxu1 %vm762_vm2, %v16656_v39  ;;  %v3763_v39 = vld [vmem:[#allocation2 + $0xeb] sm:$0xff] }
 0x36e   : > { %13281 = vmatpush3.msk.msra.mxu1 %vm983_vm0, %v16645_v32  ;;  %13229 = vmatprep.mubr.msk.f32.mxu1 %vm762_vm2, %v16660_v63  ;;  %v3761_v32 = vld [vmem:[#allocation2 + $0xdb] sm:$0xff]  ;;  %v3764_v63 = vld [vmem:[#allocation2 + $0xf3] sm:$0xff] }
 0x36f   : > { %13336 = vmatprep.subr.msk.mxu1 %vm983_vm0, %v11732_v33 }
 0x371   : > { %13230 = vmatmul.mubr.msk.f32.gmra.mrb[6].mxu1 %vm762_vm2, %v16664_v53  ;;  %v3765_v53 = vld [vmem:[#allocation2 + $0xfb] sm:$0xff] }
 0x372   : > { %13232 = vmatprep.mubr.msk.f32.mxu1 %vm762_vm2, %v16668_v19  ;;  %v3766_v19 = vld [vmem:[#allocation2 + $0x103] sm:$0xff] }
 0x375   : > { %13233 = vmatmul.mubr.msk.f32.gmra.mrb[8].mxu1 %vm762_vm2, %v16672_v38  ;;  %v3767_v38 = vld [vmem:[#allocation2 + $0x10b] sm:$0xff] }
 0x376   : > { %13235 = vmatprep.mubr.msk.f32.mxu1 %vm762_vm2, %v16676_v21  ;;  %v3768_v21 = vld [vmem:[#allocation2 + $0x113] sm:$0xff] }
 0x379   : > { %13236 = vmatmul.mubr.msk.f32.gmra.mrb[10].mxu1 %vm762_vm2, %v16680_v6  ;;  %v3769_v6 = vld [vmem:[#allocation2 + $0x11b] sm:$0xff] }
 0x37a   : > { %13238 = vmatprep.mubr.msk.f32.mxu1 %vm762_vm2, %v16684_v54  ;;  %v3770_v54 = vld [vmem:[#allocation2 + $0x123] sm:$0xff] }
 0x37d   : > { %13239 = vmatmul.mubr.msk.f32.gmra.mrb[12].mxu1 %vm762_vm2, %v2887_v50  ;;  %v3771_v50 = vld [vmem:[#allocation2 + $0x12b] sm:$0xff] }
 0x37e   : > { %13241 = vmatprep.mubr.msk.f32.mxu1 %vm762_vm2, %v2888_v62  ;;  %v4166_v62 = vld [vmem:[#allocation2 + $0x14] sm:$0xff] }
 0x381   : > { %13242 = vmatmul.mubr.msk.f32.gmra.mrb[14].mxu1 %vm762_vm2, %v2889_v7  ;;  %v4167_v7 = vld [vmem:[#allocation2 + $0x1c] sm:$0xff] }
 0x382   : > { %13244 = vmatprep.mubr.msk.f32.mxu1 %vm762_vm2, %v2890_v3  ;;  %v16812_v3 = vld [vmem:[%s18863_s8 + $0x1c] sm:$0xf] }
 0x385   : > { %13245 = vmatmul.mubr.msk.f32.gmra.mrb[16].mxu1 %vm762_vm2, %v2891_v20  ;;  %v16815_v20 = vld [vmem:[#allocation2 + $0x24] sm:$0xff] }
 0x386   : > { %13247 = vmatprep.mubr.msk.f32.mxu1 %vm762_vm2, %v2892_v46  ;;  %v16823_v46 = vld [vmem:[#allocation2 + $0x2c] sm:$0xff] }
 0x389   : > { %13248 = vmatmul.mubr.msk.f32.gmra.mrb[18].mxu1 %vm762_vm2, %v2893_v55  ;;  %v16827_v55 = vld [vmem:[#allocation2 + $0x34] sm:$0xff] }
 0x38a   : > { %13250 = vmatprep.mubr.msk.f32.mxu1 %vm762_vm2, %v2894_v58  ;;  %v16831_v58 = vld [vmem:[#allocation2 + $0x3c] sm:$0xff] }
 0x38d   : > { %13251 = vmatmul.mubr.msk.f32.gmra.mrb[20].mxu1 %vm762_vm2, %v2895_v41  ;;  %v16835_v41 = vld [vmem:[#allocation2 + $0x44] sm:$0xff] }
 0x38e   : > { %13253 = vmatprep.mubr.msk.f32.mxu1 %vm762_vm2, %v2896_v52  ;;  %v16839_v52 = vld [vmem:[#allocation2 + $0x4c] sm:$0xff] }
 0x391   : > { %13254 = vmatmul.mubr.msk.f32.gmra.mrb[22].mxu1 %vm762_vm2, %v2897_v48  ;;  %v16843_v48 = vld [vmem:[#allocation2 + $0x54] sm:$0xff] }
 0x392   : > { %13256 = vmatprep.mubr.msk.f32.mxu1 %vm762_vm2, %v2898_v2  ;;  %v16847_v2 = vld [vmem:[#allocation2 + $0x5c] sm:$0xff] }
 0x395   : > { %13257 = vmatmul.mubr.msk.f32.gmra.mrb[24].mxu1 %vm762_vm2, %v2899_v35  ;;  %v16851_v35 = vld [vmem:[#allocation2 + $0x64] sm:$0xff] }
 0x396   : > { %13259 = vmatprep.mubr.msk.f32.mxu1 %vm762_vm2, %v2900_v56  ;;  %v16855_v56 = vld [vmem:[#allocation2 + $0x6c] sm:$0xff] }
 0x399   : > { %13260 = vmatmul.mubr.msk.f32.gmra.mrb[26].mxu1 %vm762_vm2, %v2901_v13  ;;  %v16859_v13 = vld [vmem:[#allocation2 + $0x74] sm:$0xff] }
 0x39a   : > { %13262 = vmatprep.mubr.msk.f32.mxu1 %vm762_vm2, %v2902_v15  ;;  %v16863_v15 = vld [vmem:[#allocation2 + $0x7c] sm:$0xff] }
 0x39d   : > { %13263 = vmatmul.mubr.msk.f32.gmra.mrb[28].mxu1 %vm762_vm2, %v2903_v57  ;;  %v16867_v57 = vld [vmem:[#allocation2 + $0x84] sm:$0xff] }
 0x39e   : > { %13265 = vmatprep.mubr.msk.f32.mxu1 %vm762_vm2, %v2904_v0  ;;  %v16871_v0 = vld [vmem:[#allocation2 + $0x8c] sm:$0xff] }
 0x3a1   : > { %13266 = vmatmul.mubr.msk.f32.gmra.mrb[30].mxu1 %vm762_vm2, %v2905_v27  ;;  %v16875_v27 = vld [vmem:[#allocation2 + $0x94] sm:$0xff] }
 0x3a2   : > { %13268 = vmatprep.mubr.msk.f32.mxu1 %vm762_vm2, %v2906_v23  ;;  %v16879_v23 = vld [vmem:[#allocation2 + $0x9c] sm:$0xff] }
 0x3a5   : > { %13269 = vmatmul.mubr.msk.f32.gmra.mrb[32].mxu1 %vm762_vm2, %v2907_v59  ;;  %v16883_v59 = vld [vmem:[#allocation2 + $0xa4] sm:$0xff] }
 0x3a6   : > { %13271 = vmatprep.mubr.msk.f32.mxu1 %vm762_vm2, %v2908_v31  ;;  %v16887_v31 = vld [vmem:[#allocation2 + $0xac] sm:$0xff] }
 0x3a9   : > { %13272 = vmatmul.mubr.msk.f32.gmra.mrb[34].mxu1 %vm762_vm2, %v2909_v49  ;;  %v16891_v49 = vld [vmem:[#allocation2 + $0xb4] sm:$0xff] }
 0x3aa   : > { %13274 = vmatprep.mubr.msk.f32.mxu1 %vm762_vm2, %v2910_v1  ;;  %v16895_v1 = vld [vmem:[#allocation2 + $0xbc] sm:$0xff] }
 0x3ad   : > { %13275 = vmatmul.mubr.msk.f32.gmra.mrb[36].mxu1 %vm762_vm2, %v2911_v37  ;;  %v16899_v37 = vld [vmem:[#allocation2 + $0xc4] sm:$0xff] }
 0x3ae   : > { %13277 = vmatprep.mubr.msk.f32.mxu1 %vm762_vm2, %v3340_v16  ;;  %v16907_v16 = vld [vmem:[#allocation2 + $0xd4] sm:$0xff] }
 0x3b1   : > { %13278 = vmatmul.mubr.msk.f32.gmra.mrb[38].mxu1 %vm762_vm2, %v3341_v8  ;;  %v16911_v8 = vld [vmem:[#allocation2 + $0xdc] sm:$0xff] }
 0x3b2   : > { %13282 = vmatprep.mubr.msk.f32.mxu1 %vm762_vm2, %v3736_v4  ;;  %v16915_v4 = vld [vmem:[#allocation2 + $0xe4] sm:$0xff] }
 0x3b5   : > { %13283 = vmatmul.mubr.msk.f32.vlgmr.msra.gmra.mrb[4].mxu1 %vm762_vm2, %v3737_v45  ;;  %v16919_v45 = vld [vmem:[#allocation2 + $0xec] sm:$0xff] }
 0x3b6   : > { %13337 = vmatpush3.msk.msra.mxu1 %vm983_vm0, %v11732_v33  ;;  %13285 = vmatprep.mubr.msk.f32.mxu1 %vm762_vm2, %v3738_v61  ;;  %v16903_v33 = vld [vmem:[#allocation2 + $0xcc] sm:$0xff]  ;;  %v16927_v61 = vld [vmem:[#allocation2 + $0xfc] sm:$0xff] }
 0x3b7   : > { %13392 = vmatprep.subr.msk.mxu1 %vm983_vm0, %v16768_v42 }
 0x3b9   : > { %13286 = vmatmul.mubr.msk.f32.gmra.mrb[6].mxu1 %vm762_vm2, %v3739_v44  ;;  %v16931_v44 = vld [vmem:[#allocation2 + $0x104] sm:$0xff] }
 0x3ba   : > { %13288 = vmatprep.mubr.msk.f32.mxu1 %vm762_vm2, %v3740_v29  ;;  %v16935_v29 = vld [vmem:[#allocation2 + $0x10c] sm:$0xff] }
 0x3bd   : > { %13289 = vmatmul.mubr.msk.f32.gmra.mrb[8].mxu1 %vm762_vm2, %v3741_v10  ;;  %v16939_v10 = vld [vmem:[#allocation2 + $0x114] sm:$0xff] }
 0x3be   : > { %13291 = vmatprep.mubr.msk.f32.mxu1 %vm762_vm2, %v3742_v36  ;;  %v16943_v36 = vld [vmem:[#allocation2 + $0x11c] sm:$0xff] }
 0x3c1   : > { %13292 = vmatmul.mubr.msk.f32.gmra.mrb[10].mxu1 %vm762_vm2, %v3743_v9  ;;  %v16947_v9 = vld [vmem:[#allocation2 + $0x124] sm:$0xff] }
 0x3c2   : > { %13294 = vmatprep.mubr.msk.f32.mxu1 %vm762_vm2, %v3744_v11  ;;  %v4201_v11 = vld [vmem:[#allocation2 + $0x12c] sm:$0xff] }
 0x3c5   : > { %13295 = vmatmul.mubr.msk.f32.gmra.mrb[12].mxu1 %vm762_vm2, %v3745_v26  ;;  %v16957_v26 = vld [vmem:[%s18863_s8 + $0x20] sm:$0xf] }
 0x3c6   : > { %13297 = vmatprep.mubr.msk.f32.mxu1 %vm762_vm2, %v3746_v17  ;;  %v2010_v17 = vld [vmem:[%s18865_s10] sm:$0xff] }
 0x3c9   : > { %13298 = vmatmul.mubr.msk.f32.gmra.mrb[14].mxu1 %vm762_vm2, %v3747_v14  ;;  %v2011_v14 = vld [vmem:[%s18865_s10 + $0x8] sm:$0xff] }
 0x3ca   : > { %13300 = vmatprep.mubr.msk.f32.mxu1 %vm762_vm2, %v3748_v28  ;;  %v15175_v28 = vmov 0.0|0.0  }
 0x3cb   : > { %14140 = vmatprep.subr.bf16.mxu0 %v15175_v28 }
 0x3cd   : > { %13301 = vmatmul.mubr.msk.f32.gmra.mrb[16].mxu1 %vm762_vm2, %v3749_v47  ;;  %v14141_v47 = vpack.c.bf16 %v2011_v14, %v2010_v17  ;;  %v5468_v17 = vld [vmem:[#allocation2 + $0x86] sm:$0xff]  ;;  %v5469_v14 = vld [vmem:[#allocation2 + $0x8e] sm:$0xff] }
 0x3ce   : > { %13303 = vmatprep.mubr.msk.f32.mxu1 %vm762_vm2, %v3750_v5  ;;  %v2012_v5 = vld [vmem:[%s18865_s10 + $0x10] sm:$0xff] }
 0x3cf   : > { %14142 = vmatpush3.bf16.msra.mxu0 %v14141_v47  ;;  %v5471_v47 = vld [vmem:[#allocation2 + $0x9e] sm:$0xff] }
 0x3d0   : > { %14143 = vmatprep.subr.bf16.mxu0 %v15175_v28  ;;  %v5470_v28 = vld [vmem:[#allocation2 + $0x96] sm:$0xff] }
 0x3d1   : > { %13304 = vmatmul.mubr.msk.f32.gmra.mrb[18].mxu1 %vm762_vm2, %v3751_v25  ;;  %v2013_v25 = vld [vmem:[%s18865_s10 + $0x18] sm:$0xff] }
 0x3d2   : > { %13306 = vmatprep.mubr.msk.f32.mxu1 %vm762_vm2, %v3752_v43  ;;  %v14144_v43 = vpack.c.bf16 %v2013_v25, %v2012_v5  ;;  %v5472_v5 = vld [vmem:[#allocation2 + $0xa6] sm:$0xff]  ;;  %v5473_v25 = vld [vmem:[#allocation2 + $0xae] sm:$0xff] }
 0x3d4   : > { %14145 = vmatpush3.bf16.msra.mxu0 %v14144_v43  ;;  %v5474_v43 = vld [vmem:[#allocation2 + $0xb6] sm:$0xff] }
 0x3d5   : > { %13307 = vmatmul.mubr.msk.f32.gmra.mrb[20].mxu1 %vm762_vm2, %v3753_v34  ;;  %v19063_v34 = vmov 0.0  }
 0x3d6   : > { %13309 = vmatprep.mubr.msk.f32.mxu1 %vm762_vm2, %v3754_v22  ;;  %13560 = vmatprep.subr.mxu0 %v19063_v34  ;;  %v2002_v22 = vld [vmem:[%s638_s30] sm:$0x1]  ;;  %7092 = vst.msk [vmem:[#allocation3] sm:$0xff] %vm6185_vm6, %v19063_v34  ;;  %7093 = vst.msk [vmem:[#allocation3 + $0x8] sm:$0xff] %vm6185_vm6, %v19063_v34 }
 0x3d7   : > { %7132 = vst.msk [vmem:[#allocation3 + $0x133] sm:$0xff] %vm6185_vm6, %v19063_v34  ;;  %7133 = vst.msk [vmem:[#allocation3 + $0x13b] sm:$0xff] %vm6185_vm6, %v19063_v34 }
 0x3d8   : > { %7095 = vst.msk [vmem:[#allocation3 + $0x10] sm:$0x7] %vm7094_vm7, %v19063_v34  ;;  %7134 = vst.msk [vmem:[#allocation3 + $0x143] sm:$0x7] %vm7094_vm7, %v19063_v34 }
 0x3d9   : > { %13310 = vmatmul.mubr.msk.f32.gmra.mrb[22].mxu1 %vm762_vm2, %v3755_v60  ;;  %v11541_v60 = vmul.f32 -1.442695, %v2002_v22 }
 0x3da   : > { %13312 = vmatprep.mubr.msk.f32.mxu1 %vm762_vm2, %v3756_v12 }
 0x3db   : > { %15014 = vpow2.f32 %v11541_v60  ;;  %v5476_v60 = vld [vmem:[#allocation2 + $0xc6] sm:$0xff] }
 0x3dd   : > { %13313 = vmatmul.mubr.msk.f32.gmra.mrb[24].mxu1 %vm762_vm2, %v3757_v24 }
 0x3de   : > { %13315 = vmatprep.mubr.msk.f32.mxu1 %vm762_vm2, %v3758_v51 }
 0x3e1   : > { %13316 = vmatmul.mubr.msk.f32.gmra.mrb[26].mxu1 %vm762_vm2, %v3759_v18 }
 0x3e2   : > { %13318 = vmatprep.mubr.msk.f32.mxu1 %vm762_vm2, %v3760_v30  ;;  %v4630_v30 = vld [vmem:[#allocation2 + $0x134] sm:$0xff] }
 0x3e5   : > { %13319 = vmatmul.mubr.msk.f32.gmra.mrb[28].mxu1 %vm762_vm2, %v3761_v32  ;;  %v15015_v12 = vpop.eup %15014  ;;  %v4631_v32 = vld [vmem:[#allocation2 + $0x13c] sm:$0xff] }
 0x3e6   : > { %13321 = vmatprep.mubr.msk.f32.mxu1 %vm762_vm2, %v3762_v40  ;;  %v2006_v24 = vadd.f32 1.0, %v15015_v12  ;;  %v5026_v40 = vld [vmem:[#allocation2 + $0x25] sm:$0xff]  ;;  %v5477_v12 = vld [vmem:[#allocation2 + $0xce] sm:$0xff] }
 0x3e8   : > { %15016 = vrcp.f32 %v2006_v24  ;;  %v5478_v24 = vld [vmem:[#allocation2 + $0xd6] sm:$0xff] }
 0x3e9   : > { %13322 = vmatmul.mubr.msk.f32.gmra.mrb[30].mxu1 %vm762_vm2, %v3763_v39  ;;  %v5027_v39 = vld [vmem:[#allocation2 + $0x2d] sm:$0xff] }
 0x3ea   : > { %13324 = vmatprep.mubr.msk.f32.mxu1 %vm762_vm2, %v3764_v63  ;;  %v5028_v63 = vld [vmem:[#allocation2 + $0x35] sm:$0xff] }
 0x3ed   : > { %13325 = vmatmul.mubr.msk.f32.gmra.mrb[32].mxu1 %vm762_vm2, %v3765_v53  ;;  %v5029_v53 = vld [vmem:[#allocation2 + $0x3d] sm:$0xff] }
 0x3ee   : > { %13327 = vmatprep.mubr.msk.f32.mxu1 %vm762_vm2, %v3766_v19  ;;  %v5030_v19 = vld [vmem:[#allocation2 + $0x45] sm:$0xff] }
 0x3f1   : > { %13328 = vmatmul.mubr.msk.f32.gmra.mrb[34].mxu1 %vm762_vm2, %v3767_v38  ;;  %v5031_v38 = vld [vmem:[#allocation2 + $0x4d] sm:$0xff] }
 0x3f2   : > { %13330 = vmatprep.mubr.msk.f32.mxu1 %vm762_vm2, %v3768_v21  ;;  %v15017_v51 = vpop.eup %15016  ;;  %v5032_v21 = vld [vmem:[#allocation2 + $0x55] sm:$0xff] }
 0x3f3   : > { %v2009_v18 = vmul.f32 %v15017_v51, %v2002_v22  ;;  %v5475_v22 = vld [vmem:[#allocation2 + $0xbe] sm:$0xff] }
 0x3f4   : > { %v5479_v51 = vld [vmem:[#allocation2 + $0xde] sm:$0xff] }
 0x3f5   : > { %13331 = vmatmul.mubr.msk.f32.gmra.mrb[36].mxu1 %vm762_vm2, %v3769_v6  ;;  %13054 = vmatmul.mubr.msk.f32.vlgmr.msra.gmra.mrb[4].mxu0 %vm2015_vm5, %v2009_v18  ;;  %v5033_v6 = vld [vmem:[#allocation2 + $0x5d] sm:$0xff]  ;;  %v5480_v18 = vld [vmem:[#allocation2 + $0xe6] sm:$0xff] }
 0x3f6   : > { %13333 = vmatprep.mubr.msk.f32.mxu1 %vm762_vm2, %v3770_v54  ;;  %13562 = vmatprep.mubr.msk.f32.mxu0 %vm15173_vm1, %v19063_v34  ;;  %v5034_v54 = vld [vmem:[#allocation2 + $0x65] sm:$0xff] }
 0x3f9   : > { %13334 = vmatmul.mubr.msk.f32.gmra.mrb[38].mxu1 %vm762_vm2, %v3771_v50  ;;  %v5035_v50 = vld [vmem:[#allocation2 + $0x6d] sm:$0xff] }
 0x3fa   : > { %13338 = vmatprep.mubr.msk.f32.mxu1 %vm762_vm2, %v4166_v62  ;;  %v5036_v62 = vld [vmem:[#allocation2 + $0x75] sm:$0xff] }
 0x3fd   : > { %13339 = vmatmul.mubr.msk.f32.vlgmr.msra.gmra.mrb[4].mxu1 %vm762_vm2, %v4167_v7  ;;  %v5037_v7 = vld [vmem:[#allocation2 + $0x7d] sm:$0xff] }
 0x3fe   : > { %13393 = vmatpush3.msk.msra.mxu1 %vm983_vm0, %v16768_v42  ;;  %13341 = vmatprep.mubr.msk.f32.mxu1 %vm762_vm2, %v16815_v20  ;;  %v16923_v42 = vld [vmem:[#allocation2 + $0xf4] sm:$0xff] }
 0x3ff   : > { %13448 = vmatprep.subr.msk.mxu1 %vm983_vm0, %v16812_v3 }
 0x401   : > { %13342 = vmatmul.mubr.msk.f32.gmra.mrb[6].mxu1 %vm762_vm2, %v16823_v46 }
 0x402   : > { %13344 = vmatprep.mubr.msk.f32.mxu1 %vm762_vm2, %v16827_v55 }
 0x405   : > { %13345 = vmatmul.mubr.msk.f32.gmra.mrb[8].mxu1 %vm762_vm2, %v16831_v58 }
 0x406   : > { %13347 = vmatprep.mubr.msk.f32.mxu1 %vm762_vm2, %v16835_v41 }
 0x409   : > { %13348 = vmatmul.mubr.msk.f32.gmra.mrb[10].mxu1 %vm762_vm2, %v16839_v52 }
 0x40a   : > { %13350 = vmatprep.mubr.msk.f32.mxu1 %vm762_vm2, %v16843_v48 }
 0x40d   : > { %13351 = vmatmul.mubr.msk.f32.gmra.mrb[12].mxu1 %vm762_vm2, %v16847_v2 }
 0x40e   : > { %13353 = vmatprep.mubr.msk.f32.mxu1 %vm762_vm2, %v16851_v35 }
 0x411   : > { %13354 = vmatmul.mubr.msk.f32.gmra.mrb[14].mxu1 %vm762_vm2, %v16855_v56 }
 0x412   : > { %13356 = vmatprep.mubr.msk.f32.mxu1 %vm762_vm2, %v16859_v13 }
 0x415   : > { %13357 = vmatmul.mubr.msk.f32.gmra.mrb[16].mxu1 %vm762_vm2, %v16863_v15 }
 0x416   : > { %13359 = vmatprep.mubr.msk.f32.mxu1 %vm762_vm2, %v16867_v57 }
 0x419   : > { %13360 = vmatmul.mubr.msk.f32.gmra.mrb[18].mxu1 %vm762_vm2, %v16871_v0 }
 0x41a   : > { %13362 = vmatprep.mubr.msk.f32.mxu1 %vm762_vm2, %v16875_v27 }
 0x41d   : > { %13363 = vmatmul.mubr.msk.f32.gmra.mrb[20].mxu1 %vm762_vm2, %v16879_v23 }
 0x41e   : > { %13365 = vmatprep.mubr.msk.f32.mxu1 %vm762_vm2, %v16883_v59 }
 0x421   : > { %13366 = vmatmul.mubr.msk.f32.gmra.mrb[22].mxu1 %vm762_vm2, %v16887_v31 }
 0x422   : > { %13368 = vmatprep.mubr.msk.f32.mxu1 %vm762_vm2, %v16891_v49 }
 0x425   : > { %13369 = vmatmul.mubr.msk.f32.gmra.mrb[24].mxu1 %vm762_vm2, %v16895_v1 }
 0x426   : > { %13371 = vmatprep.mubr.msk.f32.mxu1 %vm762_vm2, %v16899_v37 }
 0x429   : > { %13372 = vmatmul.mubr.msk.f32.gmra.mrb[26].mxu1 %vm762_vm2, %v16903_v33 }
 0x42a   : > { %13374 = vmatprep.mubr.msk.f32.mxu1 %vm762_vm2, %v16907_v16 }
 0x42d   : > { %13375 = vmatmul.mubr.msk.f32.gmra.mrb[28].mxu1 %vm762_vm2, %v16911_v8 }
 0x42e   : > { %13377 = vmatprep.mubr.msk.f32.mxu1 %vm762_vm2, %v16915_v4 }
 0x431   : > { %13378 = vmatmul.mubr.msk.f32.gmra.mrb[30].mxu1 %vm762_vm2, %v16919_v45 }
 0x432   : > { %13380 = vmatprep.mubr.msk.f32.mxu1 %vm762_vm2, %v16923_v42 }
 0x435   : > { %13381 = vmatmul.mubr.msk.f32.gmra.mrb[32].mxu1 %vm762_vm2, %v16927_v61 }
 0x436   : > { %13383 = vmatprep.mubr.msk.f32.mxu1 %vm762_vm2, %v16931_v44 }
 0x439   : > { %13384 = vmatmul.mubr.msk.f32.gmra.mrb[34].mxu1 %vm762_vm2, %v16935_v29 }
 0x43a   : > { %13386 = vmatprep.mubr.msk.f32.mxu1 %vm762_vm2, %v16939_v10 }
 0x43d   : > { %13387 = vmatmul.mubr.msk.f32.gmra.mrb[36].mxu1 %vm762_vm2, %v16943_v36 }
 0x43e   : > { %13389 = vmatprep.mubr.msk.f32.mxu1 %vm762_vm2, %v16947_v9 }
 0x441   : > { %13390 = vmatmul.mubr.msk.f32.gmra.mrb[38].mxu1 %vm762_vm2, %v4201_v11 }
 0x442   : > { %13394 = vmatprep.mubr.msk.f32.mxu1 %vm762_vm2, %v16815_v20  ;;  %v5039_v20 = vld [vmem:[#allocation2 + $0x8d] sm:$0xff] }
 0x445   : > { %13395 = vmatmul.mubr.msk.f32.vlgmr.msra.gmra.mrb[4].mxu1 %vm762_vm2, %v16823_v46  ;;  %v5040_v46 = vld [vmem:[#allocation2 + $0x95] sm:$0xff] }
 0x446   : > { %13449 = vmatpush3.msk.msra.mxu1 %vm983_vm0, %v16812_v3  ;;  %13397 = vmatprep.mubr.msk.f32.mxu1 %vm762_vm2, %v16827_v55  ;;  %v5038_v3 = vld [vmem:[#allocation2 + $0x85] sm:$0xff]  ;;  %v5041_v55 = vld [vmem:[#allocation2 + $0x9d] sm:$0xff] }
 0x447   : > { %13504 = vmatprep.subr.msk.mxu1 %vm983_vm0, %v16957_v26 }
 0x449   : > { %13398 = vmatmul.mubr.msk.f32.gmra.mrb[6].mxu1 %vm762_vm2, %v16831_v58  ;;  %v5042_v58 = vld [vmem:[#allocation2 + $0xa5] sm:$0xff] }
 0x44a   : > { %13400 = vmatprep.mubr.msk.f32.mxu1 %vm762_vm2, %v16835_v41  ;;  %v5043_v41 = vld [vmem:[#allocation2 + $0xad] sm:$0xff] }
 0x44d   : > { %13401 = vmatmul.mubr.msk.f32.gmra.mrb[8].mxu1 %vm762_vm2, %v16839_v52  ;;  %v5044_v52 = vld [vmem:[#allocation2 + $0xb5] sm:$0xff] }
 0x44e   : > { %13403 = vmatprep.mubr.msk.f32.mxu1 %vm762_vm2, %v16843_v48  ;;  %v5045_v48 = vld [vmem:[#allocation2 + $0xbd] sm:$0xff] }
 0x451   : > { %13404 = vmatmul.mubr.msk.f32.gmra.mrb[10].mxu1 %vm762_vm2, %v16847_v2  ;;  %v5046_v2 = vld [vmem:[#allocation2 + $0xc5] sm:$0xff] }
 0x452   : > { %13406 = vmatprep.mubr.msk.f32.mxu1 %vm762_vm2, %v16851_v35  ;;  %v5047_v35 = vld [vmem:[#allocation2 + $0xcd] sm:$0xff] }
 0x455   : > { %13407 = vmatmul.mubr.msk.f32.gmra.mrb[12].mxu1 %vm762_vm2, %v16855_v56  ;;  %v5048_v56 = vld [vmem:[#allocation2 + $0xd5] sm:$0xff] }
 0x456   : > { %13409 = vmatprep.mubr.msk.f32.mxu1 %vm762_vm2, %v16859_v13  ;;  %v5049_v13 = vld [vmem:[#allocation2 + $0xdd] sm:$0xff] }
 0x459   : > { %13410 = vmatmul.mubr.msk.f32.gmra.mrb[14].mxu1 %vm762_vm2, %v16863_v15  ;;  %v5050_v15 = vld [vmem:[#allocation2 + $0xe5] sm:$0xff] }
 0x45a   : > { %13412 = vmatprep.mubr.msk.f32.mxu1 %vm762_vm2, %v16867_v57  ;;  %v5051_v57 = vld [vmem:[#allocation2 + $0xed] sm:$0xff] }
 0x45d   : > { %13413 = vmatmul.mubr.msk.f32.gmra.mrb[16].mxu1 %vm762_vm2, %v16871_v0  ;;  %v5052_v0 = vld [vmem:[#allocation2 + $0xf5] sm:$0xff] }
 0x45e   : > { %13415 = vmatprep.mubr.msk.f32.mxu1 %vm762_vm2, %v16875_v27  ;;  %v5053_v27 = vld [vmem:[#allocation2 + $0xfd] sm:$0xff] }
 0x461   : > { %13416 = vmatmul.mubr.msk.f32.gmra.mrb[18].mxu1 %vm762_vm2, %v16879_v23  ;;  %v5054_v23 = vld [vmem:[#allocation2 + $0x105] sm:$0xff] }
 0x462   : > { %13418 = vmatprep.mubr.msk.f32.mxu1 %vm762_vm2, %v16883_v59  ;;  %v5055_v59 = vld [vmem:[#allocation2 + $0x10d] sm:$0xff] }
 0x465   : > { %13419 = vmatmul.mubr.msk.f32.gmra.mrb[20].mxu1 %vm762_vm2, %v16887_v31  ;;  %v5056_v31 = vld [vmem:[#allocation2 + $0x115] sm:$0xff] }
 0x466   : > { %13421 = vmatprep.mubr.msk.f32.mxu1 %vm762_vm2, %v16891_v49  ;;  %v5057_v49 = vld [vmem:[#allocation2 + $0x11d] sm:$0xff] }
 0x469   : > { %13422 = vmatmul.mubr.msk.f32.gmra.mrb[22].mxu1 %vm762_vm2, %v16895_v1  ;;  %v5058_v1 = vld [vmem:[#allocation2 + $0x125] sm:$0xff] }
 0x46a   : > { %13424 = vmatprep.mubr.msk.f32.mxu1 %vm762_vm2, %v16899_v37  ;;  %v5059_v37 = vld [vmem:[#allocation2 + $0x12d] sm:$0xff] }
 0x46d   : > { %13425 = vmatmul.mubr.msk.f32.gmra.mrb[24].mxu1 %vm762_vm2, %v16903_v33  ;;  %v5060_v33 = vld [vmem:[#allocation2 + $0x135] sm:$0xff] }
 0x46e   : > { %13427 = vmatprep.mubr.msk.f32.mxu1 %vm762_vm2, %v16907_v16  ;;  %v5061_v16 = vld [vmem:[#allocation2 + $0x13d] sm:$0xff] }
 0x471   : > { %13428 = vmatmul.mubr.msk.f32.gmra.mrb[26].mxu1 %vm762_vm2, %v16911_v8  ;;  %v5456_v8 = vld [vmem:[#allocation2 + $0x26] sm:$0xff] }
 0x472   : > { %13430 = vmatprep.mubr.msk.f32.mxu1 %vm762_vm2, %v16915_v4  ;;  %v5457_v4 = vld [vmem:[#allocation2 + $0x2e] sm:$0xff] }
 0x475   : > { %13431 = vmatmul.mubr.msk.f32.gmra.mrb[28].mxu1 %vm762_vm2, %v16919_v45  ;;  %v5458_v45 = vld [vmem:[#allocation2 + $0x36] sm:$0xff] }
 0x476   : > { %13433 = vmatprep.mubr.msk.f32.mxu1 %vm762_vm2, %v16923_v42  ;;  %v5459_v42 = vld [vmem:[#allocation2 + $0x3e] sm:$0xff] }
 0x479   : > { %13434 = vmatmul.mubr.msk.f32.gmra.mrb[30].mxu1 %vm762_vm2, %v16927_v61  ;;  %v5460_v61 = vld [vmem:[#allocation2 + $0x46] sm:$0xff] }
 0x47a   : > { %13436 = vmatprep.mubr.msk.f32.mxu1 %vm762_vm2, %v16931_v44  ;;  %v5461_v44 = vld [vmem:[#allocation2 + $0x4e] sm:$0xff] }
 0x47d   : > { %13437 = vmatmul.mubr.msk.f32.gmra.mrb[32].mxu1 %vm762_vm2, %v16935_v29  ;;  %v5462_v29 = vld [vmem:[#allocation2 + $0x56] sm:$0xff] }
 0x47e   : > { %13439 = vmatprep.mubr.msk.f32.mxu1 %vm762_vm2, %v16939_v10  ;;  %v5463_v10 = vld [vmem:[#allocation2 + $0x5e] sm:$0xff] }
 0x481   : > { %13440 = vmatmul.mubr.msk.f32.gmra.mrb[34].mxu1 %vm762_vm2, %v16943_v36  ;;  %v5464_v36 = vld [vmem:[#allocation2 + $0x66] sm:$0xff] }
 0x482   : > { %13442 = vmatprep.mubr.msk.f32.mxu1 %vm762_vm2, %v16947_v9  ;;  %v5465_v9 = vld [vmem:[#allocation2 + $0x6e] sm:$0xff] }
 0x485   : > { %13443 = vmatmul.mubr.msk.f32.gmra.mrb[36].mxu1 %vm762_vm2, %v4201_v11  ;;  %v5466_v11 = vld [vmem:[#allocation2 + $0x76] sm:$0xff] }
 0x486   : > { %13445 = vmatprep.mubr.msk.f32.mxu1 %vm762_vm2, %v4630_v30  ;;  %v5481_v30 = vld [vmem:[#allocation2 + $0xee] sm:$0xff] }
 0x489   : > { %13446 = vmatmul.mubr.msk.f32.gmra.mrb[38].mxu1 %vm762_vm2, %v4631_v32  ;;  %v5482_v32 = vld [vmem:[#allocation2 + $0xf6] sm:$0xff] }
 0x48a   : > { %13450 = vmatprep.mubr.msk.f32.mxu1 %vm762_vm2, %v5026_v40  ;;  %v5483_v40 = vld [vmem:[#allocation2 + $0xfe] sm:$0xff] }
 0x48d   : > { %13451 = vmatmul.mubr.msk.f32.vlgmr.msra.gmra.mrb[4].mxu1 %vm762_vm2, %v5027_v39  ;;  %v5484_v39 = vld [vmem:[#allocation2 + $0x106] sm:$0xff] }
 0x48e   : > { %13505 = vmatpush3.msk.msra.mxu1 %vm983_vm0, %v16957_v26  ;;  %13453 = vmatprep.mubr.msk.f32.mxu1 %vm762_vm2, %v5028_v63  ;;  %v5467_v26 = vld [vmem:[#allocation2 + $0x7e] sm:$0xff]  ;;  %v5485_v63 = vld [vmem:[#allocation2 + $0x10e] sm:$0xff] }
 0x491   : > { %13454 = vmatmul.mubr.msk.f32.gmra.mrb[6].mxu1 %vm762_vm2, %v5029_v53  ;;  %v5486_v53 = vld [vmem:[#allocation2 + $0x116] sm:$0xff] }
 0x492   : > { %13456 = vmatprep.mubr.msk.f32.mxu1 %vm762_vm2, %v5030_v19  ;;  %v5487_v19 = vld [vmem:[#allocation2 + $0x11e] sm:$0xff] }
 0x495   : > { %13457 = vmatmul.mubr.msk.f32.gmra.mrb[8].mxu1 %vm762_vm2, %v5031_v38  ;;  %v5488_v38 = vld [vmem:[#allocation2 + $0x126] sm:$0xff] }
 0x496   : > { %13459 = vmatprep.mubr.msk.f32.mxu1 %vm762_vm2, %v5032_v21  ;;  %v5489_v21 = vld [vmem:[#allocation2 + $0x12e] sm:$0xff] }
 0x499   : > { %13460 = vmatmul.mubr.msk.f32.gmra.mrb[10].mxu1 %vm762_vm2, %v5033_v6  ;;  %v5490_v6 = vld [vmem:[#allocation2 + $0x136] sm:$0xff] }
 0x49a   : > { %13462 = vmatprep.mubr.msk.f32.mxu1 %vm762_vm2, %v5034_v54  ;;  %v5491_v54 = vld [vmem:[#allocation2 + $0x13e] sm:$0xff] }
 0x49d   : > { %13463 = vmatmul.mubr.msk.f32.gmra.mrb[12].mxu1 %vm762_vm2, %v5035_v50 }
 0x49e   : > { %13465 = vmatprep.mubr.msk.f32.mxu1 %vm762_vm2, %v5036_v62 }
 0x4a1   : > { %13466 = vmatmul.mubr.msk.f32.gmra.mrb[14].mxu1 %vm762_vm2, %v5037_v7  ;;  %v17134_v7 = vld [vmem:[%s18869_s14] sm:$0xff] }
 0x4a2   : > { %13468 = vmatprep.mubr.msk.f32.mxu1 %vm762_vm2, %v5038_v3  ;;  %13561 = vmatpush3.msra.mxu0 %v17134_v7  ;;  %v17138_v3 = vpop.permute.xlu0 %5976 }
 0x4a3   : > { %13565 = vmatprep.subr.mxu0 %v19063_v34 }
 0x4a5   : > { %13469 = vmatmul.mubr.msk.f32.gmra.mrb[16].mxu1 %vm762_vm2, %v5039_v20  ;;  %v17140_v20 = vpop.permute.xlu1 %5971 }
 0x4a6   : > { %13471 = vmatprep.mubr.msk.f32.mxu1 %vm762_vm2, %v5040_v46  ;;  %v17142_v46 = vpop.permute.xlu0 %5986 }
 0x4a7   : > { %19064 = vst [vmem:[#allocation6_spill] sm:$0xff] %v17142_v46 }
 0x4a9   : > { %13472 = vmatmul.mubr.msk.f32.gmra.mrb[18].mxu1 %vm762_vm2, %v5041_v55  ;;  %v17144_v55 = vpop.permute.xlu1 %5981 }
 0x4aa   : > { %13474 = vmatprep.mubr.msk.f32.mxu1 %vm762_vm2, %v5042_v58  ;;  %v17146_v58 = vpop.permute.xlu0 %5996 }
 0x4ab   : > { %19065 = vst [vmem:[#allocation7_spill] sm:$0xff] %v17146_v58 }
 0x4ad   : > { %13475 = vmatmul.mubr.msk.f32.gmra.mrb[20].mxu1 %vm762_vm2, %v5043_v41  ;;  %v17148_v41 = vpop.permute.xlu1 %5991 }
 0x4ae   : > { %13477 = vmatprep.mubr.msk.f32.mxu1 %vm762_vm2, %v5044_v52  ;;  %19066 = vst [vmem:[#allocation10_spill] sm:$0xff] %v17148_v41  ;;  %v17150_v52 = vpop.permute.xlu0 %6006 }
 0x4af   : > { %19067 = vst [vmem:[#allocation8_spill] sm:$0xff] %v17150_v52 }
 0x4b1   : > { %13478 = vmatmul.mubr.msk.f32.gmra.mrb[22].mxu1 %vm762_vm2, %v5045_v48  ;;  %v17152_v48 = vpop.permute.xlu1 %6001 }
 0x4b2   : > { %13480 = vmatprep.mubr.msk.f32.mxu1 %vm762_vm2, %v5046_v2  ;;  %19068 = vst [vmem:[#allocation12_spill] sm:$0xff] %v17152_v48  ;;  %v2014_v2 = vld [vmem:[%s18866_s11] sm:$0x1] }
 0x4b5   : > { %13481 = vmatmul.mubr.msk.f32.gmra.mrb[24].mxu1 %vm762_vm2, %v5047_v35 }
 0x4b6   : > { %13483 = vmatprep.mubr.msk.f32.mxu1 %vm762_vm2, %v5048_v56  ;;  %v17157_v56 = vpop.permute.xlu0 %6016 }
 0x4b7   : > { %19069 = vst [vmem:[#allocation9_spill] sm:$0xff] %v17157_v56 }
 0x4b9   : > { %13484 = vmatmul.mubr.msk.f32.gmra.mrb[26].mxu1 %vm762_vm2, %v5049_v13  ;;  %v17159_v13 = vpop.permute.xlu1 %6011 }
 0x4ba   : > { %13486 = vmatprep.mubr.msk.f32.mxu1 %vm762_vm2, %v5050_v15  ;;  %19070 = vst [vmem:[#allocation18_spill] sm:$0xff] %v17159_v13  ;;  %v17164_v15 = vld [vmem:[%s18864_s9] ss:$0 sm:$0xff] }
 0x4bd   : > { %13487 = vmatmul.mubr.msk.f32.gmra.mrb[28].mxu1 %vm762_vm2, %v5051_v57  ;;  %v19071_v57 = vld [vmem:[#allocation4_spill] sm:$0xff] }
 0x4be   : > { %13489 = vmatprep.mubr.msk.f32.mxu1 %vm762_vm2, %v5052_v0 }
 0x4c1   : > { %13490 = vmatmul.mubr.msk.f32.gmra.mrb[30].mxu1 %vm762_vm2, %v5053_v27 }
 0x4c2   : > { %13492 = vmatprep.mubr.msk.f32.mxu1 %vm762_vm2, %v5054_v23 }
 0x4c5   : > { %13493 = vmatmul.mubr.msk.f32.gmra.mrb[32].mxu1 %vm762_vm2, %v5055_v59 }
 0x4c6   : > { %13495 = vmatprep.mubr.msk.f32.mxu1 %vm762_vm2, %v5056_v31  ;;  %v17170_v31 = vpop.permute.xlu0 %6026 }
 0x4c7   : > { %19072 = vst [vmem:[#allocation5_spill] sm:$0xff] %v17170_v31 }
 0x4c8   : > { %v2085_v50 = vpop.f32.mrb[4].mxu0 }
 0x4c9   : > { %13496 = vmatmul.mubr.msk.f32.gmra.mrb[34].mxu1 %vm762_vm2, %v5057_v49  ;;  %v13055_v62 = vpop.f32.mrb[5].mxu0  ;;  %v2086_v35 = vadd.f32 %v2085_v50, %v2014_v2 }
 0x4ca   : > { %13498 = vmatprep.mubr.msk.f32.mxu1 %vm762_vm2, %v5058_v1 }
 0x4cb   : > { %v17167_v0 = vrot.slane %v2086_v35, %v19071_v57 }
 0x4cd   : > { %13499 = vmatmul.mubr.msk.f32.gmra.mrb[36].mxu1 %vm762_vm2, %v5059_v37  ;;  %v17174_v37 = vpop.permute.xlu1 %6021 }
 0x4ce   : > { %13501 = vmatprep.mubr.msk.f32.mxu1 %vm762_vm2, %v5060_v33  ;;  %19073 = vst [vmem:[#allocation11_spill] sm:$0xff] %v17174_v37 }
 0x4d1   : > { %13502 = vmatmul.mubr.msk.f32.gmra.mrb[38].mxu1 %vm762_vm2, %v5061_v16 }
 0x4d2   : > { %13506 = vmatprep.mubr.msk.f32.mxu1 %vm762_vm2, %v5456_v8 }
 0x4d5   : > { %13507 = vmatmul.mubr.msk.f32.vlgmr.msra.gmra.mrb[4].mxu1 %vm762_vm2, %v5457_v4 }
 0x4d6   : > { %13509 = vmatprep.mubr.msk.f32.mxu1 %vm762_vm2, %v5458_v45 }
 0x4d9   : > { %13510 = vmatmul.mubr.msk.f32.gmra.mrb[6].mxu1 %vm762_vm2, %v5459_v42 }
 0x4da   : > { %13512 = vmatprep.mubr.msk.f32.mxu1 %vm762_vm2, %v5460_v61 }
 0x4dd   : > { %13513 = vmatmul.mubr.msk.f32.gmra.mrb[8].mxu1 %vm762_vm2, %v5461_v44 }
 0x4de   : > { %13515 = vmatprep.mubr.msk.f32.mxu1 %vm762_vm2, %v5462_v29 }
 0x4e1   : > { %13516 = vmatmul.mubr.msk.f32.gmra.mrb[10].mxu1 %vm762_vm2, %v5463_v10  ;;  %v17188_v10 = vpop.permute.xlu0 %6036 }
 0x4e2   : > { %13518 = vmatprep.mubr.msk.f32.mxu1 %vm762_vm2, %v5464_v36  ;;  %19074 = vst [vmem:[#allocation20_spill] sm:$0xff] %v17188_v10 }
 0x4e5   : > { %13519 = vmatmul.mubr.msk.f32.gmra.mrb[12].mxu1 %vm762_vm2, %v5465_v9 }
 0x4e6   : > { %13521 = vmatprep.mubr.msk.f32.mxu1 %vm762_vm2, %v5466_v11 }
 0x4e9   : > { %13522 = vmatmul.mubr.msk.f32.gmra.mrb[14].mxu1 %vm762_vm2, %v5467_v26 }
 0x4ea   : > { %13524 = vmatprep.mubr.msk.f32.mxu1 %vm762_vm2, %v5468_v17 }
 0x4ed   : > { %13525 = vmatmul.mubr.msk.f32.gmra.mrb[16].mxu1 %vm762_vm2, %v5469_v14 }
 0x4ee   : > { %13527 = vmatprep.mubr.msk.f32.mxu1 %vm762_vm2, %v5470_v28 }
 0x4f1   : > { %13528 = vmatmul.mubr.msk.f32.gmra.mrb[18].mxu1 %vm762_vm2, %v5471_v47 }
 0x4f2   : > { %13530 = vmatprep.mubr.msk.f32.mxu1 %vm762_vm2, %v5472_v5  ;;  %v17201_v5 = vpop.permute.xlu1 %6031 }
 0x4f3   : > { %19075 = vst [vmem:[#allocation13_spill] sm:$0xff] %v17201_v5 }
 0x4f5   : > { %13531 = vmatmul.mubr.msk.f32.gmra.mrb[20].mxu1 %vm762_vm2, %v5473_v25 }
 0x4f6   : > { %13533 = vmatprep.mubr.msk.f32.mxu1 %vm762_vm2, %v5474_v43 }
 0x4f9   : > { %13534 = vmatmul.mubr.msk.f32.gmra.mrb[22].mxu1 %vm762_vm2, %v5475_v22 }
 0x4fa   : > { %13536 = vmatprep.mubr.msk.f32.mxu1 %vm762_vm2, %v5476_v60 }
 0x4fd   : > { %13537 = vmatmul.mubr.msk.f32.gmra.mrb[24].mxu1 %vm762_vm2, %v5477_v12 }
 0x4fe   : > { %13539 = vmatprep.mubr.msk.f32.mxu1 %vm762_vm2, %v5478_v24 }
 0x501   : > { %13540 = vmatmul.mubr.msk.f32.gmra.mrb[26].mxu1 %vm762_vm2, %v5479_v51 }
 0x502   : > { %13542 = vmatprep.mubr.msk.f32.mxu1 %vm762_vm2, %v5480_v18 }
 0x505   : > { %13543 = vmatmul.mubr.msk.f32.gmra.mrb[28].mxu1 %vm762_vm2, %v5481_v30 }
 0x506   : > { %13545 = vmatprep.mubr.msk.f32.mxu1 %vm762_vm2, %v5482_v32 }
 0x509   : > { %13546 = vmatmul.mubr.msk.f32.gmra.mrb[30].mxu1 %vm762_vm2, %v5483_v40 }
 0x50a   : > { %13548 = vmatprep.mubr.msk.f32.mxu1 %vm762_vm2, %v5484_v39 }
 0x50d   : > { %13549 = vmatmul.mubr.msk.f32.gmra.mrb[32].mxu1 %vm762_vm2, %v5485_v63 }
 0x50e   : > { %13551 = vmatprep.mubr.msk.f32.mxu1 %vm762_vm2, %v5486_v53 }
 0x511   : > { %13552 = vmatmul.mubr.msk.f32.gmra.mrb[34].mxu1 %vm762_vm2, %v5487_v19 }
 0x512   : > { %13554 = vmatprep.mubr.msk.f32.mxu1 %vm762_vm2, %v5488_v38 }
 0x515   : > { %13555 = vmatmul.mubr.msk.f32.gmra.mrb[36].mxu1 %vm762_vm2, %v5489_v21  ;;  %v17221_v21 = vpop.permute.xlu0 %6046 }
 0x516   : > { %13557 = vmatprep.mubr.msk.f32.mxu1 %vm762_vm2, %v5490_v6  ;;  %19076 = vst [vmem:[#allocation26_spill] sm:$0xff] %v17221_v21 }
 0x519   : > { %13558 = vmatmul.mubr.msk.f32.gmra.mrb[38].mxu1 %vm762_vm2, %v5491_v54 }
 0x5a8   : > { %v13508_v27 = vpop.f32.mrb[4].mxu1 }
 0x5a9   : > { %v5894_v23 = vadd.f32 %v13508_v27, %v17164_v15  ;;  %v5671_v59 = vpop.f32.mrb[5].mxu1 }
 0x5aa   : > { %v5893_v49 = vadd.f32 %v17164_v15, %v5671_v59  ;;  %v17233_v59 = vpop.permute.xlu1 %6041 }
 0x5ab   : > { %v5934_v1 = vadd.f32 %v17167_v0, %v5894_v23  ;;  %19077 = vst [vmem:[#allocation14_spill] sm:$0xff] %v17233_v59 }
 0x5ac   : > { %v5933_v33 = vadd.f32 %v17167_v0, %v5893_v49  ;;  %v13511_v16 = vpop.f32.mrb[6].mxu1 }
 0x5ad   : > { %v17178_v8 = vmul.f32 %v17138_v3, %v5934_v1  ;;  %v5896_v4 = vadd.f32 %v13511_v16, %v17164_v15  ;;  %v5681_v45 = vpop.f32.mrb[7].mxu1 }
 0x5ae   : > { %v17182_v42 = vmul.f32 %v17140_v20, %v5933_v33  ;;  %v5895_v61 = vadd.f32 %v17164_v15, %v5681_v45 }
 0x5af   : > { %v6264_v44 = vmul.f32 %v17178_v8, %v17178_v8  ;;  %v5936_v29 = vadd.f32 %v17167_v0, %v5896_v4  ;;  %v6187_v36 = vsel %vm6185_vm6, %v17178_v8, 0.0 }
 0x5b0   : > { %v6186_v9 = vsel %vm6185_vm6, %v17182_v42, 0.0  ;;  %v6263_v11 = vmul.f32 %v17182_v42, %v17182_v42  ;;  %v5935_v26 = vadd.f32 %v17167_v0, %v5895_v61  ;;  %v13514_v17 = vpop.f32.mrb[8].mxu1 }
 0x5b1   : > { %v17198_v14 = vmul.f32 %v17142_v46, %v5936_v29  ;;  %v5898_v28 = vadd.f32 %v13514_v17, %v17164_v15  ;;  %v5691_v47 = vpop.f32.mrb[9].mxu1  ;;  %v6300_v25 = vsel %vm6185_vm6, %v6264_v44, 0.0  ;;  %v6188_v12 = vadd.f32 %v6187_v36, %v6186_v9 }
 0x5b2   : > { %v6299_v43 = vsel %vm6185_vm6, %v6263_v11, 0.0  ;;  %v17206_v22 = vmul.f32 %v17144_v55, %v5935_v26  ;;  %v5897_v60 = vadd.f32 %v17164_v15, %v5691_v47 }
 0x5b3   : > { %v6266_v24 = vmul.f32 %v17198_v14, %v17198_v14  ;;  %v5938_v51 = vadd.f32 %v17167_v0, %v5898_v28  ;;  %v6301_v39 = vadd.f32 %v6300_v25, %v6299_v43  ;;  %v6191_v6 = vsel %vm6185_vm6, %v17198_v14, 0.0  ;;  %v17253_v43 = vpop.permute.xlu0 %6056 }
 0x5b4   : > { %v6189_v18 = vsel %vm6185_vm6, %v17206_v22, 0.0  ;;  %v6265_v30 = vmul.f32 %v17206_v22, %v17206_v22  ;;  %v5937_v32 = vadd.f32 %v17167_v0, %v5897_v60  ;;  %v13517_v40 = vpop.f32.mrb[10].mxu1  ;;  %19078 = vst [vmem:[#allocation28_spill] sm:$0xff] %v17253_v43 }
 0x5b5   : > { %v6190_v63 = vadd.f32 %v6189_v18, %v6188_v12  ;;  %v17218_v53 = vmul.f32 %v17146_v58, %v5938_v51  ;;  %v5900_v19 = vadd.f32 %v13517_v40, %v17164_v15  ;;  %v5701_v38 = vpop.f32.mrb[11].mxu1  ;;  %v6304_v2 = vsel %vm6185_vm6, %v6266_v24, 0.0 }
 0x5b6   : > { %v6302_v54 = vsel %vm6185_vm6, %v6265_v30, 0.0  ;;  %v17227_v50 = vmul.f32 %v17148_v41, %v5937_v32  ;;  %v5899_v62 = vadd.f32 %v17164_v15, %v5701_v38 }
 0x5b7   : > { %v6303_v35 = vadd.f32 %v6302_v54, %v6301_v39  ;;  %v6268_v27 = vmul.f32 %v17218_v53, %v17218_v53  ;;  %v6192_v23 = vadd.f32 %v6191_v6, %v6190_v63  ;;  %v5940_v33 = vadd.f32 %v17167_v0, %v5900_v19  ;;  %v17266_v19 = vpop.permute.xlu1 %6051 }
 0x5b8   : > { %v6193_v49 = vsel %vm6185_vm6, %v17227_v50, 0.0  ;;  %v6267_v1 = vmul.f32 %v17227_v50, %v17227_v50  ;;  %v5939_v16 = vadd.f32 %v17167_v0, %v5899_v62  ;;  %v13520_v4 = vpop.f32.mrb[12].mxu1  ;;  %v6195_v45 = vsel %vm6185_vm6, %v17218_v53, 0.0  ;;  %19079 = vst [vmem:[#allocation15_spill] sm:$0xff] %v17266_v19 }
 0x5b9   : > { %v6194_v61 = vadd.f32 %v6193_v49, %v6192_v23  ;;  %v6305_v44 = vadd.f32 %v6304_v2, %v6303_v35  ;;  %v5902_v29 = vadd.f32 %v13520_v4, %v17164_v15  ;;  %v5711_v36 = vpop.f32.mrb[13].mxu1  ;;  %v17246_v11 = vmul.f32 %v17150_v52, %v5940_v33 }
 0x5ba   : > { %v6306_v9 = vsel %vm6185_vm6, %v6267_v1, 0.0  ;;  %v17249_v26 = vmul.f32 %v17152_v48, %v5939_v16  ;;  %v5901_v17 = vadd.f32 %v17164_v15, %v5711_v36  ;;  %v6308_v60 = vsel %vm6185_vm6, %v6268_v27, 0.0 }
 0x5bb   : > { %v6307_v28 = vadd.f32 %v6306_v9, %v6305_v44  ;;  %v6196_v47 = vadd.f32 %v6195_v45, %v6194_v61  ;;  %v5942_v25 = vadd.f32 %v17167_v0, %v5902_v29  ;;  %v6270_v12 = vmul.f32 %v17246_v11, %v17246_v11  ;;  %v17285_v29 = vpop.permute.xlu0 %6066 }
 0x5bc   : > { %v6197_v24 = vsel %vm6185_vm6, %v17249_v26, 0.0  ;;  %v6269_v51 = vmul.f32 %v17249_v26, %v17249_v26  ;;  %v13523_v18 = vpop.f32.mrb[14].mxu1  ;;  %v5941_v39 = vadd.f32 %v17167_v0, %v5901_v17  ;;  %v6199_v62 = vsel %vm6185_vm6, %v17246_v11, 0.0  ;;  %19080 = vst [vmem:[#allocation34_spill] sm:$0xff] %v17285_v29 }
 0x5bd   : > { %v6198_v30 = vadd.f32 %v6197_v24, %v6196_v47  ;;  %v6309_v32 = vadd.f32 %v6308_v60, %v6307_v28  ;;  %v17263_v40 = vmul.f32 %v17157_v56, %v5942_v25  ;;  %v5721_v63 = vpop.f32.mrb[15].mxu1  ;;  %v5904_v6 = vadd.f32 %v13523_v18, %v17164_v15 }
 0x5be   : > { %v6310_v38 = vsel %vm6185_vm6, %v6269_v51, 0.0  ;;  %v5903_v54 = vadd.f32 %v17164_v15, %v5721_v63  ;;  %v6312_v2 = vsel %vm6185_vm6, %v6270_v12, 0.0  ;;  %v17275_v27 = vmul.f32 %v17159_v13, %v5941_v39  ;;  %v17298_v12 = vpop.permute.xlu1 %6061 }
 0x5bf   : > { %v6311_v35 = vadd.f32 %v6310_v38, %v6309_v32  ;;  %v6272_v23 = vmul.f32 %v17263_v40, %v17263_v40  ;;  %v6200_v49 = vadd.f32 %v6199_v62, %v6198_v30  ;;  %v5944_v1 = vadd.f32 %v17167_v0, %v5904_v6  ;;  %19081 = vst [vmem:[#allocation16_spill] sm:$0xff] %v17298_v12 }
 0x5c0   : > { %v5943_v33 = vadd.f32 %v17167_v0, %v5903_v54  ;;  %v13526_v16 = vpop.f32.mrb[16].mxu1  ;;  %v6201_v4 = vsel %vm6185_vm6, %v17275_v27, 0.0  ;;  %v6271_v45 = vmul.f32 %v17275_v27, %v17275_v27  ;;  %v6203_v47 = vsel %vm6185_vm6, %v17263_v40, 0.0 }
 0x5c1   : > { %v6313_v61 = vadd.f32 %v6312_v2, %v6311_v35  ;;  %v5731_v44 = vpop.f32.mrb[17].mxu1  ;;  %v6202_v36 = vadd.f32 %v6201_v4, %v6200_v49  ;;  %v17288_v9 = vmul.f32 %v17170_v31, %v5944_v1  ;;  %v5906_v28 = vadd.f32 %v13526_v16, %v17164_v15  ;;  %v17320_v4 = vpop.permute.xlu0 %6076 }
 0x5c2   : > { %v17291_v17 = vmul.f32 %v17174_v37, %v5943_v33  ;;  %v6314_v25 = vsel %vm6185_vm6, %v6271_v45, 0.0  ;;  %v5905_v60 = vadd.f32 %v17164_v15, %v5731_v44  ;;  %v6316_v24 = vsel %vm6185_vm6, %v6272_v23, 0.0  ;;  %19082 = vst [vmem:[#allocation36_spill] sm:$0xff] %v17320_v4 }
 0x5c3   : > { %v6315_v51 = vadd.f32 %v6314_v25, %v6313_v61  ;;  %v6274_v18 = vmul.f32 %v17288_v9, %v17288_v9  ;;  %v6204_v30 = vadd.f32 %v6203_v47, %v6202_v36  ;;  %v5946_v38 = vadd.f32 %v17167_v0, %v5906_v28 }
 0x5c4   : > { %v13529_v32 = vpop.f32.mrb[18].mxu1  ;;  %v6205_v39 = vsel %vm6185_vm6, %v17291_v17, 0.0  ;;  %v6273_v63 = vmul.f32 %v17291_v17, %v17291_v17  ;;  %v5945_v6 = vadd.f32 %v17167_v0, %v5905_v60  ;;  %v6207_v62 = vsel %vm6185_vm6, %v17288_v9, 0.0 }
 0x5c5   : > { %v5741_v54 = vpop.f32.mrb[19].mxu1  ;;  %v6206_v2 = vadd.f32 %v6205_v39, %v6204_v30  ;;  %v6317_v35 = vadd.f32 %v6316_v24, %v6315_v51  ;;  %v5908_v23 = vadd.f32 %v13529_v32, %v17164_v15  ;;  %v17314_v1 = vmul.f32 %v17188_v10, %v5946_v38  ;;  %v17330_v51 = vpop.permute.xlu1 %6071 }
 0x5c6   : > { %v6318_v49 = vsel %vm6185_vm6, %v6273_v63, 0.0  ;;  %v17317_v33 = vmul.f32 %v17201_v5, %v5945_v6  ;;  %v5907_v16 = vadd.f32 %v17164_v15, %v5741_v54  ;;  %v6320_v28 = vsel %vm6185_vm6, %v6274_v18, 0.0  ;;  %19083 = vst [vmem:[#allocation17_spill] sm:$0xff] %v17330_v51 }
 0x5c7   : > { %v6319_v45 = vadd.f32 %v6318_v49, %v6317_v35  ;;  %v6208_v61 = vadd.f32 %v6207_v62, %v6206_v2  ;;  %v5948_v44 = vadd.f32 %v17167_v0, %v5908_v23  ;;  %v6276_v47 = vmul.f32 %v17314_v1, %v17314_v1 }
 0x5c8   : > { %v13532_v36 = vpop.f32.mrb[20].mxu1  ;;  %v6209_v25 = vsel %vm6185_vm6, %v17317_v33, 0.0  ;;  %v6275_v60 = vmul.f32 %v17317_v33, %v17317_v33  ;;  %v5947_v63 = vadd.f32 %v17167_v0, %v5907_v16  ;;  %v6211_v18 = vsel %vm6185_vm6, %v17314_v1, 0.0 }
 0x5c9   : > { %v5751_v24 = vpop.f32.mrb[21].mxu1  ;;  %v6210_v30 = vadd.f32 %v6209_v25, %v6208_v61  ;;  %v6321_v32 = vadd.f32 %v6320_v28, %v6319_v45  ;;  %v17333_v39 = vmul.f32 %v17221_v21, %v5948_v44  ;;  %v5910_v6 = vadd.f32 %v13532_v36, %v17164_v15  ;;  %v17350_v28 = vpop.permute.xlu0 %6086 }
 0x5ca   : > { %v6322_v38 = vsel %vm6185_vm6, %v6275_v60, 0.0  ;;  %v5909_v54 = vadd.f32 %v17164_v15, %v5751_v24  ;;  %v6324_v62 = vsel %vm6185_vm6, %v6276_v47, 0.0  ;;  %v17345_v23 = vmul.f32 %v17233_v59, %v5947_v63  ;;  %19084 = vst [vmem:[#allocation42_spill] sm:$0xff] %v17350_v28 }
 0x5cb   : > { %v6323_v2 = vadd.f32 %v6322_v38, %v6321_v32  ;;  %v6278_v35 = vmul.f32 %v17333_v39, %v17333_v39  ;;  %v6212_v16 = vadd.f32 %v6211_v18, %v6210_v30  ;;  %v5950_v45 = vadd.f32 %v17167_v0, %v5910_v6  ;;  %v17363_v18 = vpop.permute.xlu1 %6081 }
 0x5cc   : > { %v13535_v49 = vpop.f32.mrb[22].mxu1  ;;  %v5949_v61 = vadd.f32 %v17167_v0, %v5909_v54  ;;  %v6213_v47 = vsel %vm6185_vm6, %v17345_v23, 0.0  ;;  %v6277_v25 = vmul.f32 %v17345_v23, %v17345_v23  ;;  %19085 = vst [vmem:[#allocation19_spill] sm:$0xff] %v17363_v18  ;;  %v6215_v38 = vsel %vm6185_vm6, %v17333_v39, 0.0 }
 0x5cd   : > { %v5912_v44 = vadd.f32 %v13535_v49, %v17164_v15  ;;  %v5761_v36 = vpop.f32.mrb[23].mxu1  ;;  %v6325_v60 = vadd.f32 %v6324_v62, %v6323_v2  ;;  %v6214_v24 = vadd.f32 %v6213_v47, %v6212_v16  ;;  %v17357_v32 = vmul.f32 %v17253_v43, %v5950_v45 }
 0x5ce   : > { %v17360_v30 = vmul.f32 %v17266_v19, %v5949_v61  ;;  %v6326_v6 = vsel %vm6185_vm6, %v6277_v25, 0.0  ;;  %v5911_v54 = vadd.f32 %v17164_v15, %v5761_v36  ;;  %v6328_v62 = vsel %vm6185_vm6, %v6278_v35, 0.0 }
 0x5cf   : > { %v5952_v63 = vadd.f32 %v17167_v0, %v5912_v44  ;;  %v6327_v2 = vadd.f32 %v6326_v6, %v6325_v60  ;;  %v6280_v16 = vmul.f32 %v17357_v32, %v17357_v32  ;;  %v6216_v45 = vadd.f32 %v6215_v38, %v6214_v24  ;;  %v17381_v60 = vpop.permute.xlu0 %6096 }
 0x5d0   : > { %v13538_v49 = vpop.f32.mrb[24].mxu1  ;;  %v6217_v44 = vsel %vm6185_vm6, %v17360_v30, 0.0  ;;  %v6279_v47 = vmul.f32 %v17360_v30, %v17360_v30  ;;  %v5951_v36 = vadd.f32 %v17167_v0, %v5911_v54  ;;  %19086 = vst [vmem:[#allocation44_spill] sm:$0xff] %v17381_v60  ;;  %v6219_v24 = vsel %vm6185_vm6, %v17357_v32, 0.0 }
 0x5d1   : > { %v5771_v61 = vpop.f32.mrb[25].mxu1  ;;  %v17377_v43 = vmul.f32 %v17285_v29, %v5952_v63  ;;  %v6218_v25 = vadd.f32 %v6217_v44, %v6216_v45  ;;  %v6329_v19 = vadd.f32 %v6328_v62, %v6327_v2  ;;  %v5914_v35 = vadd.f32 %v13538_v49, %v17164_v15  ;;  %v17393_v45 = vpop.permute.xlu1 %6091 }
 0x5d2   : > { %v6330_v38 = vsel %vm6185_vm6, %v6279_v47, 0.0  ;;  %v17389_v21 = vmul.f32 %v17298_v12, %v5951_v36  ;;  %v5913_v49 = vadd.f32 %v17164_v15, %v5771_v61  ;;  %19087 = vst [vmem:[#allocation21_spill] sm:$0xff] %v17393_v45  ;;  %v6332_v44 = vsel %vm6185_vm6, %v6280_v16, 0.0 }
 0x5d3   : > { %v6282_v6 = vmul.f32 %v17377_v43, %v17377_v43  ;;  %v6331_v29 = vadd.f32 %v6330_v38, %v6329_v19  ;;  %v6220_v54 = vadd.f32 %v6219_v24, %v6218_v25  ;;  %v5954_v62 = vadd.f32 %v17167_v0, %v5914_v35 }
 0x5d4   : > { %v13541_v63 = vpop.f32.mrb[26].mxu1  ;;  %v6221_v47 = vsel %vm6185_vm6, %v17389_v21, 0.0  ;;  %v6281_v59 = vmul.f32 %v17389_v21, %v17389_v21  ;;  %v5953_v61 = vadd.f32 %v17167_v0, %v5913_v49  ;;  %v6223_v35 = vsel %vm6185_vm6, %v17377_v43, 0.0  ;;  %v17416_v49 = vpop.permute.xlu0 %6106 }
 0x5d5   : > { %v5781_v2 = vpop.f32.mrb[27].mxu1  ;;  %v5916_v36 = vadd.f32 %v13541_v63, %v17164_v15  ;;  %v6222_v12 = vadd.f32 %v6221_v47, %v6220_v54  ;;  %v6333_v19 = vadd.f32 %v6332_v44, %v6331_v29  ;;  %v17402_v25 = vmul.f32 %v17320_v4, %v5954_v62  ;;  %19088 = vst [vmem:[#allocation45_spill] sm:$0xff] %v17416_v49 }
 0x5d6   : > { %v6334_v16 = vsel %vm6185_vm6, %v6281_v59, 0.0  ;;  %v5915_v38 = vadd.f32 %v17164_v15, %v5781_v2  ;;  %v6336_v5 = vsel %vm6185_vm6, %v6282_v6, 0.0  ;;  %v17414_v54 = vmul.f32 %v17330_v51, %v5953_v61  ;;  %v17427_v61 = vpop.permute.xlu1 %6101 }
 0x5d7   : > { %v5956_v24 = vadd.f32 %v17167_v0, %v5916_v36  ;;  %v6335_v63 = vadd.f32 %v6334_v16, %v6333_v19  ;;  %v6284_v29 = vmul.f32 %v17402_v25, %v17402_v25  ;;  %v6224_v44 = vadd.f32 %v6223_v35, %v6222_v12  ;;  %19089 = vst [vmem:[#allocation22_spill] sm:$0xff] %v17427_v61 }
 0x5d8   : > { %v13544_v10 = vpop.f32.mrb[28].mxu1  ;;  %v5955_v47 = vadd.f32 %v17167_v0, %v5915_v38  ;;  %v6225_v6 = vsel %vm6185_vm6, %v17414_v54, 0.0  ;;  %v6283_v36 = vmul.f32 %v17414_v54, %v17414_v54  ;;  %v6227_v16 = vsel %vm6185_vm6, %v17402_v25, 0.0 }
 0x5d9   : > { %v5791_v62 = vpop.f32.mrb[29].mxu1  ;;  %v17419_v59 = vmul.f32 %v17350_v28, %v5956_v24  ;;  %v5918_v2 = vadd.f32 %v13544_v10, %v17164_v15  ;;  %v6337_v19 = vadd.f32 %v6336_v5, %v6335_v63  ;;  %v6340_v12 = vsel %vm6185_vm6, %v6284_v29, 0.0 }
 0x5da   : > { %v6226_v35 = vadd.f32 %v6225_v6, %v6224_v44  ;;  %v17433_v24 = vmul.f32 %v17363_v18, %v5955_v47  ;;  %v6338_v10 = vsel %vm6185_vm6, %v6283_v36, 0.0  ;;  %v5917_v4 = vadd.f32 %v17164_v15, %v5791_v62  ;;  %v17450_v6 = vpop.permute.xlu0 %6116 }
 0x5db   : > { %v5958_v28 = vadd.f32 %v17167_v0, %v5918_v2  ;;  %v6339_v51 = vadd.f32 %v6338_v10, %v6337_v19  ;;  %v6286_v31 = vmul.f32 %v17419_v59, %v17419_v59  ;;  %19090 = vst [vmem:[#allocation46_spill] sm:$0xff] %v17450_v6 }
 0x5dc   : > { %v13547_v38 = vpop.f32.mrb[30].mxu1  ;;  %v6228_v37 = vadd.f32 %v6227_v16, %v6226_v35  ;;  %v6229_v29 = vsel %vm6185_vm6, %v17433_v24, 0.0  ;;  %v6285_v44 = vmul.f32 %v17433_v24, %v17433_v24  ;;  %v5957_v2 = vadd.f32 %v17167_v0, %v5917_v4 }
 0x5dd   : > { %v5920_v5 = vadd.f32 %v13547_v38, %v17164_v15  ;;  %v5801_v63 = vpop.f32.mrb[31].mxu1  ;;  %v17446_v47 = vmul.f32 %v17381_v60, %v5958_v28  ;;  %v6341_v19 = vadd.f32 %v6340_v12, %v6339_v51  ;;  %v6231_v35 = vsel %vm6185_vm6, %v17419_v59, 0.0 }
 0x5de   : > { %v6230_v36 = vadd.f32 %v6229_v29, %v6228_v37  ;;  %v5919_v38 = vadd.f32 %v17164_v15, %v5801_v63  ;;  %v6342_v10 = vsel %vm6185_vm6, %v6285_v44, 0.0  ;;  %v17459_v60 = vmul.f32 %v17393_v45, %v5957_v2  ;;  %v17482_v13 = vpop.permute.xlu0 %6126 }
 0x5df   : > { %v5960_v62 = vadd.f32 %v17167_v0, %v5920_v5  ;;  %v6288_v28 = vmul.f32 %v17446_v47, %v17446_v47  ;;  %v17461_v5 = vpop.permute.xlu1 %6111  ;;  %v6343_v18 = vadd.f32 %v6342_v10, %v6341_v19  ;;  %v6344_v63 = vsel %vm6185_vm6, %v6286_v31, 0.0  ;;  %19092 = vst [vmem:[#allocation23_spill] sm:$0xff] %v17482_v13 }
 0x5e0   : > { %v13550_v16 = vpop.f32.mrb[32].mxu1  ;;  %19091 = vst [vmem:[#allocation49_spill] sm:$0xff] %v17461_v5  ;;  %v6232_v37 = vadd.f32 %v6231_v35, %v6230_v36  ;;  %v5959_v12 = vadd.f32 %v17167_v0, %v5919_v38  ;;  %v6233_v29 = vsel %vm6185_vm6, %v17459_v60, 0.0  ;;  %v6287_v44 = vmul.f32 %v17459_v60, %v17459_v60 }
 0x5e1   : > { %v5811_v4 = vpop.f32.mrb[33].mxu1  ;;  %v17464_v51 = vmul.f32 %v17416_v49, %v5960_v62  ;;  %v5922_v2 = vadd.f32 %v13550_v16, %v17164_v15  ;;  %v6235_v45 = vsel %vm6185_vm6, %v17446_v47, 0.0  ;;  %v6348_v36 = vsel %vm6185_vm6, %v6288_v28, 0.0 }
 0x5e2   : > { %v6234_v19 = vadd.f32 %v6233_v29, %v6232_v37  ;;  %v6345_v62 = vadd.f32 %v6344_v63, %v6343_v18  ;;  %v6346_v38 = vsel %vm6185_vm6, %v6287_v44, 0.0  ;;  %v17478_v31 = vmul.f32 %v17427_v61, %v5959_v12 }
 0x5e3   : > { %v5962_v10 = vadd.f32 %v17167_v0, %v5922_v2  ;;  %v5921_v49 = vadd.f32 %v17164_v15, %v5811_v4  ;;  %v6290_v52 = vmul.f32 %v17464_v51, %v17464_v51  ;;  %v17495_v29 = vpop.permute.xlu1 %6121 }
 0x5e4   : > { %v13553_v35 = vpop.f32.mrb[34].mxu1  ;;  %v6347_v16 = vadd.f32 %v6346_v38, %v6345_v62  ;;  %v6236_v28 = vadd.f32 %v6235_v45, %v6234_v19  ;;  %v6237_v37 = vsel %vm6185_vm6, %v17478_v31, 0.0  ;;  %v6289_v12 = vmul.f32 %v17478_v31, %v17478_v31  ;;  %19093 = vst [vmem:[#allocation47_spill] sm:$0xff] %v17495_v29 }
 0x5e5   : > { %v5821_v56 = vpop.f32.mrb[35].mxu1  ;;  %v5924_v18 = vadd.f32 %v13553_v35, %v17164_v15  ;;  %v17492_v63 = vmul.f32 %v17450_v6, %v5962_v10  ;;  %v5961_v4 = vadd.f32 %v17167_v0, %v5921_v49  ;;  %v6239_v35 = vsel %vm6185_vm6, %v17464_v51, 0.0 }
 0x5e6   : > { %v6238_v44 = vadd.f32 %v6237_v37, %v6236_v28  ;;  %v6349_v2 = vadd.f32 %v6348_v36, %v6347_v16  ;;  %v5923_v45 = vadd.f32 %v17164_v15, %v5821_v56  ;;  %v6350_v38 = vsel %vm6185_vm6, %v6289_v12, 0.0 }
 0x5e7   : > { %v5964_v62 = vadd.f32 %v17167_v0, %v5924_v18  ;;  %v6292_v10 = vmul.f32 %v17492_v63, %v17492_v63  ;;  %v17505_v6 = vmul.f32 %v17461_v5, %v5961_v4  ;;  %v6352_v16 = vsel %vm6185_vm6, %v6290_v52, 0.0  ;;  %v17517_v4 = vpop.permute.xlu0 %6136  ;;  %v17528_v48 = vpop.permute.xlu1 %6131 }
 0x5e8   : > { %v13556_v19 = vpop.f32.mrb[36].mxu1  ;;  %v6351_v61 = vadd.f32 %v6350_v38, %v6349_v2  ;;  %v6240_v28 = vadd.f32 %v6239_v35, %v6238_v44  ;;  %v5963_v56 = vadd.f32 %v17167_v0, %v5923_v45  ;;  %19094 = vst [vmem:[#allocation24_spill] sm:$0xff] %v17517_v4  ;;  %v6243_v44 = vsel %vm6185_vm6, %v17492_v63, 0.0  ;;  %19095 = vst [vmem:[#allocation48_spill] sm:$0xff] %v17528_v48 }
 0x5e9   : > { %v5831_v49 = vpop.f32.mrb[37].mxu1  ;;  %v17508_v36 = vmul.f32 %v17482_v13, %v5964_v62  ;;  %v6241_v18 = vsel %vm6185_vm6, %v17505_v6, 0.0  ;;  %v6291_v37 = vmul.f32 %v17505_v6, %v17505_v6  ;;  %v5926_v12 = vadd.f32 %v13556_v19, %v17164_v15 }
 0x5ea   : > { %v6356_v2 = vsel %vm6185_vm6, %v6292_v10, 0.0  ;;  %v6242_v62 = vadd.f32 %v6241_v18, %v6240_v28  ;;  %v6353_v35 = vadd.f32 %v6352_v16, %v6351_v61  ;;  %v17524_v38 = vmul.f32 %v17495_v29, %v5963_v56 }
 0x5eb   : > { %v6354_v52 = vsel %vm6185_vm6, %v6291_v37, 0.0  ;;  %v5966_v13 = vadd.f32 %v17167_v0, %v5926_v12  ;;  %v5925_v5 = vadd.f32 %v17164_v15, %v5831_v49  ;;  %v6294_v41 = vmul.f32 %v17508_v36, %v17508_v36 }
 0x5ec   : > { %v13559_v45 = vpop.f32.mrb[38].mxu1  ;;  %v6355_v58 = vadd.f32 %v6354_v52, %v6353_v35  ;;  %v6244_v10 = vadd.f32 %v6243_v44, %v6242_v62  ;;  %v6245_v28 = vsel %vm6185_vm6, %v17524_v38, 0.0  ;;  %v6293_v56 = vmul.f32 %v17524_v38, %v17524_v38  ;;  %v17549_v52 = vpop.permute.xlu0 %6146 }
 0x5ed   : > { %v5841_v19 = vpop.f32.mrb[39].mxu1  ;;  %v5928_v61 = vadd.f32 %v13559_v45, %v17164_v15  ;;  %v17538_v16 = vmul.f32 %v17517_v4, %v5966_v13  ;;  %v5965_v49 = vadd.f32 %v17167_v0, %v5925_v5  ;;  %v6247_v44 = vsel %vm6185_vm6, %v17508_v36, 0.0  ;;  %19096 = vst [vmem:[#allocation25_spill] sm:$0xff] %v17549_v52 }
 0x5ee   : > { %v6246_v18 = vadd.f32 %v6245_v28, %v6244_v10  ;;  %v6357_v37 = vadd.f32 %v6356_v2, %v6355_v58  ;;  %v5927_v35 = vadd.f32 %v17164_v15, %v5841_v19  ;;  %v6358_v62 = vsel %vm6185_vm6, %v6293_v56, 0.0 }
 0x5ef   : > { %v5968_v12 = vadd.f32 %v17167_v0, %v5928_v61  ;;  %v17547_v45 = vmul.f32 %v17528_v48, %v5965_v49  ;;  %v6360_v13 = vsel %vm6185_vm6, %v6294_v41, 0.0  ;;  %v6296_v2 = vmul.f32 %v17538_v16, %v17538_v16  ;;  %v17562_v61 = vpop.permute.xlu1 %6141 }
 0x5f0   : > { %v6359_v4 = vadd.f32 %v6358_v62, %v6357_v37  ;;  %v6248_v5 = vadd.f32 %v6247_v44, %v6246_v18  ;;  %v5967_v58 = vadd.f32 %v17167_v0, %v5927_v35  ;;  %19097 = vst [vmem:[#allocation50_spill] sm:$0xff] %v17562_v61  ;;  %v6251_v56 = vsel %vm6185_vm6, %v17538_v16, 0.0 }
 0x5f1   : > { %v6249_v15 = vsel %vm6185_vm6, %v17547_v45, 0.0  ;;  %v6295_v19 = vmul.f32 %v17547_v45, %v17547_v45  ;;  %v17560_v10 = vmul.f32 %v17549_v52, %v5968_v12  ;;  %v6364_v35 = vsel %vm6185_vm6, %v6296_v2, 0.0 }
 0x5f2   : > { %v6250_v28 = vadd.f32 %v6249_v15, %v6248_v5  ;;  %v6361_v41 = vadd.f32 %v6360_v13, %v6359_v4  ;;  %v17568_v49 = vmul.f32 %v17562_v61, %v5967_v58 }
 0x5f3   : > { %v6362_v0 = vsel %vm6185_vm6, %v6295_v19, 0.0  ;;  %v6298_v12 = vmul.f32 %v17560_v10, %v17560_v10  ;;  %v6255_v5 = vsel %vm6185_vm6, %v17560_v10, 0.0 }
 0x5f4   : > { %v6363_v18 = vadd.f32 %v6362_v0, %v6361_v41  ;;  %v6252_v37 = vadd.f32 %v6251_v56, %v6250_v28  ;;  %v6253_v44 = vsel %vm6185_vm6, %v17568_v49, 0.0  ;;  %v6297_v4 = vmul.f32 %v17568_v49, %v17568_v49 }
 0x5f5   : > { %v6368_v2 = vsel %vm6185_vm6, %v6298_v12, 0.0 }
 0x5f6   : > { %v6254_v62 = vadd.f32 %v6253_v44, %v6252_v37  ;;  %v6365_v13 = vadd.f32 %v6364_v35, %v6363_v18  ;;  %v6366_v58 = vsel %vm6185_vm6, %v6297_v4, 0.0 }
 0x5f8   : > { %v6256_v15 = vadd.f32 %v6255_v5, %v6254_v62  ;;  %v6367_v19 = vadd.f32 %v6366_v58, %v6365_v13 }
 0x5fa   : > { %v6257_v28 = vrot.slane %v6256_v15, 4  ;;  %v6369_v41 = vadd.f32 %v6368_v2, %v6367_v19  ;;  %v11928_v19 = vld [vmem:[%s18871_s16 + $0x8] sm:$0xff] }
 0x5fb   : > { %v7172_v2 = vld [vmem:[#allocation3 + $0x1] sm:$0xff]  ;;  %14146 = vmatprep.subr.mxu1 %v11928_v19 }
 0x5fc   : > { %v6258_v56 = vadd.f32 %v6257_v28, %v6256_v15  ;;  %v6370_v0 = vrot.slane %v6369_v41, 4  ;;  %v7171_v28 = vld [vmem:[%s18871_s16] sm:$0xff]  ;;  %14147 = vmatpush3.msra.mxu1 %v11928_v19 }
 0x5fe   : > { %v6259_v52 = vrot.slane %v6258_v56, 2  ;;  %v6371_v61 = vadd.f32 %v6370_v0, %v6369_v41 }
 0x600   : > { %v6260_v48 = vadd.f32 %v6259_v52, %v6258_v56  ;;  %v6372_v29 = vrot.slane %v6371_v61, 2 }
 0x602   : > { %v6261_v46 = vrot.slane %v6260_v48, 1  ;;  %v6373_v37 = vadd.f32 %v6372_v29, %v6371_v61 }
 0x604   : > { %v6262_v18 = vadd.f32 %v6261_v46, %v6260_v48  ;;  %v6374_v35 = vrot.slane %v6373_v37, 1  ;;  %v6528_v46 = vld [vmem:[%s18870_s15] sm:$0xf] }
 0x606   : > { %13563 = vmatmul.mubr.msk.f32.vlgmr.msra.gmra.mrb[6].mxu0 %vm6185_vm6, %v6262_v18  ;;  %v6375_v12 = vadd.f32 %v6374_v35, %v6373_v37 }
 0x607   : > { %13566 = vmatpush3.msra.mxu0 %v17134_v7  ;;  %13567 = vmatprep.mubr.msk.f32.mxu0 %vm15173_vm1, %v19063_v34 }
 0x608   : > { %13570 = vmatprep.subr.mxu0 %v19063_v34 }
 0x60a   : > { %13568 = vmatmul.mubr.msk.f32.vlgmr.msra.gmra.mrb[8].mxu0 %vm6185_vm6, %v6375_v12 }
 0x60b   : > { %13572 = vmatprep.mubr.msk.f32.mxu0 %vm15173_vm1, %v19063_v34  ;;  %13571 = vmatpush3.msk.msra.mxu0 %vm983_vm0, %v6528_v46 }
 0x60c   : > { %13575 = vmatprep.subr.mxu0 %v19063_v34 }
 0x6d9   : > { %v6446_v7 = vpop.f32.mrb[6].mxu0 }
 0x6da   : > { %v6451_v48 = vmul.f32 0.001953125, %v6446_v7  ;;  %v13564_v29 = vpop.f32.mrb[7].mxu0 }
 0x6dc   : > { %13573 = vmatmul.mubr.msk.f32.vlgmr.msra.gmra.mrb[10].mxu0 %vm762_vm2, %v6451_v48  ;;  %v6526_v61 = vmul.f32 %v6451_v48, %v6451_v48 }
 0x6dd   : > { %v6521_v52 = vpop.f32.mrb[8].mxu0  ;;  %13576 = vmatpush3.msk.msra.mxu0 %vm983_vm0, %v6528_v46  ;;  %13577 = vmatprep.mubr.msk.f32.mxu0 %vm15173_vm1, %v19063_v34  ;;  %v7173_v46 = vld [vmem:[#allocation3 + $0x9] sm:$0xff] }
 0x6de   : > { %v6525_v44 = vmul.f32 0.001953125, %v6521_v52  ;;  %v13569_v4 = vpop.f32.mrb[9].mxu0  ;;  %13580 = vmatprep.subr.mxu0 %v11928_v19 }
 0x6e0   : > { %v6527_v62 = vsub.f32 %v6525_v44, %v6526_v61 }
 0x6e2   : > { %13578 = vmatmul.mubr.msk.f32.vlgmr.msra.gmra.mrb[12].mxu0 %vm762_vm2, %v6527_v62 }
 0x6e3   : > { %13581 = vmatpush3.msra.mxu0 %v11928_v19  ;;  %13582 = vmatprep.mubr.msk.f32.mxu0 %vm6185_vm6, %v7172_v2 }
 0x6e4   : > { %13636 = vmatprep.subr.mxu0 %v7171_v28 }
 0x6e6   : > { %13583 = vmatmul.mubr.msk.f32.vlgmr.msra.gmra.mrb[14].mxu0 %vm6185_vm6, %v7173_v46 }
 0x6e7   : > { %13637 = vmatpush3.msra.mxu0 %v7171_v28 }
 0x7af   : > { %v6601_v13 = vpop.f32.mrb[10].mxu0 }
 0x7b0   : > { %v13574_v5 = vpop.f32.mrb[11].mxu0  ;;  %v17609_v56 = vrot.slane %v6601_v13, %v19071_v57 }
 0x7b2   : > { %v6683_v0 = vsub.f32 %v17182_v42, %v17609_v56  ;;  %v6684_v37 = vsub.f32 %v17178_v8, %v17609_v56  ;;  %v6685_v18 = vsub.f32 %v17206_v22, %v17609_v56  ;;  %v6686_v35 = vsub.f32 %v17198_v14, %v17609_v56  ;;  %v17626_v42 = vld [vmem:[%s18871_s16 + $0x10] sm:$0xff] }
 0x7b3   : > { %v6687_v34 = vsub.f32 %v17227_v50, %v17609_v56  ;;  %v6688_v12 = vsub.f32 %v17218_v53, %v17609_v56  ;;  %19098 = vst [vmem:[#allocation27_spill] sm:$0xff] %v17626_v42  ;;  %v6689_v8 = vsub.f32 %v17249_v26, %v17609_v56  ;;  %v6690_v22 = vsub.f32 %v17246_v11, %v17609_v56 }
 0x7b4   : > { %v6691_v14 = vsub.f32 %v17275_v27, %v17609_v56  ;;  %v6692_v50 = vsub.f32 %v17263_v40, %v17609_v56  ;;  %v6693_v53 = vsub.f32 %v17291_v17, %v17609_v56  ;;  %v6694_v7 = vsub.f32 %v17288_v9, %v17609_v56  ;;  %v6719_v27 = vld [vmem:[%s18867_s12] sm:$0x1]  ;;  %13692 = vmatprep.subr.mxu0 %v17626_v42 }
 0x7b5   : > { %v6674_v58 = vpop.f32.mrb[12].mxu0  ;;  %v6695_v26 = vsub.f32 %v17317_v33, %v17609_v56  ;;  %v6696_v11 = vsub.f32 %v17314_v1, %v17609_v56  ;;  %v6697_v40 = vsub.f32 %v17345_v23, %v17609_v56  ;;  %v6698_v17 = vsub.f32 %v17333_v39, %v17609_v56 }
 0x7b6   : > { %v13579_v15 = vpop.f32.mrb[13].mxu0  ;;  %v6675_v41 = vadd.f32 1e-05, %v6674_v58  ;;  %v6699_v9 = vsub.f32 %v17360_v30, %v17609_v56  ;;  %v6700_v33 = vsub.f32 %v17357_v32, %v17609_v56  ;;  %v6701_v48 = vsub.f32 %v17389_v21, %v17609_v56 }
 0x7b7   : > { %v6702_v29 = vsub.f32 %v17377_v43, %v17609_v56  ;;  %v6703_v23 = vsub.f32 %v17414_v54, %v17609_v56  ;;  %v6704_v39 = vsub.f32 %v17402_v25, %v17609_v56  ;;  %v6705_v30 = vsub.f32 %v17433_v24, %v17609_v56 }
 0x7b8   : > { %15018 = vrsqrt.f32 %v6675_v41  ;;  %v6706_v32 = vsub.f32 %v17419_v59, %v17609_v56  ;;  %v6707_v52 = vsub.f32 %v17459_v60, %v17609_v56  ;;  %v6708_v21 = vsub.f32 %v17446_v47, %v17609_v56 }
 0x7b9   : > { %v6709_v43 = vsub.f32 %v17478_v31, %v17609_v56  ;;  %v6710_v54 = vsub.f32 %v17464_v51, %v17609_v56  ;;  %v6711_v25 = vsub.f32 %v17505_v6, %v17609_v56  ;;  %v6712_v24 = vsub.f32 %v17492_v63, %v17609_v56 }
 0x7ba   : > { %v6713_v59 = vsub.f32 %v17524_v38, %v17609_v56  ;;  %v6714_v60 = vsub.f32 %v17508_v36, %v17609_v56  ;;  %v6715_v31 = vsub.f32 %v17547_v45, %v17609_v56  ;;  %v6716_v51 = vsub.f32 %v17538_v16, %v17609_v56 }
 0x7bb   : > { %v6717_v6 = vsub.f32 %v17568_v49, %v17609_v56  ;;  %v6718_v63 = vsub.f32 %v17560_v10, %v17609_v56 }
 0x7c2   : > { %v15019_v1 = vpop.eup %15018 }
 0x7c3   : > { %v6720_v61 = vmul.f32 %v15019_v1, %v6719_v27 }
 0x7c5   : > { %v6724_v47 = vrot.slane %v6720_v61, %v19071_v57 }
 0x7c7   : > { %v6725_v44 = vmul.f32 %v6724_v47, %v6683_v0  ;;  %v6726_v4 = vmul.f32 %v6724_v47, %v6684_v37  ;;  %v6727_v38 = vmul.f32 %v6724_v47, %v6685_v18  ;;  %v6728_v62 = vmul.f32 %v6724_v47, %v6686_v35 }
 0x7c8   : > { %v6729_v13 = vmul.f32 %v6724_v47, %v6687_v34  ;;  %v6730_v36 = vmul.f32 %v6724_v47, %v6688_v12  ;;  %v6731_v5 = vmul.f32 %v6724_v47, %v6689_v8  ;;  %v6732_v57 = vmul.f32 %v6724_v47, %v6690_v22 }
 0x7c9   : > { %v6733_v58 = vmul.f32 %v6724_v47, %v6691_v14  ;;  %v6734_v15 = vmul.f32 %v6724_v47, %v6692_v50  ;;  %v6735_v45 = vmul.f32 %v6724_v47, %v6693_v53  ;;  %v6736_v19 = vmul.f32 %v6724_v47, %v6694_v7 }
 0x7ca   : > { %v6737_v2 = vmul.f32 %v6724_v47, %v6695_v26  ;;  %v6738_v16 = vmul.f32 %v6724_v47, %v6696_v11  ;;  %v6739_v28 = vmul.f32 %v6724_v47, %v6697_v40  ;;  %v6740_v41 = vmul.f32 %v6724_v47, %v6698_v17  ;;  %v17731_v17 = vld [vmem:[%s18868_s13] ss:$0 sm:$0xff] }
 0x7cb   : > { %v6741_v49 = vmul.f32 %v6724_v47, %v6699_v9  ;;  %v6742_v46 = vmul.f32 %v6724_v47, %v6700_v33  ;;  %v6743_v27 = vmul.f32 %v6724_v47, %v6701_v48  ;;  %v17694_v10 = vmul.f32 %v6724_v47, %v6702_v29 }
 0x7cc   : > { %v17696_v56 = vmul.f32 %v6724_v47, %v6703_v23  ;;  %v17698_v0 = vmul.f32 %v6724_v47, %v6704_v39  ;;  %v17700_v37 = vmul.f32 %v6724_v47, %v6705_v30  ;;  %v17702_v18 = vmul.f32 %v6724_v47, %v6706_v32 }
 0x7cd   : > { %v17704_v35 = vmul.f32 %v6724_v47, %v6707_v52  ;;  %v17706_v34 = vmul.f32 %v6724_v47, %v6708_v21  ;;  %v17708_v12 = vmul.f32 %v6724_v47, %v6709_v43  ;;  %v17710_v8 = vmul.f32 %v6724_v47, %v6710_v54 }
 0x7ce   : > { %v17712_v22 = vmul.f32 %v6724_v47, %v6711_v25  ;;  %v17714_v14 = vmul.f32 %v6724_v47, %v6712_v24  ;;  %v17716_v50 = vmul.f32 %v6724_v47, %v6713_v59  ;;  %v17718_v53 = vmul.f32 %v6724_v47, %v6714_v60 }
 0x7cf   : > { %v17720_v7 = vmul.f32 %v6724_v47, %v6715_v31  ;;  %v17722_v26 = vmul.f32 %v6724_v47, %v6716_v51  ;;  %v17724_v11 = vmul.f32 %v6724_v47, %v6717_v6  ;;  %v17726_v40 = vmul.f32 %v6724_v47, %v6718_v63 }
 0x7d0   : > { %v17734_v9 = vadd.f32 %v17731_v17, %v6725_v44  ;;  %v17737_v33 = vadd.f32 %v17731_v17, %v6726_v4  ;;  %v17740_v1 = vadd.f32 %v17731_v17, %v6727_v38  ;;  %v17743_v48 = vadd.f32 %v17731_v17, %v6728_v62 }
 0x7d1   : > { %v17746_v29 = vadd.f32 %v17731_v17, %v6729_v13  ;;  %v17749_v23 = vadd.f32 %v17731_v17, %v6730_v36  ;;  %v17752_v39 = vadd.f32 %v17731_v17, %v6731_v5  ;;  %v17758_v61 = vadd.f32 %v17731_v17, %v6732_v57 }
 0x7d2   : > { %v11892_v30 = vmul.f32 -1.442695, %v17734_v9  ;;  %v11893_v32 = vmul.f32 -1.442695, %v17737_v33  ;;  %v11894_v52 = vmul.f32 -1.442695, %v17740_v1  ;;  %v17762_v43 = vadd.f32 %v17731_v17, %v6733_v58 }
 0x7d3   : > { %v11895_v21 = vmul.f32 -1.442695, %v17743_v48  ;;  %v11896_v54 = vmul.f32 -1.442695, %v17746_v29  ;;  %v17766_v25 = vadd.f32 %v17731_v17, %v6734_v15  ;;  %v11897_v24 = vmul.f32 -1.442695, %v17749_v23 }
 0x7d4   : > { %15020 = vpow2.f32 %v11892_v30  ;;  %v17770_v59 = vadd.f32 %v17731_v17, %v6735_v45  ;;  %v11898_v60 = vmul.f32 -1.442695, %v17752_v39  ;;  %v17774_v47 = vadd.f32 %v17731_v17, %v6736_v19 }
 0x7d5   : > { %15022 = vpow2.f32 %v11893_v32  ;;  %v11899_v31 = vmul.f32 -1.442695, %v17758_v61  ;;  %v17778_v51 = vadd.f32 %v17731_v17, %v6737_v2  ;;  %v11900_v6 = vmul.f32 -1.442695, %v17762_v43 }
 0x7d6   : > { %15024 = vpow2.f32 %v11894_v52  ;;  %v17782_v63 = vadd.f32 %v17731_v17, %v6738_v16  ;;  %v11901_v44 = vmul.f32 -1.442695, %v17766_v25  ;;  %v17786_v4 = vadd.f32 %v17731_v17, %v6739_v28 }
 0x7d7   : > { %15026 = vpow2.f32 %v11895_v21  ;;  %v11902_v38 = vmul.f32 -1.442695, %v17770_v59  ;;  %v17790_v62 = vadd.f32 %v17731_v17, %v6740_v41  ;;  %v11903_v13 = vmul.f32 -1.442695, %v17774_v47 }
 0x7d8   : > { %15028 = vpow2.f32 %v11896_v54  ;;  %v17794_v36 = vadd.f32 %v17731_v17, %v6741_v49  ;;  %v11904_v5 = vmul.f32 -1.442695, %v17778_v51  ;;  %v17798_v57 = vadd.f32 %v17731_v17, %v6742_v46 }
 0x7d9   : > { %15030 = vpow2.f32 %v11897_v24  ;;  %v11905_v58 = vmul.f32 -1.442695, %v17782_v63  ;;  %v17804_v45 = vadd.f32 %v17731_v17, %v6743_v27  ;;  %v11906_v19 = vmul.f32 -1.442695, %v17786_v4 }
 0x7da   : > { %15032 = vpow2.f32 %v11898_v60  ;;  %v17811_v16 = vadd.f32 %v17731_v17, %v17694_v10  ;;  %v11907_v28 = vmul.f32 -1.442695, %v17790_v62  ;;  %v17818_v49 = vadd.f32 %v17731_v17, %v17696_v56 }
 0x7db   : > { %15034 = vpow2.f32 %v11899_v31  ;;  %v11908_v46 = vmul.f32 -1.442695, %v17794_v36  ;;  %v17825_v30 = vadd.f32 %v17731_v17, %v17698_v0  ;;  %v11909_v10 = vmul.f32 -1.442695, %v17798_v57 }
 0x7dc   : > { %15036 = vpow2.f32 %v11900_v6  ;;  %v17832_v52 = vadd.f32 %v17731_v17, %v17700_v37  ;;  %v11910_v56 = vmul.f32 -1.442695, %v17804_v45  ;;  %v17839_v54 = vadd.f32 %v17731_v17, %v17702_v18 }
 0x7dd   : > { %15038 = vpow2.f32 %v11901_v44  ;;  %v11911_v0 = vmul.f32 -1.442695, %v17811_v16  ;;  %v17846_v60 = vadd.f32 %v17731_v17, %v17704_v35  ;;  %v11912_v37 = vmul.f32 -1.442695, %v17818_v49 }
 0x7de   : > { %v17801_v15 = vpop.eup %15020  ;;  %15040 = vpow2.f32 %v11902_v38  ;;  %v17853_v6 = vadd.f32 %v17731_v17, %v17706_v34  ;;  %v11913_v18 = vmul.f32 -1.442695, %v17825_v30  ;;  %v17860_v38 = vadd.f32 %v17731_v17, %v17708_v12 }
 0x7df   : > { %v17807_v2 = vpop.eup %15022  ;;  %15042 = vpow2.f32 %v11903_v13  ;;  %19099 = vst [vmem:[#allocation51_spill] sm:$0xff] %v17846_v60  ;;  %v11914_v35 = vmul.f32 -1.442695, %v17832_v52  ;;  %v11915_v34 = vmul.f32 -1.442695, %v17839_v54  ;;  %v17902_v42 = vadd.f32 %v17731_v17, %v17720_v7 }
 0x7e0   : > { %v17814_v41 = vpop.eup %15024  ;;  %15044 = vpow2.f32 %v11904_v5  ;;  %19100 = vst [vmem:[#allocation29_spill] sm:$0xff] %v17853_v6  ;;  %19101 = vst [vmem:[#allocation30_spill] sm:$0xff] %v17860_v38  ;;  %v17867_v5 = vadd.f32 %v17731_v17, %v17710_v8  ;;  %v11916_v12 = vmul.f32 -1.442695, %v17846_v60  ;;  %v11917_v8 = vmul.f32 -1.442695, %v17853_v6 }
 0x7e1   : > { %v17821_v27 = vpop.eup %15026  ;;  %15046 = vpow2.f32 %v11905_v58  ;;  %19107 = vst [vmem:[#allocation38_spill] sm:$0xff] %v17902_v42 }
 0x7e2   : > { %v17828_v32 = vpop.eup %15028  ;;  %15048 = vpow2.f32 %v11906_v19  ;;  %19102 = vst [vmem:[#allocation31_spill] sm:$0xff] %v17867_v5  ;;  %v17874_v19 = vadd.f32 %v17731_v17, %v17712_v22  ;;  %v11918_v22 = vmul.f32 -1.442695, %v17860_v38  ;;  %v17909_v38 = vadd.f32 %v17731_v17, %v17722_v26 }
 0x7e3   : > { %v17835_v21 = vpop.eup %15030  ;;  %15050 = vpow2.f32 %v11907_v28 }
 0x7e4   : > { %v17842_v24 = vpop.eup %15032  ;;  %15052 = vpow2.f32 %v11908_v46  ;;  %19103 = vst [vmem:[#allocation32_spill] sm:$0xff] %v17874_v19  ;;  %v17881_v46 = vadd.f32 %v17731_v17, %v17714_v14  ;;  %v11919_v14 = vmul.f32 -1.442695, %v17867_v5  ;;  %19108 = vst [vmem:[#allocation39_spill] sm:$0xff] %v17909_v38  ;;  %v17916_v5 = vadd.f32 %v17731_v17, %v17724_v11 }
 0x7e5   : > { %v17849_v31 = vpop.eup %15034  ;;  %15054 = vpow2.f32 %v11909_v10  ;;  %v11925_v11 = vmul.f32 -1.442695, %v17909_v38 }
 0x7e6   : > { %v17856_v44 = vpop.eup %15036  ;;  %15056 = vpow2.f32 %v11910_v56  ;;  %19104 = vst [vmem:[#allocation33_spill] sm:$0xff] %v17881_v46  ;;  %v17888_v56 = vadd.f32 %v17731_v17, %v17716_v50  ;;  %v11920_v50 = vmul.f32 -1.442695, %v17874_v19  ;;  %19109 = vst [vmem:[#allocation40_spill] sm:$0xff] %v17916_v5  ;;  %v17923_v19 = vadd.f32 %v17731_v17, %v17726_v40 }
 0x7e7   : > { %v17863_v13 = vpop.eup %15038  ;;  %15058 = vpow2.f32 %v11911_v0 }
 0x7e8   : > { %v17870_v58 = vpop.eup %15040  ;;  %15060 = vpow2.f32 %v11912_v37  ;;  %19105 = vst [vmem:[#allocation35_spill] sm:$0xff] %v17888_v56  ;;  %v17895_v37 = vadd.f32 %v17731_v17, %v17718_v53  ;;  %v11921_v53 = vmul.f32 -1.442695, %v17881_v46  ;;  %v11922_v7 = vmul.f32 -1.442695, %v17888_v56  ;;  %19110 = vst [vmem:[#allocation41_spill] sm:$0xff] %v17923_v19 }
 0x7e9   : > { %v17877_v28 = vpop.eup %15042  ;;  %15062 = vpow2.f32 %v11913_v18  ;;  %v11924_v46 = vmul.f32 -1.442695, %v17902_v42  ;;  %v11926_v56 = vmul.f32 -1.442695, %v17916_v5  ;;  %v11927_v17 = vmul.f32 -1.442695, %v17923_v19 }
 0x7ea   : > { %v17884_v10 = vpop.eup %15044  ;;  %15064 = vpow2.f32 %v11914_v35  ;;  %19106 = vst [vmem:[#allocation37_spill] sm:$0xff] %v17895_v37  ;;  %v11923_v26 = vmul.f32 -1.442695, %v17895_v37 }
 0x7eb   : > { %v17891_v0 = vpop.eup %15046  ;;  %15066 = vpow2.f32 %v11915_v34 }
 0x7ec   : > { %v17898_v18 = vpop.eup %15048  ;;  %15068 = vpow2.f32 %v11916_v12 }
 0x7ed   : > { %v17905_v35 = vpop.eup %15050  ;;  %15070 = vpow2.f32 %v11917_v8  ;;  %v6926_v37 = vadd.f32 1.0, %v17898_v18 }
 0x7ee   : > { %v17912_v34 = vpop.eup %15052  ;;  %15072 = vpow2.f32 %v11918_v22 }
 0x7ef   : > { %v17919_v12 = vpop.eup %15054  ;;  %15074 = vpow2.f32 %v11919_v14  ;;  %v6928_v60 = vadd.f32 1.0, %v17912_v34 }
 0x7f0   : > { %v17926_v8 = vpop.eup %15056  ;;  %15076 = vpow2.f32 %v11920_v50  ;;  %v6912_v50 = vadd.f32 1.0, %v17801_v15 }
 0x7f1   : > { %v17929_v6 = vpop.eup %15058  ;;  %15078 = vpow2.f32 %v11921_v53  ;;  %v6913_v53 = vadd.f32 1.0, %v17807_v2 }
 0x7f2   : > { %v17932_v22 = vpop.eup %15060  ;;  %15080 = vpow2.f32 %v11922_v7  ;;  %v6914_v7 = vadd.f32 1.0, %v17814_v41 }
 0x7f3   : > { %v17935_v40 = vpop.eup %15062  ;;  %15082 = vpow2.f32 %v11923_v26  ;;  %v6915_v26 = vadd.f32 1.0, %v17821_v27 }
 0x7f4   : > { %v17938_v14 = vpop.eup %15064  ;;  %15084 = vpow2.f32 %v11924_v46  ;;  %v6916_v46 = vadd.f32 1.0, %v17828_v32  ;;  %v6920_v32 = vadd.f32 1.0, %v17856_v44  ;;  %v6924_v44 = vadd.f32 1.0, %v17884_v10 }
 0x7f5   : > { %v17941_v42 = vpop.eup %15066  ;;  %15086 = vpow2.f32 %v11925_v11  ;;  %v6917_v11 = vadd.f32 1.0, %v17835_v21  ;;  %v6921_v21 = vadd.f32 1.0, %v17863_v13  ;;  %v6925_v13 = vadd.f32 1.0, %v17891_v0 }
 0x7f6   : > { %v17944_v38 = vpop.eup %15068  ;;  %15088 = vpow2.f32 %v11926_v56  ;;  %v6918_v56 = vadd.f32 1.0, %v17842_v24  ;;  %v6922_v24 = vadd.f32 1.0, %v17870_v58  ;;  %v6929_v0 = vadd.f32 1.0, %v17919_v12 }
 0x7f7   : > { %v17947_v5 = vpop.eup %15070  ;;  %15090 = vpow2.f32 %v11927_v17  ;;  %v6919_v17 = vadd.f32 1.0, %v17849_v31  ;;  %v6923_v31 = vadd.f32 1.0, %v17877_v28 }
 0x7f8   : > { %v17950_v19 = vpop.eup %15072  ;;  %15092 = vrcp.f32 %v6912_v50 }
 0x7f9   : > { %v17953_v15 = vpop.eup %15074  ;;  %15094 = vrcp.f32 %v6913_v53 }
 0x7fa   : > { %v17956_v2 = vpop.eup %15076  ;;  %15096 = vrcp.f32 %v6914_v7 }
 0x7fb   : > { %v17959_v41 = vpop.eup %15078  ;;  %15098 = vrcp.f32 %v6915_v26 }
 0x7fc   : > { %v17962_v27 = vpop.eup %15080  ;;  %15100 = vrcp.f32 %v6916_v46 }
 0x7fd   : > { %v17965_v50 = vpop.eup %15082  ;;  %15102 = vrcp.f32 %v6917_v11 }
 0x7fe   : > { %v17968_v53 = vpop.eup %15084  ;;  %15104 = vrcp.f32 %v6918_v56  ;;  %v6927_v56 = vadd.f32 1.0, %v17905_v35  ;;  %v6930_v35 = vadd.f32 1.0, %v17926_v8  ;;  %v19111_v8 = vld [vmem:[#allocation6_spill] sm:$0xff] }
 0x7ff   : > { %v17971_v7 = vpop.eup %15086  ;;  %15106 = vrcp.f32 %v6919_v17 }
 0x800   : > { %v17974_v26 = vpop.eup %15088  ;;  %15108 = vrcp.f32 %v6920_v32 }
 0x801   : > { %v17977_v46 = vpop.eup %15090  ;;  %15110 = vrcp.f32 %v6921_v21 }
 0x802   : > { %v15093_v11 = vpop.eup %15092  ;;  %15112 = vrcp.f32 %v6922_v24 }
 0x803   : > { %v15095_v58 = vpop.eup %15094  ;;  %15114 = vrcp.f32 %v6923_v31  ;;  %v7020_v28 = vmul.f32 %v15093_v11, %v17734_v9 }
 0x804   : > { %v15097_v17 = vpop.eup %15096  ;;  %15116 = vrcp.f32 %v6924_v44  ;;  %v7021_v10 = vmul.f32 %v15095_v58, %v17737_v33  ;;  %v6931_v44 = vadd.f32 1.0, %v17929_v6  ;;  %v6933_v6 = vadd.f32 1.0, %v17935_v40 }
 0x805   : > { %v15099_v32 = vpop.eup %15098  ;;  %15118 = vrcp.f32 %v6925_v13  ;;  %v7022_v21 = vmul.f32 %v15097_v17, %v17740_v1  ;;  %v7056_v18 = vmul.f32 %v7020_v28, %v17140_v20  ;;  %v6932_v20 = vadd.f32 1.0, %v17932_v22  ;;  %v19112_v13 = vld [vmem:[#allocation10_spill] sm:$0xff]  ;;  %v19114_v28 = vld [vmem:[#allocation12_spill] sm:$0xff] }
 0x806   : > { %v15101_v24 = vpop.eup %15100  ;;  %15120 = vrcp.f32 %v6926_v37  ;;  %v7023_v9 = vmul.f32 %v15099_v32, %v17743_v48  ;;  %v7057_v31 = vmul.f32 %v7021_v10, %v17138_v3  ;;  %v6934_v22 = vadd.f32 1.0, %v17938_v14  ;;  %v19115_v32 = vld [vmem:[#allocation8_spill] sm:$0xff] }
 0x807   : > { %v15103_v34 = vpop.eup %15102  ;;  %15122 = vrcp.f32 %v6927_v56  ;;  %v7024_v33 = vmul.f32 %v15101_v24, %v17746_v29  ;;  %v7058_v12 = vmul.f32 %v7022_v21, %v17144_v55  ;;  %7096 = vst.msk [vmem:[#allocation3 + $0x13] sm:$0xff] %vm6185_vm6, %v7056_v18  ;;  %v6935_v40 = vadd.f32 1.0, %v17941_v42  ;;  %v19116_v18 = vld [vmem:[#allocation18_spill] sm:$0xff] }
 0x808   : > { %v15105_v1 = vpop.eup %15104  ;;  %15124 = vrcp.f32 %v6928_v60  ;;  %v7025_v37 = vmul.f32 %v15103_v34, %v17749_v23  ;;  %v7059_v48 = vmul.f32 %v7023_v9, %v19111_v8  ;;  %7097 = vst.msk [vmem:[#allocation3 + $0x1b] sm:$0xff] %vm6185_vm6, %v7057_v31  ;;  %v19113_v60 = vld [vmem:[#allocation7_spill] sm:$0xff]  ;;  %v6936_v14 = vadd.f32 1.0, %v17944_v38  ;;  %v19117_v9 = vld [vmem:[#allocation9_spill] sm:$0xff] }
 0x809   : > { %v15107_v3 = vpop.eup %15106  ;;  %15126 = vrcp.f32 %v6929_v0  ;;  %v7026_v29 = vmul.f32 %v15105_v1, %v17752_v39  ;;  %v7060_v55 = vmul.f32 %v7024_v33, %v19112_v13  ;;  %7098 = vst.msk [vmem:[#allocation3 + $0x23] sm:$0xff] %vm6185_vm6, %v7058_v12  ;;  %v6937_v42 = vadd.f32 1.0, %v17947_v5  ;;  %v19118_v33 = vld [vmem:[#allocation11_spill] sm:$0xff] }
 0x80a   : > { %v15109_v11 = vpop.eup %15108  ;;  %15128 = vrcp.f32 %v6930_v35  ;;  %v7027_v23 = vmul.f32 %v15107_v3, %v17758_v61  ;;  %v7061_v58 = vmul.f32 %v7025_v37, %v19113_v60  ;;  %7099 = vst.msk [vmem:[#allocation3 + $0x2b] sm:$0xff] %vm6185_vm6, %v7059_v48  ;;  %v6938_v38 = vadd.f32 1.0, %v17950_v19  ;;  %v19119_v37 = vld [vmem:[#allocation5_spill] sm:$0xff] }
 0x80b   : > { %v15111_v56 = vpop.eup %15110  ;;  %15130 = vrcp.f32 %v6931_v44  ;;  %v7028_v39 = vmul.f32 %v15109_v11, %v17762_v43  ;;  %v7062_v17 = vmul.f32 %v7026_v29, %v19114_v28  ;;  %7100 = vst.msk [vmem:[#allocation3 + $0x33] sm:$0xff] %vm6185_vm6, %v7060_v55  ;;  %v6939_v5 = vadd.f32 1.0, %v17953_v15  ;;  %v19121_v55 = vld [vmem:[#allocation20_spill] sm:$0xff] }
 0x80c   : > { %v15113_v10 = vpop.eup %15112  ;;  %15132 = vrcp.f32 %v6932_v20  ;;  %v7029_v61 = vmul.f32 %v15111_v56, %v17766_v25  ;;  %v7063_v0 = vmul.f32 %v7027_v23, %v19115_v32  ;;  %7101 = vst.msk [vmem:[#allocation3 + $0x3b] sm:$0xff] %vm6185_vm6, %v7061_v58  ;;  %v6941_v48 = vadd.f32 1.0, %v17959_v41  ;;  %v19122_v23 = vld [vmem:[#allocation14_spill] sm:$0xff]  ;;  %v19125_v32 = vld [vmem:[#allocation28_spill] sm:$0xff] }
 0x80d   : > { %v15115_v21 = vpop.eup %15114  ;;  %15134 = vrcp.f32 %v6933_v6  ;;  %v7030_v43 = vmul.f32 %v15113_v10, %v17770_v59  ;;  %v7064_v24 = vmul.f32 %v7028_v39, %v19116_v18  ;;  %7102 = vst.msk [vmem:[#allocation3 + $0x43] sm:$0xff] %vm6185_vm6, %v7062_v17  ;;  %v19120_v6 = vld [vmem:[#allocation13_spill] sm:$0xff]  ;;  %v19124_v10 = vld [vmem:[#allocation15_spill] sm:$0xff] }
 0x80e   : > { %v15117_v35 = vpop.eup %15116  ;;  %15136 = vrcp.f32 %v6934_v22  ;;  %v7031_v25 = vmul.f32 %v15115_v21, %v17774_v47  ;;  %v7065_v31 = vmul.f32 %v7029_v61, %v19117_v9  ;;  %7103 = vst.msk [vmem:[#allocation3 + $0x4b] sm:$0xff] %vm6185_vm6, %v7063_v0  ;;  %v7174_v34 = vld [vmem:[#allocation3 + $0x11] sm:$0xff]  ;;  %v6940_v47 = vadd.f32 1.0, %v17956_v2 }
 0x80f   : > { %v15119_v44 = vpop.eup %15118  ;;  %15138 = vrcp.f32 %v6935_v40  ;;  %v7032_v59 = vmul.f32 %v15117_v35, %v17778_v51  ;;  %v7066_v12 = vmul.f32 %v7030_v43, %v19118_v33  ;;  %7104 = vst.msk [vmem:[#allocation3 + $0x53] sm:$0xff] %vm6185_vm6, %v7064_v24  ;;  %13585 = vmatprep.mubr.msk.f32.mxu0 %vm6185_vm6, %v7174_v34  ;;  %v7175_v19 = vld [vmem:[#allocation3 + $0x19] sm:$0xff]  ;;  %v6942_v2 = vadd.f32 1.0, %v17962_v27  ;;  %v19128_v9 = vld [vmem:[#allocation17_spill] sm:$0xff] }
 0x810   : > { %v15121_v1 = vpop.eup %15120  ;;  %15140 = vrcp.f32 %v6936_v14  ;;  %v7033_v20 = vmul.f32 %v15119_v44, %v17782_v63  ;;  %v7067_v8 = vmul.f32 %v7031_v25, %v19119_v37  ;;  %7105 = vst.msk [vmem:[#allocation3 + $0x5b] sm:$0xff] %vm6185_vm6, %v7065_v31  ;;  %13586 = vmatmul.mubr.msk.f32.gmra.mrb[16].mxu0 %vm6185_vm6, %v7175_v19  ;;  %v7176_v51 = vld [vmem:[#allocation3 + $0x21] sm:$0xff]  ;;  %v6943_v22 = vadd.f32 1.0, %v17965_v50  ;;  %v19123_v40 = vld [vmem:[#allocation26_spill] sm:$0xff] }
 0x811   : > { %v15123_v15 = vpop.eup %15122  ;;  %15142 = vrcp.f32 %v6937_v42  ;;  %v7034_v3 = vmul.f32 %v15121_v1, %v17786_v4  ;;  %v7068_v29 = vmul.f32 %v7032_v59, %v19120_v6  ;;  %7106 = vst.msk [vmem:[#allocation3 + $0x63] sm:$0xff] %vm6185_vm6, %v7066_v12  ;;  %13588 = vmatprep.mubr.msk.f32.mxu0 %vm6185_vm6, %v7176_v51  ;;  %v7177_v58 = vld [vmem:[#allocation3 + $0x29] sm:$0xff]  ;;  %v6944_v27 = vadd.f32 1.0, %v17968_v53  ;;  %v19130_v12 = vld [vmem:[#allocation51_spill] sm:$0xff]  ;;  %v19133_v51 = vld [vmem:[#allocation42_spill] sm:$0xff] }
 0x812   : > { %v15125_v63 = vpop.eup %15124  ;;  %15144 = vrcp.f32 %v6938_v38  ;;  %v7035_v13 = vmul.f32 %v15123_v15, %v17790_v62  ;;  %v7069_v11 = vmul.f32 %v7033_v20, %v19121_v55  ;;  %7107 = vst.msk [vmem:[#allocation3 + $0x6b] sm:$0xff] %vm6185_vm6, %v7067_v8  ;;  %v7178_v50 = vld [vmem:[#allocation3 + $0x31] sm:$0xff]  ;;  %v6946_v53 = vadd.f32 1.0, %v17974_v26  ;;  %v19126_v42 = vld [vmem:[#allocation16_spill] sm:$0xff]  ;;  %v19131_v1 = vld [vmem:[#allocation19_spill] sm:$0xff] }
 0x813   : > { %v15127_v41 = vpop.eup %15126  ;;  %15146 = vrcp.f32 %v6939_v5  ;;  %v7036_v4 = vmul.f32 %v15125_v63, %v17794_v36  ;;  %v7070_v60 = vmul.f32 %v7034_v3, %v19122_v23  ;;  %7108 = vst.msk [vmem:[#allocation3 + $0x73] sm:$0xff] %vm6185_vm6, %v7068_v29  ;;  %v6945_v36 = vadd.f32 1.0, %v17971_v7  ;;  %v7179_v18 = vld [vmem:[#allocation3 + $0x39] sm:$0xff]  ;;  %v19129_v5 = vld [vmem:[#allocation36_spill] sm:$0xff]  ;;  %v19135_v63 = vld [vmem:[#allocation21_spill] sm:$0xff] }
 0x814   : > { %v15129_v56 = vpop.eup %15128  ;;  %15148 = vrcp.f32 %v6940_v47  ;;  %v7037_v62 = vmul.f32 %v15127_v41, %v17798_v57  ;;  %v7071_v39 = vmul.f32 %v7035_v13, %v19123_v40  ;;  %7109 = vst.msk [vmem:[#allocation3 + $0x7b] sm:$0xff] %vm6185_vm6, %v7069_v11  ;;  %13589 = vmatmul.mubr.msk.f32.gmra.mrb[18].mxu0 %vm6185_vm6, %v7177_v58  ;;  %v6947_v21 = vadd.f32 1.0, %v17977_v46  ;;  %v7180_v46 = vld [vmem:[#allocation3 + $0x41] sm:$0xff]  ;;  %v19134_v6 = vld [vmem:[#allocation30_spill] sm:$0xff] }
 0x815   : > { %v15131_v28 = vpop.eup %15130  ;;  %15150 = vrcp.f32 %v6941_v48  ;;  %v7038_v17 = vmul.f32 %v15129_v56, %v17804_v45  ;;  %v7072_v14 = vmul.f32 %v7036_v4, %v19124_v10  ;;  %7110 = vst.msk [vmem:[#allocation3 + $0x83] sm:$0xff] %vm6185_vm6, %v7070_v60  ;;  %13591 = vmatprep.mubr.msk.f32.mxu0 %vm6185_vm6, %v7178_v50  ;;  %v7181_v20 = vld [vmem:[#allocation3 + $0x49] sm:$0xff]  ;;  %v19136_v11 = vld [vmem:[#allocation31_spill] sm:$0xff] }
 0x816   : > { %v15133_v57 = vpop.eup %15132  ;;  %15152 = vrcp.f32 %v6942_v2  ;;  %v7039_v61 = vmul.f32 %v15131_v28, %v17811_v16  ;;  %v7073_v0 = vmul.f32 %v7037_v62, %v19125_v32  ;;  %7111 = vst.msk [vmem:[#allocation3 + $0x8b] sm:$0xff] %vm6185_vm6, %v7071_v39  ;;  %v19127_v16 = vld [vmem:[#allocation34_spill] sm:$0xff]  ;;  %v7135_v60 = vld [vmem:[#allocation3] sm:$0xff]  ;;  %v19138_v56 = vld [vmem:[#allocation32_spill] sm:$0xff] }
 0x817   : > { %v15135_v7 = vpop.eup %15134  ;;  %15154 = vrcp.f32 %v6943_v22  ;;  %v7040_v45 = vmul.f32 %v15133_v57, %v17818_v49  ;;  %v7074_v43 = vmul.f32 %v7038_v17, %v19126_v42  ;;  %7112 = vst.msk [vmem:[#allocation3 + $0x93] sm:$0xff] %vm6185_vm6, %v7072_v14  ;;  %v7182_v48 = vld [vmem:[#allocation3 + $0x51] sm:$0xff]  ;;  %v19137_v22 = vld [vmem:[#allocation44_spill] sm:$0xff]  ;;  %v7183_v39 = vld [vmem:[#allocation3 + $0x59] sm:$0xff] }
 0x818   : > { %v15137_v24 = vpop.eup %15136  ;;  %15156 = vrcp.f32 %v6944_v27  ;;  %v7041_v26 = vmul.f32 %v15135_v7, %v17825_v30  ;;  %v7075_v35 = vmul.f32 %v7039_v61, %v19127_v16  ;;  %7113 = vst.msk [vmem:[#allocation3 + $0x9b] sm:$0xff] %vm6185_vm6, %v7073_v0  ;;  %v7184_v38 = vld [vmem:[#allocation3 + $0x61] sm:$0xff]  ;;  %13592 = vmatmul.mubr.msk.f32.gmra.mrb[20].mxu0 %vm6185_vm6, %v7179_v18  ;;  %v19139_v62 = vld [vmem:[#allocation22_spill] sm:$0xff]  ;;  %v19140_v28 = vld [vmem:[#allocation33_spill] sm:$0xff] }
 0x819   : > { %v15139_v25 = vpop.eup %15138  ;;  %15158 = vrcp.f32 %v6945_v36  ;;  %v7042_v49 = vmul.f32 %v15137_v24, %v17832_v52  ;;  %v7076_v31 = vmul.f32 %v7040_v45, %v19128_v9  ;;  %7114 = vst.msk [vmem:[#allocation3 + $0xa3] sm:$0xff] %vm6185_vm6, %v7074_v43  ;;  %13600 = vmatprep.mubr.msk.f32.mxu1 %vm6185_vm6, %v7184_v38  ;;  %v7185_v34 = vld [vmem:[#allocation3 + $0x69] sm:$0xff]  ;;  %13594 = vmatprep.mubr.msk.f32.mxu0 %vm6185_vm6, %v7180_v46  ;;  %v19142_v57 = vld [vmem:[#allocation35_spill] sm:$0xff]  ;;  %v19145_v43 = vld [vmem:[#allocation46_spill] sm:$0xff] }
 0x81a   : > { %v15141_v30 = vpop.eup %15140  ;;  %15160 = vrcp.f32 %v6946_v53  ;;  %v7043_v44 = vmul.f32 %v15139_v25, %v17839_v54  ;;  %v7077_v59 = vmul.f32 %v7041_v26, %v19129_v5  ;;  %7115 = vst.msk [vmem:[#allocation3 + $0xab] sm:$0xff] %vm6185_vm6, %v7075_v35  ;;  %13601 = vmatmul.mubr.msk.f32.vlgmr.msra.gmra.mrb[40].mxu1 %vm6185_vm6, %v7185_v34  ;;  %v7186_v52 = vld [vmem:[#allocation3 + $0x71] sm:$0xff]  ;;  %v7136_v7 = vld [vmem:[#allocation3 + $0x8] sm:$0xff]  ;;  %v19147_v38 = vld [vmem:[#allocation47_spill] sm:$0xff] }
 0x81b   : > { %v15143_v33 = vpop.eup %15142  ;;  %15162 = vrcp.f32 %v6947_v21  ;;  %v7044_v19 = vmul.f32 %v15141_v30, %v19130_v12  ;;  %v7078_v47 = vmul.f32 %v7042_v49, %v19131_v1  ;;  %7116 = vst.msk [vmem:[#allocation3 + $0xb3] sm:$0xff] %vm6185_vm6, %v7076_v31  ;;  %13603 = vmatprep.mubr.msk.f32.mxu1 %vm6185_vm6, %v7186_v52  ;;  %v19132_v54 = vld [vmem:[#allocation29_spill] sm:$0xff]  ;;  %v7187_v13 = vld [vmem:[#allocation3 + $0x79] sm:$0xff] }
 0x81c   : > { %v15145_v37 = vpop.eup %15144  ;;  %v7045_v8 = vmul.f32 %v15143_v33, %v19132_v54  ;;  %v7079_v15 = vmul.f32 %v7043_v44, %v19133_v51  ;;  %7117 = vst.msk [vmem:[#allocation3 + $0xbb] sm:$0xff] %vm6185_vm6, %v7077_v59  ;;  %13595 = vmatmul.mubr.msk.f32.gmra.mrb[22].mxu0 %vm6185_vm6, %v7181_v20  ;;  %v7188_v23 = vld [vmem:[#allocation3 + $0x81] sm:$0xff]  ;;  %v19141_v17 = vld [vmem:[#allocation45_spill] sm:$0xff]  ;;  %v19146_v16 = vld [vmem:[#allocation38_spill] sm:$0xff] }
 0x81d   : > { %v15147_v3 = vpop.eup %15146  ;;  %v7046_v29 = vmul.f32 %v15145_v37, %v19134_v6  ;;  %v7080_v2 = vmul.f32 %v7044_v19, %v19135_v63  ;;  %7118 = vst.msk [vmem:[#allocation3 + $0xc3] sm:$0xff] %vm6185_vm6, %v7078_v47  ;;  %13597 = vmatprep.mubr.msk.f32.mxu0 %vm6185_vm6, %v7182_v48  ;;  %v19143_v61 = vld [vmem:[#allocation49_spill] sm:$0xff]  ;;  %v19148_v9 = vld [vmem:[#allocation39_spill] sm:$0xff]  ;;  %v19150_v59 = vld [vmem:[#allocation40_spill] sm:$0xff] }
 0x81e   : > { %v15149_v55 = vpop.eup %15148  ;;  %v7047_v41 = vmul.f32 %v15147_v3, %v19136_v11  ;;  %v7081_v4 = vmul.f32 %v7045_v8, %v19137_v22  ;;  %7119 = vst.msk [vmem:[#allocation3 + $0xcb] sm:$0xff] %vm6185_vm6, %v7079_v15  ;;  %13604 = vmatmul.mubr.msk.f32.gmra.mrb[42].mxu1 %vm6185_vm6, %v7187_v13  ;;  %v7189_v0 = vld [vmem:[#allocation3 + $0x89] sm:$0xff]  ;;  %v7190_v24 = vld [vmem:[#allocation3 + $0x91] sm:$0xff]  ;;  %v19149_v34 = vld [vmem:[#allocation23_spill] sm:$0xff] }
 0x81f   : > { %v15151_v58 = vpop.eup %15150  ;;  %v7048_v27 = vmul.f32 %v15149_v55, %v19138_v56  ;;  %v7082_v40 = vmul.f32 %v7046_v29, %v19139_v62  ;;  %7120 = vst.msk [vmem:[#allocation3 + $0xd3] sm:$0xff] %vm6185_vm6, %v7080_v2  ;;  %13606 = vmatprep.mubr.msk.f32.mxu1 %vm6185_vm6, %v7188_v23  ;;  %v19144_v45 = vld [vmem:[#allocation37_spill] sm:$0xff]  ;;  %v19151_v33 = vld [vmem:[#allocation48_spill] sm:$0xff]  ;;  %v7191_v19 = vld [vmem:[#allocation3 + $0x99] sm:$0xff] }
 0x820   : > { %v15153_v50 = vpop.eup %15152  ;;  %v7049_v36 = vmul.f32 %v15151_v58, %v19140_v28  ;;  %v7083_v10 = vmul.f32 %v7047_v41, %v19141_v17  ;;  %7121 = vst.msk [vmem:[#allocation3 + $0xdb] sm:$0xff] %vm6185_vm6, %v7081_v4  ;;  %13598 = vmatmul.mubr.msk.f32.gmra.mrb[24].mxu0 %vm6185_vm6, %v7183_v39  ;;  %v18116_v25 = vld [vmem:[%s18871_s16 + $0x18] sm:$0xff]  ;;  %v19152_v1 = vld [vmem:[#allocation27_spill] sm:$0xff]  ;;  %v19154_v37 = vld [vmem:[#allocation24_spill] sm:$0xff] }
 0x821   : > { %v15155_v14 = vpop.eup %15154  ;;  %v7050_v53 = vmul.f32 %v15153_v50, %v19142_v57  ;;  %v7084_v32 = vmul.f32 %v7048_v27, %v19143_v61  ;;  %7122 = vst.msk [vmem:[#allocation3 + $0xe3] sm:$0xff] %vm6185_vm6, %v7082_v40  ;;  %13638 = vmatprep.mubr.msk.f32.mxu0 %vm6185_vm6, %v7135_v60  ;;  %v7137_v44 = vld [vmem:[#allocation3 + $0x10] sm:$0xff]  ;;  %v7192_v8 = vld [vmem:[#allocation3 + $0xa1] sm:$0xff]  ;;  %v19155_v51 = vld [vmem:[#allocation50_spill] sm:$0xff] }
 0x822   : > { %v15157_v21 = vpop.eup %15156  ;;  %v7051_v42 = vmul.f32 %v15155_v14, %v19144_v45  ;;  %v7085_v18 = vmul.f32 %v7049_v36, %v19145_v43  ;;  %7123 = vst.msk [vmem:[#allocation3 + $0xeb] sm:$0xff] %vm6185_vm6, %v7083_v10  ;;  %13607 = vmatmul.mubr.msk.f32.gmra.mrb[44].mxu1 %vm6185_vm6, %v7189_v0  ;;  %v19153_v47 = vld [vmem:[#allocation41_spill] sm:$0xff]  ;;  %v7138_v48 = vld [vmem:[#allocation3 + $0x18] sm:$0xff]  ;;  %v7139_v29 = vld [vmem:[#allocation3 + $0x20] sm:$0xff] }
 0x823   : > { %v15159_v26 = vpop.eup %15158  ;;  %v7052_v35 = vmul.f32 %v15157_v21, %v19146_v16  ;;  %v7086_v46 = vmul.f32 %v7050_v53, %v19147_v38  ;;  %7124 = vst.msk [vmem:[#allocation3 + $0xf3] sm:$0xff] %vm6185_vm6, %v7084_v32  ;;  %13609 = vmatprep.mubr.msk.f32.mxu1 %vm6185_vm6, %v7190_v24  ;;  %v19156_v3 = vld [vmem:[#allocation25_spill] sm:$0xff]  ;;  %v7140_v13 = vld [vmem:[#allocation3 + $0x28] sm:$0xff]  ;;  %v7195_v11 = vld [vmem:[#allocation3 + $0xb9] sm:$0xff] }
 0x824   : > { %v15161_v49 = vpop.eup %15160  ;;  %v7053_v31 = vmul.f32 %v15159_v26, %v19148_v9  ;;  %v7087_v30 = vmul.f32 %v7051_v42, %v19149_v34  ;;  %7125 = vst.msk [vmem:[#allocation3 + $0xfb] sm:$0xff] %vm6185_vm6, %v7085_v18  ;;  %13639 = vmatmul.mubr.msk.f32.vlgmr.msra.gmra.mrb[14].mxu0 %vm6185_vm6, %v7136_v7  ;;  %v7193_v63 = vld [vmem:[#allocation3 + $0xa9] sm:$0xff]  ;;  %v7194_v2 = vld [vmem:[#allocation3 + $0xb1] sm:$0xff]  ;;  %v7196_v41 = vld [vmem:[#allocation3 + $0xc1] sm:$0xff] }
 0x825   : > { %v15163_v5 = vpop.eup %15162  ;;  %v7054_v52 = vmul.f32 %v15161_v49, %v19150_v59  ;;  %v7088_v12 = vmul.f32 %v7052_v35, %v19151_v33  ;;  %7126 = vst.msk [vmem:[#allocation3 + $0x103] sm:$0xff] %vm6185_vm6, %v7086_v46  ;;  %13693 = vmatpush3.msra.mxu0 %v19152_v1  ;;  %13641 = vmatprep.mubr.msk.f32.mxu0 %vm6185_vm6, %v7137_v44  ;;  %v7141_v55 = vld [vmem:[#allocation3 + $0x30] sm:$0xff]  ;;  %v7142_v22 = vld [vmem:[#allocation3 + $0x38] sm:$0xff]  ;;  %v7143_v4 = vld [vmem:[#allocation3 + $0x40] sm:$0xff] }
 0x826   : > { %v7055_v20 = vmul.f32 %v15163_v5, %v19153_v47  ;;  %v7089_v54 = vmul.f32 %v7053_v31, %v19154_v37  ;;  %7127 = vst.msk [vmem:[#allocation3 + $0x10b] sm:$0xff] %vm6185_vm6, %v7087_v30  ;;  %13610 = vmatmul.mubr.msk.f32.gmra.mrb[46].mxu1 %vm6185_vm6, %v7191_v19  ;;  %13748 = vmatprep.subr.mxu0 %v18116_v25  ;;  %v7197_v23 = vld [vmem:[#allocation3 + $0xc9] sm:$0xff]  ;;  %v7198_v60 = vld [vmem:[#allocation3 + $0xd1] sm:$0xff]  ;;  %v7147_v39 = vld [vmem:[#allocation3 + $0x60] sm:$0xff] }
 0x827   : > { %v7090_v15 = vmul.f32 %v7054_v52, %v19155_v51  ;;  %7128 = vst.msk [vmem:[#allocation3 + $0x113] sm:$0xff] %vm6185_vm6, %v7088_v12  ;;  %13612 = vmatprep.mubr.msk.f32.mxu1 %vm6185_vm6, %v7192_v8  ;;  %v7144_v58 = vld [vmem:[#allocation3 + $0x48] sm:$0xff]  ;;  %v7145_v56 = vld [vmem:[#allocation3 + $0x50] sm:$0xff]  ;;  %v7199_v27 = vld [vmem:[#allocation3 + $0xd9] sm:$0xff] }
 0x828   : > { %v7091_v6 = vmul.f32 %v7055_v20, %v19156_v3  ;;  %7129 = vst.msk [vmem:[#allocation3 + $0x11b] sm:$0xff] %vm6185_vm6, %v7089_v54  ;;  %13642 = vmatmul.mubr.msk.f32.gmra.mrb[16].mxu0 %vm6185_vm6, %v7138_v48  ;;  %v7200_v62 = vld [vmem:[#allocation3 + $0xe1] sm:$0xff]  ;;  %v7146_v40 = vld [vmem:[#allocation3 + $0x58] sm:$0xff]  ;;  %v7149_v17 = vld [vmem:[#allocation3 + $0x70] sm:$0xff] }
 0x829   : > { %7130 = vst.msk [vmem:[#allocation3 + $0x123] sm:$0xff] %vm6185_vm6, %v7090_v15  ;;  %13644 = vmatprep.mubr.msk.f32.mxu0 %vm6185_vm6, %v7139_v29  ;;  %v7201_v50 = vld [vmem:[#allocation3 + $0xe9] sm:$0xff]  ;;  %v7150_v57 = vld [vmem:[#allocation3 + $0x78] sm:$0xff]  ;;  %v7151_v53 = vld [vmem:[#allocation3 + $0x80] sm:$0xff] }
 0x82a   : > { %7131 = vst.msk [vmem:[#allocation3 + $0x12b] sm:$0xff] %vm6185_vm6, %v7091_v6  ;;  %13613 = vmatmul.mubr.msk.f32.gmra.mrb[48].mxu1 %vm6185_vm6, %v7193_v63  ;;  %v7202_v28 = vld [vmem:[#allocation3 + $0xf1] sm:$0xff]  ;;  %v7148_v36 = vld [vmem:[#allocation3 + $0x68] sm:$0xff]  ;;  %v7155_v42 = vld [vmem:[#allocation3 + $0xa0] sm:$0xff] }
 0x82b   : > { %13615 = vmatprep.mubr.msk.f32.mxu1 %vm6185_vm6, %v7194_v2  ;;  %v7203_v10 = vld [vmem:[#allocation3 + $0xf9] sm:$0xff]  ;;  %v7152_v0 = vld [vmem:[#allocation3 + $0x88] sm:$0xff]  ;;  %v7153_v7 = vld [vmem:[#allocation3 + $0x90] sm:$0xff] }
 0x82c   : > { %13645 = vmatmul.mubr.msk.f32.gmra.mrb[18].mxu0 %vm6185_vm6, %v7140_v13  ;;  %v7204_v14 = vld [vmem:[#allocation3 + $0x101] sm:$0xff]  ;;  %v7154_v45 = vld [vmem:[#allocation3 + $0x98] sm:$0xff]  ;;  %v7157_v18 = vld [vmem:[#allocation3 + $0xb0] sm:$0xff] }
 0x82d   : > { %13647 = vmatprep.mubr.msk.f32.mxu0 %vm6185_vm6, %v7141_v55  ;;  %v7205_v61 = vld [vmem:[#allocation3 + $0x109] sm:$0xff]  ;;  %v7158_v24 = vld [vmem:[#allocation3 + $0xb8] sm:$0xff]  ;;  %v7159_v26 = vld [vmem:[#allocation3 + $0xc0] sm:$0xff] }
 0x82e   : > { %13616 = vmatmul.mubr.msk.f32.gmra.mrb[50].mxu1 %vm6185_vm6, %v7195_v11  ;;  %v7206_v32 = vld [vmem:[#allocation3 + $0x111] sm:$0xff]  ;;  %v7156_v43 = vld [vmem:[#allocation3 + $0xa8] sm:$0xff]  ;;  %v7163_v46 = vld [vmem:[#allocation3 + $0xe0] sm:$0xff] }
 0x82f   : > { %13618 = vmatprep.mubr.msk.f32.mxu1 %vm6185_vm6, %v7196_v41  ;;  %v7207_v21 = vld [vmem:[#allocation3 + $0x119] sm:$0xff]  ;;  %v7160_v16 = vld [vmem:[#allocation3 + $0xc8] sm:$0xff]  ;;  %v7161_v35 = vld [vmem:[#allocation3 + $0xd0] sm:$0xff] }
 0x830   : > { %13648 = vmatmul.mubr.msk.f32.gmra.mrb[20].mxu0 %vm6185_vm6, %v7142_v22  ;;  %v7162_v38 = vld [vmem:[#allocation3 + $0xd8] sm:$0xff]  ;;  %v7164_v49 = vld [vmem:[#allocation3 + $0xe8] sm:$0xff]  ;;  %v7165_v9 = vld [vmem:[#allocation3 + $0xf0] sm:$0xff] }
 0x831   : > { %13650 = vmatprep.mubr.msk.f32.mxu0 %vm6185_vm6, %v7143_v4  ;;  %v7166_v31 = vld [vmem:[#allocation3 + $0xf8] sm:$0xff]  ;;  %v7167_v34 = vld [vmem:[#allocation3 + $0x100] sm:$0xff]  ;;  %v7168_v30 = vld [vmem:[#allocation3 + $0x108] sm:$0xff] }
 0x832   : > { %13619 = vmatmul.mubr.msk.f32.gmra.mrb[52].mxu1 %vm6185_vm6, %v7197_v23  ;;  %v7169_v44 = vld [vmem:[#allocation3 + $0x110] sm:$0xff]  ;;  %v7916_v5 = vld [vmem:[#allocation3 + $0x2] sm:$0xff]  ;;  %v7170_v59 = vld [vmem:[#allocation3 + $0x118] sm:$0xff] }
 0x833   : > { %13621 = vmatprep.mubr.msk.f32.mxu1 %vm6185_vm6, %v7198_v60  ;;  %v7917_v52 = vld [vmem:[#allocation3 + $0xa] sm:$0xff]  ;;  %v18191_v33 = vld [vmem:[%s18871_s16 + $0x20] sm:$0xff]  ;;  %v18204_v1 = vld [vmem:[#allocation3 + $0x22] sm:$0xff] }
 0x834   : > { %13651 = vmatmul.mubr.msk.f32.gmra.mrb[22].mxu0 %vm6185_vm6, %v7144_v58  ;;  %v18194_v12 = vld [vmem:[#allocation3 + $0x12] sm:$0xff]  ;;  %v18200_v19 = vld [vmem:[#allocation3 + $0x1a] sm:$0xff]  ;;  %v18208_v47 = vld [vmem:[#allocation3 + $0x2a] sm:$0xff] }
 0x835   : > { %13653 = vmatprep.mubr.msk.f32.mxu0 %vm6185_vm6, %v7145_v56  ;;  %v18216_v20 = vld [vmem:[#allocation3 + $0x3a] sm:$0xff]  ;;  %v18220_v37 = vld [vmem:[#allocation3 + $0x42] sm:$0xff]  ;;  %v18224_v54 = vld [vmem:[#allocation3 + $0x4a] sm:$0xff] }
 0x836   : > { %13622 = vmatmul.mubr.msk.f32.gmra.mrb[54].mxu1 %vm6185_vm6, %v7199_v27  ;;  %v18228_v8 = vld [vmem:[#allocation3 + $0x52] sm:$0xff]  ;;  %v7927_v51 = vld [vmem:[#allocation3 + $0x5a] sm:$0xff]  ;;  %v7928_v15 = vld [vmem:[#allocation3 + $0x62] sm:$0xff] }
 0x837   : > { %13624 = vmatprep.mubr.msk.f32.mxu1 %vm6185_vm6, %v7200_v62  ;;  %v7929_v48 = vld [vmem:[#allocation3 + $0x6a] sm:$0xff]  ;;  %v7930_v3 = vld [vmem:[#allocation3 + $0x72] sm:$0xff]  ;;  %v7931_v6 = vld [vmem:[#allocation3 + $0x7a] sm:$0xff] }
 0x838   : > { %13654 = vmatmul.mubr.msk.f32.gmra.mrb[24].mxu0 %vm6185_vm6, %v7146_v40  ;;  %v7932_v29 = vld [vmem:[#allocation3 + $0x82] sm:$0xff]  ;;  %v7933_v63 = vld [vmem:[#allocation3 + $0x8a] sm:$0xff]  ;;  %v7934_v2 = vld [vmem:[#allocation3 + $0x92] sm:$0xff] }
 0x839   : > { %13656 = vmatprep.mubr.msk.f32.mxu0 %vm6185_vm6, %v7147_v39  ;;  %v7935_v13 = vld [vmem:[#allocation3 + $0x9a] sm:$0xff]  ;;  %v7936_v55 = vld [vmem:[#allocation3 + $0xa2] sm:$0xff]  ;;  %v7937_v11 = vld [vmem:[#allocation3 + $0xaa] sm:$0xff] }
 0x83a   : > { %13625 = vmatmul.mubr.msk.f32.gmra.mrb[56].mxu1 %vm6185_vm6, %v7201_v50  ;;  %v7938_v41 = vld [vmem:[#allocation3 + $0xb2] sm:$0xff]  ;;  %v7939_v22 = vld [vmem:[#allocation3 + $0xba] sm:$0xff]  ;;  %v7940_v4 = vld [vmem:[#allocation3 + $0xc2] sm:$0xff] }
 0x83b   : > { %13627 = vmatprep.mubr.msk.f32.mxu1 %vm6185_vm6, %v7202_v28  ;;  %v7941_v23 = vld [vmem:[#allocation3 + $0xca] sm:$0xff]  ;;  %v7942_v60 = vld [vmem:[#allocation3 + $0xd2] sm:$0xff]  ;;  %v7943_v58 = vld [vmem:[#allocation3 + $0xda] sm:$0xff] }
 0x83c   : > { %13657 = vmatmul.mubr.msk.f32.gmra.mrb[26].mxu0 %vm6185_vm6, %v7148_v36  ;;  %v7944_v56 = vld [vmem:[#allocation3 + $0xe2] sm:$0xff]  ;;  %v7945_v27 = vld [vmem:[#allocation3 + $0xea] sm:$0xff]  ;;  %v7946_v62 = vld [vmem:[#allocation3 + $0xf2] sm:$0xff] }
 0x83d   : > { %13659 = vmatprep.mubr.msk.f32.mxu0 %vm6185_vm6, %v7149_v17  ;;  %v7947_v40 = vld [vmem:[#allocation3 + $0xfa] sm:$0xff]  ;;  %v7948_v39 = vld [vmem:[#allocation3 + $0x102] sm:$0xff]  ;;  %v7949_v50 = vld [vmem:[#allocation3 + $0x10a] sm:$0xff] }
 0x83e   : > { %13628 = vmatmul.mubr.msk.f32.gmra.mrb[58].mxu1 %vm6185_vm6, %v7203_v10  ;;  %v7950_v28 = vld [vmem:[#allocation3 + $0x112] sm:$0xff]  ;;  %v7951_v36 = vld [vmem:[#allocation3 + $0x11a] sm:$0xff] }
 0x83f   : > { %13630 = vmatprep.mubr.msk.f32.mxu1 %vm6185_vm6, %v7204_v14  ;;  %v12112_v17 = vld [vmem:[%s18871_s16 + $0x28] sm:$0xff] }
 0x840   : > { %13660 = vmatmul.mubr.msk.f32.gmra.mrb[28].mxu0 %vm6185_vm6, %v7150_v57 }
 0x841   : > { %13662 = vmatprep.mubr.msk.f32.mxu0 %vm6185_vm6, %v7151_v53 }
 0x842   : > { %13631 = vmatmul.mubr.msk.f32.gmra.mrb[60].mxu1 %vm6185_vm6, %v7205_v61  ;;  %v8377_v61 = vld [vmem:[#allocation3 + $0x122] sm:$0xff] }
 0x843   : > { %13633 = vmatprep.mubr.msk.f32.mxu1 %vm6185_vm6, %v7206_v32 }
 0x844   : > { %13663 = vmatmul.mubr.msk.f32.gmra.mrb[30].mxu0 %vm6185_vm6, %v7152_v0 }
 0x845   : > { %13665 = vmatprep.mubr.msk.f32.mxu0 %vm6185_vm6, %v7153_v7  ;;  %v8378_v7 = vld [vmem:[#allocation3 + $0x12a] sm:$0xff] }
 0x846   : > { %13634 = vmatmul.mubr.msk.f32.gmra.mrb[62].mxu1 %vm6185_vm6, %v7207_v21  ;;  %v8770_v21 = vld [vmem:[#allocation3 + $0x13] sm:$0xff] }
 0x848   : > { %13666 = vmatmul.mubr.msk.f32.gmra.mrb[32].mxu0 %vm6185_vm6, %v7154_v45 }
 0x849   : > { %13668 = vmatprep.mubr.msk.f32.mxu0 %vm6185_vm6, %v7155_v42 }
 0x84c   : > { %13669 = vmatmul.mubr.msk.f32.gmra.mrb[34].mxu0 %vm6185_vm6, %v7156_v43  ;;  %v8771_v43 = vld [vmem:[#allocation3 + $0x1b] sm:$0xff] }
 0x84d   : > { %13671 = vmatprep.mubr.msk.f32.mxu0 %vm6185_vm6, %v7157_v18  ;;  %v18326_v18 = vld [vmem:[%s18871_s16 + $0x30] sm:$0xff] }
 0x850   : > { %13672 = vmatmul.mubr.msk.f32.gmra.mrb[36].mxu0 %vm6185_vm6, %v7158_v24  ;;  %v8772_v24 = vld [vmem:[#allocation3 + $0x23] sm:$0xff] }
 0x851   : > { %13674 = vmatprep.mubr.msk.f32.mxu0 %vm6185_vm6, %v7159_v26 }
 0x854   : > { %13675 = vmatmul.mubr.msk.f32.gmra.mrb[38].mxu0 %vm6185_vm6, %v7160_v16 }
 0x855   : > { %13677 = vmatprep.mubr.msk.f32.mxu0 %vm6185_vm6, %v7161_v35  ;;  %v8773_v35 = vld [vmem:[#allocation3 + $0x2b] sm:$0xff] }
 0x858   : > { %13678 = vmatmul.mubr.msk.f32.gmra.mrb[40].mxu0 %vm6185_vm6, %v7162_v38  ;;  %v8774_v38 = vld [vmem:[#allocation3 + $0x33] sm:$0xff] }
 0x859   : > { %13680 = vmatprep.mubr.msk.f32.mxu0 %vm6185_vm6, %v7163_v46 }
 0x85c   : > { %13681 = vmatmul.mubr.msk.f32.gmra.mrb[42].mxu0 %vm6185_vm6, %v7164_v49 }
 0x85d   : > { %13683 = vmatprep.mubr.msk.f32.mxu0 %vm6185_vm6, %v7165_v9  ;;  %v8775_v9 = vld [vmem:[#allocation3 + $0x3b] sm:$0xff] }
 0x860   : > { %13684 = vmatmul.mubr.msk.f32.gmra.mrb[44].mxu0 %vm6185_vm6, %v7166_v31  ;;  %v8776_v31 = vld [vmem:[#allocation3 + $0x43] sm:$0xff] }
 0x861   : > { %13686 = vmatprep.mubr.msk.f32.mxu0 %vm6185_vm6, %v7167_v34 }
 0x864   : > { %13687 = vmatmul.mubr.msk.f32.gmra.mrb[46].mxu0 %vm6185_vm6, %v7168_v30 }
 0x865   : > { %13689 = vmatprep.mubr.msk.f32.mxu0 %vm6185_vm6, %v7169_v44  ;;  %v8777_v44 = vld [vmem:[#allocation3 + $0x4b] sm:$0xff] }
 0x868   : > { %13690 = vmatmul.mubr.msk.f32.gmra.mrb[48].mxu0 %vm6185_vm6, %v7170_v59 }
 0x869   : > { %13694 = vmatprep.mubr.msk.f32.mxu0 %vm6185_vm6, %v7916_v5  ;;  %v8778_v5 = vld [vmem:[#allocation3 + $0x53] sm:$0xff] }
 0x86c   : > { %13695 = vmatmul.mubr.msk.f32.vlgmr.msra.gmra.mrb[14].mxu0 %vm6185_vm6, %v7917_v52 }
 0x86d   : > { %13749 = vmatpush3.msra.mxu0 %v18116_v25  ;;  %13697 = vmatprep.mubr.msk.f32.mxu0 %vm6185_vm6, %v18194_v12  ;;  %v18212_v25 = vld [vmem:[#allocation3 + $0x32] sm:$0xff] }
 0x86e   : > { %13804 = vmatprep.subr.mxu0 %v18191_v33 }
 0x870   : > { %13698 = vmatmul.mubr.msk.f32.gmra.mrb[16].mxu0 %vm6185_vm6, %v18200_v19 }
 0x871   : > { %13700 = vmatprep.mubr.msk.f32.mxu0 %vm6185_vm6, %v18204_v1 }
 0x874   : > { %13701 = vmatmul.mubr.msk.f32.gmra.mrb[18].mxu0 %vm6185_vm6, %v18208_v47 }
 0x875   : > { %13703 = vmatprep.mubr.msk.f32.mxu0 %vm6185_vm6, %v18212_v25 }
 0x878   : > { %13704 = vmatmul.mubr.msk.f32.gmra.mrb[20].mxu0 %vm6185_vm6, %v18216_v20 }
 0x879   : > { %13706 = vmatprep.mubr.msk.f32.mxu0 %vm6185_vm6, %v18220_v37 }
 0x87c   : > { %13707 = vmatmul.mubr.msk.f32.gmra.mrb[22].mxu0 %vm6185_vm6, %v18224_v54 }
 0x87d   : > { %13709 = vmatprep.mubr.msk.f32.mxu0 %vm6185_vm6, %v18228_v8 }
 0x880   : > { %13710 = vmatmul.mubr.msk.f32.gmra.mrb[24].mxu0 %vm6185_vm6, %v7927_v51 }
 0x881   : > { %13712 = vmatprep.mubr.msk.f32.mxu0 %vm6185_vm6, %v7928_v15 }
 0x884   : > { %13713 = vmatmul.mubr.msk.f32.gmra.mrb[26].mxu0 %vm6185_vm6, %v7929_v48 }
 0x885   : > { %13715 = vmatprep.mubr.msk.f32.mxu0 %vm6185_vm6, %v7930_v3 }
 0x888   : > { %13716 = vmatmul.mubr.msk.f32.gmra.mrb[28].mxu0 %vm6185_vm6, %v7931_v6 }
 0x889   : > { %13718 = vmatprep.mubr.msk.f32.mxu0 %vm6185_vm6, %v7932_v29 }
 0x88c   : > { %13719 = vmatmul.mubr.msk.f32.gmra.mrb[30].mxu0 %vm6185_vm6, %v7933_v63 }
 0x88d   : > { %13721 = vmatprep.mubr.msk.f32.mxu0 %vm6185_vm6, %v7934_v2 }
 0x890   : > { %13722 = vmatmul.mubr.msk.f32.gmra.mrb[32].mxu0 %vm6185_vm6, %v7935_v13 }
 0x891   : > { %13724 = vmatprep.mubr.msk.f32.mxu0 %vm6185_vm6, %v7936_v55 }
 0x894   : > { %13725 = vmatmul.mubr.msk.f32.gmra.mrb[34].mxu0 %vm6185_vm6, %v7937_v11 }
 0x895   : > { %13727 = vmatprep.mubr.msk.f32.mxu0 %vm6185_vm6, %v7938_v41 }
 0x898   : > { %13728 = vmatmul.mubr.msk.f32.gmra.mrb[36].mxu0 %vm6185_vm6, %v7939_v22 }
 0x899   : > { %13730 = vmatprep.mubr.msk.f32.mxu0 %vm6185_vm6, %v7940_v4 }
 0x89c   : > { %13731 = vmatmul.mubr.msk.f32.gmra.mrb[38].mxu0 %vm6185_vm6, %v7941_v23 }
 0x89d   : > { %13733 = vmatprep.mubr.msk.f32.mxu0 %vm6185_vm6, %v7942_v60 }
 0x8a0   : > { %13734 = vmatmul.mubr.msk.f32.gmra.mrb[40].mxu0 %vm6185_vm6, %v7943_v58 }
 0x8a1   : > { %13736 = vmatprep.mubr.msk.f32.mxu0 %vm6185_vm6, %v7944_v56 }
 0x8a4   : > { %13737 = vmatmul.mubr.msk.f32.gmra.mrb[42].mxu0 %vm6185_vm6, %v7945_v27 }
 0x8a5   : > { %13739 = vmatprep.mubr.msk.f32.mxu0 %vm6185_vm6, %v7946_v62 }
 0x8a8   : > { %13740 = vmatmul.mubr.msk.f32.gmra.mrb[44].mxu0 %vm6185_vm6, %v7947_v40 }
 0x8a9   : > { %13742 = vmatprep.mubr.msk.f32.mxu0 %vm6185_vm6, %v7948_v39 }
 0x8ac   : > { %13743 = vmatmul.mubr.msk.f32.gmra.mrb[46].mxu0 %vm6185_vm6, %v7949_v50 }
 0x8ad   : > { %13745 = vmatprep.mubr.msk.f32.mxu0 %vm6185_vm6, %v7950_v28 }
 0x8b0   : > { %13746 = vmatmul.mubr.msk.f32.gmra.mrb[48].mxu0 %vm6185_vm6, %v7951_v36 }
 0x8b1   : > { %13750 = vmatprep.mubr.msk.f32.mxu0 %vm6185_vm6, %v18194_v12  ;;  %v8780_v12 = vld [vmem:[#allocation3 + $0x63] sm:$0xff] }
 0x8b4   : > { %13751 = vmatmul.mubr.msk.f32.vlgmr.msra.gmra.mrb[14].mxu0 %vm6185_vm6, %v18200_v19 }
 0x8b5   : > { %13805 = vmatpush3.msra.mxu0 %v18191_v33  ;;  %13753 = vmatprep.mubr.msk.f32.mxu0 %vm6185_vm6, %v18204_v1  ;;  %v8779_v33 = vld [vmem:[#allocation3 + $0x5b] sm:$0xff] }
 0x8b6   : > { %13860 = vmatprep.subr.mxu0 %v12112_v17 }
 0x8b8   : > { %13754 = vmatmul.mubr.msk.f32.gmra.mrb[16].mxu0 %vm6185_vm6, %v18208_v47  ;;  %v8781_v47 = vld [vmem:[#allocation3 + $0x6b] sm:$0xff] }
 0x8b9   : > { %13756 = vmatprep.mubr.msk.f32.mxu0 %vm6185_vm6, %v18212_v25  ;;  %v8782_v25 = vld [vmem:[#allocation3 + $0x73] sm:$0xff] }
 0x8bc   : > { %13757 = vmatmul.mubr.msk.f32.gmra.mrb[18].mxu0 %vm6185_vm6, %v18216_v20 }
 0x8bd   : > { %13759 = vmatprep.mubr.msk.f32.mxu0 %vm6185_vm6, %v18220_v37 }
 0x8c0   : > { %13760 = vmatmul.mubr.msk.f32.gmra.mrb[20].mxu0 %vm6185_vm6, %v18224_v54  ;;  %v8783_v54 = vld [vmem:[#allocation3 + $0x7b] sm:$0xff] }
 0x8c1   : > { %13762 = vmatprep.mubr.msk.f32.mxu0 %vm6185_vm6, %v18228_v8  ;;  %v8784_v8 = vld [vmem:[#allocation3 + $0x83] sm:$0xff] }
 0x8c4   : > { %13763 = vmatmul.mubr.msk.f32.gmra.mrb[22].mxu0 %vm6185_vm6, %v7927_v51 }
 0x8c5   : > { %13765 = vmatprep.mubr.msk.f32.mxu0 %vm6185_vm6, %v7928_v15 }
 0x8c8   : > { %13766 = vmatmul.mubr.msk.f32.gmra.mrb[24].mxu0 %vm6185_vm6, %v7929_v48  ;;  %v8785_v48 = vld [vmem:[#allocation3 + $0x8b] sm:$0xff] }
 0x8c9   : > { %13768 = vmatprep.mubr.msk.f32.mxu0 %vm6185_vm6, %v7930_v3  ;;  %v8786_v3 = vld [vmem:[#allocation3 + $0x93] sm:$0xff] }
 0x8cc   : > { %13769 = vmatmul.mubr.msk.f32.gmra.mrb[26].mxu0 %vm6185_vm6, %v7931_v6 }
 0x8cd   : > { %13771 = vmatprep.mubr.msk.f32.mxu0 %vm6185_vm6, %v7932_v29 }
 0x8d0   : > { %13772 = vmatmul.mubr.msk.f32.gmra.mrb[28].mxu0 %vm6185_vm6, %v7933_v63  ;;  %v8787_v63 = vld [vmem:[#allocation3 + $0x9b] sm:$0xff] }
 0x8d1   : > { %13774 = vmatprep.mubr.msk.f32.mxu0 %vm6185_vm6, %v7934_v2  ;;  %v8788_v2 = vld [vmem:[#allocation3 + $0xa3] sm:$0xff] }
 0x8d4   : > { %13775 = vmatmul.mubr.msk.f32.gmra.mrb[30].mxu0 %vm6185_vm6, %v7935_v13  ;;  %v8789_v13 = vld [vmem:[#allocation3 + $0xab] sm:$0xff] }
 0x8d5   : > { %13777 = vmatprep.mubr.msk.f32.mxu0 %vm6185_vm6, %v7936_v55  ;;  %v8790_v55 = vld [vmem:[#allocation3 + $0xb3] sm:$0xff] }
 0x8d8   : > { %13778 = vmatmul.mubr.msk.f32.gmra.mrb[32].mxu0 %vm6185_vm6, %v7937_v11  ;;  %v8791_v11 = vld [vmem:[#allocation3 + $0xbb] sm:$0xff] }
 0x8d9   : > { %13780 = vmatprep.mubr.msk.f32.mxu0 %vm6185_vm6, %v7938_v41  ;;  %v8792_v41 = vld [vmem:[#allocation3 + $0xc3] sm:$0xff] }
 0x8dc   : > { %13781 = vmatmul.mubr.msk.f32.gmra.mrb[34].mxu0 %vm6185_vm6, %v7939_v22  ;;  %v8793_v22 = vld [vmem:[#allocation3 + $0xcb] sm:$0xff] }
 0x8dd   : > { %13783 = vmatprep.mubr.msk.f32.mxu0 %vm6185_vm6, %v7940_v4  ;;  %v8794_v4 = vld [vmem:[#allocation3 + $0xd3] sm:$0xff] }
 0x8e0   : > { %13784 = vmatmul.mubr.msk.f32.gmra.mrb[36].mxu0 %vm6185_vm6, %v7941_v23  ;;  %v8795_v23 = vld [vmem:[#allocation3 + $0xdb] sm:$0xff] }
 0x8e1   : > { %13786 = vmatprep.mubr.msk.f32.mxu0 %vm6185_vm6, %v7942_v60  ;;  %v8796_v60 = vld [vmem:[#allocation3 + $0xe3] sm:$0xff] }
 0x8e4   : > { %13787 = vmatmul.mubr.msk.f32.gmra.mrb[38].mxu0 %vm6185_vm6, %v7943_v58  ;;  %v8797_v58 = vld [vmem:[#allocation3 + $0xeb] sm:$0xff] }
 0x8e5   : > { %13789 = vmatprep.mubr.msk.f32.mxu0 %vm6185_vm6, %v7944_v56  ;;  %v8798_v56 = vld [vmem:[#allocation3 + $0xf3] sm:$0xff] }
 0x8e8   : > { %13790 = vmatmul.mubr.msk.f32.gmra.mrb[40].mxu0 %vm6185_vm6, %v7945_v27  ;;  %v8799_v27 = vld [vmem:[#allocation3 + $0xfb] sm:$0xff] }
 0x8e9   : > { %13792 = vmatprep.mubr.msk.f32.mxu0 %vm6185_vm6, %v7946_v62  ;;  %v8800_v62 = vld [vmem:[#allocation3 + $0x103] sm:$0xff] }
 0x8ec   : > { %13793 = vmatmul.mubr.msk.f32.gmra.mrb[42].mxu0 %vm6185_vm6, %v7947_v40  ;;  %v8801_v40 = vld [vmem:[#allocation3 + $0x10b] sm:$0xff] }
 0x8ed   : > { %v18300_v10 = vpop.f32.mrb[40].mxu1  ;;  %13795 = vmatprep.mubr.msk.f32.mxu0 %vm6185_vm6, %v7948_v39  ;;  %v8802_v39 = vld [vmem:[#allocation3 + $0x113] sm:$0xff] }
 0x8ee   : > { %v18303_v14 = vpop.f32.mrb[41].mxu1 }
 0x8f0   : > { %13796 = vmatmul.mubr.msk.f32.gmra.mrb[44].mxu0 %vm6185_vm6, %v7949_v50  ;;  %v8803_v50 = vld [vmem:[#allocation3 + $0x11b] sm:$0xff] }
 0x8f1   : > { %v18306_v57 = vpop.f32.mrb[42].mxu1  ;;  %13798 = vmatprep.mubr.msk.f32.mxu0 %vm6185_vm6, %v7950_v28  ;;  %v8804_v28 = vld [vmem:[#allocation3 + $0x123] sm:$0xff] }
 0x8f2   : > { %v18309_v53 = vpop.f32.mrb[43].mxu1 }
 0x8f4   : > { %13799 = vmatmul.mubr.msk.f32.gmra.mrb[46].mxu0 %vm6185_vm6, %v7951_v36  ;;  %v8805_v36 = vld [vmem:[#allocation3 + $0x12b] sm:$0xff] }
 0x8f5   : > { %v18312_v32 = vpop.f32.mrb[44].mxu1  ;;  %13801 = vmatprep.mubr.msk.f32.mxu0 %vm6185_vm6, %v8377_v61  ;;  %v9198_v61 = vld [vmem:[#allocation3 + $0x1c] sm:$0xff] }
 0x8f6   : > { %v18315_v0 = vpop.f32.mrb[45].mxu1 }
 0x8f8   : > { %13802 = vmatmul.mubr.msk.f32.gmra.mrb[48].mxu0 %vm6185_vm6, %v8378_v7  ;;  %v18400_v7 = vld [vmem:[%s18871_s16 + $0x38] sm:$0xff] }
 0x8f9   : > { %v18318_v45 = vpop.f32.mrb[46].mxu1  ;;  %13806 = vmatprep.mubr.msk.f32.mxu0 %vm6185_vm6, %v8770_v21  ;;  %v18403_v21 = vld [vmem:[#allocation3 + $0x24] sm:$0xff] }
 0x8fa   : > { %v18321_v42 = vpop.f32.mrb[47].mxu1 }
 0x8fc   : > { %13807 = vmatmul.mubr.msk.f32.vlgmr.msra.gmra.mrb[14].mxu0 %vm6185_vm6, %v8771_v43  ;;  %v18409_v43 = vld [vmem:[#allocation3 + $0x2c] sm:$0xff] }
 0x8fd   : > { %v18329_v26 = vpop.f32.mrb[48].mxu1  ;;  %13861 = vmatpush3.msra.mxu0 %v12112_v17  ;;  %13809 = vmatprep.mubr.msk.f32.mxu0 %vm6185_vm6, %v8772_v24  ;;  %v9197_v17 = vld [vmem:[#allocation3 + $0x14] sm:$0xff] }
 0x8fe   : > { %v18332_v16 = vpop.f32.mrb[49].mxu1  ;;  %13916 = vmatprep.subr.mxu0 %v18326_v18  ;;  %v18413_v24 = vld [vmem:[#allocation3 + $0x34] sm:$0xff] }
 0x900   : > { %13810 = vmatmul.mubr.msk.f32.gmra.mrb[16].mxu0 %vm6185_vm6, %v8773_v35  ;;  %v18417_v35 = vld [vmem:[#allocation3 + $0x3c] sm:$0xff] }
 0x901   : > { %v18336_v46 = vpop.f32.mrb[50].mxu1  ;;  %13812 = vmatprep.mubr.msk.f32.mxu0 %vm6185_vm6, %v8774_v38  ;;  %v18425_v38 = vld [vmem:[#allocation3 + $0x4c] sm:$0xff] }
 0x902   : > { %v18339_v49 = vpop.f32.mrb[51].mxu1 }
 0x904   : > { %13813 = vmatmul.mubr.msk.f32.gmra.mrb[18].mxu0 %vm6185_vm6, %v8775_v9  ;;  %v18429_v9 = vld [vmem:[#allocation3 + $0x54] sm:$0xff] }
 0x905   : > { %v18342_v34 = vpop.f32.mrb[52].mxu1  ;;  %13815 = vmatprep.mubr.msk.f32.mxu0 %vm6185_vm6, %v8776_v31  ;;  %v18433_v31 = vld [vmem:[#allocation3 + $0x5c] sm:$0xff] }
 0x906   : > { %v18345_v30 = vpop.f32.mrb[53].mxu1 }
 0x908   : > { %13816 = vmatmul.mubr.msk.f32.gmra.mrb[20].mxu0 %vm6185_vm6, %v8777_v44  ;;  %v18437_v44 = vld [vmem:[#allocation3 + $0x64] sm:$0xff] }
 0x909   : > { %v18348_v59 = vpop.f32.mrb[54].mxu1  ;;  %13818 = vmatprep.mubr.msk.f32.mxu0 %vm6185_vm6, %v8778_v5  ;;  %v9208_v5 = vld [vmem:[#allocation3 + $0x6c] sm:$0xff] }
 0x90a   : > { %v18351_v52 = vpop.f32.mrb[55].mxu1 }
 0x90c   : > { %13819 = vmatmul.mubr.msk.f32.gmra.mrb[22].mxu0 %vm6185_vm6, %v8779_v33  ;;  %v9209_v33 = vld [vmem:[#allocation3 + $0x74] sm:$0xff] }
 0x90d   : > { %v18354_v19 = vpop.f32.mrb[56].mxu1  ;;  %13821 = vmatprep.mubr.msk.f32.mxu0 %vm6185_vm6, %v8780_v12  ;;  %v9210_v12 = vld [vmem:[#allocation3 + $0x7c] sm:$0xff] }
 0x90e   : > { %v18357_v1 = vpop.f32.mrb[57].mxu1 }
 0x910   : > { %13822 = vmatmul.mubr.msk.f32.gmra.mrb[24].mxu0 %vm6185_vm6, %v8781_v47  ;;  %v9211_v47 = vld [vmem:[#allocation3 + $0x84] sm:$0xff] }
 0x911   : > { %v18360_v20 = vpop.f32.mrb[58].mxu1  ;;  %13824 = vmatprep.mubr.msk.f32.mxu0 %vm6185_vm6, %v8782_v25  ;;  %v9212_v25 = vld [vmem:[#allocation3 + $0x8c] sm:$0xff] }
 0x912   : > { %v18363_v37 = vpop.f32.mrb[59].mxu1 }
 0x914   : > { %13825 = vmatmul.mubr.msk.f32.gmra.mrb[26].mxu0 %vm6185_vm6, %v8783_v54  ;;  %v9213_v54 = vld [vmem:[#allocation3 + $0x94] sm:$0xff] }
 0x915   : > { %v18366_v51 = vpop.f32.mrb[60].mxu1  ;;  %13827 = vmatprep.mubr.msk.f32.mxu0 %vm6185_vm6, %v8784_v8  ;;  %v9214_v8 = vld [vmem:[#allocation3 + $0x9c] sm:$0xff] }
 0x916   : > { %v18369_v15 = vpop.f32.mrb[61].mxu1 }
 0x918   : > { %13828 = vmatmul.mubr.msk.f32.gmra.mrb[28].mxu0 %vm6185_vm6, %v8785_v48  ;;  %v9215_v48 = vld [vmem:[#allocation3 + $0xa4] sm:$0xff] }
 0x919   : > { %v18372_v6 = vpop.f32.mrb[62].mxu1  ;;  %13830 = vmatprep.mubr.msk.f32.mxu0 %vm6185_vm6, %v8786_v3  ;;  %v9216_v3 = vld [vmem:[#allocation3 + $0xac] sm:$0xff] }
 0x91a   : > { %v18375_v29 = vpop.f32.mrb[63].mxu1 }
 0x91c   : > { %13831 = vmatmul.mubr.msk.f32.gmra.mrb[30].mxu0 %vm6185_vm6, %v8787_v63  ;;  %v9217_v63 = vld [vmem:[#allocation3 + $0xb4] sm:$0xff] }
 0x91d   : > { %13833 = vmatprep.mubr.msk.f32.mxu0 %vm6185_vm6, %v8788_v2  ;;  %v9218_v2 = vld [vmem:[#allocation3 + $0xbc] sm:$0xff] }
 0x920   : > { %13834 = vmatmul.mubr.msk.f32.gmra.mrb[32].mxu0 %vm6185_vm6, %v8789_v13  ;;  %v9219_v13 = vld [vmem:[#allocation3 + $0xc4] sm:$0xff] }
 0x921   : > { %13836 = vmatprep.mubr.msk.f32.mxu0 %vm6185_vm6, %v8790_v55  ;;  %v9220_v55 = vld [vmem:[#allocation3 + $0xcc] sm:$0xff] }
 0x924   : > { %13837 = vmatmul.mubr.msk.f32.gmra.mrb[34].mxu0 %vm6185_vm6, %v8791_v11  ;;  %v9221_v11 = vld [vmem:[#allocation3 + $0xd4] sm:$0xff] }
 0x925   : > { %13839 = vmatprep.mubr.msk.f32.mxu0 %vm6185_vm6, %v8792_v41  ;;  %v9222_v41 = vld [vmem:[#allocation3 + $0xdc] sm:$0xff] }
 0x928   : > { %13840 = vmatmul.mubr.msk.f32.gmra.mrb[36].mxu0 %vm6185_vm6, %v8793_v22  ;;  %v9223_v22 = vld [vmem:[#allocation3 + $0xe4] sm:$0xff] }
 0x929   : > { %13842 = vmatprep.mubr.msk.f32.mxu0 %vm6185_vm6, %v8794_v4  ;;  %v9224_v4 = vld [vmem:[#allocation3 + $0xec] sm:$0xff] }
 0x92c   : > { %13843 = vmatmul.mubr.msk.f32.gmra.mrb[38].mxu0 %vm6185_vm6, %v8795_v23  ;;  %v9225_v23 = vld [vmem:[#allocation3 + $0xf4] sm:$0xff] }
 0x92d   : > { %13845 = vmatprep.mubr.msk.f32.mxu0 %vm6185_vm6, %v8796_v60  ;;  %v9226_v60 = vld [vmem:[#allocation3 + $0xfc] sm:$0xff] }
 0x930   : > { %13846 = vmatmul.mubr.msk.f32.gmra.mrb[40].mxu0 %vm6185_vm6, %v8797_v58  ;;  %v9227_v58 = vld [vmem:[#allocation3 + $0x104] sm:$0xff] }
 0x931   : > { %13848 = vmatprep.mubr.msk.f32.mxu0 %vm6185_vm6, %v8798_v56  ;;  %v9228_v56 = vld [vmem:[#allocation3 + $0x10c] sm:$0xff] }
 0x934   : > { %13849 = vmatmul.mubr.msk.f32.gmra.mrb[42].mxu0 %vm6185_vm6, %v8799_v27  ;;  %v9229_v27 = vld [vmem:[#allocation3 + $0x114] sm:$0xff] }
 0x935   : > { %13851 = vmatprep.mubr.msk.f32.mxu0 %vm6185_vm6, %v8800_v62  ;;  %v9230_v62 = vld [vmem:[#allocation3 + $0x11c] sm:$0xff] }
 0x938   : > { %13852 = vmatmul.mubr.msk.f32.gmra.mrb[44].mxu0 %vm6185_vm6, %v8801_v40  ;;  %v9231_v40 = vld [vmem:[#allocation3 + $0x124] sm:$0xff] }
 0x939   : > { %13854 = vmatprep.mubr.msk.f32.mxu0 %vm6185_vm6, %v8802_v39  ;;  %v9232_v39 = vld [vmem:[#allocation3 + $0x12c] sm:$0xff] }
 0x93c   : > { %13855 = vmatmul.mubr.msk.f32.gmra.mrb[46].mxu0 %vm6185_vm6, %v8803_v50  ;;  %v12223_v50 = vld [vmem:[%s18871_s16 + $0x40] sm:$0xff] }
 0x93d   : > { %13857 = vmatprep.mubr.msk.f32.mxu0 %vm6185_vm6, %v8804_v28  ;;  %v9658_v28 = vld [vmem:[#allocation3 + $0x134] sm:$0xff] }
 0x940   : > { %13858 = vmatmul.mubr.msk.f32.gmra.mrb[48].mxu0 %vm6185_vm6, %v8805_v36  ;;  %v9659_v36 = vld [vmem:[#allocation3 + $0x13c] sm:$0xff] }
 0x941   : > { %13862 = vmatprep.mubr.msk.f32.mxu0 %vm6185_vm6, %v9197_v17  ;;  %v10051_v17 = vld [vmem:[#allocation3 + $0x25] sm:$0xff] }
 0x944   : > { %13863 = vmatmul.mubr.msk.f32.vlgmr.msra.gmra.mrb[14].mxu0 %vm6185_vm6, %v9198_v61  ;;  %v10052_v61 = vld [vmem:[#allocation3 + $0x2d] sm:$0xff] }
 0x945   : > { %13917 = vmatpush3.msra.mxu0 %v18326_v18  ;;  %13865 = vmatprep.mubr.msk.f32.mxu0 %vm6185_vm6, %v18403_v21  ;;  %v18421_v18 = vld [vmem:[#allocation3 + $0x44] sm:$0xff] }
 0x946   : > { %13972 = vmatprep.subr.mxu0 %v18400_v7 }
 0x948   : > { %13866 = vmatmul.mubr.msk.f32.gmra.mrb[16].mxu0 %vm6185_vm6, %v18409_v43 }
 0x949   : > { %13868 = vmatprep.mubr.msk.f32.mxu0 %vm6185_vm6, %v18413_v24 }
 0x94c   : > { %13869 = vmatmul.mubr.msk.f32.gmra.mrb[18].mxu0 %vm6185_vm6, %v18417_v35 }
 0x94d   : > { %13871 = vmatprep.mubr.msk.f32.mxu0 %vm6185_vm6, %v18421_v18 }
 0x950   : > { %13872 = vmatmul.mubr.msk.f32.gmra.mrb[20].mxu0 %vm6185_vm6, %v18425_v38 }
 0x951   : > { %13874 = vmatprep.mubr.msk.f32.mxu0 %vm6185_vm6, %v18429_v9 }
 0x954   : > { %13875 = vmatmul.mubr.msk.f32.gmra.mrb[22].mxu0 %vm6185_vm6, %v18433_v31 }
 0x955   : > { %13877 = vmatprep.mubr.msk.f32.mxu0 %vm6185_vm6, %v18437_v44 }
 0x958   : > { %13878 = vmatmul.mubr.msk.f32.gmra.mrb[24].mxu0 %vm6185_vm6, %v9208_v5 }
 0x959   : > { %13880 = vmatprep.mubr.msk.f32.mxu0 %vm6185_vm6, %v9209_v33 }
 0x95c   : > { %13881 = vmatmul.mubr.msk.f32.gmra.mrb[26].mxu0 %vm6185_vm6, %v9210_v12 }
 0x95d   : > { %13883 = vmatprep.mubr.msk.f32.mxu0 %vm6185_vm6, %v9211_v47 }
 0x960   : > { %13884 = vmatmul.mubr.msk.f32.gmra.mrb[28].mxu0 %vm6185_vm6, %v9212_v25 }
 0x961   : > { %13886 = vmatprep.mubr.msk.f32.mxu0 %vm6185_vm6, %v9213_v54 }
 0x964   : > { %13887 = vmatmul.mubr.msk.f32.gmra.mrb[30].mxu0 %vm6185_vm6, %v9214_v8 }
 0x965   : > { %13889 = vmatprep.mubr.msk.f32.mxu0 %vm6185_vm6, %v9215_v48 }
 0x968   : > { %13890 = vmatmul.mubr.msk.f32.gmra.mrb[32].mxu0 %vm6185_vm6, %v9216_v3 }
 0x969   : > { %13892 = vmatprep.mubr.msk.f32.mxu0 %vm6185_vm6, %v9217_v63 }
 0x96c   : > { %13893 = vmatmul.mubr.msk.f32.gmra.mrb[34].mxu0 %vm6185_vm6, %v9218_v2 }
 0x96d   : > { %13895 = vmatprep.mubr.msk.f32.mxu0 %vm6185_vm6, %v9219_v13 }
 0x970   : > { %13896 = vmatmul.mubr.msk.f32.gmra.mrb[36].mxu0 %vm6185_vm6, %v9220_v55 }
 0x971   : > { %13898 = vmatprep.mubr.msk.f32.mxu0 %vm6185_vm6, %v9221_v11 }
 0x974   : > { %13899 = vmatmul.mubr.msk.f32.gmra.mrb[38].mxu0 %vm6185_vm6, %v9222_v41 }
 0x975   : > { %13901 = vmatprep.mubr.msk.f32.mxu0 %vm6185_vm6, %v9223_v22 }
 0x978   : > { %13902 = vmatmul.mubr.msk.f32.gmra.mrb[40].mxu0 %vm6185_vm6, %v9224_v4 }
 0x979   : > { %13904 = vmatprep.mubr.msk.f32.mxu0 %vm6185_vm6, %v9225_v23 }
 0x97c   : > { %13905 = vmatmul.mubr.msk.f32.gmra.mrb[42].mxu0 %vm6185_vm6, %v9226_v60 }
 0x97d   : > { %13907 = vmatprep.mubr.msk.f32.mxu0 %vm6185_vm6, %v9227_v58 }
 0x980   : > { %13908 = vmatmul.mubr.msk.f32.gmra.mrb[44].mxu0 %vm6185_vm6, %v9228_v56 }
 0x981   : > { %13910 = vmatprep.mubr.msk.f32.mxu0 %vm6185_vm6, %v9229_v27 }
 0x984   : > { %13911 = vmatmul.mubr.msk.f32.gmra.mrb[46].mxu0 %vm6185_vm6, %v9230_v62 }
 0x985   : > { %13913 = vmatprep.mubr.msk.f32.mxu0 %vm6185_vm6, %v9231_v40 }
 0x988   : > { %13914 = vmatmul.mubr.msk.f32.gmra.mrb[48].mxu0 %vm6185_vm6, %v9232_v39 }
 0x989   : > { %13918 = vmatprep.mubr.msk.f32.mxu0 %vm6185_vm6, %v18403_v21  ;;  %v10053_v21 = vld [vmem:[#allocation3 + $0x35] sm:$0xff] }
 0x98c   : > { %13919 = vmatmul.mubr.msk.f32.vlgmr.msra.gmra.mrb[14].mxu0 %vm6185_vm6, %v18409_v43  ;;  %v10054_v43 = vld [vmem:[#allocation3 + $0x3d] sm:$0xff] }
 0x98d   : > { %13973 = vmatpush3.msra.mxu0 %v18400_v7  ;;  %13921 = vmatprep.mubr.msk.f32.mxu0 %vm6185_vm6, %v18413_v24  ;;  %v18519_v7 = vld [vmem:[%s18873_s18] sm:$0xf]  ;;  %v10055_v24 = vld [vmem:[#allocation3 + $0x45] sm:$0xff] }
 0x98e   : > { %14028 = vmatprep.subr.mxu0 %v12223_v50 }
 0x990   : > { %13922 = vmatmul.mubr.msk.f32.gmra.mrb[16].mxu0 %vm6185_vm6, %v18417_v35  ;;  %v10056_v35 = vld [vmem:[#allocation3 + $0x4d] sm:$0xff] }
 0x991   : > { %13924 = vmatprep.mubr.msk.f32.mxu0 %vm6185_vm6, %v18421_v18  ;;  %v10057_v18 = vld [vmem:[#allocation3 + $0x55] sm:$0xff] }
 0x994   : > { %13925 = vmatmul.mubr.msk.f32.gmra.mrb[18].mxu0 %vm6185_vm6, %v18425_v38  ;;  %v10058_v38 = vld [vmem:[#allocation3 + $0x5d] sm:$0xff] }
 0x995   : > { %13927 = vmatprep.mubr.msk.f32.mxu0 %vm6185_vm6, %v18429_v9  ;;  %v10059_v9 = vld [vmem:[#allocation3 + $0x65] sm:$0xff] }
 0x998   : > { %13928 = vmatmul.mubr.msk.f32.gmra.mrb[20].mxu0 %vm6185_vm6, %v18433_v31  ;;  %v10060_v31 = vld [vmem:[#allocation3 + $0x6d] sm:$0xff] }
 0x999   : > { %13930 = vmatprep.mubr.msk.f32.mxu0 %vm6185_vm6, %v18437_v44  ;;  %v10061_v44 = vld [vmem:[#allocation3 + $0x75] sm:$0xff] }
 0x99c   : > { %13931 = vmatmul.mubr.msk.f32.gmra.mrb[22].mxu0 %vm6185_vm6, %v9208_v5  ;;  %v10062_v5 = vld [vmem:[#allocation3 + $0x7d] sm:$0xff] }
 0x99d   : > { %13933 = vmatprep.mubr.msk.f32.mxu0 %vm6185_vm6, %v9209_v33  ;;  %v10063_v33 = vld [vmem:[#allocation3 + $0x85] sm:$0xff] }
 0x9a0   : > { %13934 = vmatmul.mubr.msk.f32.gmra.mrb[24].mxu0 %vm6185_vm6, %v9210_v12  ;;  %v10064_v12 = vld [vmem:[#allocation3 + $0x8d] sm:$0xff] }
 0x9a1   : > { %13936 = vmatprep.mubr.msk.f32.mxu0 %vm6185_vm6, %v9211_v47  ;;  %v10065_v47 = vld [vmem:[#allocation3 + $0x95] sm:$0xff] }
 0x9a4   : > { %13937 = vmatmul.mubr.msk.f32.gmra.mrb[26].mxu0 %vm6185_vm6, %v9212_v25  ;;  %v10066_v25 = vld [vmem:[#allocation3 + $0x9d] sm:$0xff] }
 0x9a5   : > { %13939 = vmatprep.mubr.msk.f32.mxu0 %vm6185_vm6, %v9213_v54  ;;  %v10067_v54 = vld [vmem:[#allocation3 + $0xa5] sm:$0xff] }
 0x9a8   : > { %13940 = vmatmul.mubr.msk.f32.gmra.mrb[28].mxu0 %vm6185_vm6, %v9214_v8  ;;  %v10068_v8 = vld [vmem:[#allocation3 + $0xad] sm:$0xff] }
 0x9a9   : > { %13942 = vmatprep.mubr.msk.f32.mxu0 %vm6185_vm6, %v9215_v48  ;;  %v10069_v48 = vld [vmem:[#allocation3 + $0xb5] sm:$0xff] }
 0x9ac   : > { %13943 = vmatmul.mubr.msk.f32.gmra.mrb[30].mxu0 %vm6185_vm6, %v9216_v3  ;;  %v10070_v3 = vld [vmem:[#allocation3 + $0xbd] sm:$0xff] }
 0x9ad   : > { %13945 = vmatprep.mubr.msk.f32.mxu0 %vm6185_vm6, %v9217_v63  ;;  %v10071_v63 = vld [vmem:[#allocation3 + $0xc5] sm:$0xff] }
 0x9b0   : > { %13946 = vmatmul.mubr.msk.f32.gmra.mrb[32].mxu0 %vm6185_vm6, %v9218_v2  ;;  %v10072_v2 = vld [vmem:[#allocation3 + $0xcd] sm:$0xff] }
 0x9b1   : > { %13948 = vmatprep.mubr.msk.f32.mxu0 %vm6185_vm6, %v9219_v13  ;;  %v10073_v13 = vld [vmem:[#allocation3 + $0xd5] sm:$0xff] }
 0x9b4   : > { %13949 = vmatmul.mubr.msk.f32.gmra.mrb[34].mxu0 %vm6185_vm6, %v9220_v55  ;;  %v10074_v55 = vld [vmem:[#allocation3 + $0xdd] sm:$0xff] }
 0x9b5   : > { %13951 = vmatprep.mubr.msk.f32.mxu0 %vm6185_vm6, %v9221_v11  ;;  %v10075_v11 = vld [vmem:[#allocation3 + $0xe5] sm:$0xff] }
 0x9b8   : > { %13952 = vmatmul.mubr.msk.f32.gmra.mrb[36].mxu0 %vm6185_vm6, %v9222_v41  ;;  %v10076_v41 = vld [vmem:[#allocation3 + $0xed] sm:$0xff] }
 0x9b9   : > { %13954 = vmatprep.mubr.msk.f32.mxu0 %vm6185_vm6, %v9223_v22  ;;  %v10077_v22 = vld [vmem:[#allocation3 + $0xf5] sm:$0xff] }
 0x9bc   : > { %13955 = vmatmul.mubr.msk.f32.gmra.mrb[38].mxu0 %vm6185_vm6, %v9224_v4  ;;  %v10078_v4 = vld [vmem:[#allocation3 + $0xfd] sm:$0xff] }
 0x9bd   : > { %13957 = vmatprep.mubr.msk.f32.mxu0 %vm6185_vm6, %v9225_v23  ;;  %v10079_v23 = vld [vmem:[#allocation3 + $0x105] sm:$0xff] }
 0x9c0   : > { %13958 = vmatmul.mubr.msk.f32.gmra.mrb[40].mxu0 %vm6185_vm6, %v9226_v60  ;;  %v10080_v60 = vld [vmem:[#allocation3 + $0x10d] sm:$0xff] }
 0x9c1   : > { %13960 = vmatprep.mubr.msk.f32.mxu0 %vm6185_vm6, %v9227_v58  ;;  %v10081_v58 = vld [vmem:[#allocation3 + $0x115] sm:$0xff] }
 0x9c4   : > { %13961 = vmatmul.mubr.msk.f32.gmra.mrb[42].mxu0 %vm6185_vm6, %v9228_v56  ;;  %v10082_v56 = vld [vmem:[#allocation3 + $0x11d] sm:$0xff] }
 0x9c5   : > { %13963 = vmatprep.mubr.msk.f32.mxu0 %vm6185_vm6, %v9229_v27  ;;  %v10083_v27 = vld [vmem:[#allocation3 + $0x125] sm:$0xff] }
 0x9c8   : > { %13964 = vmatmul.mubr.msk.f32.gmra.mrb[44].mxu0 %vm6185_vm6, %v9230_v62  ;;  %v10085_v62 = vld [vmem:[#allocation3 + $0x135] sm:$0xff] }
 0x9c9   : > { %13966 = vmatprep.mubr.msk.f32.mxu0 %vm6185_vm6, %v9231_v40  ;;  %v10084_v40 = vld [vmem:[#allocation3 + $0x12d] sm:$0xff] }
 0x9cc   : > { %13967 = vmatmul.mubr.msk.f32.gmra.mrb[46].mxu0 %vm6185_vm6, %v9232_v39  ;;  %v10086_v39 = vld [vmem:[#allocation3 + $0x13d] sm:$0xff] }
 0x9cd   : > { %13969 = vmatprep.mubr.msk.f32.mxu0 %vm6185_vm6, %v9658_v28  ;;  %v10479_v28 = vld [vmem:[#allocation3 + $0x2e] sm:$0xff] }
 0x9d0   : > { %13970 = vmatmul.mubr.msk.f32.gmra.mrb[48].mxu0 %vm6185_vm6, %v9659_v36  ;;  %v10480_v36 = vld [vmem:[#allocation3 + $0x36] sm:$0xff] }
 0x9d1   : > { %13974 = vmatprep.mubr.msk.f32.mxu0 %vm6185_vm6, %v10051_v17  ;;  %v10481_v17 = vld [vmem:[#allocation3 + $0x3e] sm:$0xff] }
 0x9d4   : > { %13975 = vmatmul.mubr.msk.f32.vlgmr.msra.gmra.mrb[14].mxu0 %vm6185_vm6, %v10052_v61  ;;  %v10482_v61 = vld [vmem:[#allocation3 + $0x46] sm:$0xff] }
 0x9d5   : > { %14029 = vmatpush3.msra.mxu0 %v12223_v50  ;;  %13977 = vmatprep.mubr.msk.f32.mxu0 %vm6185_vm6, %v10053_v21  ;;  %v10478_v50 = vld [vmem:[#allocation3 + $0x26] sm:$0xff]  ;;  %v10483_v21 = vld [vmem:[#allocation3 + $0x4e] sm:$0xff] }
 0x9d6   : > { %14084 = vmatprep.subr.msk.mxu0 %vm983_vm0, %v18519_v7 }
 0x9d8   : > { %13978 = vmatmul.mubr.msk.f32.gmra.mrb[16].mxu0 %vm6185_vm6, %v10054_v43  ;;  %v10484_v43 = vld [vmem:[#allocation3 + $0x56] sm:$0xff] }
 0x9d9   : > { %13980 = vmatprep.mubr.msk.f32.mxu0 %vm6185_vm6, %v10055_v24  ;;  %v10485_v24 = vld [vmem:[#allocation3 + $0x5e] sm:$0xff] }
 0x9dc   : > { %13981 = vmatmul.mubr.msk.f32.gmra.mrb[18].mxu0 %vm6185_vm6, %v10056_v35  ;;  %v10486_v35 = vld [vmem:[#allocation3 + $0x66] sm:$0xff] }
 0x9dd   : > { %13983 = vmatprep.mubr.msk.f32.mxu0 %vm6185_vm6, %v10057_v18  ;;  %v10488_v18 = vld [vmem:[#allocation3 + $0x76] sm:$0xff] }
 0x9e0   : > { %13984 = vmatmul.mubr.msk.f32.gmra.mrb[20].mxu0 %vm6185_vm6, %v10058_v38  ;;  %v10489_v38 = vld [vmem:[#allocation3 + $0x7e] sm:$0xff] }
 0x9e1   : > { %13986 = vmatprep.mubr.msk.f32.mxu0 %vm6185_vm6, %v10059_v9  ;;  %v10490_v9 = vld [vmem:[#allocation3 + $0x86] sm:$0xff] }
 0x9e4   : > { %13987 = vmatmul.mubr.msk.f32.gmra.mrb[22].mxu0 %vm6185_vm6, %v10060_v31  ;;  %v10491_v31 = vld [vmem:[#allocation3 + $0x8e] sm:$0xff] }
 0x9e5   : > { %13989 = vmatprep.mubr.msk.f32.mxu0 %vm6185_vm6, %v10061_v44  ;;  %v10492_v44 = vld [vmem:[#allocation3 + $0x96] sm:$0xff] }
 0x9e8   : > { %13990 = vmatmul.mubr.msk.f32.gmra.mrb[24].mxu0 %vm6185_vm6, %v10062_v5  ;;  %v10493_v5 = vld [vmem:[#allocation3 + $0x9e] sm:$0xff] }
 0x9e9   : > { %13992 = vmatprep.mubr.msk.f32.mxu0 %vm6185_vm6, %v10063_v33  ;;  %v10494_v33 = vld [vmem:[#allocation3 + $0xa6] sm:$0xff] }
 0x9ec   : > { %13993 = vmatmul.mubr.msk.f32.gmra.mrb[26].mxu0 %vm6185_vm6, %v10064_v12  ;;  %v10495_v12 = vld [vmem:[#allocation3 + $0xae] sm:$0xff] }
 0x9ed   : > { %13995 = vmatprep.mubr.msk.f32.mxu0 %vm6185_vm6, %v10065_v47  ;;  %v10496_v47 = vld [vmem:[#allocation3 + $0xb6] sm:$0xff] }
 0x9f0   : > { %13996 = vmatmul.mubr.msk.f32.gmra.mrb[28].mxu0 %vm6185_vm6, %v10066_v25  ;;  %v10497_v25 = vld [vmem:[#allocation3 + $0xbe] sm:$0xff] }
 0x9f1   : > { %13998 = vmatprep.mubr.msk.f32.mxu0 %vm6185_vm6, %v10067_v54  ;;  %v10498_v54 = vld [vmem:[#allocation3 + $0xc6] sm:$0xff] }
 0x9f4   : > { %13999 = vmatmul.mubr.msk.f32.gmra.mrb[30].mxu0 %vm6185_vm6, %v10068_v8  ;;  %v10499_v8 = vld [vmem:[#allocation3 + $0xce] sm:$0xff] }
 0x9f5   : > { %14001 = vmatprep.mubr.msk.f32.mxu0 %vm6185_vm6, %v10069_v48  ;;  %v10500_v48 = vld [vmem:[#allocation3 + $0xd6] sm:$0xff] }
 0x9f8   : > { %14002 = vmatmul.mubr.msk.f32.gmra.mrb[32].mxu0 %vm6185_vm6, %v10070_v3  ;;  %v10501_v3 = vld [vmem:[#allocation3 + $0xde] sm:$0xff] }
 0x9f9   : > { %14004 = vmatprep.mubr.msk.f32.mxu0 %vm6185_vm6, %v10071_v63  ;;  %v10502_v63 = vld [vmem:[#allocation3 + $0xe6] sm:$0xff] }
 0x9fc   : > { %14005 = vmatmul.mubr.msk.f32.gmra.mrb[34].mxu0 %vm6185_vm6, %v10072_v2  ;;  %v10503_v2 = vld [vmem:[#allocation3 + $0xee] sm:$0xff] }
 0x9fd   : > { %14007 = vmatprep.mubr.msk.f32.mxu0 %vm6185_vm6, %v10073_v13  ;;  %v10504_v13 = vld [vmem:[#allocation3 + $0xf6] sm:$0xff] }
 0xa00   : > { %14008 = vmatmul.mubr.msk.f32.gmra.mrb[36].mxu0 %vm6185_vm6, %v10074_v55  ;;  %v10505_v55 = vld [vmem:[#allocation3 + $0xfe] sm:$0xff] }
 0xa01   : > { %14010 = vmatprep.mubr.msk.f32.mxu0 %vm6185_vm6, %v10075_v11  ;;  %v10506_v11 = vld [vmem:[#allocation3 + $0x106] sm:$0xff] }
 0xa04   : > { %14011 = vmatmul.mubr.msk.f32.gmra.mrb[38].mxu0 %vm6185_vm6, %v10076_v41  ;;  %v10507_v41 = vld [vmem:[#allocation3 + $0x10e] sm:$0xff] }
 0xa05   : > { %14013 = vmatprep.mubr.msk.f32.mxu0 %vm6185_vm6, %v10077_v22  ;;  %v10508_v22 = vld [vmem:[#allocation3 + $0x116] sm:$0xff] }
 0xa08   : > { %14014 = vmatmul.mubr.msk.f32.gmra.mrb[40].mxu0 %vm6185_vm6, %v10078_v4  ;;  %v10509_v4 = vld [vmem:[#allocation3 + $0x11e] sm:$0xff] }
 0xa09   : > { %14016 = vmatprep.mubr.msk.f32.mxu0 %vm6185_vm6, %v10079_v23  ;;  %v10510_v23 = vld [vmem:[#allocation3 + $0x126] sm:$0xff] }
 0xa0c   : > { %14017 = vmatmul.mubr.msk.f32.gmra.mrb[42].mxu0 %vm6185_vm6, %v10080_v60  ;;  %v10512_v60 = vld [vmem:[#allocation3 + $0x136] sm:$0xff] }
 0xa0d   : > { %14019 = vmatprep.mubr.msk.f32.mxu0 %vm6185_vm6, %v10081_v58  ;;  %v10511_v58 = vld [vmem:[#allocation3 + $0x12e] sm:$0xff] }
 0xa10   : > { %14020 = vmatmul.mubr.msk.f32.gmra.mrb[44].mxu0 %vm6185_vm6, %v10082_v56  ;;  %v10513_v56 = vld [vmem:[#allocation3 + $0x13e] sm:$0xff] }
 0xa11   : > { %14022 = vmatprep.mubr.msk.f32.mxu0 %vm6185_vm6, %v10083_v27  ;;  %v10905_v27 = vld [vmem:[%s15312_s0 + $0x13] sm:$0xff] }
 0xa14   : > { %14023 = vmatmul.mubr.msk.f32.gmra.mrb[46].mxu0 %vm6185_vm6, %v10084_v40  ;;  %v10907_v40 = vld [vmem:[%s15312_s0 + $0x23] sm:$0xff] }
 0xa15   : > { %14025 = vmatprep.mubr.msk.f32.mxu0 %vm6185_vm6, %v10085_v62  ;;  %v10906_v62 = vld [vmem:[%s15312_s0 + $0x1b] sm:$0xff] }
 0xa18   : > { %14026 = vmatmul.mubr.msk.f32.gmra.mrb[48].mxu0 %vm6185_vm6, %v10086_v39  ;;  %v10908_v39 = vld [vmem:[%s15312_s0 + $0x2b] sm:$0xff] }
 0xa19   : > { %14030 = vmatprep.mubr.msk.f32.mxu0 %vm6185_vm6, %v10478_v50  ;;  %v10909_v50 = vld [vmem:[%s15312_s0 + $0x33] sm:$0xff] }
 0xa1c   : > { %14031 = vmatmul.mubr.msk.f32.vlgmr.msra.gmra.mrb[14].mxu0 %vm6185_vm6, %v10479_v28  ;;  %v10910_v28 = vld [vmem:[%s15312_s0 + $0x3b] sm:$0xff] }
 0xa1d   : > { %14085 = vmatpush3.msk.msra.mxu0 %vm983_vm0, %v18519_v7  ;;  %14033 = vmatprep.mubr.msk.f32.mxu0 %vm6185_vm6, %v10480_v36  ;;  %v10487_v7 = vld [vmem:[#allocation3 + $0x6e] sm:$0xff]  ;;  %v10911_v36 = vld [vmem:[%s15312_s0 + $0x43] sm:$0xff] }
 0xa20   : > { %14034 = vmatmul.mubr.msk.f32.gmra.mrb[16].mxu0 %vm6185_vm6, %v10481_v17  ;;  %v10912_v17 = vld [vmem:[%s15312_s0 + $0x4b] sm:$0xff] }
 0xa21   : > { %14036 = vmatprep.mubr.msk.f32.mxu0 %vm6185_vm6, %v10482_v61  ;;  %v10913_v61 = vld [vmem:[%s15312_s0 + $0x53] sm:$0xff] }
 0xa24   : > { %14037 = vmatmul.mubr.msk.f32.gmra.mrb[18].mxu0 %vm6185_vm6, %v10483_v21  ;;  %v10914_v21 = vld [vmem:[%s15312_s0 + $0x5b] sm:$0xff] }
 0xa25   : > { %14039 = vmatprep.mubr.msk.f32.mxu0 %vm6185_vm6, %v10484_v43  ;;  %v10915_v43 = vld [vmem:[%s15312_s0 + $0x63] sm:$0xff] }
 0xa28   : > { %14040 = vmatmul.mubr.msk.f32.gmra.mrb[20].mxu0 %vm6185_vm6, %v10485_v24  ;;  %v10916_v24 = vld [vmem:[%s15312_s0 + $0x6b] sm:$0xff] }
 0xa29   : > { %14042 = vmatprep.mubr.msk.f32.mxu0 %vm6185_vm6, %v10486_v35  ;;  %v10917_v35 = vld [vmem:[%s15312_s0 + $0x73] sm:$0xff] }
 0xa2c   : > { %14043 = vmatmul.mubr.msk.f32.gmra.mrb[22].mxu0 %vm6185_vm6, %v10487_v7  ;;  %v10918_v7 = vld [vmem:[%s15312_s0 + $0x7b] sm:$0xff] }
 0xa2d   : > { %14045 = vmatprep.mubr.msk.f32.mxu0 %vm6185_vm6, %v10488_v18  ;;  %v10919_v18 = vld [vmem:[%s15312_s0 + $0x83] sm:$0xff] }
 0xa30   : > { %14046 = vmatmul.mubr.msk.f32.gmra.mrb[24].mxu0 %vm6185_vm6, %v10489_v38  ;;  %v10920_v38 = vld [vmem:[%s15312_s0 + $0x8b] sm:$0xff] }
 0xa31   : > { %14048 = vmatprep.mubr.msk.f32.mxu0 %vm6185_vm6, %v10490_v9  ;;  %v10921_v9 = vld [vmem:[%s15312_s0 + $0x93] sm:$0xff] }
 0xa34   : > { %14049 = vmatmul.mubr.msk.f32.gmra.mrb[26].mxu0 %vm6185_vm6, %v10491_v31  ;;  %v10922_v31 = vld [vmem:[%s15312_s0 + $0x9b] sm:$0xff] }
 0xa35   : > { %14051 = vmatprep.mubr.msk.f32.mxu0 %vm6185_vm6, %v10492_v44  ;;  %v10923_v44 = vld [vmem:[%s15312_s0 + $0xa3] sm:$0xff] }
 0xa38   : > { %14052 = vmatmul.mubr.msk.f32.gmra.mrb[28].mxu0 %vm6185_vm6, %v10493_v5  ;;  %v10924_v5 = vld [vmem:[%s15312_s0 + $0xab] sm:$0xff] }
 0xa39   : > { %14054 = vmatprep.mubr.msk.f32.mxu0 %vm6185_vm6, %v10494_v33  ;;  %v10925_v33 = vld [vmem:[%s15312_s0 + $0xb3] sm:$0xff] }
 0xa3c   : > { %14055 = vmatmul.mubr.msk.f32.gmra.mrb[30].mxu0 %vm6185_vm6, %v10495_v12  ;;  %v10926_v12 = vld [vmem:[%s15312_s0 + $0xbb] sm:$0xff] }
 0xa3d   : > { %14057 = vmatprep.mubr.msk.f32.mxu0 %vm6185_vm6, %v10496_v47  ;;  %v10927_v47 = vld [vmem:[%s15312_s0 + $0xc3] sm:$0xff] }
 0xa40   : > { %14058 = vmatmul.mubr.msk.f32.gmra.mrb[32].mxu0 %vm6185_vm6, %v10497_v25  ;;  %v10928_v25 = vld [vmem:[%s15312_s0 + $0xcb] sm:$0xff] }
 0xa41   : > { %14060 = vmatprep.mubr.msk.f32.mxu0 %vm6185_vm6, %v10498_v54  ;;  %v10929_v54 = vld [vmem:[%s15312_s0 + $0xd3] sm:$0xff] }
 0xa44   : > { %14061 = vmatmul.mubr.msk.f32.gmra.mrb[34].mxu0 %vm6185_vm6, %v10499_v8  ;;  %v10930_v8 = vld [vmem:[%s15312_s0 + $0xdb] sm:$0xff] }
 0xa45   : > { %14063 = vmatprep.mubr.msk.f32.mxu0 %vm6185_vm6, %v10500_v48  ;;  %v10931_v48 = vld [vmem:[%s15312_s0 + $0xe3] sm:$0xff] }
 0xa48   : > { %14064 = vmatmul.mubr.msk.f32.gmra.mrb[36].mxu0 %vm6185_vm6, %v10501_v3  ;;  %v10932_v3 = vld [vmem:[%s15312_s0 + $0xeb] sm:$0xff] }
 0xa49   : > { %14066 = vmatprep.mubr.msk.f32.mxu0 %vm6185_vm6, %v10502_v63  ;;  %v10933_v63 = vld [vmem:[%s15312_s0 + $0xf3] sm:$0xff] }
 0xa4c   : > { %14067 = vmatmul.mubr.msk.f32.gmra.mrb[38].mxu0 %vm6185_vm6, %v10503_v2  ;;  %v10934_v2 = vld [vmem:[%s15312_s0 + $0xfb] sm:$0xff] }
 0xa4d   : > { %14069 = vmatprep.mubr.msk.f32.mxu0 %vm6185_vm6, %v10504_v13  ;;  %v10935_v13 = vld [vmem:[%s15312_s0 + $0x103] sm:$0xff] }
 0xa50   : > { %14070 = vmatmul.mubr.msk.f32.gmra.mrb[40].mxu0 %vm6185_vm6, %v10505_v55  ;;  %v10936_v55 = vld [vmem:[%s15312_s0 + $0x10b] sm:$0xff] }
 0xa51   : > { %14072 = vmatprep.mubr.msk.f32.mxu0 %vm6185_vm6, %v10506_v11  ;;  %v10937_v11 = vld [vmem:[%s15312_s0 + $0x113] sm:$0xff] }
 0xa54   : > { %14073 = vmatmul.mubr.msk.f32.gmra.mrb[42].mxu0 %vm6185_vm6, %v10507_v41  ;;  %v10938_v41 = vld [vmem:[%s15312_s0 + $0x11b] sm:$0xff] }
 0xa55   : > { %14075 = vmatprep.mubr.msk.f32.mxu0 %vm6185_vm6, %v10508_v22  ;;  %v10939_v22 = vld [vmem:[%s15312_s0 + $0x123] sm:$0xff] }
 0xa58   : > { %14076 = vmatmul.mubr.msk.f32.gmra.mrb[44].mxu0 %vm6185_vm6, %v10509_v4  ;;  %v10940_v4 = vld [vmem:[%s15312_s0 + $0x12b] sm:$0xff]  ;;  %s18683_s0 = scalar_lea.vmem %s18875_s20, %s14833_s24 }
 0xa59   : > { %14078 = vmatprep.mubr.msk.f32.mxu0 %vm6185_vm6, %v10510_v23  ;;  %v18672_v23 = vld [vmem:[%s18874_s19] ss:$0 sm:$0xff] }
 0xa5c   : > { %14079 = vmatmul.mubr.msk.f32.gmra.mrb[46].mxu0 %vm6185_vm6, %v10511_v58  ;;  %v18677_v58 = vld [vmem:[%s18872_s17] ss:$0 sm:$0xff] }
 0xa5d   : > { %14081 = vmatprep.mubr.msk.f32.mxu0 %vm6185_vm6, %v10512_v60 }
 0xa60   : > { %14082 = vmatmul.mubr.msk.f32.gmra.mrb[48].mxu0 %vm6185_vm6, %v10513_v56 }
 0xa61   : > { %14086 = vmatprep.mubr.msk.f32.mxu0 %vm762_vm2, %v10905_v27 }
 0xa64   : > { %14087 = vmatmul.mubr.msk.f32.vlgmr.msra.gmra.mrb[14].mxu0 %vm762_vm2, %v10906_v62 }
 0xa65   : > { %14089 = vmatprep.mubr.msk.f32.mxu0 %vm762_vm2, %v10907_v40 }
 0xa68   : > { %14090 = vmatmul.mubr.msk.f32.gmra.mrb[16].mxu0 %vm762_vm2, %v10908_v39 }
 0xa69   : > { %14092 = vmatprep.mubr.msk.f32.mxu0 %vm762_vm2, %v10909_v50 }
 0xa6c   : > { %14093 = vmatmul.mubr.msk.f32.gmra.mrb[18].mxu0 %vm762_vm2, %v10910_v28 }
 0xa6d   : > { %14095 = vmatprep.mubr.msk.f32.mxu0 %vm762_vm2, %v10911_v36 }
 0xa70   : > { %14096 = vmatmul.mubr.msk.f32.gmra.mrb[20].mxu0 %vm762_vm2, %v10912_v17 }
 0xa71   : > { %14098 = vmatprep.mubr.msk.f32.mxu0 %vm762_vm2, %v10913_v61 }
 0xa74   : > { %14099 = vmatmul.mubr.msk.f32.gmra.mrb[22].mxu0 %vm762_vm2, %v10914_v21 }
 0xa75   : > { %14101 = vmatprep.mubr.msk.f32.mxu0 %vm762_vm2, %v10915_v43 }
 0xa78   : > { %14102 = vmatmul.mubr.msk.f32.gmra.mrb[24].mxu0 %vm762_vm2, %v10916_v24 }
 0xa79   : > { %14104 = vmatprep.mubr.msk.f32.mxu0 %vm762_vm2, %v10917_v35 }
 0xa7c   : > { %14105 = vmatmul.mubr.msk.f32.gmra.mrb[26].mxu0 %vm762_vm2, %v10918_v7 }
 0xa7d   : > { %14107 = vmatprep.mubr.msk.f32.mxu0 %vm762_vm2, %v10919_v18 }
 0xa80   : > { %14108 = vmatmul.mubr.msk.f32.gmra.mrb[28].mxu0 %vm762_vm2, %v10920_v38 }
 0xa81   : > { %14110 = vmatprep.mubr.msk.f32.mxu0 %vm762_vm2, %v10921_v9 }
 0xa84   : > { %14111 = vmatmul.mubr.msk.f32.gmra.mrb[30].mxu0 %vm762_vm2, %v10922_v31 }
 0xa85   : > { %14113 = vmatprep.mubr.msk.f32.mxu0 %vm762_vm2, %v10923_v44 }
 0xa88   : > { %14114 = vmatmul.mubr.msk.f32.gmra.mrb[32].mxu0 %vm762_vm2, %v10924_v5 }
 0xa89   : > { %14116 = vmatprep.mubr.msk.f32.mxu0 %vm762_vm2, %v10925_v33 }
 0xa8c   : > { %14117 = vmatmul.mubr.msk.f32.gmra.mrb[34].mxu0 %vm762_vm2, %v10926_v12 }
 0xa8d   : > { %14119 = vmatprep.mubr.msk.f32.mxu0 %vm762_vm2, %v10927_v47 }
 0xa90   : > { %14120 = vmatmul.mubr.msk.f32.gmra.mrb[36].mxu0 %vm762_vm2, %v10928_v25 }
 0xa91   : > { %14122 = vmatprep.mubr.msk.f32.mxu0 %vm762_vm2, %v10929_v54 }
 0xa94   : > { %14123 = vmatmul.mubr.msk.f32.gmra.mrb[38].mxu0 %vm762_vm2, %v10930_v8 }
 0xa95   : > { %14125 = vmatprep.mubr.msk.f32.mxu0 %vm762_vm2, %v10931_v48 }
 0xa98   : > { %14126 = vmatmul.mubr.msk.f32.gmra.mrb[40].mxu0 %vm762_vm2, %v10932_v3 }
 0xa99   : > { %14128 = vmatprep.mubr.msk.f32.mxu0 %vm762_vm2, %v10933_v63 }
 0xa9c   : > { %14129 = vmatmul.mubr.msk.f32.gmra.mrb[42].mxu0 %vm762_vm2, %v10934_v2 }
 0xa9d   : > { %14131 = vmatprep.mubr.msk.f32.mxu0 %vm762_vm2, %v10935_v13 }
 0xaa0   : > { %14132 = vmatmul.mubr.msk.f32.gmra.mrb[44].mxu0 %vm762_vm2, %v10936_v55 }
 0xaa1   : > { %14134 = vmatprep.mubr.msk.f32.mxu0 %vm762_vm2, %v10937_v11  ;;  %v14172_v11 = vadd.f32 %v18300_v10, %v18672_v23  ;;  %v14178_v10 = vadd.f32 %v18306_v57, %v18672_v23  ;;  %v14184_v57 = vadd.f32 %v18312_v32, %v18672_v23  ;;  %v14190_v32 = vadd.f32 %v18318_v45, %v18672_v23 }
 0xaa2   : > { %v14196_v45 = vadd.f32 %v18329_v26, %v18672_v23  ;;  %v14202_v26 = vadd.f32 %v18336_v46, %v18672_v23  ;;  %v14208_v46 = vadd.f32 %v18342_v34, %v18672_v23  ;;  %v14214_v34 = vadd.f32 %v18348_v59, %v18672_v23 }
 0xaa3   : > { %v14220_v59 = vadd.f32 %v18354_v19, %v18672_v23  ;;  %v14226_v19 = vadd.f32 %v18360_v20, %v18672_v23  ;;  %v14232_v20 = vadd.f32 %v18366_v51, %v18672_v23  ;;  %v14238_v51 = vadd.f32 %v18372_v6, %v18672_v23 }
 0xaa4   : > { %14135 = vmatmul.mubr.msk.f32.gmra.mrb[46].mxu0 %vm762_vm2, %v10938_v41 }
 0xaa5   : > { %14137 = vmatprep.mubr.msk.f32.mxu0 %vm762_vm2, %v10939_v22  ;;  %v14175_v22 = vadd.f32 %v18672_v23, %v18303_v14  ;;  %v14181_v14 = vadd.f32 %v18672_v23, %v18309_v53  ;;  %v14187_v53 = vadd.f32 %v18672_v23, %v18315_v0  ;;  %v14193_v0 = vadd.f32 %v18672_v23, %v18321_v42 }
 0xaa6   : > { %v14199_v42 = vadd.f32 %v18672_v23, %v18332_v16  ;;  %v14205_v16 = vadd.f32 %v18672_v23, %v18339_v49  ;;  %v14211_v49 = vadd.f32 %v18672_v23, %v18345_v30  ;;  %v14217_v30 = vadd.f32 %v18672_v23, %v18351_v52 }
 0xaa7   : > { %v14223_v52 = vadd.f32 %v18672_v23, %v18357_v1  ;;  %v14229_v1 = vadd.f32 %v18672_v23, %v18363_v37  ;;  %v14235_v37 = vadd.f32 %v18672_v23, %v18369_v15  ;;  %v14241_v15 = vadd.f32 %v18672_v23, %v18375_v29 }
 0xaa8   : > { %14138 = vmatmul.mubr.msk.f32.gmra.mrb[48].mxu0 %vm762_vm2, %v10940_v4 }
 0xb37   : > { %v14088_v60 = vpop.f32.mrb[14].mxu0 }
 0xb38   : > { %v11132_v56 = vadd.f32 %v14088_v60, %v18672_v23  ;;  %v11126_v27 = vpop.f32.mrb[15].mxu0 }
 0xb39   : > { %v11127_v62 = vadd.f32 %v18672_v23, %v11126_v27 }
 0xb3a   : > { %v14149_v40 = vadd.f32 %v18677_v58, %v11132_v56 }
 0xb3b   : > { %v14151_v39 = vadd.f32 %v18677_v58, %v11127_v62  ;;  %v14091_v50 = vpop.f32.mrb[16].mxu0 }
 0xb3c   : > { %11385 = vst.msk [vmem:[%s18683_s0 + $0x8] sm:$0xff] %vm6185_vm6, %v14149_v40  ;;  %v11142_v28 = vadd.f32 %v14091_v50, %v18672_v23  ;;  %v11136_v36 = vpop.f32.mrb[17].mxu0 }
 0xb3d   : > { %11384 = vst.msk [vmem:[%s18683_s0] sm:$0xff] %vm6185_vm6, %v14151_v39  ;;  %v11137_v17 = vadd.f32 %v18672_v23, %v11136_v36 }
 0xb3e   : > { %v14153_v61 = vadd.f32 %v18677_v58, %v11142_v28 }
 0xb3f   : > { %v14155_v21 = vadd.f32 %v18677_v58, %v11137_v17  ;;  %v14094_v43 = vpop.f32.mrb[18].mxu0 }
 0xb40   : > { %11387 = vst.msk [vmem:[%s18683_s0 + $0x18] sm:$0xff] %vm6185_vm6, %v14153_v61  ;;  %v11152_v24 = vadd.f32 %v14094_v43, %v18672_v23  ;;  %v11146_v35 = vpop.f32.mrb[19].mxu0 }
 0xb41   : > { %11386 = vst.msk [vmem:[%s18683_s0 + $0x10] sm:$0xff] %vm6185_vm6, %v14155_v21  ;;  %v11147_v7 = vadd.f32 %v18672_v23, %v11146_v35 }
 0xb42   : > { %v14157_v18 = vadd.f32 %v18677_v58, %v11152_v24 }
 0xb43   : > { %v14159_v38 = vadd.f32 %v18677_v58, %v11147_v7  ;;  %v14097_v9 = vpop.f32.mrb[20].mxu0 }
 0xb44   : > { %11389 = vst.msk [vmem:[%s18683_s0 + $0x28] sm:$0xff] %vm6185_vm6, %v14157_v18  ;;  %v11162_v31 = vadd.f32 %v14097_v9, %v18672_v23  ;;  %v11156_v44 = vpop.f32.mrb[21].mxu0 }
 0xb45   : > { %11388 = vst.msk [vmem:[%s18683_s0 + $0x20] sm:$0xff] %vm6185_vm6, %v14159_v38  ;;  %v11157_v5 = vadd.f32 %v18672_v23, %v11156_v44 }
 0xb46   : > { %v14161_v33 = vadd.f32 %v18677_v58, %v11162_v31 }
 0xb47   : > { %v14163_v12 = vadd.f32 %v18677_v58, %v11157_v5  ;;  %v14100_v47 = vpop.f32.mrb[22].mxu0 }
 0xb48   : > { %11391 = vst.msk [vmem:[%s18683_s0 + $0x38] sm:$0xff] %vm6185_vm6, %v14161_v33  ;;  %v11172_v25 = vadd.f32 %v14100_v47, %v18672_v23  ;;  %v11166_v54 = vpop.f32.mrb[23].mxu0 }
 0xb49   : > { %11390 = vst.msk [vmem:[%s18683_s0 + $0x30] sm:$0xff] %vm6185_vm6, %v14163_v12  ;;  %v11167_v8 = vadd.f32 %v18672_v23, %v11166_v54 }
 0xb4a   : > { %v14165_v48 = vadd.f32 %v18677_v58, %v11172_v25 }
 0xb4b   : > { %v14167_v3 = vadd.f32 %v18677_v58, %v11167_v8  ;;  %v14103_v63 = vpop.f32.mrb[24].mxu0 }
 0xb4c   : > { %11393 = vst.msk [vmem:[%s18683_s0 + $0x48] sm:$0xff] %vm6185_vm6, %v14165_v48  ;;  %v11182_v2 = vadd.f32 %v14103_v63, %v18672_v23  ;;  %v11176_v13 = vpop.f32.mrb[25].mxu0 }
 0xb4d   : > { %11392 = vst.msk [vmem:[%s18683_s0 + $0x40] sm:$0xff] %vm6185_vm6, %v14167_v3  ;;  %v11177_v55 = vadd.f32 %v18672_v23, %v11176_v13 }
 0xb4e   : > { %v14169_v41 = vadd.f32 %v18677_v58, %v11182_v2 }
 0xb4f   : > { %v14171_v4 = vadd.f32 %v18677_v58, %v11177_v55  ;;  %v14106_v60 = vpop.f32.mrb[26].mxu0 }
 0xb50   : > { %11395 = vst.msk [vmem:[%s18683_s0 + $0x58] sm:$0xff] %vm6185_vm6, %v14169_v41  ;;  %v14173_v56 = vadd.f32 %v14172_v11, %v14106_v60  ;;  %v11186_v27 = vpop.f32.mrb[27].mxu0 }
 0xb51   : > { %11394 = vst.msk [vmem:[%s18683_s0 + $0x50] sm:$0xff] %vm6185_vm6, %v14171_v4  ;;  %v14176_v62 = vadd.f32 %v14175_v22, %v11186_v27 }
 0xb52   : > { %v14174_v40 = vadd.f32 %v14173_v56, %v18677_v58 }
 0xb53   : > { %v14177_v39 = vadd.f32 %v14176_v62, %v18677_v58  ;;  %v14109_v50 = vpop.f32.mrb[28].mxu0 }
 0xb54   : > { %11397 = vst.msk [vmem:[%s18683_s0 + $0x68] sm:$0xff] %vm6185_vm6, %v14174_v40  ;;  %v14179_v28 = vadd.f32 %v14178_v10, %v14109_v50  ;;  %v11196_v36 = vpop.f32.mrb[29].mxu0 }
 0xb55   : > { %11396 = vst.msk [vmem:[%s18683_s0 + $0x60] sm:$0xff] %vm6185_vm6, %v14177_v39  ;;  %v14182_v17 = vadd.f32 %v14181_v14, %v11196_v36 }
 0xb56   : > { %v14180_v61 = vadd.f32 %v14179_v28, %v18677_v58 }
 0xb57   : > { %v14183_v21 = vadd.f32 %v14182_v17, %v18677_v58  ;;  %v14112_v43 = vpop.f32.mrb[30].mxu0 }
 0xb58   : > { %11399 = vst.msk [vmem:[%s18683_s0 + $0x78] sm:$0xff] %vm6185_vm6, %v14180_v61  ;;  %v14185_v24 = vadd.f32 %v14184_v57, %v14112_v43  ;;  %v11206_v35 = vpop.f32.mrb[31].mxu0 }
 0xb59   : > { %11398 = vst.msk [vmem:[%s18683_s0 + $0x70] sm:$0xff] %vm6185_vm6, %v14183_v21  ;;  %v14188_v7 = vadd.f32 %v14187_v53, %v11206_v35 }
 0xb5a   : > { %v14186_v18 = vadd.f32 %v14185_v24, %v18677_v58 }
 0xb5b   : > { %v14189_v38 = vadd.f32 %v14188_v7, %v18677_v58  ;;  %v14115_v9 = vpop.f32.mrb[32].mxu0 }
 0xb5c   : > { %11401 = vst.msk [vmem:[%s18683_s0 + $0x88] sm:$0xff] %vm6185_vm6, %v14186_v18  ;;  %v14191_v31 = vadd.f32 %v14190_v32, %v14115_v9  ;;  %v11216_v44 = vpop.f32.mrb[33].mxu0 }
 0xb5d   : > { %11400 = vst.msk [vmem:[%s18683_s0 + $0x80] sm:$0xff] %vm6185_vm6, %v14189_v38  ;;  %v14194_v5 = vadd.f32 %v14193_v0, %v11216_v44 }
 0xb5e   : > { %v14192_v33 = vadd.f32 %v14191_v31, %v18677_v58 }
 0xb5f   : > { %v14195_v12 = vadd.f32 %v14194_v5, %v18677_v58  ;;  %v14118_v47 = vpop.f32.mrb[34].mxu0 }
 0xb60   : > { %11403 = vst.msk [vmem:[%s18683_s0 + $0x98] sm:$0xff] %vm6185_vm6, %v14192_v33  ;;  %v14197_v25 = vadd.f32 %v14196_v45, %v14118_v47  ;;  %v11226_v54 = vpop.f32.mrb[35].mxu0 }
 0xb61   : > { %11402 = vst.msk [vmem:[%s18683_s0 + $0x90] sm:$0xff] %vm6185_vm6, %v14195_v12  ;;  %v14200_v8 = vadd.f32 %v14199_v42, %v11226_v54 }
 0xb62   : > { %v14198_v48 = vadd.f32 %v14197_v25, %v18677_v58 }
 0xb63   : > { %v14201_v3 = vadd.f32 %v14200_v8, %v18677_v58  ;;  %v14121_v63 = vpop.f32.mrb[36].mxu0 }
 0xb64   : > { %11405 = vst.msk [vmem:[%s18683_s0 + $0xa8] sm:$0xff] %vm6185_vm6, %v14198_v48  ;;  %v14203_v2 = vadd.f32 %v14202_v26, %v14121_v63  ;;  %v11236_v13 = vpop.f32.mrb[37].mxu0 }
 0xb65   : > { %11404 = vst.msk [vmem:[%s18683_s0 + $0xa0] sm:$0xff] %vm6185_vm6, %v14201_v3  ;;  %v14206_v55 = vadd.f32 %v14205_v16, %v11236_v13 }
 0xb66   : > { %v14204_v11 = vadd.f32 %v14203_v2, %v18677_v58 }
 0xb67   : > { %v14207_v41 = vadd.f32 %v14206_v55, %v18677_v58  ;;  %v14124_v22 = vpop.f32.mrb[38].mxu0 }
 0xb68   : > { %11407 = vst.msk [vmem:[%s18683_s0 + $0xb8] sm:$0xff] %vm6185_vm6, %v14204_v11  ;;  %v14209_v4 = vadd.f32 %v14208_v46, %v14124_v22  ;;  %v11246_v60 = vpop.f32.mrb[39].mxu0 }
 0xb69   : > { %11406 = vst.msk [vmem:[%s18683_s0 + $0xb0] sm:$0xff] %vm6185_vm6, %v14207_v41  ;;  %v14212_v56 = vadd.f32 %v14211_v49, %v11246_v60 }
 0xb6a   : > { %v14210_v27 = vadd.f32 %v14209_v4, %v18677_v58 }
 0xb6b   : > { %v14213_v62 = vadd.f32 %v14212_v56, %v18677_v58  ;;  %v14127_v10 = vpop.f32.mrb[40].mxu0 }
 0xb6c   : > { %11409 = vst.msk [vmem:[%s18683_s0 + $0xc8] sm:$0xff] %vm6185_vm6, %v14210_v27  ;;  %v14215_v40 = vadd.f32 %v14214_v34, %v14127_v10  ;;  %v11256_v14 = vpop.f32.mrb[41].mxu0 }
 0xb6d   : > { %11408 = vst.msk [vmem:[%s18683_s0 + $0xc0] sm:$0xff] %vm6185_vm6, %v14213_v62  ;;  %v14218_v39 = vadd.f32 %v14217_v30, %v11256_v14 }
 0xb6e   : > { %v14216_v50 = vadd.f32 %v14215_v40, %v18677_v58 }
 0xb6f   : > { %v14219_v28 = vadd.f32 %v14218_v39, %v18677_v58  ;;  %v14130_v36 = vpop.f32.mrb[42].mxu0 }
 0xb70   : > { %11411 = vst.msk [vmem:[%s18683_s0 + $0xd8] sm:$0xff] %vm6185_vm6, %v14216_v50  ;;  %v14221_v17 = vadd.f32 %v14220_v59, %v14130_v36  ;;  %v11266_v57 = vpop.f32.mrb[43].mxu0 }
 0xb71   : > { %11410 = vst.msk [vmem:[%s18683_s0 + $0xd0] sm:$0xff] %vm6185_vm6, %v14219_v28  ;;  %v14224_v61 = vadd.f32 %v14223_v52, %v11266_v57 }
 0xb72   : > { %v14222_v53 = vadd.f32 %v14221_v17, %v18677_v58 }
 0xb73   : > { %v14225_v21 = vadd.f32 %v14224_v61, %v18677_v58  ;;  %v14133_v43 = vpop.f32.mrb[44].mxu0 }
 0xb74   : > { %11413 = vst.msk [vmem:[%s18683_s0 + $0xe8] sm:$0xff] %vm6185_vm6, %v14222_v53  ;;  %v14227_v24 = vadd.f32 %v14226_v19, %v14133_v43  ;;  %v11276_v35 = vpop.f32.mrb[45].mxu0 }
 0xb75   : > { %11412 = vst.msk [vmem:[%s18683_s0 + $0xe0] sm:$0xff] %vm6185_vm6, %v14225_v21  ;;  %v14230_v7 = vadd.f32 %v14229_v1, %v11276_v35 }
 0xb76   : > { %v14228_v32 = vadd.f32 %v14227_v24, %v18677_v58 }
 0xb77   : > { %v14231_v18 = vadd.f32 %v14230_v7, %v18677_v58  ;;  %v14136_v0 = vpop.f32.mrb[46].mxu0 }
 0xb78   : > { %11415 = vst.msk [vmem:[%s18683_s0 + $0xf8] sm:$0xff] %vm6185_vm6, %v14228_v32  ;;  %v14233_v38 = vadd.f32 %v14232_v20, %v14136_v0  ;;  %v11286_v9 = vpop.f32.mrb[47].mxu0 }
 0xb79   : > { %11414 = vst.msk [vmem:[%s18683_s0 + $0xf0] sm:$0xff] %vm6185_vm6, %v14231_v18  ;;  %v14236_v31 = vadd.f32 %v14235_v37, %v11286_v9 }
 0xb7a   : > { %v14234_v44 = vadd.f32 %v14233_v38, %v18677_v58 }
 0xb7b   : > { %v14237_v5 = vadd.f32 %v14236_v31, %v18677_v58  ;;  %v14139_v45 = vpop.f32.mrb[48].mxu0 }
 0xb7c   : > { %11417 = vst.msk [vmem:[%s18683_s0 + $0x108] sm:$0xff] %vm6185_vm6, %v14234_v44  ;;  %v14239_v33 = vadd.f32 %v14238_v51, %v14139_v45  ;;  %v11296_v42 = vpop.f32.mrb[49].mxu0 }
 0xb7d   : > { %11416 = vst.msk [vmem:[%s18683_s0 + $0x100] sm:$0xff] %vm6185_vm6, %v14237_v5  ;;  %v14242_v12 = vadd.f32 %v14241_v15, %v11296_v42 }
 0xb7e   : > { %v14240_v47 = vadd.f32 %v14239_v33, %v18677_v58 }
 0xb7f   : > { %v14243_v25 = vadd.f32 %v14242_v12, %v18677_v58 }
 0xb80   : > { %11419 = vst.msk [vmem:[%s18683_s0 + $0x118] sm:$0xff] %vm6185_vm6, %v14240_v47 }
 0xb81   : > { %11418 = vst.msk [vmem:[%s18683_s0 + $0x110] sm:$0xff] %vm6185_vm6, %v14243_v25 }
 0xb82 PF: > { %s30_s1 = sadd.s32 1, %s15170_s1  }
 0xb83   : > { %p27_p4 = scmp.ge.s32.totalorder %s30_s1, 4  }
 0xb85   :  { %29 = sbr.rel (!%p27_p4) target bundleno = 6 (0x6), region = 149 }

</bundles_post_ra>
